<compile_context>
chip_gen: v7x
topology: tpu7x:2x2x1
jax: 0.10.0
libtpu: 0.0.40
codegen_flags: <defaults>
</compile_context>

<pallas_src>
import numpy as np
import jax
import jax.numpy as jnp
from jax.experimental import pallas as pl
from jax.experimental.pallas import tpu as pltpu

BN_EPS = 1e-5

# ---------------------------------------------------------------------------
# Static geometry (MNIST 28x28 input, required so that conv4 -> 1x1).
#   layer1: pad 30x30, conv out 28x28 (flat pitch 30), pool -> 14x14
#   layer2: pad 16x16, conv out 14x14 (pitch 16),       pool -> 7x7
#   layer3: pad  9x9,  conv out  7x7  (pitch 9),        pool -> 3x3
#   layer4: 3x3 valid conv -> 1x1  (== FC with K = 9*128)
# Flat activation buffer lengths (padded spatial + 2 tail lanes so every tap
# slice of length Ho*Wpad stays in bounds):
L1, L2, L3, L4 = 30 * 30 + 2, 16 * 16 + 2, 9 * 9 + 2, 3 * 3 + 2
NC1, NC2, NC3, NC4 = 28 * 30, 14 * 16, 7 * 9, 1 * 3          # conv output lanes


def _pool_repack_matrix(ho, wp, w2p, l_next, border):
    """Constant selection matrix: 2x2-maxed flat conv output -> next layer's
    zero-padded flat activation buffer (does the stride-2 gather + re-pad)."""
    h2n = ho // 2
    src_len = ho * wp - wp - 1
    g = np.zeros((src_len, l_next), np.float32)
    for h2 in range(h2n):
        for w2 in range(h2n):
            g[2 * h2 * wp + 2 * w2, (h2 + border) * w2p + (w2 + border)] = 1.0
    return g


_G1 = _pool_repack_matrix(28, 30, 16, L2, 1)   # (809, 258)
_G2 = _pool_repack_matrix(14, 16, 9, L3, 1)    # (207, 83)
_G3 = _pool_repack_matrix(7, 9, 3, L4, 0)      # (53, 11)


# ---------------------------------------------------------------------------
# In-kernel helpers (traced inside the Pallas body; all sizes are static).
def _conv_im2col(a, w_ref, col_ref, cin, wp, nc):
    """a: (cin, L) flat padded activation value.  Builds the (9*cin, nc)
    im2col slab in VMEM and does ONE matmul -> (cout, nc) f32 accumulator."""
    for kh in range(3):
        for kw in range(3):
            t = kh * 3 + kw
            off = kh * wp + kw
            col_ref[t * cin:(t + 1) * cin, :] = a[:, off:off + nc]
    return jnp.dot(w_ref[...], col_ref[...], preferred_element_type=jnp.float32)


def _bn_relu(acc, s_ref, b_ref):
    # Folded eval-mode BatchNorm (+ conv bias) and ReLU; scale/bias are (C, 1)
    # columns broadcasting along the flat-spatial lane dimension.
    return jnp.maximum(acc * s_ref[...] + b_ref[...], 0.0)


def _pool_repack(y, g_ref, wp):
    """2x2/stride-2 max pool of the flat conv output y (C, Ho*wp) followed by
    the constant gather/re-pad matmul producing the next layer's buffer."""
    nc = y.shape[1]
    yh = jnp.maximum(y[:, :nc - wp], y[:, wp:])          # vertical pair max
    yw = jnp.maximum(yh[:, :nc - wp - 1], yh[:, 1:])     # horizontal pair max
    return jnp.dot(yw, g_ref[...], preferred_element_type=jnp.float32)


def _net_kernel(x_ref, w1_ref, w2_ref, w3_ref, w4_ref,
                s1_ref, b1_ref, s2_ref, b2_ref, s3_ref, b3_ref, b4_ref,
                g1_ref, g2_ref, g3_ref,
                o_ref,
                col2_ref, col3_ref, col4_ref):
    # ---- layer 1: conv(1->16, pad 1) + BN + ReLU + pool ---------------------
    # Cin == 1, so the "matmul" is a pure VPU broadcast multiply per tap.
    x1 = x_ref[0]                                   # (1, L1) padded flat image
    w1 = w1_ref[...]                                # (16, 9)
    acc = jnp.zeros((16, NC1), jnp.float32)
    for kh in range(3):
        for kw in range(3):
            t = kh * 3 + kw
            off = kh * 30 + kw
            acc = acc + w1[:, t:t + 1] * x1[:, off:off + NC1]
    a2 = _pool_repack(_bn_relu(acc, s1_ref, b1_ref), g1_ref, 30)     # (16, L2)

    # ---- layer 2: conv(16->64, pad 1, groups folded dense) ------------------
    acc = _conv_im2col(a2, w2_ref, col2_ref, 16, 16, NC2)            # (64, 224)
    a3 = _pool_repack(_bn_relu(acc, s2_ref, b2_ref), g2_ref, 16)     # (64, L3)

    # ---- layer 3: conv(64->128, pad 1, groups folded dense) -----------------
    acc = _conv_im2col(a3, w3_ref, col3_ref, 64, 9, NC3)             # (128, 63)
    a4 = _pool_repack(_bn_relu(acc, s3_ref, b3_ref), g3_ref, 9)      # (128, L4)

    # ---- layer 4: conv(128->10, valid) == FC with K = 1152 ------------------
    acc = _conv_im2col(a4, w4_ref, col4_ref, 128, 3, NC4)            # (10, 3)
    out = acc + b4_ref[...]
    o_ref[0] = out[:, 0:1]                           # only flat position 0 is valid


# ---------------------------------------------------------------------------
def _flatten_hwio(w):
    """(3,3,Cin,Cout) HWIO -> (Cout, 9*Cin) im2col weight (tap-major, ci minor)."""
    kh, kw, ci, co = w.shape
    return jnp.transpose(w, (3, 0, 1, 2)).reshape(co, kh * kw * ci)


def _const_spec(shape):
    return pl.BlockSpec(shape, lambda i: (0, 0))


@jax.jit
def net_forward(x_nchw, p):
    n = x_nchw.shape[0]
    # NCHW (N,1,28,28) -> zero-padded flat (N, 1, 902) image in the wrapper
    # (tiny; avoids any in-kernel scatter of the input).
    x = x_nchw[:, 0].astype(jnp.float32)                       # (N, 28, 28)
    xp = jnp.pad(x, ((0, 0), (1, 1), (1, 1)))                  # (N, 30, 30)
    xf = jnp.pad(xp.reshape(n, 1, 900), ((0, 0), (0, 0), (0, 2)))   # (N,1,L1)

    w1f = _flatten_hwio(p['w1'])        # (16, 9)
    w2f = _flatten_hwio(p['w2'])        # (64, 144)
    w3f = _flatten_hwio(p['w3'])        # (128, 576)
    w4f = _flatten_hwio(p['w4'])        # (10, 1152)
    col = lambda v: v.reshape(-1, 1)    # per-channel columns for the kernel

    g1 = jnp.asarray(_G1)
    g2 = jnp.asarray(_G2)
    g3 = jnp.asarray(_G3)

    out = pl.pallas_call(
        _net_kernel,
        out_shape=jax.ShapeDtypeStruct((n, 10, 1), jnp.float32),
        grid_spec=pltpu.PrefetchScalarGridSpec(
            num_scalar_prefetch=0,
            grid=(n,),
            in_specs=[
                pl.BlockSpec((1, 1, L1), lambda i: (i, 0, 0)),
                _const_spec((16, 9)),
                _const_spec((64, 144)),
                _const_spec((128, 576)),
                _const_spec((10, 1152)),
                _const_spec((16, 1)), _const_spec((16, 1)),
                _const_spec((64, 1)), _const_spec((64, 1)),
                _const_spec((128, 1)), _const_spec((128, 1)),
                _const_spec((10, 1)),
                _const_spec((_G1.shape[0], _G1.shape[1])),
                _const_spec((_G2.shape[0], _G2.shape[1])),
                _const_spec((_G3.shape[0], _G3.shape[1])),
            ],
            out_specs=pl.BlockSpec((1, 10, 1), lambda i: (i, 0, 0)),
            scratch_shapes=[
                pltpu.VMEM((9 * 16, NC2), jnp.float32),    # im2col layer 2
                pltpu.VMEM((9 * 64, NC3), jnp.float32),    # im2col layer 3
                pltpu.VMEM((9 * 128, NC4), jnp.float32),   # im2col layer 4 (FC)
            ]),
        compiler_params=pltpu.CompilerParams(
            dimension_semantics=("parallel",)),
    )(xf, w1f, w2f, w3f, w4f,
      col(p['s1']), col(p['b1']), col(p['s2']), col(p['b2']),
      col(p['s3']), col(p['b3']), col(p['b4']),
      g1, g2, g3)

    return out.reshape(n, 10, 1, 1)                      # (N, 10, 1, 1) like PyTorch


# ---------------------------------------------------------------------------
# Parameter construction (grouped convs expanded to block-diagonal dense HWIO,
# BatchNorm folded to per-channel scale/bias).
def _grouped_to_dense(wg):
    g, kh, kw, ci, co = wg.shape
    dense = jnp.zeros((kh, kw, g * ci, g * co), wg.dtype)
    for gi in range(g):
        dense = dense.at[:, :, gi * ci:(gi + 1) * ci,
                         gi * co:(gi + 1) * co].set(wg[gi])
    return dense


def _fold_bn(gamma, beta, mean, var, conv_bias):
    scale = gamma / jnp.sqrt(var + BN_EPS)
    bias = beta + (conv_bias - mean) * scale
    return scale, bias


def init_params(key):
    ks = jax.random.split(key, 20)
    nrm = lambda k, shape: 0.1 * jax.random.normal(k, shape, jnp.float32)
    uni = lambda k, shape: jax.random.uniform(k, shape, jnp.float32, 0.5, 1.5)
    p = {}
    p['w1'] = nrm(ks[0], (3, 3, 1, 16))
    p['s1'], p['b1'] = _fold_bn(uni(ks[1], (16,)), nrm(ks[2], (16,)),
                                nrm(ks[3], (16,)), uni(ks[4], (16,)),
                                nrm(ks[5], (16,)))
    p['w2'] = _grouped_to_dense(nrm(ks[6], (8, 3, 3, 2, 8)))
    p['s2'], p['b2'] = _fold_bn(uni(ks[7], (64,)), nrm(ks[8], (64,)),
                                nrm(ks[9], (64,)), uni(ks[10], (64,)),
                                nrm(ks[11], (64,)))
    p['w3'] = _grouped_to_dense(nrm(ks[12], (16, 3, 3, 4, 8)))
    p['s3'], p['b3'] = _fold_bn(uni(ks[13], (128,)), nrm(ks[14], (128,)),
                                nrm(ks[15], (128,)), uni(ks[16], (128,)),
                                nrm(ks[17], (128,)))
    p['w4'] = nrm(ks[18], (3, 3, 128, 10))
    p['b4'] = nrm(ks[19], (10,))
    return p


# ---- pure-JAX reference (independent path, for a sanity check) --------------
def _ref_block(x, w, s, b, relu, pool, pad):
    y = jax.lax.conv_general_dilated(
        x, w, window_strides=(1, 1), padding=[(pad, pad), (pad, pad)],
        dimension_numbers=('NHWC', 'HWIO', 'NHWC'))
    y = y * s.reshape(1, 1, 1, -1) + b.reshape(1, 1, 1, -1)
    if relu:
        y = jnp.maximum(y, 0.0)
    if pool:
        y = jax.lax.reduce_window(y, -jnp.inf, jax.lax.max,
                                  (1, 2, 2, 1), (1, 2, 2, 1), 'VALID')
    return y


def ref_forward(x_nchw, p):
    x = jnp.transpose(x_nchw, (0, 2, 3, 1)).astype(jnp.float32)
    y = _ref_block(x, p['w1'], p['s1'], p['b1'], True, True, 1)
    y = _ref_block(y, p['w2'], p['s2'], p['b2'], True, True, 1)
    y = _ref_block(y, p['w3'], p['s3'], p['b3'], True, True, 1)
    y = _ref_block(y, p['w4'], jnp.ones((10,), jnp.float32), p['b4'],
                   False, False, 0)
    return jnp.transpose(y, (0, 3, 1, 2))


if __name__ == "__main__":
    key = jax.random.PRNGKey(0)
    kx, kp = jax.random.split(key)
    # MNIST-shaped input: batch=2, 1 channel, 28x28 (required so conv4 -> 1x1).
    x = jax.random.normal(kx, (2, 1, 28, 28), jnp.float32)      # NCHW like PyTorch
    params = init_params(kp)

    out = jax.block_until_ready(net_forward(x, params))
    assert out.shape == (2, 10, 1, 1), out.shape

    ref = jax.block_until_ready(ref_forward(x, params))
    np.testing.assert_allclose(np.asarray(out), np.asarray(ref),
                               rtol=2e-2, atol=2e-2)
    print("KERNEL_OK")
</pallas_src>

<mosaic_0001>
module attributes {stable_mosaic.version = 11 : i64} {
  func.func @_net_kernel(%arg0: i32, %arg1: memref<1x1x902xf32, #tpu.memory_space<vmem>>, %arg2: memref<16x9xf32, #tpu.memory_space<vmem>>, %arg3: memref<64x144xf32, #tpu.memory_space<vmem>>, %arg4: memref<128x576xf32, #tpu.memory_space<vmem>>, %arg5: memref<10x1152xf32, #tpu.memory_space<vmem>>, %arg6: memref<16x1xf32, #tpu.memory_space<vmem>>, %arg7: memref<16x1xf32, #tpu.memory_space<vmem>>, %arg8: memref<64x1xf32, #tpu.memory_space<vmem>>, %arg9: memref<64x1xf32, #tpu.memory_space<vmem>>, %arg10: memref<128x1xf32, #tpu.memory_space<vmem>>, %arg11: memref<128x1xf32, #tpu.memory_space<vmem>>, %arg12: memref<10x1xf32, #tpu.memory_space<vmem>>, %arg13: memref<809x258xf32, #tpu.memory_space<vmem>>, %arg14: memref<207x83xf32, #tpu.memory_space<vmem>>, %arg15: memref<53x11xf32, #tpu.memory_space<vmem>>, %arg16: memref<1x10x1xf32, #tpu.memory_space<vmem>>, %arg17: memref<144x224xf32, #tpu.memory_space<vmem>>, %arg18: memref<576x63xf32, #tpu.memory_space<vmem>>, %arg19: memref<1152x3xf32, #tpu.memory_space<vmem>>) attributes {dimension_semantics = [#tpu.dimension_semantics<parallel>], iteration_bounds = array<i64: 2>, scalar_prefetch = 0 : i64, scratch_operands = 3 : i64, tpu.core_type = #tpu.core_type<tc>, window_params = [{transform_indices = @transform_0, window_bounds = array<i64: 1, 1, 902>}, {pipeline_mode = #tpu.pipeline_mode<synchronous>, transform_indices = @transform_1, window_bounds = array<i64: 16, 9>}, {pipeline_mode = #tpu.pipeline_mode<synchronous>, transform_indices = @transform_2, window_bounds = array<i64: 64, 144>}, {pipeline_mode = #tpu.pipeline_mode<synchronous>, transform_indices = @transform_3, window_bounds = array<i64: 128, 576>}, {pipeline_mode = #tpu.pipeline_mode<synchronous>, transform_indices = @transform_4, window_bounds = array<i64: 10, 1152>}, {pipeline_mode = #tpu.pipeline_mode<synchronous>, transform_indices = @transform_5, window_bounds = array<i64: 16, 1>}, {pipeline_mode = #tpu.pipeline_mode<synchronous>, transform_indices = @transform_6, window_bounds = array<i64: 16, 1>}, {pipeline_mode = #tpu.pipeline_mode<synchronous>, transform_indices = @transform_7, window_bounds = array<i64: 64, 1>}, {pipeline_mode = #tpu.pipeline_mode<synchronous>, transform_indices = @transform_8, window_bounds = array<i64: 64, 1>}, {pipeline_mode = #tpu.pipeline_mode<synchronous>, transform_indices = @transform_9, window_bounds = array<i64: 128, 1>}, {pipeline_mode = #tpu.pipeline_mode<synchronous>, transform_indices = @transform_10, window_bounds = array<i64: 128, 1>}, {pipeline_mode = #tpu.pipeline_mode<synchronous>, transform_indices = @transform_11, window_bounds = array<i64: 10, 1>}, {pipeline_mode = #tpu.pipeline_mode<synchronous>, transform_indices = @transform_12, window_bounds = array<i64: 809, 258>}, {pipeline_mode = #tpu.pipeline_mode<synchronous>, transform_indices = @transform_13, window_bounds = array<i64: 207, 83>}, {pipeline_mode = #tpu.pipeline_mode<synchronous>, transform_indices = @transform_14, window_bounds = array<i64: 53, 11>}, {transform_indices = @transform_15, window_bounds = array<i64: 1, 10, 1>}]} {
    %c0 = arith.constant 0 : index
    %c0_0 = arith.constant 0 : index
    %c0_1 = arith.constant 0 : index
    %0 = vector.load %arg1[%c0, %c0_0, %c0_1] : memref<1x1x902xf32, #tpu.memory_space<vmem>>, vector<1x1x902xf32>
    %1 = vector.shape_cast %0 : vector<1x1x902xf32> to vector<1x902xf32>
    %c0_2 = arith.constant 0 : index
    %c0_3 = arith.constant 0 : index
    %2 = vector.load %arg2[%c0_2, %c0_3] : memref<16x9xf32, #tpu.memory_space<vmem>>, vector<16x9xf32>
    %cst = arith.constant 0.000000e+00 : f32
    %3 = vector.broadcast %cst : f32 to vector<16x840xf32>
    %4 = vector.extract_strided_slice %2 {offsets = [0, 0], sizes = [16, 1], strides = [1, 1]} : vector<16x9xf32> to vector<16x1xf32>
    %5 = vector.extract_strided_slice %1 {offsets = [0, 0], sizes = [1, 840], strides = [1, 1]} : vector<1x902xf32> to vector<1x840xf32>
    %6 = vector.broadcast %4 : vector<16x1xf32> to vector<16x840xf32>
    %7 = vector.broadcast %5 : vector<1x840xf32> to vector<16x840xf32>
    %8 = arith.mulf %6, %7 : vector<16x840xf32>
    %9 = arith.addf %3, %8 : vector<16x840xf32>
    %10 = vector.extract_strided_slice %2 {offsets = [0, 1], sizes = [16, 1], strides = [1, 1]} : vector<16x9xf32> to vector<16x1xf32>
    %11 = vector.extract_strided_slice %1 {offsets = [0, 1], sizes = [1, 840], strides = [1, 1]} : vector<1x902xf32> to vector<1x840xf32>
    %12 = vector.broadcast %10 : vector<16x1xf32> to vector<16x840xf32>
    %13 = vector.broadcast %11 : vector<1x840xf32> to vector<16x840xf32>
    %14 = arith.mulf %12, %13 : vector<16x840xf32>
    %15 = arith.addf %9, %14 : vector<16x840xf32>
    %16 = vector.extract_strided_slice %2 {offsets = [0, 2], sizes = [16, 1], strides = [1, 1]} : vector<16x9xf32> to vector<16x1xf32>
    %17 = vector.extract_strided_slice %1 {offsets = [0, 2], sizes = [1, 840], strides = [1, 1]} : vector<1x902xf32> to vector<1x840xf32>
    %18 = vector.broadcast %16 : vector<16x1xf32> to vector<16x840xf32>
    %19 = vector.broadcast %17 : vector<1x840xf32> to vector<16x840xf32>
    %20 = arith.mulf %18, %19 : vector<16x840xf32>
    %21 = arith.addf %15, %20 : vector<16x840xf32>
    %22 = vector.extract_strided_slice %2 {offsets = [0, 3], sizes = [16, 1], strides = [1, 1]} : vector<16x9xf32> to vector<16x1xf32>
    %23 = vector.extract_strided_slice %1 {offsets = [0, 30], sizes = [1, 840], strides = [1, 1]} : vector<1x902xf32> to vector<1x840xf32>
    %24 = vector.broadcast %22 : vector<16x1xf32> to vector<16x840xf32>
    %25 = vector.broadcast %23 : vector<1x840xf32> to vector<16x840xf32>
    %26 = arith.mulf %24, %25 : vector<16x840xf32>
    %27 = arith.addf %21, %26 : vector<16x840xf32>
    %28 = vector.extract_strided_slice %2 {offsets = [0, 4], sizes = [16, 1], strides = [1, 1]} : vector<16x9xf32> to vector<16x1xf32>
    %29 = vector.extract_strided_slice %1 {offsets = [0, 31], sizes = [1, 840], strides = [1, 1]} : vector<1x902xf32> to vector<1x840xf32>
    %30 = vector.broadcast %28 : vector<16x1xf32> to vector<16x840xf32>
    %31 = vector.broadcast %29 : vector<1x840xf32> to vector<16x840xf32>
    %32 = arith.mulf %30, %31 : vector<16x840xf32>
    %33 = arith.addf %27, %32 : vector<16x840xf32>
    %34 = vector.extract_strided_slice %2 {offsets = [0, 5], sizes = [16, 1], strides = [1, 1]} : vector<16x9xf32> to vector<16x1xf32>
    %35 = vector.extract_strided_slice %1 {offsets = [0, 32], sizes = [1, 840], strides = [1, 1]} : vector<1x902xf32> to vector<1x840xf32>
    %36 = vector.broadcast %34 : vector<16x1xf32> to vector<16x840xf32>
    %37 = vector.broadcast %35 : vector<1x840xf32> to vector<16x840xf32>
    %38 = arith.mulf %36, %37 : vector<16x840xf32>
    %39 = arith.addf %33, %38 : vector<16x840xf32>
    %40 = vector.extract_strided_slice %2 {offsets = [0, 6], sizes = [16, 1], strides = [1, 1]} : vector<16x9xf32> to vector<16x1xf32>
    %41 = vector.extract_strided_slice %1 {offsets = [0, 60], sizes = [1, 840], strides = [1, 1]} : vector<1x902xf32> to vector<1x840xf32>
    %42 = vector.broadcast %40 : vector<16x1xf32> to vector<16x840xf32>
    %43 = vector.broadcast %41 : vector<1x840xf32> to vector<16x840xf32>
    %44 = arith.mulf %42, %43 : vector<16x840xf32>
    %45 = arith.addf %39, %44 : vector<16x840xf32>
    %46 = vector.extract_strided_slice %2 {offsets = [0, 7], sizes = [16, 1], strides = [1, 1]} : vector<16x9xf32> to vector<16x1xf32>
    %47 = vector.extract_strided_slice %1 {offsets = [0, 61], sizes = [1, 840], strides = [1, 1]} : vector<1x902xf32> to vector<1x840xf32>
    %48 = vector.broadcast %46 : vector<16x1xf32> to vector<16x840xf32>
    %49 = vector.broadcast %47 : vector<1x840xf32> to vector<16x840xf32>
    %50 = arith.mulf %48, %49 : vector<16x840xf32>
    %51 = arith.addf %45, %50 : vector<16x840xf32>
    %52 = vector.extract_strided_slice %2 {offsets = [0, 8], sizes = [16, 1], strides = [1, 1]} : vector<16x9xf32> to vector<16x1xf32>
    %53 = vector.extract_strided_slice %1 {offsets = [0, 62], sizes = [1, 840], strides = [1, 1]} : vector<1x902xf32> to vector<1x840xf32>
    %54 = vector.broadcast %52 : vector<16x1xf32> to vector<16x840xf32>
    %55 = vector.broadcast %53 : vector<1x840xf32> to vector<16x840xf32>
    %56 = arith.mulf %54, %55 : vector<16x840xf32>
    %57 = arith.addf %51, %56 : vector<16x840xf32>
    %c0_4 = arith.constant 0 : index
    %c0_5 = arith.constant 0 : index
    %58 = vector.load %arg6[%c0_4, %c0_5] : memref<16x1xf32, #tpu.memory_space<vmem>>, vector<16x1xf32>
    %59 = vector.broadcast %58 : vector<16x1xf32> to vector<16x840xf32>
    %60 = arith.mulf %57, %59 : vector<16x840xf32>
    %c0_6 = arith.constant 0 : index
    %c0_7 = arith.constant 0 : index
    %61 = vector.load %arg7[%c0_6, %c0_7] : memref<16x1xf32, #tpu.memory_space<vmem>>, vector<16x1xf32>
    %62 = vector.broadcast %61 : vector<16x1xf32> to vector<16x840xf32>
    %63 = arith.addf %60, %62 : vector<16x840xf32>
    %cst_8 = arith.constant 0.000000e+00 : f32
    %64 = vector.broadcast %cst_8 : f32 to vector<16x840xf32>
    %65 = arith.maximumf %63, %64 : vector<16x840xf32>
    %66 = vector.extract_strided_slice %65 {offsets = [0, 0], sizes = [16, 810], strides = [1, 1]} : vector<16x840xf32> to vector<16x810xf32>
    %67 = vector.extract_strided_slice %65 {offsets = [0, 30], sizes = [16, 810], strides = [1, 1]} : vector<16x840xf32> to vector<16x810xf32>
    %68 = arith.maximumf %66, %67 : vector<16x810xf32>
    %69 = vector.extract_strided_slice %68 {offsets = [0, 0], sizes = [16, 809], strides = [1, 1]} : vector<16x810xf32> to vector<16x809xf32>
    %70 = vector.extract_strided_slice %68 {offsets = [0, 1], sizes = [16, 809], strides = [1, 1]} : vector<16x810xf32> to vector<16x809xf32>
    %71 = arith.maximumf %69, %70 : vector<16x809xf32>
    %c0_9 = arith.constant 0 : index
    %c0_10 = arith.constant 0 : index
    %72 = vector.load %arg13[%c0_9, %c0_10] : memref<809x258xf32, #tpu.memory_space<vmem>>, vector<809x258xf32>
    %cst_11 = arith.constant dense<0.000000e+00> : vector<16x258xf32>
    %73 = tpu.matmul %71, %72, %cst_11 {dimension_numbers = #tpu.dot_dimension_numbers<[1], [0], [0], [1], [0, 0, 1, 1], [], []>} : vector<16x809xf32>, vector<809x258xf32>, vector<16x258xf32> -> vector<16x258xf32>
    %74 = vector.extract_strided_slice %73 {offsets = [0, 0], sizes = [16, 224], strides = [1, 1]} : vector<16x258xf32> to vector<16x224xf32>
    %c0_12 = arith.constant 0 : index
    %c0_13 = arith.constant 0 : index
    %75 = vector.load %arg17[%c0_12, %c0_13] : memref<144x224xf32, #tpu.memory_space<vmem>>, vector<16x224xf32>
    tpu.vector_store %arg17[%c0_12, %c0_13], %74 {strides = array<i32>} : memref<144x224xf32, #tpu.memory_space<vmem>>, vector<16x224xf32>,
    %76 = vector.extract_strided_slice %73 {offsets = [0, 1], sizes = [16, 224], strides = [1, 1]} : vector<16x258xf32> to vector<16x224xf32>
    %c16 = arith.constant 16 : index
    %c0_14 = arith.constant 0 : index
    %77 = vector.load %arg17[%c16, %c0_14] : memref<144x224xf32, #tpu.memory_space<vmem>>, vector<16x224xf32>
    tpu.vector_store %arg17[%c16, %c0_14], %76 {strides = array<i32>} : memref<144x224xf32, #tpu.memory_space<vmem>>, vector<16x224xf32>,
    %78 = vector.extract_strided_slice %73 {offsets = [0, 2], sizes = [16, 224], strides = [1, 1]} : vector<16x258xf32> to vector<16x224xf32>
    %c32 = arith.constant 32 : index
    %c0_15 = arith.constant 0 : index
    %79 = vector.load %arg17[%c32, %c0_15] : memref<144x224xf32, #tpu.memory_space<vmem>>, vector<16x224xf32>
    tpu.vector_store %arg17[%c32, %c0_15], %78 {strides = array<i32>} : memref<144x224xf32, #tpu.memory_space<vmem>>, vector<16x224xf32>,
    %80 = vector.extract_strided_slice %73 {offsets = [0, 16], sizes = [16, 224], strides = [1, 1]} : vector<16x258xf32> to vector<16x224xf32>
    %c48 = arith.constant 48 : index
    %c0_16 = arith.constant 0 : index
    %81 = vector.load %arg17[%c48, %c0_16] : memref<144x224xf32, #tpu.memory_space<vmem>>, vector<16x224xf32>
    tpu.vector_store %arg17[%c48, %c0_16], %80 {strides = array<i32>} : memref<144x224xf32, #tpu.memory_space<vmem>>, vector<16x224xf32>,
    %82 = vector.extract_strided_slice %73 {offsets = [0, 17], sizes = [16, 224], strides = [1, 1]} : vector<16x258xf32> to vector<16x224xf32>
    %c64 = arith.constant 64 : index
    %c0_17 = arith.constant 0 : index
    %83 = vector.load %arg17[%c64, %c0_17] : memref<144x224xf32, #tpu.memory_space<vmem>>, vector<16x224xf32>
    tpu.vector_store %arg17[%c64, %c0_17], %82 {strides = array<i32>} : memref<144x224xf32, #tpu.memory_space<vmem>>, vector<16x224xf32>,
    %84 = vector.extract_strided_slice %73 {offsets = [0, 18], sizes = [16, 224], strides = [1, 1]} : vector<16x258xf32> to vector<16x224xf32>
    %c80 = arith.constant 80 : index
    %c0_18 = arith.constant 0 : index
    %85 = vector.load %arg17[%c80, %c0_18] : memref<144x224xf32, #tpu.memory_space<vmem>>, vector<16x224xf32>
    tpu.vector_store %arg17[%c80, %c0_18], %84 {strides = array<i32>} : memref<144x224xf32, #tpu.memory_space<vmem>>, vector<16x224xf32>,
    %86 = vector.extract_strided_slice %73 {offsets = [0, 32], sizes = [16, 224], strides = [1, 1]} : vector<16x258xf32> to vector<16x224xf32>
    %c96 = arith.constant 96 : index
    %c0_19 = arith.constant 0 : index
    %87 = vector.load %arg17[%c96, %c0_19] : memref<144x224xf32, #tpu.memory_space<vmem>>, vector<16x224xf32>
    tpu.vector_store %arg17[%c96, %c0_19], %86 {strides = array<i32>} : memref<144x224xf32, #tpu.memory_space<vmem>>, vector<16x224xf32>,
    %88 = vector.extract_strided_slice %73 {offsets = [0, 33], sizes = [16, 224], strides = [1, 1]} : vector<16x258xf32> to vector<16x224xf32>
    %c112 = arith.constant 112 : index
    %c0_20 = arith.constant 0 : index
    %89 = vector.load %arg17[%c112, %c0_20] : memref<144x224xf32, #tpu.memory_space<vmem>>, vector<16x224xf32>
    tpu.vector_store %arg17[%c112, %c0_20], %88 {strides = array<i32>} : memref<144x224xf32, #tpu.memory_space<vmem>>, vector<16x224xf32>,
    %90 = vector.extract_strided_slice %73 {offsets = [0, 34], sizes = [16, 224], strides = [1, 1]} : vector<16x258xf32> to vector<16x224xf32>
    %c128 = arith.constant 128 : index
    %c0_21 = arith.constant 0 : index
    %91 = vector.load %arg17[%c128, %c0_21] : memref<144x224xf32, #tpu.memory_space<vmem>>, vector<16x224xf32>
    tpu.vector_store %arg17[%c128, %c0_21], %90 {strides = array<i32>} : memref<144x224xf32, #tpu.memory_space<vmem>>, vector<16x224xf32>,
    %c0_22 = arith.constant 0 : index
    %c0_23 = arith.constant 0 : index
    %92 = vector.load %arg3[%c0_22, %c0_23] : memref<64x144xf32, #tpu.memory_space<vmem>>, vector<64x144xf32>
    %c0_24 = arith.constant 0 : index
    %c0_25 = arith.constant 0 : index
    %93 = vector.load %arg17[%c0_24, %c0_25] : memref<144x224xf32, #tpu.memory_space<vmem>>, vector<144x224xf32>
    %cst_26 = arith.constant dense<0.000000e+00> : vector<64x224xf32>
    %94 = tpu.matmul %92, %93, %cst_26 {dimension_numbers = #tpu.dot_dimension_numbers<[1], [0], [0], [1], [0, 0, 1, 1], [], []>} : vector<64x144xf32>, vector<144x224xf32>, vector<64x224xf32> -> vector<64x224xf32>
    %c0_27 = arith.constant 0 : index
    %c0_28 = arith.constant 0 : index
    %95 = vector.load %arg8[%c0_27, %c0_28] : memref<64x1xf32, #tpu.memory_space<vmem>>, vector<64x1xf32>
    %96 = vector.broadcast %95 : vector<64x1xf32> to vector<64x224xf32>
    %97 = arith.mulf %94, %96 : vector<64x224xf32>
    %c0_29 = arith.constant 0 : index
    %c0_30 = arith.constant 0 : index
    %98 = vector.load %arg9[%c0_29, %c0_30] : memref<64x1xf32, #tpu.memory_space<vmem>>, vector<64x1xf32>
    %99 = vector.broadcast %98 : vector<64x1xf32> to vector<64x224xf32>
    %100 = arith.addf %97, %99 : vector<64x224xf32>
    %cst_31 = arith.constant 0.000000e+00 : f32
    %101 = vector.broadcast %cst_31 : f32 to vector<64x224xf32>
    %102 = arith.maximumf %100, %101 : vector<64x224xf32>
    %103 = vector.extract_strided_slice %102 {offsets = [0, 0], sizes = [64, 208], strides = [1, 1]} : vector<64x224xf32> to vector<64x208xf32>
    %104 = vector.extract_strided_slice %102 {offsets = [0, 16], sizes = [64, 208], strides = [1, 1]} : vector<64x224xf32> to vector<64x208xf32>
    %105 = arith.maximumf %103, %104 : vector<64x208xf32>
    %106 = vector.extract_strided_slice %105 {offsets = [0, 0], sizes = [64, 207], strides = [1, 1]} : vector<64x208xf32> to vector<64x207xf32>
    %107 = vector.extract_strided_slice %105 {offsets = [0, 1], sizes = [64, 207], strides = [1, 1]} : vector<64x208xf32> to vector<64x207xf32>
    %108 = arith.maximumf %106, %107 : vector<64x207xf32>
    %c0_32 = arith.constant 0 : index
    %c0_33 = arith.constant 0 : index
    %109 = vector.load %arg14[%c0_32, %c0_33] : memref<207x83xf32, #tpu.memory_space<vmem>>, vector<207x83xf32>
    %cst_34 = arith.constant dense<0.000000e+00> : vector<64x83xf32>
    %110 = tpu.matmul %108, %109, %cst_34 {dimension_numbers = #tpu.dot_dimension_numbers<[1], [0], [0], [1], [0, 0, 1, 1], [], []>} : vector<64x207xf32>, vector<207x83xf32>, vector<64x83xf32> -> vector<64x83xf32>
    %111 = vector.extract_strided_slice %110 {offsets = [0, 0], sizes = [64, 63], strides = [1, 1]} : vector<64x83xf32> to vector<64x63xf32>
    %c0_35 = arith.constant 0 : index
    %c0_36 = arith.constant 0 : index
    %112 = vector.load %arg18[%c0_35, %c0_36] : memref<576x63xf32, #tpu.memory_space<vmem>>, vector<64x63xf32>
    tpu.vector_store %arg18[%c0_35, %c0_36], %111 {strides = array<i32>} : memref<576x63xf32, #tpu.memory_space<vmem>>, vector<64x63xf32>,
    %113 = vector.extract_strided_slice %110 {offsets = [0, 1], sizes = [64, 63], strides = [1, 1]} : vector<64x83xf32> to vector<64x63xf32>
    %c64_37 = arith.constant 64 : index
    %c0_38 = arith.constant 0 : index
    %114 = vector.load %arg18[%c64_37, %c0_38] : memref<576x63xf32, #tpu.memory_space<vmem>>, vector<64x63xf32>
    tpu.vector_store %arg18[%c64_37, %c0_38], %113 {strides = array<i32>} : memref<576x63xf32, #tpu.memory_space<vmem>>, vector<64x63xf32>,
    %115 = vector.extract_strided_slice %110 {offsets = [0, 2], sizes = [64, 63], strides = [1, 1]} : vector<64x83xf32> to vector<64x63xf32>
    %c128_39 = arith.constant 128 : index
    %c0_40 = arith.constant 0 : index
    %116 = vector.load %arg18[%c128_39, %c0_40] : memref<576x63xf32, #tpu.memory_space<vmem>>, vector<64x63xf32>
    tpu.vector_store %arg18[%c128_39, %c0_40], %115 {strides = array<i32>} : memref<576x63xf32, #tpu.memory_space<vmem>>, vector<64x63xf32>,
    %117 = vector.extract_strided_slice %110 {offsets = [0, 9], sizes = [64, 63], strides = [1, 1]} : vector<64x83xf32> to vector<64x63xf32>
    %c192 = arith.constant 192 : index
    %c0_41 = arith.constant 0 : index
    %118 = vector.load %arg18[%c192, %c0_41] : memref<576x63xf32, #tpu.memory_space<vmem>>, vector<64x63xf32>
    tpu.vector_store %arg18[%c192, %c0_41], %117 {strides = array<i32>} : memref<576x63xf32, #tpu.memory_space<vmem>>, vector<64x63xf32>,
    %119 = vector.extract_strided_slice %110 {offsets = [0, 10], sizes = [64, 63], strides = [1, 1]} : vector<64x83xf32> to vector<64x63xf32>
    %c256 = arith.constant 256 : index
    %c0_42 = arith.constant 0 : index
    %120 = vector.load %arg18[%c256, %c0_42] : memref<576x63xf32, #tpu.memory_space<vmem>>, vector<64x63xf32>
    tpu.vector_store %arg18[%c256, %c0_42], %119 {strides = array<i32>} : memref<576x63xf32, #tpu.memory_space<vmem>>, vector<64x63xf32>,
    %121 = vector.extract_strided_slice %110 {offsets = [0, 11], sizes = [64, 63], strides = [1, 1]} : vector<64x83xf32> to vector<64x63xf32>
    %c320 = arith.constant 320 : index
    %c0_43 = arith.constant 0 : index
    %122 = vector.load %arg18[%c320, %c0_43] : memref<576x63xf32, #tpu.memory_space<vmem>>, vector<64x63xf32>
    tpu.vector_store %arg18[%c320, %c0_43], %121 {strides = array<i32>} : memref<576x63xf32, #tpu.memory_space<vmem>>, vector<64x63xf32>,
    %123 = vector.extract_strided_slice %110 {offsets = [0, 18], sizes = [64, 63], strides = [1, 1]} : vector<64x83xf32> to vector<64x63xf32>
    %c384 = arith.constant 384 : index
    %c0_44 = arith.constant 0 : index
    %124 = vector.load %arg18[%c384, %c0_44] : memref<576x63xf32, #tpu.memory_space<vmem>>, vector<64x63xf32>
    tpu.vector_store %arg18[%c384, %c0_44], %123 {strides = array<i32>} : memref<576x63xf32, #tpu.memory_space<vmem>>, vector<64x63xf32>,
    %125 = vector.extract_strided_slice %110 {offsets = [0, 19], sizes = [64, 63], strides = [1, 1]} : vector<64x83xf32> to vector<64x63xf32>
    %c448 = arith.constant 448 : index
    %c0_45 = arith.constant 0 : index
    %126 = vector.load %arg18[%c448, %c0_45] : memref<576x63xf32, #tpu.memory_space<vmem>>, vector<64x63xf32>
    tpu.vector_store %arg18[%c448, %c0_45], %125 {strides = array<i32>} : memref<576x63xf32, #tpu.memory_space<vmem>>, vector<64x63xf32>,
    %127 = vector.extract_strided_slice %110 {offsets = [0, 20], sizes = [64, 63], strides = [1, 1]} : vector<64x83xf32> to vector<64x63xf32>
    %c512 = arith.constant 512 : index
    %c0_46 = arith.constant 0 : index
    %128 = vector.load %arg18[%c512, %c0_46] : memref<576x63xf32, #tpu.memory_space<vmem>>, vector<64x63xf32>
    tpu.vector_store %arg18[%c512, %c0_46], %127 {strides = array<i32>} : memref<576x63xf32, #tpu.memory_space<vmem>>, vector<64x63xf32>,
    %c0_47 = arith.constant 0 : index
    %c0_48 = arith.constant 0 : index
    %129 = vector.load %arg4[%c0_47, %c0_48] : memref<128x576xf32, #tpu.memory_space<vmem>>, vector<128x576xf32>
    %c0_49 = arith.constant 0 : index
    %c0_50 = arith.constant 0 : index
    %130 = vector.load %arg18[%c0_49, %c0_50] : memref<576x63xf32, #tpu.memory_space<vmem>>, vector<576x63xf32>
    %cst_51 = arith.constant dense<0.000000e+00> : vector<128x63xf32>
    %131 = tpu.matmul %129, %130, %cst_51 {dimension_numbers = #tpu.dot_dimension_numbers<[1], [0], [0], [1], [0, 0, 1, 1], [], []>} : vector<128x576xf32>, vector<576x63xf32>, vector<128x63xf32> -> vector<128x63xf32>
    %c0_52 = arith.constant 0 : index
    %c0_53 = arith.constant 0 : index
    %132 = vector.load %arg10[%c0_52, %c0_53] : memref<128x1xf32, #tpu.memory_space<vmem>>, vector<128x1xf32>
    %133 = vector.broadcast %132 : vector<128x1xf32> to vector<128x63xf32>
    %134 = arith.mulf %131, %133 : vector<128x63xf32>
    %c0_54 = arith.constant 0 : index
    %c0_55 = arith.constant 0 : index
    %135 = vector.load %arg11[%c0_54, %c0_55] : memref<128x1xf32, #tpu.memory_space<vmem>>, vector<128x1xf32>
    %136 = vector.broadcast %135 : vector<128x1xf32> to vector<128x63xf32>
    %137 = arith.addf %134, %136 : vector<128x63xf32>
    %cst_56 = arith.constant 0.000000e+00 : f32
    %138 = vector.broadcast %cst_56 : f32 to vector<128x63xf32>
    %139 = arith.maximumf %137, %138 : vector<128x63xf32>
    %140 = vector.extract_strided_slice %139 {offsets = [0, 0], sizes = [128, 54], strides = [1, 1]} : vector<128x63xf32> to vector<128x54xf32>
    %141 = vector.extract_strided_slice %139 {offsets = [0, 9], sizes = [128, 54], strides = [1, 1]} : vector<128x63xf32> to vector<128x54xf32>
    %142 = arith.maximumf %140, %141 : vector<128x54xf32>
    %143 = vector.extract_strided_slice %142 {offsets = [0, 0], sizes = [128, 53], strides = [1, 1]} : vector<128x54xf32> to vector<128x53xf32>
    %144 = vector.extract_strided_slice %142 {offsets = [0, 1], sizes = [128, 53], strides = [1, 1]} : vector<128x54xf32> to vector<128x53xf32>
    %145 = arith.maximumf %143, %144 : vector<128x53xf32>
    %c0_57 = arith.constant 0 : index
    %c0_58 = arith.constant 0 : index
    %146 = vector.load %arg15[%c0_57, %c0_58] : memref<53x11xf32, #tpu.memory_space<vmem>>, vector<53x11xf32>
    %cst_59 = arith.constant dense<0.000000e+00> : vector<128x11xf32>
    %147 = tpu.matmul %145, %146, %cst_59 {dimension_numbers = #tpu.dot_dimension_numbers<[1], [0], [0], [1], [0, 0, 1, 1], [], []>} : vector<128x53xf32>, vector<53x11xf32>, vector<128x11xf32> -> vector<128x11xf32>
    %148 = vector.extract_strided_slice %147 {offsets = [0, 0], sizes = [128, 3], strides = [1, 1]} : vector<128x11xf32> to vector<128x3xf32>
    %c0_60 = arith.constant 0 : index
    %c0_61 = arith.constant 0 : index
    %149 = vector.load %arg19[%c0_60, %c0_61] : memref<1152x3xf32, #tpu.memory_space<vmem>>, vector<128x3xf32>
    tpu.vector_store %arg19[%c0_60, %c0_61], %148 {strides = array<i32>} : memref<1152x3xf32, #tpu.memory_space<vmem>>, vector<128x3xf32>,
    %150 = vector.extract_strided_slice %147 {offsets = [0, 1], sizes = [128, 3], strides = [1, 1]} : vector<128x11xf32> to vector<128x3xf32>
    %c128_62 = arith.constant 128 : index
    %c0_63 = arith.constant 0 : index
    %151 = vector.load %arg19[%c128_62, %c0_63] : memref<1152x3xf32, #tpu.memory_space<vmem>>, vector<128x3xf32>
    tpu.vector_store %arg19[%c128_62, %c0_63], %150 {strides = array<i32>} : memref<1152x3xf32, #tpu.memory_space<vmem>>, vector<128x3xf32>,
    %152 = vector.extract_strided_slice %147 {offsets = [0, 2], sizes = [128, 3], strides = [1, 1]} : vector<128x11xf32> to vector<128x3xf32>
    %c256_64 = arith.constant 256 : index
    %c0_65 = arith.constant 0 : index
    %153 = vector.load %arg19[%c256_64, %c0_65] : memref<1152x3xf32, #tpu.memory_space<vmem>>, vector<128x3xf32>
    tpu.vector_store %arg19[%c256_64, %c0_65], %152 {strides = array<i32>} : memref<1152x3xf32, #tpu.memory_space<vmem>>, vector<128x3xf32>,
    %154 = vector.extract_strided_slice %147 {offsets = [0, 3], sizes = [128, 3], strides = [1, 1]} : vector<128x11xf32> to vector<128x3xf32>
    %c384_66 = arith.constant 384 : index
    %c0_67 = arith.constant 0 : index
    %155 = vector.load %arg19[%c384_66, %c0_67] : memref<1152x3xf32, #tpu.memory_space<vmem>>, vector<128x3xf32>
    tpu.vector_store %arg19[%c384_66, %c0_67], %154 {strides = array<i32>} : memref<1152x3xf32, #tpu.memory_space<vmem>>, vector<128x3xf32>,
    %156 = vector.extract_strided_slice %147 {offsets = [0, 4], sizes = [128, 3], strides = [1, 1]} : vector<128x11xf32> to vector<128x3xf32>
    %c512_68 = arith.constant 512 : index
    %c0_69 = arith.constant 0 : index
    %157 = vector.load %arg19[%c512_68, %c0_69] : memref<1152x3xf32, #tpu.memory_space<vmem>>, vector<128x3xf32>
    tpu.vector_store %arg19[%c512_68, %c0_69], %156 {strides = array<i32>} : memref<1152x3xf32, #tpu.memory_space<vmem>>, vector<128x3xf32>,
    %158 = vector.extract_strided_slice %147 {offsets = [0, 5], sizes = [128, 3], strides = [1, 1]} : vector<128x11xf32> to vector<128x3xf32>
    %c640 = arith.constant 640 : index
    %c0_70 = arith.constant 0 : index
    %159 = vector.load %arg19[%c640, %c0_70] : memref<1152x3xf32, #tpu.memory_space<vmem>>, vector<128x3xf32>
    tpu.vector_store %arg19[%c640, %c0_70], %158 {strides = array<i32>} : memref<1152x3xf32, #tpu.memory_space<vmem>>, vector<128x3xf32>,
    %160 = vector.extract_strided_slice %147 {offsets = [0, 6], sizes = [128, 3], strides = [1, 1]} : vector<128x11xf32> to vector<128x3xf32>
    %c768 = arith.constant 768 : index
    %c0_71 = arith.constant 0 : index
    %161 = vector.load %arg19[%c768, %c0_71] : memref<1152x3xf32, #tpu.memory_space<vmem>>, vector<128x3xf32>
    tpu.vector_store %arg19[%c768, %c0_71], %160 {strides = array<i32>} : memref<1152x3xf32, #tpu.memory_space<vmem>>, vector<128x3xf32>,
    %162 = vector.extract_strided_slice %147 {offsets = [0, 7], sizes = [128, 3], strides = [1, 1]} : vector<128x11xf32> to vector<128x3xf32>
    %c896 = arith.constant 896 : index
    %c0_72 = arith.constant 0 : index
    %163 = vector.load %arg19[%c896, %c0_72] : memref<1152x3xf32, #tpu.memory_space<vmem>>, vector<128x3xf32>
    tpu.vector_store %arg19[%c896, %c0_72], %162 {strides = array<i32>} : memref<1152x3xf32, #tpu.memory_space<vmem>>, vector<128x3xf32>,
    %164 = vector.extract_strided_slice %147 {offsets = [0, 8], sizes = [128, 3], strides = [1, 1]} : vector<128x11xf32> to vector<128x3xf32>
    %c1024 = arith.constant 1024 : index
    %c0_73 = arith.constant 0 : index
    %165 = vector.load %arg19[%c1024, %c0_73] : memref<1152x3xf32, #tpu.memory_space<vmem>>, vector<128x3xf32>
    tpu.vector_store %arg19[%c1024, %c0_73], %164 {strides = array<i32>} : memref<1152x3xf32, #tpu.memory_space<vmem>>, vector<128x3xf32>,
    %c0_74 = arith.constant 0 : index
    %c0_75 = arith.constant 0 : index
    %166 = vector.load %arg5[%c0_74, %c0_75] : memref<10x1152xf32, #tpu.memory_space<vmem>>, vector<10x1152xf32>
    %c0_76 = arith.constant 0 : index
    %c0_77 = arith.constant 0 : index
    %167 = vector.load %arg19[%c0_76, %c0_77] : memref<1152x3xf32, #tpu.memory_space<vmem>>, vector<1152x3xf32>
    %cst_78 = arith.constant dense<0.000000e+00> : vector<10x3xf32>
    %168 = tpu.matmul %166, %167, %cst_78 {dimension_numbers = #tpu.dot_dimension_numbers<[1], [0], [0], [1], [0, 0, 1, 1], [], []>} : vector<10x1152xf32>, vector<1152x3xf32>, vector<10x3xf32> -> vector<10x3xf32>
    %c0_79 = arith.constant 0 : index
    %c0_80 = arith.constant 0 : index
    %169 = vector.load %arg12[%c0_79, %c0_80] : memref<10x1xf32, #tpu.memory_space<vmem>>, vector<10x1xf32>
    %170 = vector.broadcast %169 : vector<10x1xf32> to vector<10x3xf32>
    %171 = arith.addf %168, %170 : vector<10x3xf32>
    %172 = vector.extract_strided_slice %171 {offsets = [0, 0], sizes = [10, 1], strides = [1, 1]} : vector<10x3xf32> to vector<10x1xf32>
    %c0_81 = arith.constant 0 : index
    %c0_82 = arith.constant 0 : index
    %c0_83 = arith.constant 0 : index
    %173 = vector.load %arg16[%c0_81, %c0_82, %c0_83] : memref<1x10x1xf32, #tpu.memory_space<vmem>>, vector<1x10x1xf32>
    %174 = vector.shape_cast %173 : vector<1x10x1xf32> to vector<10x1xf32>
    %175 = vector.shape_cast %172 : vector<10x1xf32> to vector<1x10x1xf32>
    tpu.vector_store %arg16[%c0_81, %c0_82, %c0_83], %175 {strides = array<i32>} : memref<1x10x1xf32, #tpu.memory_space<vmem>>, vector<1x10x1xf32>,
    return
  }
  func.func @transform_0(%arg0: i32) -> (i32, i32, i32) {
    %c0_i32 = arith.constant 0 : i32
    %c0_i32_0 = arith.constant 0 : i32
    %c0_i32_1 = arith.constant 0 : i32
    return %arg0, %c0_i32, %c0_i32_0 : i32, i32, i32
  }
  func.func @transform_1(%arg0: i32) -> (i32, i32) {
    %c0_i32 = arith.constant 0 : i32
    %c0_i32_0 = arith.constant 0 : i32
    %c0_i32_1 = arith.constant 0 : i32
    return %c0_i32, %c0_i32_0 : i32, i32
  }
  func.func @transform_2(%arg0: i32) -> (i32, i32) {
    %c0_i32 = arith.constant 0 : i32
    %c0_i32_0 = arith.constant 0 : i32
    %c0_i32_1 = arith.constant 0 : i32
    return %c0_i32, %c0_i32_0 : i32, i32
  }
  func.func @transform_3(%arg0: i32) -> (i32, i32) {
    %c0_i32 = arith.constant 0 : i32
    %c0_i32_0 = arith.constant 0 : i32
    %c0_i32_1 = arith.constant 0 : i32
    return %c0_i32, %c0_i32_0 : i32, i32
  }
  func.func @transform_4(%arg0: i32) -> (i32, i32) {
    %c0_i32 = arith.constant 0 : i32
    %c0_i32_0 = arith.constant 0 : i32
    %c0_i32_1 = arith.constant 0 : i32
    return %c0_i32, %c0_i32_0 : i32, i32
  }
  func.func @transform_5(%arg0: i32) -> (i32, i32) {
    %c0_i32 = arith.constant 0 : i32
    %c0_i32_0 = arith.constant 0 : i32
    %c0_i32_1 = arith.constant 0 : i32
    return %c0_i32, %c0_i32_0 : i32, i32
  }
  func.func @transform_6(%arg0: i32) -> (i32, i32) {
    %c0_i32 = arith.constant 0 : i32
    %c0_i32_0 = arith.constant 0 : i32
    %c0_i32_1 = arith.constant 0 : i32
    return %c0_i32, %c0_i32_0 : i32, i32
  }
  func.func @transform_7(%arg0: i32) -> (i32, i32) {
    %c0_i32 = arith.constant 0 : i32
    %c0_i32_0 = arith.constant 0 : i32
    %c0_i32_1 = arith.constant 0 : i32
    return %c0_i32, %c0_i32_0 : i32, i32
  }
  func.func @transform_8(%arg0: i32) -> (i32, i32) {
    %c0_i32 = arith.constant 0 : i32
    %c0_i32_0 = arith.constant 0 : i32
    %c0_i32_1 = arith.constant 0 : i32
    return %c0_i32, %c0_i32_0 : i32, i32
  }
  func.func @transform_9(%arg0: i32) -> (i32, i32) {
    %c0_i32 = arith.constant 0 : i32
    %c0_i32_0 = arith.constant 0 : i32
    %c0_i32_1 = arith.constant 0 : i32
    return %c0_i32, %c0_i32_0 : i32, i32
  }
  func.func @transform_10(%arg0: i32) -> (i32, i32) {
    %c0_i32 = arith.constant 0 : i32
    %c0_i32_0 = arith.constant 0 : i32
    %c0_i32_1 = arith.constant 0 : i32
    return %c0_i32, %c0_i32_0 : i32, i32
  }
  func.func @transform_11(%arg0: i32) -> (i32, i32) {
    %c0_i32 = arith.constant 0 : i32
    %c0_i32_0 = arith.constant 0 : i32
    %c0_i32_1 = arith.constant 0 : i32
    return %c0_i32, %c0_i32_0 : i32, i32
  }
  func.func @transform_12(%arg0: i32) -> (i32, i32) {
    %c0_i32 = arith.constant 0 : i32
    %c0_i32_0 = arith.constant 0 : i32
    %c0_i32_1 = arith.constant 0 : i32
    return %c0_i32, %c0_i32_0 : i32, i32
  }
  func.func @transform_13(%arg0: i32) -> (i32, i32) {
    %c0_i32 = arith.constant 0 : i32
    %c0_i32_0 = arith.constant 0 : i32
    %c0_i32_1 = arith.constant 0 : i32
    return %c0_i32, %c0_i32_0 : i32, i32
  }
  func.func @transform_14(%arg0: i32) -> (i32, i32) {
    %c0_i32 = arith.constant 0 : i32
    %c0_i32_0 = arith.constant 0 : i32
    %c0_i32_1 = arith.constant 0 : i32
    return %c0_i32, %c0_i32_0 : i32, i32
  }
  func.func @transform_15(%arg0: i32) -> (i32, i32, i32) {
    %c0_i32 = arith.constant 0 : i32
    %c0_i32_0 = arith.constant 0 : i32
    %c0_i32_1 = arith.constant 0 : i32
    return %arg0, %c0_i32, %c0_i32_0 : i32, i32, i32
  }
}

</mosaic_0001>

<bundles_post_ra>
// kernel: net_forward.1
= control target key start
LH: loop header
LB: loop body
LE: loop exit
PB: predicated region body
PF: predicated region fallthrough
CT: control target
= control target key end

     0   :  { %s7700_s18 = smov 0   ;;  %s11595_s0 = inlined_call_operand.vmem [shape: f32[2,1,902], index: 0, kind: input, shape index: {}]   ;;  %s11596_s1 = inlined_call_operand.vmem [shape: f32[16,9], index: 1, kind: input, shape index: {}]   ;;  %s11597_s2 = inlined_call_operand.vmem [shape: f32[64,144], index: 2, kind: input, shape index: {}]   ;;  %s11598_s3 = inlined_call_operand.vmem [shape: f32[128,576], index: 3, kind: input, shape index: {}]   ;;  %s11599_s4 = inlined_call_operand.vmem [shape: f32[10,1152], index: 4, kind: input, shape index: {}]   ;;  %s11600_s5 = inlined_call_operand.vmem [shape: f32[16,1], index: 5, kind: input, shape index: {}]   ;;  %s11601_s6 = inlined_call_operand.vmem [shape: f32[16,1], index: 6, kind: input, shape index: {}]   ;;  %s11602_s7 = inlined_call_operand.vmem [shape: f32[64,1], index: 7, kind: input, shape index: {}]   ;;  %s11603_s8 = inlined_call_operand.vmem [shape: f32[64,1], index: 8, kind: input, shape index: {}]   ;;  %s11604_s9 = inlined_call_operand.vmem [shape: f32[128,1], index: 9, kind: input, shape index: {}]   ;;  %s11605_s10 = inlined_call_operand.vmem [shape: f32[128,1], index: 10, kind: input, shape index: {}]   ;;  %s11606_s11 = inlined_call_operand.vmem [shape: f32[10,1], index: 11, kind: input, shape index: {}]   ;;  %s11607_s12 = inlined_call_operand.vmem [shape: f32[809,258], index: 12, kind: input, shape index: {}]   ;;  %s11608_s13 = inlined_call_operand.vmem [shape: f32[207,83], index: 13, kind: input, shape index: {}]   ;;  %s11609_s14 = inlined_call_operand.vmem [shape: f32[53,11], index: 14, kind: input, shape index: {}]   ;;  %s11610_s15 = inlined_call_operand.vmem [shape: f32[2,10,1], index: 15, kind: output, shape index: {}]  }
   0x1 LB: > { %s6113_s19 = sadd.s32 4294967295, %s7582_s18   ;;  %p6117_p0 = scmp.ge.s32.totalorder %s7582_s18, 1  ;;  %s7582_s18 = sphi %s7700_s18, %s25_s18  }
   0x2   : > { %p436_p1 = scmp.lt.s32.totalorder %s7582_s18, 3 }
   0x4   : > { %p437_p2 = pnand %p6117_p0, %p436_p1 }
   0x6   : > { %440 = sbr.rel (%p437_p2) target bundleno = 3466 (0xd8a), region = 80 }
   0xd   : > { %v493_v0 = vld [vmem:[%s11596_s1] sm:$0xff]  ;;  %v7584_v1 = vmov 1   ;;  %v7585_v2 = vmov 3   ;;  %p483_p3 = scmp.lt.s32.totalorder %s6113_s19, 1  ;;  %v506_v3 = vlaneseq  ;;  %v7586_v5 = vmov 2   ;;  %v494_v15 = vld [vmem:[%s11596_s1 + $0x8] sm:$0xff] }
   0xe   : > { %7508 = vset.pattern.permute.xlu0 %v7584_v1  ;;  %7510 = vset.pattern.permute.xlu1 %v7585_v2  ;;  %v7587_v6 = vmov 4   ;;  %v7588_v12 = vmov 5   ;;  %v7589_v13 = vmov 6   ;;  %v7590_v14 = vmov 7   ;;  %v1444_v20 = vld [vmem:[%s11600_s5] sm:$0xff]  ;;  %s11623_s17 = smov 127  }
   0xf   : > { %570 = vperm.xlu0 %7508, %v493_v0   ;;  %780 = vperm.xlu1 %7510, %v493_v0   ;;  %s11719_s19 = smov (!%p483_p3, %s6113_s19), 1  ;;  %v7713_v4 = vshrl.u32 %v506_v3, 7  ;;  %v7591_v16 = vmov 8   ;;  %v7592_v17 = vmov 0   ;;  %v1470_v21 = vld [vmem:[%s11601_s6] sm:$0xff]  ;;  %s11620_s20 = smov 126  }
  0x10   : > { %s6118_s22 = sshll.u32 %s11719_s19, 3  ;;  %s7595_s21 = smov 98   ;;  %vm633_vm0 = vcmask 1039360   ;;  %vm738_vm1 = vcmask 1031168   ;;  %vm843_vm2 = vcmask 801792   ;;  %vm948_vm3 = vcmask 793600  }
  0x11   : > { %s486_s25 = scalar_lea.vmem %s11595_s0, %s6118_s22  ;;  %v528_v7 = vsub.s32 5, %v7713_v4  ;;  %v532_v8 = vsub.s32 6, %v7713_v4  ;;  %v1104_v18 = vsub.s32 7, %v7713_v4  ;;  %v516_v22 = vsub.s32 2, %v7713_v4  ;;  %s7596_s22 = smov 97  }
  0x12   : > { %v492_v9 = vld [vmem:[%s486_s25] sm:$0xff]  ;;  %v512_v23 = vsub.s32 1, %v7713_v4  ;;  %v524_v26 = vsub.s32 4, %v7713_v4  ;;  %v520_v27 = vsub.s32 3, %v7713_v4  ;;  %v508_v29 = vsub.s32 0, %v7713_v4  ;;  %s11618_s23 = smov 96  }
  0x13   : > { %7509 = vset.pattern.permute.xlu0 %v7586_v5  ;;  %7511 = vset.pattern.permute.xlu1 %v7587_v6  ;;  %v7721_v10 = vrot.slane %v492_v9, %v528_v7  ;;  %v7723_v11 = vrot.slane %v492_v9, %v532_v8  ;;  %v7729_v19 = vrot.slane %v492_v9, %v1104_v18  ;;  %s11622_s24 = smov 68   ;;  %s7599_s25 = smov 67   ;;  %vm1053_vm4 = vcmask 785408  }
  0x14   : > { %675 = vperm.xlu0 %7509, %v493_v0   ;;  %885 = vperm.xlu1 %7511, %v493_v0   ;;  %v7739_v24 = vrot.slane %v492_v9, %v516_v22  ;;  %v7741_v25 = vrot.slane %v492_v9, %v512_v23  ;;  %v7752_v32 = vrot.slane %v492_v9, %v524_v26  ;;  %s7600_s26 = smov 66   ;;  %vm1171_vm5 = vcmask 556032   ;;  %s11701_s27 = smov 127  }
  0x15   : > { %11655 = vst [vmem:[#allocation5_spill] sm:$0xff] %v7721_v10  ;;  %11656 = vst [vmem:[#allocation6_spill] sm:$0xff] %v7723_v11  ;;  %v7754_v33 = vrot.slane %v492_v9, %v520_v27  ;;  %v7764_v37 = vrot.slane %v492_v9, %v508_v29  ;;  %vm1286_vm6 = vcmask 547840   ;;  %vm1401_vm7 = vcmask 539648   ;;  %s11703_s28 = smov 68   ;;  %s11716_s29 = smov 96  }
  0x16   : > { %11657 = vst [vmem:[#allocation7_spill] sm:$0xff] %v7729_v19  ;;  %11658 = vst [vmem:[#allocation8_spill] sm:$0xff] %v7741_v25  ;;  %vm1987_vm8 = vcmask 1040384   ;;  %vm7601_vm9 = vmmov 1   ;;  %vm1980_vm11 = vcmask 334848   ;;  %s7606_s30 = smov 95  }
  0x17   : > { %11659 = vst [vmem:[#allocation9_spill] sm:$0xff] %v7752_v32  ;;  %vm9820_vm10 = vmpackc.low %vm1987_vm8, %vm7601_vm9  ;;  %vm2828_vm12 = vcmask 130048   ;;  %vm2657_vm13 = vcmask 916480   ;;  %vm2676_vm14 = vcmask 908288   ;;  %vm2695_vm15 = vcmask 900096   ;;  %s7618_s16 = smov 122  }
  0x18   : > { %7512 = vset.pattern.permute.xlu1 %v7588_v12  ;;  %7513 = vset.pattern.permute.xlu0 %v7589_v13  ;;  %vm4762_vm8 = vcmask 433152  }
  0x19   : > { %990 = vperm.xlu1 %7512, %v493_v0   ;;  %1095 = vperm.xlu0 %7513, %v493_v0  }
  0x1d   : > { %7514 = vset.pattern.permute.xlu1 %v7590_v14  ;;  %7518 = vset.pattern.permute.xlu0 %v7585_v2 }
  0x1e   : > { %1215 = vperm.xlu1 %7514, %v493_v0   ;;  %784 = vperm.xlu0 %7518, %v494_v15  }
  0x22   : > { %7515 = vset.pattern.permute.xlu1 %v7591_v16  ;;  %7520 = vset.pattern.permute.xlu0 %v7588_v12 }
  0x23   : > { %1330 = vperm.xlu1 %7515, %v493_v0   ;;  %994 = vperm.xlu0 %7520, %v494_v15  }
  0x27   : > { %7516 = vset.pattern.permute.xlu1 %v7584_v1  ;;  %7521 = vset.pattern.permute.xlu0 %v7592_v17 }
  0x28   : > { %574 = vperm.xlu1 %7516, %v494_v15   ;;  %497 = vperm.xlu0 %7521, %v493_v0  }
  0x2c   : > { %7517 = vset.pattern.permute.xlu1 %v7586_v5  ;;  %502 = vperm.xlu0 %7521, %v494_v15  }
  0x2d   : > { %679 = vperm.xlu1 %7517, %v494_v15  }
  0x31   : > { %7519 = vset.pattern.permute.xlu1 %v7587_v6 }
  0x32   : > { %889 = vperm.xlu1 %7519, %v494_v15  }
  0x36   : > { %7522 = vset.pattern.permute.xlu1 %v7589_v13 }
  0x37   : > { %1099 = vperm.xlu1 %7522, %v494_v15  }
  0x3b   : > { %7523 = vset.pattern.permute.xlu1 %v7590_v14 }
  0x3c   : > { %1219 = vperm.xlu1 %7523, %v494_v15  }
  0x40   : > { %7524 = vset.pattern.permute.xlu1 %v7591_v16 }
  0x41   : > { %1334 = vperm.xlu1 %7524, %v494_v15  }
  0x45   : > { %7525 = vset.pattern.permute.xlu1 %v7592_v17 }
  0x46   : > { %1448 = vperm.xlu1 %7525, %v1444_v20  }
  0x4a   : > { %1474 = vperm.xlu1 %7525, %v1470_v21  }
  0x8e   : > { %v7745_v28 = vpop.permute.xlu0 %570  ;;  %v7778_v42 = vpop.permute.xlu1 %780 }
  0x8f   : > { %v579_v30 = vmul.f32 %v7745_v28, %v7739_v24  ;;  %v578_v31 = vmul.f32 %v7745_v28, %v7741_v25  ;;  %v581_v34 = vmul.f32 %v7745_v28, %v7752_v32  ;;  %v580_v35 = vmul.f32 %v7745_v28, %v7754_v33 }
  0x90   : > { %v577_v39 = vmul.f32 %v7745_v28, %v7764_v37  ;;  %v788_v43 = vmul.f32 %v7778_v42, %v7741_v25  ;;  %v790_v45 = vmul.f32 %v7778_v42, %v7754_v33  ;;  %v787_v48 = vmul.f32 %v7778_v42, %v7764_v37 }
  0x91   : > { %609 = vrot.lane.b32.xlu0 %v579_v30, %s11623_s17  ;;  %607 = vrot.lane.b32.xlu1 %v578_v31, %s11623_s17  ;;  %v789_v49 = vmul.f32 %v7778_v42, %v7739_v24  ;;  %v791_v51 = vmul.f32 %v7778_v42, %v7752_v32 }
  0x93   : > { %v7762_v36 = vpop.permute.xlu0 %675  ;;  %v7794_v47 = vpop.permute.xlu1 %885 }
  0x94   : > { %v685_v38 = vmul.f32 %v7762_v36, %v7754_v33  ;;  %v682_v40 = vmul.f32 %v7762_v36, %v7764_v37  ;;  %v683_v41 = vmul.f32 %v7762_v36, %v7741_v25  ;;  %v684_v44 = vmul.f32 %v7762_v36, %v7739_v24 }
  0x95   : > { %613 = vrot.lane.b32.xlu0 %v581_v34, %s11623_s17  ;;  %611 = vrot.lane.b32.xlu1 %v580_v35, %s11623_s17  ;;  %v686_v46 = vmul.f32 %v7762_v36, %v7752_v32  ;;  %v893_v50 = vmul.f32 %v7794_v47, %v7741_v25  ;;  %v895_v52 = vmul.f32 %v7794_v47, %v7754_v33 }
  0x96   : > { %v894_v53 = vmul.f32 %v7794_v47, %v7739_v24  ;;  %v892_v55 = vmul.f32 %v7794_v47, %v7764_v37  ;;  %v896_v56 = vmul.f32 %v7794_v47, %v7752_v32 }
  0x98   : > { %v7814_v54 = vpop.permute.xlu1 %990  ;;  %v7828_v59 = vpop.permute.xlu0 %1095 }
  0x99   : > { %716 = vrot.lane.b32.xlu0 %v685_v38, %s11620_s20  ;;  %605 = vrot.lane.b32.xlu1 %v577_v39, %s11623_s17  ;;  %v998_v57 = vmul.f32 %v7814_v54, %v7741_v25  ;;  %v999_v58 = vmul.f32 %v7814_v54, %v7739_v24  ;;  %11660 = vst [vmem:[#allocation10_spill] sm:$0xff] %v7828_v59 }
  0x9a   : > { %v1000_v60 = vmul.f32 %v7814_v54, %v7754_v33  ;;  %v1001_v61 = vmul.f32 %v7814_v54, %v7752_v32  ;;  %v1108_v62 = vmul.f32 %v7828_v59, %v7741_v25  ;;  %v997_v63 = vmul.f32 %v7814_v54, %v7764_v37 }
  0x9b   : > { %v1109_v1 = vmul.f32 %v7828_v59, %v7739_v24  ;;  %v1110_v2 = vmul.f32 %v7828_v59, %v7754_v33  ;;  %v1111_v4 = vmul.f32 %v7828_v59, %v7752_v32  ;;  %v1107_v6 = vmul.f32 %v7828_v59, %v7764_v37 }
  0x9d   : > { %710 = vrot.lane.b32.xlu0 %v682_v40, %s11620_s20  ;;  %712 = vrot.lane.b32.xlu1 %v683_v41, %s11620_s20  ;;  %v7842_v0 = vpop.permute.xlu1 %1215  ;;  %v7920_v39 = vpop.permute.xlu0 %784 }
  0x9e   : > { %v1223_v3 = vmul.f32 %v7842_v0, %v7741_v25  ;;  %v1225_v7 = vmul.f32 %v7842_v0, %v7754_v33  ;;  %v1224_v9 = vmul.f32 %v7842_v0, %v7739_v24  ;;  %v1226_v12 = vmul.f32 %v7842_v0, %v7752_v32 }
  0x9f   : > { %v1222_v15 = vmul.f32 %v7842_v0, %v7764_v37 }
  0xa1   : > { %817 = vrot.lane.b32.xlu0 %v788_v43, %s7595_s21  ;;  %714 = vrot.lane.b32.xlu1 %v684_v44, %s11620_s20 }
  0xa2   : > { %v7856_v5 = vpop.permute.xlu1 %1330  ;;  %v7932_v44 = vpop.permute.xlu0 %994 }
  0xa3   : > { %11661 = vst [vmem:[#allocation11_spill] sm:$0xff] %v7856_v5  ;;  %v1338_v8 = vmul.f32 %v7856_v5, %v7741_v25  ;;  %v1340_v13 = vmul.f32 %v7856_v5, %v7754_v33  ;;  %v1337_v16 = vmul.f32 %v7856_v5, %v7764_v37  ;;  %v1339_v20 = vmul.f32 %v7856_v5, %v7739_v24 }
  0xa4   : > { %v1341_v21 = vmul.f32 %v7856_v5, %v7752_v32 }
  0xa5   : > { %821 = vrot.lane.b32.xlu0 %v790_v45, %s7595_s21  ;;  %718 = vrot.lane.b32.xlu1 %v686_v46, %s11620_s20  ;;  %v582_v45 = vmul.f32 %v7745_v28, %v7721_v10  ;;  %v583_v46 = vmul.f32 %v7745_v28, %v7723_v11  ;;  %v797_v28 = vmul.f32 %v7920_v39, %v7754_v33 }
  0xa7   : > { %v7876_v14 = vpop.permute.xlu1 %574 }
  0xa8   : > { %v585_v17 = vmul.f32 %v7876_v14, %v7741_v25  ;;  %v586_v22 = vmul.f32 %v7876_v14, %v7739_v24  ;;  %v587_v26 = vmul.f32 %v7876_v14, %v7754_v33  ;;  %v588_v27 = vmul.f32 %v7876_v14, %v7752_v32 }
  0xa9   : > { %815 = vrot.lane.b32.xlu0 %v787_v48, %s7595_s21  ;;  %819 = vrot.lane.b32.xlu1 %v789_v49, %s7595_s21  ;;  %v584_v31 = vmul.f32 %v7876_v14, %v7764_v37  ;;  %v795_v48 = vmul.f32 %v7920_v39, %v7741_v25  ;;  %v796_v49 = vmul.f32 %v7920_v39, %v7739_v24 }
  0xac   : > { %v7886_v18 = vpop.permute.xlu1 %679 }
  0xad   : > { %922 = vrot.lane.b32.xlu0 %v893_v50, %s7596_s22  ;;  %823 = vrot.lane.b32.xlu1 %v791_v51, %s7595_s21  ;;  %v690_v29 = vmul.f32 %v7886_v18, %v7741_v25  ;;  %v691_v34 = vmul.f32 %v7886_v18, %v7739_v24  ;;  %v692_v35 = vmul.f32 %v7886_v18, %v7754_v33  ;;  %v7946_v51 = vpop.permute.xlu0 %497 }
  0xae   : > { %v693_v40 = vmul.f32 %v7886_v18, %v7752_v32  ;;  %v689_v41 = vmul.f32 %v7886_v18, %v7764_v37  ;;  %11666 = vst [vmem:[#allocation16_spill] sm:$0xff] %v7946_v51 }
  0xb1   : > { %926 = vrot.lane.b32.xlu0 %v895_v52, %s7596_s22  ;;  %924 = vrot.lane.b32.xlu1 %v894_v53, %s7596_s22  ;;  %v7896_v23 = vpop.permute.xlu1 %889  ;;  %v798_v52 = vmul.f32 %v7920_v39, %v7752_v32 }
  0xb5   : > { %920 = vrot.lane.b32.xlu0 %v892_v55, %s7596_s22  ;;  %928 = vrot.lane.b32.xlu1 %v896_v56, %s7596_s22  ;;  %v7958_v55 = vpop.permute.xlu0 %502  ;;  %v794_v56 = vmul.f32 %v7920_v39, %v7764_v37 }
  0xb6   : > { %v7908_v30 = vpop.permute.xlu1 %1099  ;;  %11668 = vst [vmem:[#allocation18_spill] sm:$0xff] %v7958_v55 }
  0xb7   : > { %11662 = vst [vmem:[#allocation12_spill] sm:$0xff] %v7908_v30 }
  0xb9   : > { %1027 = vrot.lane.b32.xlu0 %v998_v57, %s11618_s23  ;;  %1029 = vrot.lane.b32.xlu1 %v999_v58, %s11618_s23  ;;  %v687_v57 = vmul.f32 %v7762_v36, %v7721_v10 }
  0xbb   : > { %v7918_v38 = vpop.permute.xlu1 %1219 }
  0xbc   : > { %11663 = vst [vmem:[#allocation13_spill] sm:$0xff] %v7918_v38 }
  0xbd   : > { %1031 = vrot.lane.b32.xlu0 %v1000_v60, %s11618_s23  ;;  %1033 = vrot.lane.b32.xlu1 %v1001_v61, %s11618_s23  ;;  %v688_v61 = vmul.f32 %v7762_v36, %v7723_v11 }
  0xc0   : > { %v7930_v43 = vpop.permute.xlu1 %1334 }
  0xc1   : > { %1025 = vrot.lane.b32.xlu0 %v997_v63, %s11618_s23  ;;  %1141 = vrot.lane.b32.xlu1 %v1108_v62, %s11622_s24  ;;  %11664 = vst [vmem:[#allocation14_spill] sm:$0xff] %v7930_v43  ;;  %v900_v62 = vmul.f32 %v7896_v23, %v7741_v25  ;;  %v1347_v55 = vmul.f32 %v7930_v43, %v7739_v24 }
  0xc5   : > { %1143 = vrot.lane.b32.xlu0 %v1109_v1, %s11622_s24  ;;  %1145 = vrot.lane.b32.xlu1 %v1110_v2, %s11622_s24  ;;  %v7944_v50 = vpop.permute.xlu1 %1448  ;;  %v901_v2 = vmul.f32 %v7896_v23, %v7739_v24 }
  0xc6   : > { %11665 = vst [vmem:[#allocation15_spill] sm:$0xff] %v7944_v50 }
  0xc9   : > { %1147 = vrot.lane.b32.xlu0 %v1111_v4, %s11622_s24  ;;  %1256 = vrot.lane.b32.xlu1 %v1223_v3, %s7599_s25  ;;  %v7956_v53 = vpop.permute.xlu1 %1474  ;;  %v902_v3 = vmul.f32 %v7896_v23, %v7754_v33 }
  0xca   : > { %11667 = vst [vmem:[#allocation17_spill] sm:$0xff] %v7956_v53 }
  0xcd   : > { %1139 = vrot.lane.b32.xlu0 %v1107_v6, %s11622_s24  ;;  %1260 = vrot.lane.b32.xlu1 %v1225_v7, %s7599_s25  ;;  %v903_v6 = vmul.f32 %v7896_v23, %v7752_v32  ;;  %v899_v7 = vmul.f32 %v7896_v23, %v7764_v37 }
  0xd1   : > { %1258 = vrot.lane.b32.xlu0 %v1224_v9, %s7599_s25  ;;  %1371 = vrot.lane.b32.xlu1 %v1338_v8, %s7600_s26 }
  0xd5   : > { %1262 = vrot.lane.b32.xlu0 %v1226_v12, %s7599_s25  ;;  %1375 = vrot.lane.b32.xlu1 %v1340_v13, %s7600_s26  ;;  %v792_v12 = vmul.f32 %v7778_v42, %v7721_v10  ;;  %v793_v13 = vmul.f32 %v7778_v42, %v7723_v11 }
  0xd9   : > { %1254 = vrot.lane.b32.xlu0 %v1222_v15, %s7599_s25  ;;  %1369 = vrot.lane.b32.xlu1 %v1337_v16, %s7600_s26 }
  0xdd   : > { %1373 = vrot.lane.b32.xlu0 %v1339_v20, %s7600_s26  ;;  %621 = vrot.lane.b32.xlu1 %v585_v17, %s11623_s17  ;;  %v1005_v17 = vmul.f32 %v7932_v44, %v7741_v25  ;;  %v1006_v20 = vmul.f32 %v7932_v44, %v7739_v24 }
  0xe1   : > { %1377 = vrot.lane.b32.xlu0 %v1341_v21, %s7600_s26  ;;  %623 = vrot.lane.b32.xlu1 %v586_v22, %s11623_s17  ;;  %v1007_v22 = vmul.f32 %v7932_v44, %v7754_v33 }
  0xe5   : > { %625 = vrot.lane.b32.xlu0 %v587_v26, %s11623_s17  ;;  %627 = vrot.lane.b32.xlu1 %v588_v27, %s11623_s17  ;;  %v1008_v26 = vmul.f32 %v7932_v44, %v7752_v32 }
  0xe9   : > { %619 = vrot.lane.b32.xlu0 %v584_v31, %s11623_s17  ;;  %726 = vrot.lane.b32.xlu1 %v690_v29, %s11620_s20  ;;  %v1004_v31 = vmul.f32 %v7932_v44, %v7764_v37 }
  0xed   : > { %728 = vrot.lane.b32.xlu0 %v691_v34, %s11620_s20  ;;  %730 = vrot.lane.b32.xlu1 %v692_v35, %s11620_s20  ;;  %v897_v34 = vmul.f32 %v7794_v47, %v7721_v10 }
  0xf1   : > { %732 = vrot.lane.b32.xlu0 %v693_v40, %s11620_s20  ;;  %724 = vrot.lane.b32.xlu1 %v689_v41, %s11620_s20  ;;  %v898_v41 = vmul.f32 %v7794_v47, %v7723_v11  ;;  %v1445_v47 = vld [vmem:[%s11600_s5 + $0x8] sm:$0xff] }
  0xf5   : > { %615 = vrot.lane.b32.xlu0 %v582_v45, %s11623_s17  ;;  %617 = vrot.lane.b32.xlu1 %v583_v46, %s11623_s17  ;;  %v1116_v45 = vmul.f32 %v7908_v30, %v7741_v25 }
  0xf9   : > { %831 = vrot.lane.b32.xlu0 %v795_v48, %s7595_s21  ;;  %833 = vrot.lane.b32.xlu1 %v796_v49, %s7595_s21  ;;  %v1117_v49 = vmul.f32 %v7908_v30, %v7739_v24 }
  0xfd   : > { %835 = vrot.lane.b32.xlu0 %v797_v28, %s7595_s21  ;;  %837 = vrot.lane.b32.xlu1 %v798_v52, %s7595_s21  ;;  %v1118_v28 = vmul.f32 %v7908_v30, %v7754_v33 }
 0x101   : > { %829 = vrot.lane.b32.xlu0 %v794_v56, %s7595_s21  ;;  %720 = vrot.lane.b32.xlu1 %v687_v57, %s11620_s20  ;;  %v1119_v57 = vmul.f32 %v7908_v30, %v7752_v32 }
 0x103   : > { %v7966_v58 = vpop.permute.xlu0 %609  ;;  %v7968_v60 = vpop.permute.xlu1 %607 }
 0x105   : > { %722 = vrot.lane.b32.xlu0 %v688_v61, %s11620_s20  ;;  %936 = vrot.lane.b32.xlu1 %v900_v62, %s7596_s22 }
 0x107   : > { %v7976_v63 = vpop.permute.xlu0 %613  ;;  %v7978_v1 = vpop.permute.xlu1 %611 }
 0x108   : > { %11669 = vst [vmem:[#allocation19_spill] sm:$0xff] %v7976_v63  ;;  %v636_v19 = vsel %vm633_vm0, %v7966_v58, %v7978_v1 }
 0x109   : > { %938 = vrot.lane.b32.xlu0 %v901_v2, %s7596_s22  ;;  %940 = vrot.lane.b32.xlu1 %v902_v3, %s7596_s22  ;;  %v1115_v2 = vmul.f32 %v7908_v30, %v7764_v37  ;;  %v1002_v3 = vmul.f32 %v7814_v54, %v7721_v10 }
 0x10b   : > { %v7986_v36 = vpop.permute.xlu0 %716  ;;  %v7988_v4 = vpop.permute.xlu1 %605 }
 0x10d   : > { %942 = vrot.lane.b32.xlu0 %v903_v6, %s7596_s22  ;;  %934 = vrot.lane.b32.xlu1 %v899_v7, %s7596_s22 }
 0x10f   : > { %v7996_v8 = vpop.permute.xlu0 %710  ;;  %v7998_v9 = vpop.permute.xlu1 %712 }
 0x111   : > { %825 = vrot.lane.b32.xlu0 %v792_v12, %s7595_s21  ;;  %827 = vrot.lane.b32.xlu1 %v793_v13, %s7595_s21  ;;  %v1003_v12 = vmul.f32 %v7814_v54, %v7723_v11  ;;  %v1231_v13 = vmul.f32 %v7918_v38, %v7741_v25  ;;  %v1471_v54 = vld [vmem:[%s11601_s6 + $0x8] sm:$0xff] }
 0x113   : > { %v8006_v15 = vpop.permute.xlu0 %817  ;;  %v8008_v16 = vpop.permute.xlu1 %714 }
 0x115   : > { %1041 = vrot.lane.b32.xlu0 %v1005_v17, %s11618_s23  ;;  %1043 = vrot.lane.b32.xlu1 %v1006_v20, %s11618_s23 }
 0x117   : > { %v8016_v21 = vpop.permute.xlu0 %821  ;;  %v8018_v42 = vpop.permute.xlu1 %718 }
 0x119   : > { %1045 = vrot.lane.b32.xlu0 %v1007_v22, %s11618_s23  ;;  %1047 = vrot.lane.b32.xlu1 %v1008_v26, %s11618_s23  ;;  %v1232_v22 = vmul.f32 %v7918_v38, %v7739_v24  ;;  %v1233_v26 = vmul.f32 %v7918_v38, %v7754_v33 }
 0x11b   : > { %v8026_v27 = vpop.permute.xlu0 %815  ;;  %v8028_v29 = vpop.permute.xlu1 %819 }
 0x11d   : > { %1039 = vrot.lane.b32.xlu0 %v1004_v31, %s11618_s23  ;;  %930 = vrot.lane.b32.xlu1 %v897_v34, %s7596_s22 }
 0x11f   : > { %v8036_v35 = vpop.permute.xlu0 %922  ;;  %v8038_v40 = vpop.permute.xlu1 %823 }
 0x121   : > { %932 = vrot.lane.b32.xlu0 %v898_v41, %s7596_s22  ;;  %1157 = vrot.lane.b32.xlu1 %v1116_v45, %s11622_s24  ;;  %v1234_v41 = vmul.f32 %v7918_v38, %v7752_v32 }
 0x123   : > { %v8046_v46 = vpop.permute.xlu0 %926  ;;  %v8048_v48 = vpop.permute.xlu1 %924 }
 0x125   : > { %1159 = vrot.lane.b32.xlu0 %v1117_v49, %s11622_s24  ;;  %1161 = vrot.lane.b32.xlu1 %v1118_v28, %s11622_s24  ;;  %v1230_v28 = vmul.f32 %v7918_v38, %v7764_v37 }
 0x127   : > { %v8059_v52 = vpop.permute.xlu0 %920  ;;  %v8061_v56 = vpop.permute.xlu1 %928 }
 0x129   : > { %1163 = vrot.lane.b32.xlu0 %v1119_v57, %s11622_s24  ;;  %1453 = vperm.xlu1 %7525, %v1445_v47   ;;  %v1112_v47 = vmul.f32 %v7828_v59, %v7721_v10  ;;  %v1113_v57 = vmul.f32 %v7828_v59, %v7723_v11 }
 0x12b   : > { %v8066_v61 = vpop.permute.xlu0 %1027  ;;  %v8068_v62 = vpop.permute.xlu1 %1029 }
 0x12d   : > { %1155 = vrot.lane.b32.xlu0 %v1115_v2, %s11622_s24  ;;  %1035 = vrot.lane.b32.xlu1 %v1002_v3, %s11618_s23  ;;  %v8120_v2 = vmul.f32 %v7842_v0, %v7721_v10  ;;  %v542_v3 = vmul.f32 %v7741_v25, %v7946_v51 }
 0x12f   : > { %v8076_v6 = vpop.permute.xlu0 %1031  ;;  %v8078_v7 = vpop.permute.xlu1 %1033 }
 0x131   : > { %1037 = vrot.lane.b32.xlu0 %v1003_v12, %s11618_s23  ;;  %1272 = vrot.lane.b32.xlu1 %v1231_v13, %s7599_s25  ;;  %v635_v12 = vsel %vm633_vm0, %v7968_v60, %v7966_v58  ;;  %v543_v13 = vmul.f32 %v7739_v24, %v7946_v51  ;;  %v1348_v58 = vmul.f32 %v7930_v43, %v7754_v33 }
 0x133   : > { %v8086_v17 = vpop.permute.xlu0 %1025  ;;  %v8088_v20 = vpop.permute.xlu1 %1141 }
 0x135   : > { %1274 = vrot.lane.b32.xlu0 %v1232_v22, %s7599_s25  ;;  %1276 = vrot.lane.b32.xlu1 %v1233_v26, %s7599_s25  ;;  %v634_v22 = vsel %vm633_vm0, %v7988_v4, %v7968_v60  ;;  %v544_v26 = vmul.f32 %v7754_v33, %v7946_v51  ;;  %v637_v60 = vsel %vm633_vm0, %v7978_v1, %v7976_v63 }
 0x136   : > { %v739_v4 = vsel %vm738_vm1, %v7996_v8, %v7998_v9  ;;  %v741_v1 = vsel %vm738_vm1, %v8008_v16, %v7986_v36  ;;  %v742_v8 = vsel %vm738_vm1, %v7986_v36, %v8018_v42  ;;  %v846_v36 = vsel %vm843_vm2, %v8028_v29, %v8016_v21 }
 0x137   : > { %v8099_v31 = vpop.permute.xlu0 %1143  ;;  %v8101_v34 = vpop.permute.xlu1 %1145 }
 0x139   : > { %1278 = vrot.lane.b32.xlu0 %v1234_v41, %s7599_s25  ;;  %1479 = vperm.xlu1 %7525, %v1471_v54   ;;  %v541_v54 = vmul.f32 %v7764_v37, %v7946_v51  ;;  %v740_v51 = vsel %vm738_vm1, %v7998_v9, %v8008_v16  ;;  %v844_v9 = vsel %vm843_vm2, %v8026_v27, %v8006_v15 }
 0x13a   : > { %v845_v16 = vsel %vm843_vm2, %v8006_v15, %v8028_v29  ;;  %v847_v27 = vsel %vm843_vm2, %v8016_v21, %v8038_v40  ;;  %v950_v15 = vsel %vm948_vm3, %v8036_v35, %v8048_v48  ;;  %v951_v21 = vsel %vm948_vm3, %v8048_v48, %v8046_v46 }
 0x13b   : > { %v8106_v45 = vpop.permute.xlu0 %1147  ;;  %v8108_v49 = vpop.permute.xlu1 %1256  ;;  %v660_v59 = vadd.f32 %v634_v22, %v541_v54  ;;  %v1054_v29 = vsel %vm1053_vm4, %v8086_v17, %v8066_v61  ;;  %v1055_v48 = vsel %vm1053_vm4, %v8066_v61, %v8068_v62  ;;  %v1056_v17 = vsel %vm1053_vm4, %v8068_v62, %v8076_v6 }
 0x13c   : > { %11670 = vst [vmem:[#allocation20_spill] sm:$0xff] %v8106_v45  ;;  %v1174_v61 = vsel %vm1171_vm5, %v8099_v31, %v8101_v34  ;;  %v1228_v62 = vmul.f32 %v7842_v0, %v7723_v11 }
 0x13d   : > { %1270 = vrot.lane.b32.xlu0 %v1230_v28, %s7599_s25  ;;  %1149 = vrot.lane.b32.xlu1 %v1112_v47, %s11622_s24  ;;  %v1346_v47 = vmul.f32 %v7930_v43, %v7741_v25  ;;  %v661_v25 = vadd.f32 %v635_v12, %v542_v3  ;;  %v662_v3 = vadd.f32 %v636_v19, %v543_v13 }
 0x13e   : > { %v663_v12 = vadd.f32 %v637_v60, %v544_v26  ;;  %v765_v22 = vadd.f32 %v739_v4, %v660_v59  ;;  %v949_v19 = vsel %vm948_vm3, %v8059_v52, %v8036_v35  ;;  %v1345_v52 = vmul.f32 %v7930_v43, %v7764_v37 }
 0x13f   : > { %v1140_v41 = vpop.permute.xlu0 %1139  ;;  %v8136_v28 = vpop.permute.xlu1 %1260  ;;  %v766_v54 = vadd.f32 %v740_v51, %v661_v25  ;;  %v767_v59 = vadd.f32 %v741_v1, %v662_v3  ;;  %v952_v35 = vsel %vm948_vm3, %v8046_v46, %v8061_v56  ;;  %v1173_v46 = vsel %vm1171_vm5, %v8088_v20, %v8099_v31 }
 0x140   : > { %v768_v25 = vadd.f32 %v742_v8, %v663_v12  ;;  %v870_v51 = vadd.f32 %v844_v9, %v765_v22  ;;  %v1172_v1 = vsel %vm1171_vm5, %v1140_v41, %v8088_v20 }
 0x141   : > { %1151 = vrot.lane.b32.xlu0 %v1113_v57, %s11622_s24  ;;  %1387 = vrot.lane.b32.xlu1 %v1346_v47, %s7600_s26  ;;  %v1349_v57 = vmul.f32 %v7930_v43, %v7752_v32  ;;  %v871_v13 = vadd.f32 %v845_v16, %v766_v54  ;;  %v872_v26 = vadd.f32 %v846_v36, %v767_v59 }
 0x142   : > { %v975_v60 = vadd.f32 %v949_v19, %v870_v51  ;;  %v1057_v36 = vsel %vm1053_vm4, %v8076_v6, %v8078_v7  ;;  %v1175_v6 = vsel %vm1171_vm5, %v8101_v34, %v8106_v45 }
 0x143   : > { %v1259_v47 = vpop.permute.xlu0 %1258  ;;  %v1372_v63 = vpop.permute.xlu1 %1371  ;;  %v976_v8 = vadd.f32 %v950_v15, %v871_v13  ;;  %v977_v9 = vadd.f32 %v951_v21, %v872_v26 }
 0x144   : > { %v1080_v3 = vadd.f32 %v1054_v29, %v975_v60  ;;  %v1288_v20 = vsel %vm1286_vm6, %v8108_v49, %v1259_v47  ;;  %v1289_v31 = vsel %vm1286_vm6, %v1259_v47, %v8136_v28  ;;  %v1342_v47 = vmul.f32 %v7856_v5, %v7721_v10 }
 0x145   : > { %1389 = vrot.lane.b32.xlu0 %v1347_v55, %s7600_s26  ;;  %1391 = vrot.lane.b32.xlu1 %v1348_v58, %s7600_s26  ;;  %v873_v55 = vadd.f32 %v847_v27, %v768_v25  ;;  %v1081_v12 = vadd.f32 %v1055_v48, %v976_v8  ;;  %v1082_v22 = vadd.f32 %v1056_v17, %v977_v9 }
 0x146   : > { %v1200_v54 = vadd.f32 %v1172_v1, %v1080_v3 }
 0x147   : > { %v8194_v4 = vpop.permute.xlu0 %1262  ;;  %v1376_v58 = vpop.permute.xlu1 %1375  ;;  %v978_v41 = vadd.f32 %v952_v35, %v873_v55  ;;  %v1201_v19 = vadd.f32 %v1173_v46, %v1081_v12  ;;  %v1202_v59 = vadd.f32 %v1174_v61, %v1082_v22 }
 0x148   : > { %11671 = vst [vmem:[#allocation21_spill] sm:$0xff] %v8194_v4  ;;  %v1290_v26 = vsel %vm1286_vm6, %v8136_v28, %v8194_v4 }
 0x149   : > { %1393 = vrot.lane.b32.xlu0 %v1349_v57, %s7600_s26  ;;  %1385 = vrot.lane.b32.xlu1 %v1345_v52, %s7600_s26  ;;  %v1083_v15 = vadd.f32 %v1057_v36, %v978_v41  ;;  %v1316_v21 = vadd.f32 %v1288_v20, %v1201_v19  ;;  %v1317_v29 = vadd.f32 %v1289_v31, %v1202_v59 }
 0x14a   : > { %v589_v59 = vmul.f32 %v7876_v14, %v7721_v10 }
 0x14b   : > { %v1255_v16 = vpop.permute.xlu0 %1254  ;;  %v1370_v57 = vpop.permute.xlu1 %1369  ;;  %v1203_v60 = vadd.f32 %v1175_v6, %v1083_v15 }
 0x14c   : > { %v1287_v27 = vsel %vm1286_vm6, %v1255_v16, %v8108_v49  ;;  %v1402_v51 = vsel %vm1401_vm7, %v1370_v57, %v1372_v63  ;;  %v1343_v49 = vmul.f32 %v7856_v5, %v7723_v11 }
 0x14d   : > { %v1315_v25 = vadd.f32 %v1287_v27, %v1200_v54  ;;  %1264 = vrot.lane.b32.xlu0 %v8120_v2, %s7599_s25  ;;  %1266 = vrot.lane.b32.xlu1 %v1228_v62, %s7599_s25  ;;  %v1318_v17 = vadd.f32 %v1290_v26, %v1203_v60 }
 0x14f   : > { %v1430_v52 = vadd.f32 %v1402_v51, %v1315_v25  ;;  %v1374_v13 = vpop.permute.xlu0 %1373  ;;  %v8237_v2 = vpop.permute.xlu1 %621 }
 0x150   : > { %v1403_v34 = vsel %vm1401_vm7, %v1372_v63, %v1374_v13  ;;  %v1404_v55 = vsel %vm1401_vm7, %v1374_v13, %v1376_v58 }
 0x151   : > { %v1431_v35 = vadd.f32 %v1403_v34, %v1316_v21  ;;  %v1432_v48 = vadd.f32 %v1404_v55, %v1317_v29  ;;  %1379 = vrot.lane.b32.xlu0 %v1342_v47, %s7600_s26  ;;  %1381 = vrot.lane.b32.xlu1 %v1343_v49, %s7600_s26  ;;  %v1456_v1 = vmul.f32 %v7944_v50, %v1430_v52 }
 0x152   : > { %v694_v47 = vmul.f32 %v7886_v18, %v7721_v10  ;;  %v590_v49 = vmul.f32 %v7876_v14, %v7723_v11  ;;  %v799_v29 = vmul.f32 %v7920_v39, %v7721_v10  ;;  %v695_v52 = vmul.f32 %v7886_v18, %v7723_v11 }
 0x153   : > { %v1457_v8 = vmul.f32 %v7944_v50, %v1431_v35  ;;  %v1458_v9 = vmul.f32 %v7944_v50, %v1432_v48  ;;  %v8249_v3 = vpop.permute.xlu0 %1377  ;;  %v8251_v28 = vpop.permute.xlu1 %623  ;;  %v8262_v41 = vadd.f32 %v7956_v53, %v1456_v1  ;;  %v904_v14 = vmul.f32 %v7896_v23, %v7721_v10 }
 0x154   : > { %11672 = vst [vmem:[#allocation22_spill] sm:$0xff] %v8249_v3  ;;  %v1405_v63 = vsel %vm1401_vm7, %v1376_v58, %v8249_v3  ;;  %v800_v34 = vmul.f32 %v7920_v39, %v7723_v11  ;;  %v1009_v18 = vmul.f32 %v7932_v44, %v7721_v10  ;;  %v905_v35 = vmul.f32 %v7896_v23, %v7723_v11 }
 0x155   : > { %v8256_v46 = vadd.f32 %v7956_v53, %v1457_v8  ;;  %v8259_v61 = vadd.f32 %v7956_v53, %v1458_v9  ;;  %v1433_v62 = vadd.f32 %v1405_v63, %v1318_v17  ;;  %11675 = vst [vmem:[#allocation25_spill] sm:$0xff] %v8262_v41  ;;  %v11626_v20 = vmax.f32 %v8262_v41, 0.0  ;;  %v1694_v41 = vld [vmem:[%s11607_s12 + $0xa0] sm:$0xff] }
 0x156   : > { %v1120_v39 = vmul.f32 %v7908_v30, %v7721_v10  ;;  %v1010_v1 = vmul.f32 %v7932_v44, %v7723_v11  ;;  %v1235_v23 = vmul.f32 %v7918_v38, %v7721_v10  ;;  %v1121_v63 = vmul.f32 %v7908_v30, %v7723_v11  ;;  %v11678_v44 = vld [vmem:[#allocation10_spill] sm:$0xff] }
 0x157   : > { %11673 = vst [vmem:[#allocation23_spill] sm:$0xff] %v8256_v46  ;;  %11674 = vst [vmem:[#allocation24_spill] sm:$0xff] %v8259_v61  ;;  %v11628_v12 = vmax.f32 %v8256_v46, 0.0  ;;  %v11627_v22 = vmax.f32 %v8259_v61, 0.0  ;;  %v1459_v54 = vmul.f32 %v7944_v50, %v1433_v62  ;;  %v8267_v16 = vpop.permute.xlu0 %625  ;;  %v8269_v57 = vpop.permute.xlu1 %627  ;;  %v1697_v61 = vld [vmem:[%s11607_s12 + $0xb8] sm:$0xff] }
 0x159   : > { %v8272_v58 = vadd.f32 %v7956_v53, %v1459_v54  ;;  %v7526_v36 = vpack.i.bf16 %v11627_v22, %v11628_v12  ;;  %v1676_v22 = vld [vmem:[%s11607_s12 + $0x10] sm:$0xff]  ;;  %v1679_v12 = vld [vmem:[%s11607_s12 + $0x28] sm:$0xff]  ;;  %v1741_v53 = vld [vmem:[%s11607_s12 + $0x218] sm:$0xff] }
 0x15b   : > { %11676 = vst [vmem:[#allocation26_spill] sm:$0xff] %v8272_v58  ;;  %v11625_v31 = vmax.f32 %v8272_v58, 0.0  ;;  %v8280_v27 = vpop.permute.xlu0 %619  ;;  %7527 = vrot.lane.b32.xlu0 %v7526_v36, %s7595_s21  ;;  %v8283_v19 = vpop.permute.xlu1 %726  ;;  %v11679_v36 = vld [vmem:[#allocation7_spill] sm:$0xff] }
 0x15d   : > { %v7531_v25 = vpack.i.bf16 %v11626_v20, %v11625_v31  ;;  %v1689_v31 = vld [vmem:[%s11607_s12 + $0x78] sm:$0xff] }
 0x15f   : > { %v8291_v6 = vpop.permute.xlu0 %728  ;;  %629 = vrot.lane.b32.xlu0 %v589_v59, %s11623_s17  ;;  %v8294_v51 = vpop.permute.xlu1 %730  ;;  %7532 = vrot.lane.b32.xlu1 %v7531_v25, %s7595_s21  ;;  %v1114_v59 = vmul.f32 %v11679_v36, %v11678_v44  ;;  %v1236_v25 = vmul.f32 %v7918_v38, %v7723_v11 }
 0x163   : > { %v8301_v15 = vpop.permute.xlu0 %732  ;;  %734 = vrot.lane.b32.xlu0 %v694_v47, %s11620_s20  ;;  %v8304_v21 = vpop.permute.xlu1 %724  ;;  %631 = vrot.lane.b32.xlu1 %v590_v49, %s11623_s17  ;;  %s11715_s17 = smov 126  }
 0x167   : > { %v8311_v13 = vpop.permute.xlu0 %615  ;;  %839 = vrot.lane.b32.xlu0 %v799_v29, %s7595_s21  ;;  %v8314_v26 = vpop.permute.xlu1 %617  ;;  %736 = vrot.lane.b32.xlu1 %v695_v52, %s11620_s20  ;;  %v1675_v29 = vld [vmem:[%s11607_s12 + $0x8] sm:$0xff]  ;;  %v1678_v52 = vld [vmem:[%s11607_s12 + $0x20] sm:$0xff]  ;;  %s7607_s20 = smov 94  }
 0x168   : > { %11677 = vst [vmem:[#allocation27_spill] sm:$0xff] %v8314_v26 }
 0x16b   : > { %v8321_v55 = vpop.permute.xlu0 %831  ;;  %944 = vrot.lane.b32.xlu0 %v904_v14, %s7596_s22  ;;  %v8324_v60 = vpop.permute.xlu1 %833  ;;  %841 = vrot.lane.b32.xlu1 %v800_v34, %s7595_s21  ;;  %v1674_v14 = vld [vmem:[%s11607_s12] sm:$0xff]  ;;  %v1351_v34 = vmul.f32 %v7930_v43, %v7723_v11  ;;  %v1685_v11 = vld [vmem:[%s11607_s12 + $0x58] sm:$0xff] }
 0x16f   : > { %v8331_v48 = vpop.permute.xlu0 %835  ;;  %1049 = vrot.lane.b32.xlu0 %v1009_v18, %s11618_s23  ;;  %v8334_v17 = vpop.permute.xlu1 %837  ;;  %946 = vrot.lane.b32.xlu1 %v905_v35, %s7596_s22  ;;  %v1350_v18 = vmul.f32 %v7930_v43, %v7721_v10  ;;  %v6808_v35 = vpack.c.bf16 %v1678_v52, %v1675_v29  ;;  %v1687_v52 = vld [vmem:[%s11607_s12 + $0x68] sm:$0xff]  ;;  %v1704_v43 = vld [vmem:[%s11607_s12 + $0xf0] sm:$0xff]  ;;  %s6180_s22 = sshll.u32 %s11719_s19, 4 }
 0x171   : > { %6809 = vmatprep.subr.bf16.mxu0 %v6808_v35  ;;  %v1696_v35 = vld [vmem:[%s11607_s12 + $0xb0] sm:$0xff] }
 0x173   : > { %v8341_v8 = vpop.permute.xlu0 %829  ;;  %1165 = vrot.lane.b32.xlu0 %v1120_v39, %s11622_s24  ;;  %v8344_v9 = vpop.permute.xlu1 %720  ;;  %1051 = vrot.lane.b32.xlu1 %v1010_v1, %s11618_s23  ;;  %v1677_v39 = vld [vmem:[%s11607_s12 + $0x18] sm:$0xff]  ;;  %s7617_s23 = smov 121  }
 0x174   : > { %v1681_v1 = vld [vmem:[%s11607_s12 + $0x38] sm:$0xff] }
 0x177   : > { %v8351_v62 = vpop.permute.xlu0 %722  ;;  %1280 = vrot.lane.b32.xlu0 %v1235_v23, %s7599_s25  ;;  %v8354_v54 = vpop.permute.xlu1 %936  ;;  %1167 = vrot.lane.b32.xlu1 %v1121_v63, %s11622_s24  ;;  %v1684_v23 = vld [vmem:[%s11607_s12 + $0x50] sm:$0xff]  ;;  %v6810_v63 = vpack.c.bf16 %v1677_v39, %v1674_v14  ;;  %v1690_v14 = vld [vmem:[%s11607_s12 + $0x80] sm:$0xff] }
 0x178   : > { %v6812_v44 = vpack.c.bf16 %v1684_v23, %v1681_v1  ;;  %v1229_v1 = vmul.f32 %v7842_v0, %v11679_v36  ;;  %v1693_v0 = vld [vmem:[%s11607_s12 + $0x98] sm:$0xff] }
 0x179   : > { %6811 = vmatpush1.bf16.msra.mxu0 %v6810_v63 }
 0x17a   : > { %6813 = vmatprep.subr.bf16.mxu0 %v6812_v44 }
 0x17b   : > { %v8361_v47 = vpop.permute.xlu0 %938  ;;  %1153 = vrot.lane.b32.xlu0 %v1114_v59, %s11622_s24  ;;  %v8364_v49 = vpop.permute.xlu1 %940  ;;  %1282 = vrot.lane.b32.xlu1 %v1236_v25, %s7599_s25  ;;  %v1680_v59 = vld [vmem:[%s11607_s12 + $0x30] sm:$0xff]  ;;  %v1683_v25 = vld [vmem:[%s11607_s12 + $0x48] sm:$0xff]  ;;  %s7604_s24 = smov 111  }
 0x17c   : > { %v6814_v23 = vpack.c.bf16 %v1683_v25, %v1680_v59  ;;  %v6820_v59 = vpack.c.bf16 %v1696_v35, %v1693_v0  ;;  %v1692_v25 = vld [vmem:[%s11607_s12 + $0x90] sm:$0xff]  ;;  %v1698_v0 = vld [vmem:[%s11607_s12 + $0xc0] sm:$0xff] }
 0x17e   : > { %6815 = vmatpush1.bf16.msra.mxu0 %v6814_v23  ;;  %v1724_v23 = vld [vmem:[%s11607_s12 + $0x190] sm:$0xff] }
 0x17f   : > { %v8395_v29 = vpop.permute.xlu0 %942  ;;  %1397 = vrot.lane.b32.xlu0 %v1351_v34, %s7600_s26  ;;  %1395 = vrot.lane.b32.xlu1 %v1350_v18, %s7600_s26  ;;  %v8405_v39 = vpop.permute.xlu1 %934  ;;  %v6816_v34 = vpack.c.bf16 %v1690_v14, %v1687_v52  ;;  %v1686_v18 = vld [vmem:[%s11607_s12 + $0x60] sm:$0xff]  ;;  %v1695_v52 = vld [vmem:[%s11607_s12 + $0xa8] sm:$0xff] }
 0x180   : > { %v6818_v63 = vpack.c.bf16 %v1689_v31, %v1686_v18  ;;  %v1702_v31 = vld [vmem:[%s11607_s12 + $0xe0] sm:$0xff]  ;;  %v6822_v18 = vpack.c.bf16 %v1695_v52, %v1692_v25  ;;  %v7016_v25 = vpack.c.bf16 %v1679_v12, %v1676_v22 }
 0x181   : > { %6817 = vmatprep.subr.bf16.mxu0 %v6816_v34  ;;  %v1727_v34 = vld [vmem:[%s11607_s12 + $0x1a8] sm:$0xff]  ;;  %v1730_v52 = vld [vmem:[%s11607_s12 + $0x1c0] sm:$0xff] }
 0x182   : > { %6819 = vmatpush1.bf16.msra.mxu0 %v6818_v63  ;;  %v7014_v35 = vpack.c.bf16 %v1727_v34, %v1724_v23  ;;  %v1701_v63 = vld [vmem:[%s11607_s12 + $0xd8] sm:$0xff]  ;;  %v1682_v22 = vld [vmem:[%s11607_s12 + $0x40] sm:$0xff] }
 0x183   : > { %v8415_v20 = vpop.permute.xlu0 %825  ;;  %1268 = vrot.lane.b32.xlu1 %v1229_v1, %s7599_s25  ;;  %v8424_v44 = vpop.permute.xlu1 %827  ;;  %v1699_v1 = vld [vmem:[%s11607_s12 + $0xc8] sm:$0xff]  ;;  %6821 = vmatprep.subr.bf16.mxu0 %v6820_v59  ;;  %v1733_v23 = vld [vmem:[%s11607_s12 + $0x1d8] sm:$0xff]  ;;  %v6826_v38 = vpack.c.bf16 %v1701_v63, %v1698_v0  ;;  %v1688_v63 = vld [vmem:[%s11607_s12 + $0x70] sm:$0xff] }
 0x184   : > { %v6824_v58 = vpack.c.bf16 %v1702_v31, %v1699_v1  ;;  %v1705_v59 = vld [vmem:[%s11607_s12 + $0xf8] sm:$0xff]  ;;  %v1708_v1 = vld [vmem:[%s11607_s12 + $0x110] sm:$0xff]  ;;  %7015 = vmatprep.subr.bf16.mxu1 %v7014_v35  ;;  %v7018_v12 = vpack.c.bf16 %v1733_v23, %v1730_v52  ;;  %v7020_v35 = vpack.c.bf16 %v1685_v11, %v1682_v22  ;;  %v1691_v11 = vld [vmem:[%s11607_s12 + $0x88] sm:$0xff] }
 0x185   : > { %7017 = vmatpush3.bf16.msra.mxu1 %v7016_v25  ;;  %v1736_v52 = vld [vmem:[%s11607_s12 + $0x1f0] sm:$0xff]  ;;  %v1739_v25 = vld [vmem:[%s11607_s12 + $0x208] sm:$0xff]  ;;  %v6828_v23 = vpack.c.bf16 %v1708_v1, %v1705_v59  ;;  %v1714_v59 = vld [vmem:[%s11607_s12 + $0x140] sm:$0xff]  ;;  %v7024_v22 = vpack.c.bf16 %v1691_v11, %v1688_v63 }
 0x186   : > { %6823 = vmatpush1.bf16.msra.mxu0 %v6822_v18  ;;  %7019 = vmatprep.subr.bf16.mxu1 %v7018_v12  ;;  %v1707_v18 = vld [vmem:[%s11607_s12 + $0x108] sm:$0xff]  ;;  %v7022_v0 = vpack.c.bf16 %v1739_v25, %v1736_v52  ;;  %v1742_v1 = vld [vmem:[%s11607_s12 + $0x220] sm:$0xff]  ;;  %v1745_v52 = vld [vmem:[%s11607_s12 + $0x238] sm:$0xff] }
 0x187   : > { %v8432_v14 = vpop.permute.xlu0 %1041  ;;  %v8475_v31 = vpop.permute.xlu1 %1043  ;;  %6825 = vmatprep.subr.bf16.mxu0 %v6824_v58  ;;  %v1711_v58 = vld [vmem:[%s11607_s12 + $0x128] sm:$0xff]  ;;  %v6830_v25 = vpack.c.bf16 %v1707_v18, %v1704_v43  ;;  %v7026_v30 = vpack.c.bf16 %v1745_v52, %v1742_v1  ;;  %v1710_v63 = vld [vmem:[%s11607_s12 + $0x120] sm:$0xff]  ;;  %v1717_v18 = vld [vmem:[%s11607_s12 + $0x158] sm:$0xff] }
 0x188   : > { %v1719_v1 = vld [vmem:[%s11607_s12 + $0x168] sm:$0xff] }
 0x189   : > { %7021 = vmatpush3.bf16.msra.mxu1 %v7020_v35  ;;  %v6832_v35 = vpack.c.bf16 %v1714_v59, %v1711_v58  ;;  %v1716_v59 = vld [vmem:[%s11607_s12 + $0x150] sm:$0xff] }
 0x18a   : > { %6827 = vmatpush1.bf16.msra.mxu0 %v6826_v38  ;;  %7023 = vmatprep.subr.bf16.mxu1 %v7022_v0  ;;  %v1713_v38 = vld [vmem:[%s11607_s12 + $0x138] sm:$0xff]  ;;  %v1720_v0 = vld [vmem:[%s11607_s12 + $0x170] sm:$0xff] }
 0x18b   : > { %v8464_v34 = vpop.permute.xlu0 %1045  ;;  %v8518_v46 = vpop.permute.xlu1 %1047  ;;  %6829 = vmatprep.subr.bf16.mxu0 %v6828_v23  ;;  %v7028_v23 = vpack.c.bf16 %v1697_v61, %v1694_v41  ;;  %v6834_v11 = vpack.c.bf16 %v1713_v38, %v1710_v63  ;;  %v6836_v58 = vpack.c.bf16 %v1720_v0, %v1717_v18  ;;  %v6838_v41 = vpack.c.bf16 %v1719_v1, %v1716_v59  ;;  %v1725_v63 = vld [vmem:[%s11607_s12 + $0x198] sm:$0xff]  ;;  %v1732_v0 = vld [vmem:[%s11607_s12 + $0x1d0] sm:$0xff]  ;;  %v1731_v1 = vld [vmem:[%s11607_s12 + $0x1c8] sm:$0xff] }
 0x18c   : > { %v1729_v18 = vld [vmem:[%s11607_s12 + $0x1b8] sm:$0xff]  ;;  %v1728_v59 = vld [vmem:[%s11607_s12 + $0x1b0] sm:$0xff] }
 0x18d   : > { %7025 = vmatpush3.bf16.msra.mxu1 %v7024_v22  ;;  %v1723_v22 = vld [vmem:[%s11607_s12 + $0x188] sm:$0xff] }
 0x18e   : > { %6831 = vmatpush1.bf16.msra.mxu0 %v6830_v25  ;;  %7027 = vmatprep.subr.bf16.mxu1 %v7026_v30  ;;  %v1726_v30 = vld [vmem:[%s11607_s12 + $0x1a0] sm:$0xff] }
 0x18f   : > { %v8498_v12 = vpop.permute.xlu0 %1039  ;;  %6833 = vmatprep.subr.bf16.mxu0 %v6832_v35  ;;  %v8548_v61 = vpop.permute.xlu1 %930  ;;  %v6840_v25 = vpack.c.bf16 %v1726_v30, %v1723_v22  ;;  %v1722_v35 = vld [vmem:[%s11607_s12 + $0x180] sm:$0xff]  ;;  %v1735_v30 = vld [vmem:[%s11607_s12 + $0x1e8] sm:$0xff] }
 0x191   : > { %7029 = vmatpush3.bf16.msra.mxu1 %v7028_v23  ;;  %v6842_v23 = vpack.c.bf16 %v1725_v63, %v1722_v35  ;;  %v1734_v63 = vld [vmem:[%s11607_s12 + $0x1e0] sm:$0xff] }
 0x192   : > { %6835 = vmatpush1.bf16.msra.mxu0 %v6834_v11 }
 0x193   : > { %v8526_v43 = vpop.permute.xlu0 %932  ;;  %6837 = vmatprep.subr.bf16.mxu0 %v6836_v58  ;;  %v8564_v11 = vpop.permute.xlu1 %1157  ;;  %v6844_v58 = vpack.c.bf16 %v1732_v0, %v1729_v18  ;;  %v1737_v18 = vld [vmem:[%s11607_s12 + $0x1f8] sm:$0xff] }
 0x196   : > { %6839 = vmatpush1.bf16.msra.mxu0 %v6838_v41  ;;  %v1738_v41 = vld [vmem:[%s11607_s12 + $0x200] sm:$0xff] }
 0x197   : > { %v8540_v52 = vpop.permute.xlu0 %1159  ;;  %6841 = vmatprep.subr.bf16.mxu0 %v6840_v25  ;;  %v6846_v25 = vpack.c.bf16 %v1731_v1, %v1728_v59  ;;  %v6848_v35 = vpack.c.bf16 %v1738_v41, %v1735_v30  ;;  %v6850_v59 = vpack.c.bf16 %v1737_v18, %v1734_v63  ;;  %v1740_v30 = vld [vmem:[%s11607_s12 + $0x210] sm:$0xff]  ;;  %v1743_v41 = vld [vmem:[%s11607_s12 + $0x228] sm:$0xff]  ;;  %v642_v63 = vsel %vm633_vm0, %v8251_v28, %v8267_v16 }
 0x198   : > { %v6854_v50 = vpack.c.bf16 %v1743_v41, %v1740_v30  ;;  %v11684_v41 = vld [vmem:[#allocation16_spill] sm:$0xff] }
 0x199   : > { %v545_v4 = vmul.f32 %v7752_v32, %v11684_v41 }
 0x19a   : > { %6843 = vmatpush1.bf16.msra.mxu0 %v6842_v23  ;;  %v1744_v23 = vld [vmem:[%s11607_s12 + $0x230] sm:$0xff] }
 0x19b   : > { %v8556_v38 = vpop.permute.xlu0 %1163  ;;  %6845 = vmatprep.subr.bf16.mxu0 %v6844_v58  ;;  %v8594_v58 = vpop.permute.xlu1 %1161  ;;  %v6852_v1 = vpack.c.bf16 %v1744_v23, %v1741_v53  ;;  %v11682_v23 = vld [vmem:[#allocation18_spill] sm:$0xff] }
 0x19c   : > { %v550_v30 = vmul.f32 %v7739_v24, %v11682_v23  ;;  %v546_v24 = vmul.f32 %v7721_v10, %v11684_v41 }
 0x19e   : > { %6847 = vmatpush1.bf16.msra.mxu0 %v6846_v25  ;;  %v669_v45 = vadd.f32 %v642_v63, %v550_v30 }
 0x19f   : > { %v8572_v22 = vpop.permute.xlu0 %1155  ;;  %6849 = vmatprep.subr.bf16.mxu0 %v6848_v35  ;;  %v641_v35 = vsel %vm633_vm0, %v8237_v2, %v8251_v28  ;;  %v548_v28 = vmul.f32 %v7764_v37, %v11682_v23 }
 0x1a2   : > { %6851 = vmatpush1.bf16.msra.mxu0 %v6850_v59  ;;  %v11683_v59 = vld [vmem:[#allocation8_spill] sm:$0xff] }
 0x1a3   : > { %v8586_v0 = vpop.permute.xlu0 %1037  ;;  %6853 = vmatprep.subr.bf16.mxu0 %v6852_v1  ;;  %v549_v1 = vmul.f32 %v11683_v59, %v11682_v23  ;;  %v640_v59 = vsel %vm633_vm0, %v8280_v27, %v8237_v2  ;;  %v748_v2 = vsel %vm738_vm1, %v8294_v51, %v8301_v15  ;;  %v745_v27 = vsel %vm738_vm1, %v8304_v21, %v8283_v19 }
 0x1a4   : > { %11680 = vst [vmem:[#allocation10_spill] sm:$0xff] %v8586_v0  ;;  %v551_v0 = vmul.f32 %v7754_v33, %v11682_v23  ;;  %v747_v33 = vsel %vm738_vm1, %v8291_v6, %v8294_v51  ;;  %v667_v30 = vadd.f32 %v640_v59, %v548_v28  ;;  %v852_v51 = vsel %vm843_vm2, %v8324_v60, %v8331_v48 }
 0x1a5   : > { %v853_v21 = vsel %vm843_vm2, %v8331_v48, %v8334_v17  ;;  %v850_v28 = vsel %vm843_vm2, %v8341_v8, %v8321_v55 }
 0x1a6   : > { %6855 = vmatpush1.bf16.msra.mxu0 %v6854_v50  ;;  %v643_v50 = vsel %vm633_vm0, %v8267_v16, %v8269_v57  ;;  %v746_v16 = vsel %vm738_vm1, %v8283_v19, %v8291_v6  ;;  %v639_v6 = vsel %vm633_vm0, %v8311_v13, %v8314_v26  ;;  %v774_v19 = vadd.f32 %v747_v33, %v669_v45 }
 0x1a7   : > { %v8602_v5 = vpop.permute.xlu0 %1274  ;;  %v670_v37 = vadd.f32 %v643_v50, %v551_v0  ;;  %v851_v0 = vsel %vm843_vm2, %v8321_v55, %v8324_v60  ;;  %v956_v26 = vsel %vm948_vm3, %v8354_v54, %v8361_v47  ;;  %v665_v10 = vadd.f32 %v639_v6, %v546_v24 }
 0x1a8   : > { %v8604_v36 = vpop.permute.xlu1 %1453  ;;  %v743_v45 = vsel %vm738_vm1, %v8018_v42, %v8344_v9  ;;  %v1061_v55 = vsel %vm1053_vm4, %v8432_v14, %v8475_v31  ;;  %v957_v24 = vsel %vm948_vm3, %v8361_v47, %v8364_v49  ;;  %v958_v42 = vsel %vm948_vm3, %v8364_v49, %v8395_v29 }
 0x1a9   : > { %11681 = vst [vmem:[#allocation28_spill] sm:$0xff] %v8604_v36  ;;  %v668_v36 = vadd.f32 %v641_v35, %v549_v1  ;;  %v11685_v35 = vld [vmem:[#allocation19_spill] sm:$0xff]  ;;  %v775_v59 = vadd.f32 %v748_v2, %v670_v37  ;;  %v955_v37 = vsel %vm948_vm3, %v8405_v39, %v8354_v54  ;;  %v1180_v47 = vsel %vm1171_vm5, %v8564_v11, %v8540_v52 }
 0x1aa   : > { %v638_v63 = vsel %vm633_vm0, %v11685_v35, %v8311_v13  ;;  %v772_v13 = vadd.f32 %v745_v27, %v667_v30  ;;  %v1062_v49 = vsel %vm1053_vm4, %v8475_v31, %v8464_v34  ;;  %v1063_v54 = vsel %vm1053_vm4, %v8464_v34, %v8518_v46 }
 0x1ab   : > { %v8606_v3 = vpop.permute.xlu0 %1278  ;;  %v773_v50 = vadd.f32 %v746_v16, %v668_v36  ;;  %v664_v35 = vadd.f32 %v638_v63, %v545_v4  ;;  %v879_v36 = vadd.f32 %v852_v51, %v774_v19  ;;  %v880_v16 = vadd.f32 %v853_v21, %v775_v59 }
 0x1ac   : > { %v8608_v25 = vpop.permute.xlu1 %1035  ;;  %v877_v33 = vadd.f32 %v850_v28, %v772_v13  ;;  %v744_v4 = vsel %vm738_vm1, %v8344_v9, %v8351_v62  ;;  %v848_v9 = vsel %vm843_vm2, %v8038_v40, %v8415_v20  ;;  %v1060_v31 = vsel %vm1053_vm4, %v8498_v12, %v8432_v14 }
 0x1ad   : > { %v878_v60 = vadd.f32 %v851_v0, %v773_v50  ;;  %v769_v2 = vadd.f32 %v743_v45, %v664_v35  ;;  %v770_v27 = vadd.f32 %v744_v4, %v665_v10  ;;  %v984_v30 = vadd.f32 %v957_v24, %v879_v36 }
 0x1ae   : > { %v982_v6 = vadd.f32 %v955_v37, %v877_v33  ;;  %v1181_v21 = vsel %vm1171_vm5, %v8540_v52, %v8594_v58  ;;  %v1182_v28 = vsel %vm1171_vm5, %v8594_v58, %v8556_v38  ;;  %v953_v59 = vsel %vm948_vm3, %v8061_v56, %v8548_v61 }
 0x1af   : > { %v8610_v53 = vpop.permute.xlu0 %1270  ;;  %v983_v8 = vadd.f32 %v956_v26, %v878_v60  ;;  %v849_v26 = vsel %vm843_vm2, %v8415_v20, %v8424_v44  ;;  %v985_v20 = vadd.f32 %v958_v42, %v880_v16  ;;  %v874_v0 = vadd.f32 %v848_v9, %v769_v2 }
 0x1b0   : > { %v8618_v18 = vpop.permute.xlu1 %1272  ;;  %v875_v51 = vadd.f32 %v849_v26, %v770_v27  ;;  %v1089_v19 = vadd.f32 %v1062_v49, %v984_v30  ;;  %v954_v13 = vsel %vm948_vm3, %v8548_v61, %v8526_v43  ;;  %v1179_v14 = vsel %vm1171_vm5, %v8572_v22, %v8564_v11  ;;  %v11687_v2 = vld [vmem:[#allocation28_spill] sm:$0xff]  ;;  %v11688_v27 = vld [vmem:[#allocation10_spill] sm:$0xff] }
 0x1b1   : > { %v1088_v63 = vadd.f32 %v1061_v55, %v983_v8  ;;  %v1295_v10 = vsel %vm1286_vm6, %v8618_v18, %v8602_v5  ;;  %v1090_v34 = vadd.f32 %v1063_v54, %v985_v20  ;;  %v1087_v60 = vadd.f32 %v1060_v31, %v982_v6  ;;  %v11686_v8 = vld [vmem:[#allocation20_spill] sm:$0xff]  ;;  %v1751_v30 = vld [vmem:[%s11607_s12 + $0x268] sm:$0xff]  ;;  %v1746_v20 = vld [vmem:[%s11607_s12 + $0x240] sm:$0xff] }
 0x1b2   : > { %v1209_v56 = vadd.f32 %v1181_v21, %v1089_v19  ;;  %v1058_v61 = vsel %vm1053_vm4, %v8078_v7, %v8608_v25  ;;  %v979_v22 = vadd.f32 %v953_v59, %v874_v0  ;;  %v980_v33 = vadd.f32 %v954_v13, %v875_v51  ;;  %v1749_v6 = vld [vmem:[%s11607_s12 + $0x258] sm:$0xff]  ;;  %v11689_v19 = vld [vmem:[#allocation21_spill] sm:$0xff] }
 0x1b3   : > { %v8644_v32 = vpop.permute.xlu0 %1151  ;;  %v1208_v50 = vadd.f32 %v1180_v47, %v1088_v63  ;;  %v1210_v45 = vadd.f32 %v1182_v28, %v1090_v34  ;;  %v1207_v4 = vadd.f32 %v1179_v14, %v1087_v60  ;;  %v1747_v47 = vld [vmem:[%s11607_s12 + $0x248] sm:$0xff]  ;;  %v1059_v63 = vsel %vm1053_vm4, %v8608_v25, %v11688_v27  ;;  %v1700_v25 = vld [vmem:[%s11607_s12 + $0xd0] sm:$0xff] }
 0x1b4   : > { %v1277_v1 = vpop.permute.xlu1 %1276  ;;  %v1084_v37 = vadd.f32 %v1058_v61, %v979_v22  ;;  %v6858_v31 = vpack.c.bf16 %v1749_v6, %v1746_v20  ;;  %v1757_v22 = vld [vmem:[%s11607_s12 + $0x298] sm:$0xff]  ;;  %v1763_v6 = vld [vmem:[%s11607_s12 + $0x2c8] sm:$0xff] }
 0x1b5   : > { %v1323_v12 = vadd.f32 %v1295_v10, %v1208_v50  ;;  %v1296_v52 = vsel %vm1286_vm6, %v8602_v5, %v1277_v1  ;;  %v1297_v58 = vsel %vm1286_vm6, %v1277_v1, %v8606_v3  ;;  %v1294_v5 = vsel %vm1286_vm6, %v8610_v53, %v8618_v18  ;;  %v1750_v53 = vld [vmem:[%s11607_s12 + $0x260] sm:$0xff]  ;;  %v1748_v18 = vld [vmem:[%s11607_s12 + $0x250] sm:$0xff]  ;;  %v1703_v50 = vld [vmem:[%s11607_s12 + $0xe8] sm:$0xff] }
 0x1b6   : > { %v1324_v55 = vadd.f32 %v1296_v52, %v1209_v56  ;;  %v1325_v1 = vadd.f32 %v1297_v58, %v1210_v45  ;;  %v6856_v54 = vpack.c.bf16 %v1750_v53, %v1747_v47  ;;  %v1322_v10 = vadd.f32 %v1294_v5, %v1207_v4  ;;  %v1753_v58 = vld [vmem:[%s11607_s12 + $0x278] sm:$0xff]  ;;  %v1754_v56 = vld [vmem:[%s11607_s12 + $0x280] sm:$0xff]  ;;  %v1755_v4 = vld [vmem:[%s11607_s12 + $0x288] sm:$0xff] }
 0x1b7   : > { %v1390_v41 = vpop.permute.xlu0 %1389  ;;  %v7030_v51 = vpack.c.bf16 %v1751_v30, %v1748_v18  ;;  %v7032_v14 = vpack.c.bf16 %v1703_v50, %v1700_v25 }
 0x1b8   : > { %v8676_v48 = vpop.permute.xlu1 %1479  ;;  %6857 = vmatprep.subr.bf16.mxu0 %v6856_v54 }
 0x1b9   : > { %7031 = vmatprep.subr.bf16.mxu1 %v7030_v51  ;;  %6859 = vmatpush1.bf16.msra.mxu0 %v6858_v31 }
 0x1ba   : > { %7033 = vmatpush3.bf16.msra.mxu1 %v7032_v14 }
 0x1bb   : > { %v8708_v39 = vpop.permute.xlu0 %1393 }
 0x1bc   : > { %v8710_v40 = vpop.permute.xlu1 %1149 }
 0x1bd   : > { %v1176_v24 = vsel %vm1171_vm5, %v11686_v8, %v8710_v40  ;;  %v1177_v45 = vsel %vm1171_vm5, %v8710_v40, %v8644_v32  ;;  %v11690_v40 = vld [vmem:[#allocation22_spill] sm:$0xff] }
 0x1be   : > { %v1204_v0 = vadd.f32 %v1176_v24, %v1084_v37  ;;  %v1706_v24 = vld [vmem:[%s11607_s12 + $0x100] sm:$0xff] }
 0x1bf   : > { %v8741_v16 = vpop.permute.xlu0 %1264 }
 0x1c0   : > { %v1388_v35 = vpop.permute.xlu1 %1387  ;;  %v1291_v34 = vsel %vm1286_vm6, %v11689_v19, %v8741_v16  ;;  %v1712_v19 = vld [vmem:[%s11607_s12 + $0x130] sm:$0xff] }
 0x1c1   : > { %v1410_v36 = vsel %vm1401_vm7, %v1388_v35, %v1390_v41  ;;  %v1319_v5 = vadd.f32 %v1291_v34, %v1204_v0  ;;  %v1761_v0 = vld [vmem:[%s11607_s12 + $0x2b8] sm:$0xff]  ;;  %v1715_v34 = vld [vmem:[%s11607_s12 + $0x148] sm:$0xff] }
 0x1c2   : > { %v1438_v11 = vadd.f32 %v1410_v36, %v1323_v12  ;;  %v1085_v12 = vadd.f32 %v1059_v63, %v980_v33  ;;  %v1756_v36 = vld [vmem:[%s11607_s12 + $0x290] sm:$0xff]  ;;  %v1759_v63 = vld [vmem:[%s11607_s12 + $0x2a8] sm:$0xff] }
 0x1c3   : > { %v8783_v21 = vpop.permute.xlu0 %1379  ;;  %v1752_v33 = vld [vmem:[%s11607_s12 + $0x270] sm:$0xff] }
 0x1c4   : > { %v1392_v42 = vpop.permute.xlu1 %1391  ;;  %v1464_v7 = vmul.f32 %v11687_v2, %v1438_v11  ;;  %v6860_v11 = vpack.c.bf16 %v1756_v36, %v1753_v58  ;;  %v6862_v8 = vpack.c.bf16 %v1755_v4, %v1752_v33  ;;  %v1205_v54 = vadd.f32 %v1177_v45, %v1085_v12  ;;  %v1768_v45 = vld [vmem:[%s11607_s12 + $0x2f0] sm:$0xff]  ;;  %v1769_v4 = vld [vmem:[%s11607_s12 + $0x2f8] sm:$0xff] }
 0x1c5   : > { %v1411_v9 = vsel %vm1401_vm7, %v1390_v41, %v1392_v42  ;;  %v1412_v26 = vsel %vm1401_vm7, %v1392_v42, %v8708_v39  ;;  %v1709_v42 = vld [vmem:[%s11607_s12 + $0x118] sm:$0xff]  ;;  %v7040_v12 = vpack.c.bf16 %v1715_v34, %v1712_v19 }
 0x1c6   : > { %v1439_v41 = vadd.f32 %v1411_v9, %v1324_v55  ;;  %v1440_v49 = vadd.f32 %v1412_v26, %v1325_v1  ;;  %v8788_v60 = vadd.f32 %v8676_v48, %v1464_v7  ;;  %v1406_v55 = vsel %vm1401_vm7, %v11690_v40, %v8783_v21  ;;  %6861 = vmatprep.subr.bf16.mxu0 %v6860_v11  ;;  %v11691_v11 = vld [vmem:[#allocation15_spill] sm:$0xff]  ;;  %v1767_v40 = vld [vmem:[%s11607_s12 + $0x2e8] sm:$0xff] }
 0x1c7   : > { %v7034_v1 = vpack.c.bf16 %v1757_v22, %v1754_v56  ;;  %v7036_v47 = vpack.c.bf16 %v1709_v42, %v1706_v24  ;;  %6863 = vmatpush1.bf16.msra.mxu0 %v6862_v8  ;;  %v1434_v30 = vadd.f32 %v1406_v55, %v1319_v5  ;;  %v1765_v56 = vld [vmem:[%s11607_s12 + $0x2d8] sm:$0xff]  ;;  %v1764_v5 = vld [vmem:[%s11607_s12 + $0x2d0] sm:$0xff] }
 0x1c8   : > { %v1465_v28 = vmul.f32 %v11687_v2, %v1439_v41  ;;  %v1466_v59 = vmul.f32 %v11687_v2, %v1440_v49  ;;  %v1386_v13 = vpop.permute.xlu1 %1385  ;;  %v1504_v53 = vmax.f32 %v8788_v60, 0.0  ;;  %v1762_v41 = vld [vmem:[%s11607_s12 + $0x2c0] sm:$0xff]  ;;  %v1760_v49 = vld [vmem:[%s11607_s12 + $0x2b0] sm:$0xff]  ;;  %v6868_v24 = vpack.c.bf16 %v1768_v45, %v1765_v56 }
 0x1c9   : > { %v1409_v52 = vsel %vm1401_vm7, %v1386_v13, %v1388_v35  ;;  %7035 = vmatprep.subr.bf16.mxu1 %v7034_v1  ;;  %v6864_v31 = vpack.c.bf16 %v1762_v41, %v1759_v63  ;;  %v7038_v25 = vpack.c.bf16 %v1763_v6, %v1760_v49  ;;  %v1460_v22 = vmul.f32 %v11691_v11, %v1434_v30  ;;  %v11692_v55 = vld [vmem:[#allocation7_spill] sm:$0xff]  ;;  %v11694_v6 = vld [vmem:[#allocation17_spill] sm:$0xff] }
 0x1ca   : > { %v8804_v35 = vadd.f32 %v8676_v48, %v1465_v28  ;;  %v1437_v61 = vadd.f32 %v1409_v52, %v1322_v10  ;;  %v8825_v37 = vadd.f32 %v8676_v48, %v1466_v59  ;;  %7037 = vmatpush3.bf16.msra.mxu1 %v7036_v47  ;;  %v1758_v10 = vld [vmem:[%s11607_s12 + $0x2a0] sm:$0xff]  ;;  %v11693_v1 = vld [vmem:[#allocation11_spill] sm:$0xff] }
 0x1cb   : > { %v6866_v50 = vpack.c.bf16 %v1761_v0, %v1758_v10  ;;  %6865 = vmatprep.subr.bf16.mxu0 %v6864_v31  ;;  %7039 = vmatprep.subr.bf16.mxu1 %v7038_v25  ;;  %v1344_v8 = vmul.f32 %v11693_v1, %v11692_v55  ;;  %v1718_v47 = vld [vmem:[%s11607_s12 + $0x160] sm:$0xff]  ;;  %v8914_v10 = vadd.f32 %v11694_v6, %v1460_v22  ;;  %v11695_v25 = vld [vmem:[#allocation23_spill] sm:$0xff] }
 0x1cc   : > { %v1505_v7 = vmax.f32 %v8804_v35, 0.0  ;;  %v1463_v9 = vmul.f32 %v11687_v2, %v1437_v61  ;;  %v8829_v26 = vpop.permute.xlu1 %1266  ;;  %v1506_v28 = vmax.f32 %v8825_v37, 0.0  ;;  %v1766_v61 = vld [vmem:[%s11607_s12 + $0x2e0] sm:$0xff] }
 0x1cd   : > { %v1292_v18 = vsel %vm1286_vm6, %v8741_v16, %v8829_v26  ;;  %v7528_v16 = vpop.permute.xlu0 %7527  ;;  %6867 = vmatpush1.bf16.msra.mxu0 %v6866_v50  ;;  %v7042_v42 = vpack.c.bf16 %v1769_v4, %v1766_v61  ;;  %v11696_v50 = vmax.f32 %v11695_v25, 0.0  ;;  %v11699_v56 = vld [vmem:[#allocation25_spill] sm:$0xff]  ;;  %v11704_v4 = vld [vmem:[#allocation14_spill] sm:$0xff] }
 0x1ce   : > { %v8845_v20 = vadd.f32 %v8676_v48, %v1463_v9  ;;  %v7536_v51 = vpack.i.bf16 %v1505_v7, %v1504_v53  ;;  %v1320_v13 = vadd.f32 %v1292_v18, %v1205_v54  ;;  %v7530_v52 = vunpack.i.h.bf16 %v7528_v16  ;;  %7041 = vmatpush3.bf16.msra.mxu1 %v7040_v12  ;;  %v1721_v18 = vld [vmem:[%s11607_s12 + $0x178] sm:$0xff]  ;;  %6869 = vmatprep.subr.bf16.mxu0 %v6868_v24  ;;  %v1774_v24 = vld [vmem:[%s11607_s12 + $0x320] sm:$0xff] }
 0x1cf   : > { %v7529_v58 = vunpack.i.l.bf16 %v7528_v16  ;;  %v6870_v9 = vpack.c.bf16 %v1767_v40, %v1764_v5  ;;  %v7044_v49 = vpack.c.bf16 %v1721_v18, %v1718_v47  ;;  %7043 = vmatprep.subr.bf16.mxu1 %v7042_v42  ;;  %v11700_v45 = vmax.f32 %v11699_v56, 0.0  ;;  %v11705_v40 = vld [vmem:[#allocation13_spill] sm:$0xff] }
 0x1d0   : > { %v1503_v59 = vmax.f32 %v8845_v20, 0.0  ;;  %v8868_v14 = vpop.permute.xlu1 %1381  ;;  %7537 = vrot.lane.b32.xlu0 %v7536_v51, %s7595_s21  ;;  %v1352_v5 = vmul.f32 %v11704_v4, %v11692_v55  ;;  %v1237_v1 = vmul.f32 %v11705_v40, %v11692_v55  ;;  %v11707_v4 = vld [vmem:[#allocation5_spill] sm:$0xff] }
 0x1d1   : > { %v1407_v36 = vsel %vm1401_vm7, %v8783_v21, %v8868_v14  ;;  %v1553_v54 = vsel %vm843_vm2, %v7529_v58, %v7530_v52  ;;  %6871 = vmatpush1.bf16.msra.mxu0 %v6870_v9  ;;  %v1820_v9 = vld [vmem:[%s11607_s12 + $0x490] sm:$0xff]  ;;  %v630_v18 = vpop.permute.xlu0 %629  ;;  %v1770_v35 = vld [vmem:[%s11607_s12 + $0x300] sm:$0xff] }
 0x1d2   : > { %v1435_v33 = vadd.f32 %v1407_v36, %v1320_v13  ;;  %v7541_v21 = vpack.i.bf16 %v1503_v59, %v1506_v28  ;;  %7045 = vmatpush3.bf16.msra.mxu1 %v7044_v49  ;;  %v8925_v19 = vmax.f32 %v11696_v50, %v1553_v54  ;;  %v11697_v13 = vld [vmem:[#allocation24_spill] sm:$0xff] }
 0x1d3   : > { %v11698_v12 = vmax.f32 %v11697_v13, 0.0 }
 0x1d4   : > { %v1461_v63 = vmul.f32 %v11691_v11, %v1435_v33  ;;  %7542 = vrot.lane.b32.xlu1 %v7541_v21, %s7595_s21  ;;  %v8907_v41 = vpop.permute.xlu1 %7532  ;;  %1383 = vrot.lane.b32.xlu0 %v1344_v8, %s7600_s26  ;;  %v11702_v33 = vld [vmem:[#allocation12_spill] sm:$0xff]  ;;  %v1771_v8 = vld [vmem:[%s11607_s12 + $0x308] sm:$0xff] }
 0x1d5   : > { %v7535_v30 = vunpack.i.h.bf16 %v8907_v41  ;;  %v7534_v16 = vunpack.i.l.bf16 %v8907_v41  ;;  %v1122_v21 = vmul.f32 %v11692_v55, %v11702_v33  ;;  %v6872_v42 = vpack.c.bf16 %v1774_v24, %v1771_v8  ;;  %v1823_v55 = vld [vmem:[%s11607_s12 + $0x4a8] sm:$0xff]  ;;  %v735_v49 = vpop.permute.xlu0 %734 }
 0x1d6   : > { %v8917_v0 = vadd.f32 %v11694_v6, %v1461_v63  ;;  %v7046_v47 = vpack.c.bf16 %v1823_v55, %v1820_v9  ;;  %v11711_v41 = vld [vmem:[#allocation26_spill] sm:$0xff] }
 0x1d7   : > { %v1552_v51 = vsel %vm843_vm2, %v7535_v30, %v7529_v58  ;;  %v1554_v31 = vsel %vm843_vm2, %v7530_v52, %v7534_v16  ;;  %v1500_v58 = vmax.f32 %v8914_v10, 0.0  ;;  %6873 = vmatprep.subr.bf16.mxu0 %v6872_v42 }
 0x1d8   : > { %v1501_v34 = vmax.f32 %v8917_v0, 0.0  ;;  %v8930_v36 = vmax.f32 %v11698_v12, %v1554_v31  ;;  %v8934_v61 = vmax.f32 %v11700_v45, %v1552_v51  ;;  %7047 = vmatprep.subr.bf16.mxu1 %v7046_v47  ;;  %v8968_v63 = vpop.permute.xlu1 %631  ;;  %v644_v45 = vsel %vm633_vm0, %v8269_v57, %v630_v18 }
 0x1d9   : > { %v840_v30 = vpop.permute.xlu0 %839  ;;  %v645_v33 = vsel %vm633_vm0, %v630_v18, %v8968_v63 }
 0x1da   : > { %1606 = vrot.lane.b32.xlu0 %v8934_v61, %s11701_s27  ;;  %v7546_v52 = vpack.i.bf16 %v8930_v36, %v8925_v19  ;;  %v7551_v22 = vpack.i.bf16 %v1501_v34, %v1500_v58  ;;  %v854_v57 = vsel %vm843_vm2, %v8334_v17, %v840_v30 }
 0x1dc   : > { %7547 = vrot.lane.b32.xlu1 %v7546_v52, %s11701_s27  ;;  %v8970_v54 = vpop.permute.xlu1 %736  ;;  %v11706_v52 = vld [vmem:[#allocation9_spill] sm:$0xff] }
 0x1dd   : > { %v945_v31 = vpop.permute.xlu0 %944  ;;  %v750_v8 = vsel %vm738_vm1, %v735_v49, %v8970_v54 }
 0x1de   : > { %7552 = vrot.lane.b32.xlu0 %v7551_v22, %s7595_s21  ;;  %v552_v22 = vmul.f32 %v11706_v52, %v11682_v23 }
 0x1e0   : > { %1169 = vrot.lane.b32.xlu1 %v1122_v21, %s11703_s28  ;;  %v8972_v51 = vpop.permute.xlu1 %841  ;;  %v749_v21 = vsel %vm738_vm1, %v8301_v15, %v735_v49  ;;  %v959_v15 = vsel %vm948_vm3, %v8395_v29, %v945_v31  ;;  %s11653_s28 = smov 110  }
 0x1e1   : > { %v1050_v50 = vpop.permute.xlu0 %1049  ;;  %v855_v9 = vsel %vm843_vm2, %v840_v30, %v8972_v51 }
 0x1e2   : > { %1399 = vrot.lane.b32.xlu0 %v1352_v5, %s7600_s26  ;;  %v553_v5 = vmul.f32 %v11707_v4, %v11682_v23  ;;  %v1064_v49 = vsel %vm1053_vm4, %v8518_v46, %v1050_v50  ;;  %v11708_v4 = vld [vmem:[#allocation16_spill] sm:$0xff]  ;;  %s7609_s26 = smov 119  }
 0x1e4   : > { %1284 = vrot.lane.b32.xlu1 %v1237_v1, %s7599_s25  ;;  %v8974_v25 = vpop.permute.xlu1 %946  ;;  %v671_v1 = vadd.f32 %v644_v45, %v552_v22  ;;  %v672_v24 = vadd.f32 %v645_v33, %v553_v5  ;;  %v11709_v5 = vld [vmem:[#allocation6_spill] sm:$0xff]  ;;  %s7603_s25 = smov 112  }
 0x1e5   : > { %v1166_v12 = vpop.permute.xlu0 %1165  ;;  %v960_v45 = vsel %vm948_vm3, %v945_v31, %v8974_v25  ;;  %v547_v29 = vmul.f32 %v11709_v5, %v11708_v4  ;;  %vm3337_vm3 = vcmask 1046528  }
 0x1e6   : > { %v776_v42 = vadd.f32 %v749_v21, %v671_v1  ;;  %v777_v47 = vadd.f32 %v750_v8, %v672_v24  ;;  %v1183_v21 = vsel %vm1171_vm5, %v8556_v38, %v1166_v12 }
 0x1e8   : > { %v8976_v13 = vpop.permute.xlu1 %1051  ;;  %v881_v18 = vadd.f32 %v854_v57, %v776_v42  ;;  %v882_v52 = vadd.f32 %v855_v9, %v777_v47  ;;  %v11710_v57 = vld [vmem:[#allocation27_spill] sm:$0xff] }
 0x1e9   : > { %v1281_v40 = vpop.permute.xlu0 %1280  ;;  %v1065_v33 = vsel %vm1053_vm4, %v1050_v50, %v8976_v13  ;;  %v666_v42 = vadd.f32 %v11710_v57, %v547_v29 }
 0x1ea   : > { %v986_v17 = vadd.f32 %v959_v15, %v881_v18  ;;  %v987_v30 = vadd.f32 %v960_v45, %v882_v52  ;;  %v1298_v46 = vsel %vm1286_vm6, %v8606_v3, %v1281_v40 }
 0x1eb   : > { %v771_v18 = vadd.f32 %v8351_v62, %v666_v42 }
 0x1ec   : > { %v8978_v56 = vpop.permute.xlu1 %1167  ;;  %v1091_v1 = vadd.f32 %v1064_v49, %v986_v17  ;;  %v1092_v24 = vadd.f32 %v1065_v33, %v987_v30 }
 0x1ed   : > { %v1154_v22 = vpop.permute.xlu0 %1153  ;;  %v1184_v31 = vsel %vm1171_vm5, %v1166_v12, %v8978_v56  ;;  %v876_v3 = vadd.f32 %v8424_v44, %v771_v18 }
 0x1ee   : > { %v1211_v9 = vadd.f32 %v1183_v21, %v1091_v1  ;;  %v1212_v47 = vadd.f32 %v1184_v31, %v1092_v24  ;;  %v1178_v30 = vsel %vm1171_vm5, %v8644_v32, %v1154_v22 }
 0x1ef   : > { %v981_v33 = vadd.f32 %v8526_v43, %v876_v3  ;;  %v554_v43 = vmul.f32 %v11709_v5, %v11682_v23  ;;  %v1780_v3 = vld [vmem:[%s11607_s12 + $0x350] sm:$0xff] }
 0x1f0   : > { %v8996_v55 = vpop.permute.xlu1 %1282  ;;  %v1326_v12 = vadd.f32 %v1298_v46, %v1211_v9 }
 0x1f1   : > { %v1299_v50 = vsel %vm1286_vm6, %v1281_v40, %v8996_v55  ;;  %v9017_v38 = vpop.permute.xlu0 %1397  ;;  %v1086_v21 = vadd.f32 %v11688_v27, %v981_v33  ;;  %v673_v42 = vadd.f32 %v8968_v63, %v554_v43 }
 0x1f2   : > { %v1327_v52 = vadd.f32 %v1299_v50, %v1212_v47 }
 0x1f3   : > { %v1206_v31 = vadd.f32 %v1178_v30, %v1086_v21  ;;  %v778_v47 = vadd.f32 %v8970_v54, %v673_v42  ;;  %v1772_v30 = vld [vmem:[%s11607_s12 + $0x310] sm:$0xff]  ;;  %v1775_v21 = vld [vmem:[%s11607_s12 + $0x328] sm:$0xff]  ;;  %v1786_v42 = vld [vmem:[%s11607_s12 + $0x380] sm:$0xff] }
 0x1f4   : > { %v1396_v8 = vpop.permute.xlu1 %1395 }
 0x1f5   : > { %v1413_v15 = vsel %vm1401_vm7, %v8708_v39, %v1396_v8  ;;  %v1414_v45 = vsel %vm1401_vm7, %v1396_v8, %v9017_v38 }
 0x1f6   : > { %v1441_v49 = vadd.f32 %v1413_v15, %v1326_v12  ;;  %v1442_v17 = vadd.f32 %v1414_v45, %v1327_v52  ;;  %v1777_v52 = vld [vmem:[%s11607_s12 + $0x338] sm:$0xff] }
 0x1f8   : > { %v1269_v40 = vpop.permute.xlu1 %1268  ;;  %v1467_v39 = vmul.f32 %v11687_v2, %v1441_v49  ;;  %v1468_v4 = vmul.f32 %v11687_v2, %v1442_v17 }
 0x1f9   : > { %v1293_v29 = vsel %vm1286_vm6, %v8829_v26, %v1269_v40 }
 0x1fa   : > { %v1321_v24 = vadd.f32 %v1293_v29, %v1206_v31  ;;  %v9040_v46 = vadd.f32 %v8676_v48, %v1467_v39  ;;  %v9043_v57 = vadd.f32 %v8676_v48, %v1468_v4  ;;  %v1826_v4 = vld [vmem:[%s11607_s12 + $0x4c0] sm:$0xff]  ;;  %v1829_v29 = vld [vmem:[%s11607_s12 + $0x4d8] sm:$0xff] }
 0x1fc   : > { %v1507_v15 = vmax.f32 %v9040_v46, 0.0 }
 0x242   : > { %v7538_v62 = vpop.permute.xlu0 %7537 }
 0x243   : > { %v7540_v1 = vunpack.i.h.bf16 %v7538_v62  ;;  %v7539_v44 = vunpack.i.l.bf16 %v7538_v62 }
 0x245   : > { %v1559_v32 = vsel %vm843_vm2, %v7539_v44, %v7540_v1 }
 0x246   : > { %v9033_v8 = vpop.permute.xlu1 %7542  ;;  %v1384_v27 = vpop.permute.xlu0 %1383  ;;  %v9053_v5 = vmax.f32 %v1504_v53, %v1559_v32  ;;  %v883_v53 = vadd.f32 %v8972_v51, %v778_v47  ;;  %v1776_v32 = vld [vmem:[%s11607_s12 + $0x330] sm:$0xff] }
 0x247   : > { %v7544_v22 = vunpack.i.l.bf16 %v9033_v8  ;;  %v1408_v26 = vsel %vm1401_vm7, %v8868_v14, %v1384_v27  ;;  %v1508_v14 = vmax.f32 %v9043_v57, 0.0  ;;  %v7545_v60 = vunpack.i.h.bf16 %v9033_v8  ;;  %v1779_v27 = vld [vmem:[%s11607_s12 + $0x348] sm:$0xff]  ;;  %v1888_v57 = vld [vmem:[%s11607_s12 + $0x6b0] sm:$0xff] }
 0x248   : > { %v1436_v9 = vadd.f32 %v1408_v26, %v1321_v24  ;;  %v988_v49 = vadd.f32 %v8974_v25, %v883_v53  ;;  %v6876_v24 = vpack.c.bf16 %v1780_v3, %v1777_v52  ;;  %v6878_v20 = vpack.c.bf16 %v1779_v27, %v1776_v32  ;;  %v1791_v32 = vld [vmem:[%s11607_s12 + $0x3a8] sm:$0xff] }
 0x249   : > { %v1560_v23 = vsel %vm843_vm2, %v7540_v1, %v7544_v22  ;;  %v7561_v33 = vpack.i.bf16 %v1508_v14, %v1507_v15  ;;  %v1558_v25 = vsel %vm843_vm2, %v7545_v60, %v7539_v44  ;;  %v1835_v60 = vld [vmem:[%s11607_s12 + $0x508] sm:$0xff] }
 0x24a   : > { %v9057_v50 = vmax.f32 %v1505_v7, %v1560_v23  ;;  %v1462_v63 = vmul.f32 %v11691_v11, %v1436_v9  ;;  %v1773_v7 = vld [vmem:[%s11607_s12 + $0x318] sm:$0xff]  ;;  %v1093_v1 = vadd.f32 %v8976_v13, %v988_v49  ;;  %v7048_v9 = vpack.c.bf16 %v1775_v21, %v1772_v30  ;;  %v1795_v27 = vld [vmem:[%s11607_s12 + $0x3c8] sm:$0xff] }
 0x24b   : > { %v6874_v40 = vpack.c.bf16 %v1773_v7, %v1770_v35  ;;  %v9137_v47 = vmax.f32 %v1503_v59, %v1558_v25  ;;  %v1832_v59 = vld [vmem:[%s11607_s12 + $0x4f0] sm:$0xff]  ;;  %v1785_v30 = vld [vmem:[%s11607_s12 + $0x378] sm:$0xff] }
 0x24c   : > { %v1607_v18 = vpop.permute.xlu0 %1606  ;;  %v7556_v12 = vpack.i.bf16 %v9057_v50, %v9053_v5  ;;  %v9086_v51 = vadd.f32 %v11694_v6, %v1462_v63 }
 0x24e   : > { %7557 = vrot.lane.b32.xlu1 %v7556_v12, %s11701_s27  ;;  %v9074_v54 = vpop.permute.xlu1 %7547  ;;  %v1502_v23 = vmax.f32 %v9086_v51, 0.0  ;;  %v1781_v12 = vld [vmem:[%s11607_s12 + $0x358] sm:$0xff] }
 0x24f   : > { %v7550_v11 = vunpack.i.h.bf16 %v9074_v54  ;;  %v7549_v45 = vunpack.i.l.bf16 %v9074_v54 }
 0x250   : > { %v9088_v17 = vpop.permute.xlu0 %7552 }
 0x251   : > { %v7554_v6 = vunpack.i.l.bf16 %v9088_v17  ;;  %v1635_v39 = vsel %vm633_vm0, %v7549_v45, %v7550_v11  ;;  %v1634_v62 = vsel %vm633_vm0, %v1607_v18, %v7549_v45  ;;  %v7555_v26 = vunpack.i.h.bf16 %v9088_v17  ;;  %v1778_v18 = vld [vmem:[%s11607_s12 + $0x340] sm:$0xff] }
 0x252   : > { %7562 = vrot.lane.b32.xlu1 %v7561_v33, %s7595_s21  ;;  %v1170_v44 = vpop.permute.xlu1 %1169  ;;  %v1661_v31 = vmax.f32 %v8925_v19, %v1635_v39  ;;  %v1660_v43 = vmax.f32 %v8934_v61, %v1634_v62  ;;  %v1783_v61 = vld [vmem:[%s11607_s12 + $0x368] sm:$0xff]  ;;  %v1782_v33 = vld [vmem:[%s11607_s12 + $0x360] sm:$0xff]  ;;  %v7052_v21 = vpack.c.bf16 %v1781_v12, %v1778_v18  ;;  %v1784_v39 = vld [vmem:[%s11607_s12 + $0x370] sm:$0xff] }
 0x253   : > { %v1555_v13 = vsel %vm843_vm2, %v7534_v16, %v7554_v6  ;;  %v1185_v19 = vsel %vm1171_vm5, %v8978_v56, %v1170_v44  ;;  %v11712_v16 = vmax.f32 %v11711_v41, 0.0  ;;  %v7050_v56 = vpack.c.bf16 %v1829_v29, %v1826_v4  ;;  %v1787_v62 = vld [vmem:[%s11607_s12 + $0x388] sm:$0xff]  ;;  %v1838_v29 = vld [vmem:[%s11607_s12 + $0x520] sm:$0xff]  ;;  %v1797_v12 = vld [vmem:[%s11607_s12 + $0x3d8] sm:$0xff] }
 0x254   : > { %2061 = vmatprep.mubr.f32.mxu0 %v1661_v31  ;;  %2369 = vmatprep.mubr.f32.mxu1 %v1661_v31  ;;  %v1213_v35 = vadd.f32 %v1185_v19, %v1093_v1  ;;  %v1400_v7 = vpop.permute.xlu0 %1399  ;;  %v6880_v52 = vpack.c.bf16 %v1786_v42, %v1783_v61  ;;  %v1556_v3 = vsel %vm843_vm2, %v7554_v6, %v7555_v26  ;;  %v1841_v1 = vld [vmem:[%s11607_s12 + $0x538] sm:$0xff]  ;;  %v1790_v61 = vld [vmem:[%s11607_s12 + $0x3a0] sm:$0xff]  ;;  %vm3312_vm5 = vcmask 646144  }
 0x255   : > { %v9141_v63 = vmax.f32 %v11712_v16, %v1555_v13  ;;  %2062 = vmatmul.mubr.f32.vlgmr.msra.gmra.mrb[0].mxu0 %v1660_v43  ;;  %2370 = vmatmul.mubr.f32.vlgmr.msra.gmra.mrb[0].mxu1 %v1660_v43  ;;  %v7054_v6 = vpack.c.bf16 %v1835_v60, %v1832_v59  ;;  %v1415_v4 = vsel %vm1401_vm7, %v9017_v38, %v1400_v7  ;;  %v1788_v38 = vld [vmem:[%s11607_s12 + $0x390] sm:$0xff]  ;;  %v1798_v13 = vld [vmem:[%s11607_s12 + $0x3e0] sm:$0xff]  ;;  %v1793_v42 = vld [vmem:[%s11607_s12 + $0x3b8] sm:$0xff]  ;;  %vm4811_vm7 = vcmask 1044480  }
 0x256   : > { %1536 = vrot.lane.b32.xlu1 %v1502_v23, %s7595_s21  ;;  %v1285_v53 = vpop.permute.xlu1 %1284  ;;  %6875 = vmatpush1.bf16.msra.mxu0 %v6874_v40  ;;  %v1789_v40 = vld [vmem:[%s11607_s12 + $0x398] sm:$0xff]  ;;  %v9194_v31 = vmax.f32 %v1500_v58, %v1556_v3  ;;  %v6882_v43 = vpack.c.bf16 %v1785_v30, %v1782_v33  ;;  %v7056_v10 = vpack.c.bf16 %v1787_v62, %v1784_v39  ;;  %v1794_v18 = vld [vmem:[%s11607_s12 + $0x3c0] sm:$0xff]  ;;  %v1804_v60 = vld [vmem:[%s11607_s12 + $0x410] sm:$0xff] }
 0x257   : > { %v7566_v45 = vpack.i.bf16 %v9141_v63, %v9137_v47  ;;  %v1300_v49 = vsel %vm1286_vm6, %v8996_v55, %v1285_v53  ;;  %6877 = vmatprep.subr.bf16.mxu0 %v6876_v24  ;;  %7049 = vmatpush3.bf16.msra.mxu1 %v7048_v9  ;;  %v1792_v55 = vld [vmem:[%s11607_s12 + $0x3b0] sm:$0xff]  ;;  %v7058_v19 = vpack.c.bf16 %v1841_v1, %v1838_v29  ;;  %v1847_v9 = vld [vmem:[%s11607_s12 + $0x568] sm:$0xff]  ;;  %v1805_v39 = vld [vmem:[%s11607_s12 + $0x418] sm:$0xff]  ;;  %vm3446_vm6 = vcmask 515072  }
 0x258   : > { %v1328_v25 = vadd.f32 %v1300_v49, %v1213_v35  ;;  %7051 = vmatprep.subr.bf16.mxu1 %v7050_v56  ;;  %v6884_v24 = vpack.c.bf16 %v1792_v55, %v1789_v40  ;;  %v6886_v16 = vpack.c.bf16 %v1791_v32, %v1788_v38  ;;  %v6888_v56 = vpack.c.bf16 %v1798_v13, %v1795_v27  ;;  %v1796_v7 = vld [vmem:[%s11607_s12 + $0x3d0] sm:$0xff]  ;;  %v1799_v53 = vld [vmem:[%s11607_s12 + $0x3e8] sm:$0xff]  ;;  %v1862_v13 = vld [vmem:[%s11607_s12 + $0x5e0] sm:$0xff] }
 0x259   : > { %7567 = vrot.lane.b32.xlu0 %v7566_v45, %s11701_s27  ;;  %v7060_v59 = vpack.c.bf16 %v1793_v42, %v1790_v61  ;;  %v1850_v45 = vld [vmem:[%s11607_s12 + $0x580] sm:$0xff]  ;;  %v6890_v3 = vpack.c.bf16 %v1797_v12, %v1794_v18  ;;  %v1800_v33 = vld [vmem:[%s11607_s12 + $0x3f0] sm:$0xff]  ;;  %v1803_v30 = vld [vmem:[%s11607_s12 + $0x408] sm:$0xff] }
 0x25a   : > { %v1443_v44 = vadd.f32 %v1415_v4, %v1328_v25  ;;  %6879 = vmatpush1.bf16.msra.mxu0 %v6878_v20  ;;  %v1801_v20 = vld [vmem:[%s11607_s12 + $0x3f8] sm:$0xff]  ;;  %v1807_v40 = vld [vmem:[%s11607_s12 + $0x428] sm:$0xff]  ;;  %v1810_v25 = vld [vmem:[%s11607_s12 + $0x440] sm:$0xff]  ;;  %v6894_v29 = vpack.c.bf16 %v1803_v30, %v1800_v33 }
 0x25b   : > { %6881 = vmatprep.subr.bf16.mxu0 %v6880_v52  ;;  %7053 = vmatpush3.bf16.msra.mxu1 %v7052_v21  ;;  %v1853_v52 = vld [vmem:[%s11607_s12 + $0x598] sm:$0xff]  ;;  %v6892_v49 = vpack.c.bf16 %v1804_v60, %v1801_v20  ;;  %v7064_v21 = vpack.c.bf16 %v1799_v53, %v1796_v7  ;;  %v1856_v62 = vld [vmem:[%s11607_s12 + $0x5b0] sm:$0xff]  ;;  %v1859_v4 = vld [vmem:[%s11607_s12 + $0x5c8] sm:$0xff]  ;;  %v6896_v1 = vpack.c.bf16 %v1810_v25, %v1807_v40 }
 0x25c   : > { %v1469_v58 = vmul.f32 %v11687_v2, %v1443_v44  ;;  %7055 = vmatprep.subr.bf16.mxu1 %v7054_v6  ;;  %v1844_v2 = vld [vmem:[%s11607_s12 + $0x550] sm:$0xff]  ;;  %v7066_v55 = vpack.c.bf16 %v1853_v52, %v1850_v45  ;;  %v1802_v6 = vld [vmem:[%s11607_s12 + $0x400] sm:$0xff]  ;;  %v7070_v27 = vpack.c.bf16 %v1859_v4, %v1856_v62  ;;  %v1821_v53 = vld [vmem:[%s11607_s12 + $0x498] sm:$0xff] }
 0x25d   : > { %1614 = vrot.lane.b32.xlu0 %v9194_v31, %s11701_s27  ;;  %v7062_v35 = vpack.c.bf16 %v1847_v9, %v1844_v2  ;;  %v1806_v44 = vld [vmem:[%s11607_s12 + $0x420] sm:$0xff]  ;;  %v7068_v38 = vpack.c.bf16 %v1805_v39, %v1802_v6  ;;  %v1816_v32 = vld [vmem:[%s11607_s12 + $0x470] sm:$0xff]  ;;  %v1815_v9 = vld [vmem:[%s11607_s12 + $0x468] sm:$0xff] }
 0x25e   : > { %v9224_v41 = vadd.f32 %v8676_v48, %v1469_v58  ;;  %6883 = vmatpush1.bf16.msra.mxu0 %v6882_v43  ;;  %v1809_v43 = vld [vmem:[%s11607_s12 + $0x438] sm:$0xff]  ;;  %v1811_v58 = vld [vmem:[%s11607_s12 + $0x448] sm:$0xff]  ;;  %v1812_v2 = vld [vmem:[%s11607_s12 + $0x450] sm:$0xff] }
 0x25f   : > { %6885 = vmatprep.subr.bf16.mxu0 %v6884_v24  ;;  %7057 = vmatpush3.bf16.msra.mxu1 %v7056_v10  ;;  %v1813_v24 = vld [vmem:[%s11607_s12 + $0x458] sm:$0xff]  ;;  %v1808_v10 = vld [vmem:[%s11607_s12 + $0x430] sm:$0xff]  ;;  %v6898_v61 = vpack.c.bf16 %v1809_v43, %v1806_v44  ;;  %v1822_v18 = vld [vmem:[%s11607_s12 + $0x4a0] sm:$0xff]  ;;  %v6902_v60 = vpack.c.bf16 %v1815_v9, %v1812_v2 }
 0x260   : > { %v1509_v48 = vmax.f32 %v9224_v41, 0.0  ;;  %7059 = vmatprep.subr.bf16.mxu1 %v7058_v19  ;;  %v1865_v19 = vld [vmem:[%s11607_s12 + $0x5f8] sm:$0xff]  ;;  %v6900_v42 = vpack.c.bf16 %v1816_v32, %v1813_v24  ;;  %v1814_v20 = vld [vmem:[%s11607_s12 + $0x460] sm:$0xff]  ;;  %v1824_v30 = vld [vmem:[%s11607_s12 + $0x4b0] sm:$0xff] }
 0x261   : > { %v7074_v12 = vpack.c.bf16 %v1865_v19, %v1862_v13  ;;  %v1818_v7 = vld [vmem:[%s11607_s12 + $0x480] sm:$0xff]  ;;  %v1825_v52 = vld [vmem:[%s11607_s12 + $0x4b8] sm:$0xff]  ;;  %v1827_v40 = vld [vmem:[%s11607_s12 + $0x4c8] sm:$0xff] }
 0x262   : > { %1550 = vrot.lane.b32.xlu0 %v1509_v48, %s7595_s21  ;;  %6887 = vmatpush1.bf16.msra.mxu0 %v6886_v16  ;;  %v1819_v16 = vld [vmem:[%s11607_s12 + $0x488] sm:$0xff]  ;;  %v1834_v25 = vld [vmem:[%s11607_s12 + $0x500] sm:$0xff]  ;;  %v1833_v62 = vld [vmem:[%s11607_s12 + $0x4f8] sm:$0xff]  ;;  %s11717_s21 = smov 110  }
 0x263   : > { %6889 = vmatprep.subr.bf16.mxu0 %v6888_v56  ;;  %7061 = vmatpush3.bf16.msra.mxu1 %v7060_v59  ;;  %v7072_v56 = vpack.c.bf16 %v1811_v58, %v1808_v10  ;;  %v1817_v59 = vld [vmem:[%s11607_s12 + $0x478] sm:$0xff]  ;;  %v1830_v39 = vld [vmem:[%s11607_s12 + $0x4e0] sm:$0xff]  ;;  %v1836_v43 = vld [vmem:[%s11607_s12 + $0x510] sm:$0xff] }
 0x264   : > { %7063 = vmatprep.subr.bf16.mxu1 %v7062_v35  ;;  %v6904_v35 = vpack.c.bf16 %v1822_v18, %v1819_v16  ;;  %v7076_v45 = vpack.c.bf16 %v1817_v59, %v1814_v20  ;;  %v1837_v4 = vld [vmem:[%s11607_s12 + $0x518] sm:$0xff]  ;;  %v1839_v24 = vld [vmem:[%s11607_s12 + $0x528] sm:$0xff]  ;;  %v1846_v32 = vld [vmem:[%s11607_s12 + $0x560] sm:$0xff] }
 0x265   : > { %v1842_v58 = vld [vmem:[%s11607_s12 + $0x540] sm:$0xff]  ;;  %v1845_v13 = vld [vmem:[%s11607_s12 + $0x558] sm:$0xff]  ;;  %v1848_v9 = vld [vmem:[%s11607_s12 + $0x570] sm:$0xff] }
 0x266   : > { %6891 = vmatpush1.bf16.msra.mxu0 %v6890_v3  ;;  %v1828_v3 = vld [vmem:[%s11607_s12 + $0x4d0] sm:$0xff]  ;;  %v1849_v19 = vld [vmem:[%s11607_s12 + $0x578] sm:$0xff]  ;;  %v1851_v16 = vld [vmem:[%s11607_s12 + $0x588] sm:$0xff] }
 0x267   : > { %6893 = vmatprep.subr.bf16.mxu0 %v6892_v49  ;;  %7065 = vmatpush3.bf16.msra.mxu1 %v7064_v21  ;;  %v6906_v49 = vpack.c.bf16 %v1821_v53, %v1818_v7  ;;  %v6908_v33 = vpack.c.bf16 %v1828_v3, %v1825_v52  ;;  %v1831_v21 = vld [vmem:[%s11607_s12 + $0x4e8] sm:$0xff]  ;;  %v1858_v18 = vld [vmem:[%s11607_s12 + $0x5c0] sm:$0xff]  ;;  %v1864_v7 = vld [vmem:[%s11607_s12 + $0x5f0] sm:$0xff] }
 0x268   : > { %7067 = vmatprep.subr.bf16.mxu1 %v7066_v55  ;;  %v6910_v55 = vpack.c.bf16 %v1827_v40, %v1824_v30  ;;  %v6912_v6 = vpack.c.bf16 %v1834_v25, %v1831_v21  ;;  %v1854_v59 = vld [vmem:[%s11607_s12 + $0x5a0] sm:$0xff]  ;;  %v1860_v52 = vld [vmem:[%s11607_s12 + $0x5d0] sm:$0xff]  ;;  %v1863_v3 = vld [vmem:[%s11607_s12 + $0x5e8] sm:$0xff] }
 0x269   : > { %v6934_v30 = vpack.c.bf16 %v1863_v3, %v1860_v52  ;;  %v1916_v21 = vld [vmem:[%s11607_s12 + $0x790] sm:$0xff]  ;;  %v1919_v25 = vld [vmem:[%s11607_s12 + $0x7a8] sm:$0xff]  ;;  %v1866_v17 = vld [vmem:[%s11607_s12 + $0x600] sm:$0xff] }
 0x26a   : > { %6895 = vmatpush1.bf16.msra.mxu0 %v6894_v29  ;;  %v1840_v29 = vld [vmem:[%s11607_s12 + $0x530] sm:$0xff]  ;;  %v1885_v41 = vld [vmem:[%s11607_s12 + $0x698] sm:$0xff] }
 0x26b   : > { %6897 = vmatprep.subr.bf16.mxu0 %v6896_v1  ;;  %7069 = vmatpush3.bf16.msra.mxu1 %v7068_v38  ;;  %v6914_v1 = vpack.c.bf16 %v1833_v62, %v1830_v39  ;;  %v6916_v44 = vpack.c.bf16 %v1840_v29, %v1837_v4  ;;  %v1843_v38 = vld [vmem:[%s11607_s12 + $0x548] sm:$0xff] }
 0x26c   : > { %7071 = vmatprep.subr.bf16.mxu1 %v7070_v27  ;;  %v6918_v27 = vpack.c.bf16 %v1839_v24, %v1836_v43  ;;  %v6920_v10 = vpack.c.bf16 %v1846_v32, %v1843_v38 }
 0x26e   : > { %6899 = vmatpush1.bf16.msra.mxu0 %v6898_v61  ;;  %v1852_v61 = vld [vmem:[%s11607_s12 + $0x590] sm:$0xff] }
 0x26f   : > { %6901 = vmatprep.subr.bf16.mxu0 %v6900_v42  ;;  %7073 = vmatpush3.bf16.msra.mxu1 %v7072_v56  ;;  %v6922_v42 = vpack.c.bf16 %v1845_v13, %v1842_v58  ;;  %v6924_v2 = vpack.c.bf16 %v1852_v61, %v1849_v19  ;;  %v1855_v56 = vld [vmem:[%s11607_s12 + $0x5a8] sm:$0xff]  ;;  %v1873_v13 = vld [vmem:[%s11607_s12 + $0x638] sm:$0xff]  ;;  %v1868_v19 = vld [vmem:[%s11607_s12 + $0x610] sm:$0xff] }
 0x270   : > { %7075 = vmatprep.subr.bf16.mxu1 %v7074_v12  ;;  %v6926_v12 = vpack.c.bf16 %v1851_v16, %v1848_v9  ;;  %v6928_v20 = vpack.c.bf16 %v1858_v18, %v1855_v56  ;;  %v1871_v61 = vld [vmem:[%s11607_s12 + $0x628] sm:$0xff]  ;;  %v1872_v56 = vld [vmem:[%s11607_s12 + $0x630] sm:$0xff] }
 0x271   : > { %v1879_v18 = vld [vmem:[%s11607_s12 + $0x668] sm:$0xff] }
 0x272   : > { %6903 = vmatpush1.bf16.msra.mxu0 %v6902_v60  ;;  %v1857_v60 = vld [vmem:[%s11607_s12 + $0x5b8] sm:$0xff] }
 0x273   : > { %6905 = vmatprep.subr.bf16.mxu0 %v6904_v35  ;;  %7077 = vmatpush3.bf16.msra.mxu1 %v7076_v45  ;;  %v1861_v35 = vld [vmem:[%s11607_s12 + $0x5d8] sm:$0xff]  ;;  %v6930_v53 = vpack.c.bf16 %v1857_v60, %v1854_v59  ;;  %v1874_v59 = vld [vmem:[%s11607_s12 + $0x640] sm:$0xff] }
 0x274   : > { %v6932_v45 = vpack.c.bf16 %v1864_v7, %v1861_v35  ;;  %v1877_v60 = vld [vmem:[%s11607_s12 + $0x658] sm:$0xff]  ;;  %v1928_v7 = vld [vmem:[%s11607_s12 + $0x7f0] sm:$0xff] }
 0x276   : > { %6907 = vmatpush1.bf16.msra.mxu0 %v6906_v49  ;;  %v1867_v49 = vld [vmem:[%s11607_s12 + $0x608] sm:$0xff] }
 0x277   : > { %6909 = vmatprep.subr.bf16.mxu0 %v6908_v33  ;;  %v1870_v33 = vld [vmem:[%s11607_s12 + $0x620] sm:$0xff] }
 0x278   : > { %v6936_v40 = vpack.c.bf16 %v1870_v33, %v1867_v49 }
 0x27a   : > { %6911 = vmatpush1.bf16.msra.mxu0 %v6910_v55  ;;  %v7078_v55 = vpack.c.bf16 %v1919_v25, %v1916_v21  ;;  %v1880_v21 = vld [vmem:[%s11607_s12 + $0x670] sm:$0xff]  ;;  %v1883_v25 = vld [vmem:[%s11607_s12 + $0x688] sm:$0xff] }
 0x27b   : > { %6913 = vmatprep.subr.bf16.mxu0 %v6912_v6 }
 0x27c   : > { %7079 = vmatprep.subr.bf16.mxu1 %v7078_v55  ;;  %v1934_v55 = vld [vmem:[%s11607_s12 + $0x820] sm:$0xff] }
 0x27e   : > { %6915 = vmatpush1.bf16.msra.mxu0 %v6914_v1 }
 0x27f   : > { %6917 = vmatprep.subr.bf16.mxu0 %v6916_v44 }
 0x282   : > { %6919 = vmatpush1.bf16.msra.mxu0 %v6918_v27 }
 0x283   : > { %6921 = vmatprep.subr.bf16.mxu0 %v6920_v10 }
 0x286   : > { %6923 = vmatpush1.bf16.msra.mxu0 %v6922_v42  ;;  %v1925_v42 = vld [vmem:[%s11607_s12 + $0x7d8] sm:$0xff] }
 0x287   : > { %6925 = vmatprep.subr.bf16.mxu0 %v6924_v2 }
 0x28a   : > { %6927 = vmatpush1.bf16.msra.mxu0 %v6926_v12  ;;  %v7080_v12 = vpack.c.bf16 %v1871_v61, %v1868_v19  ;;  %v1895_v19 = vld [vmem:[%s11607_s12 + $0x6e8] sm:$0xff]  ;;  %v1946_v61 = vld [vmem:[%s11607_s12 + $0x880] sm:$0xff] }
 0x28b   : > { %6929 = vmatprep.subr.bf16.mxu0 %v6928_v20 }
 0x28e   : > { %6931 = vmatpush1.bf16.msra.mxu0 %v6930_v53  ;;  %v1931_v53 = vld [vmem:[%s11607_s12 + $0x808] sm:$0xff] }
 0x28f   : > { %6933 = vmatprep.subr.bf16.mxu0 %v6932_v45 }
 0x292   : > { %6935 = vmatpush1.bf16.msra.mxu0 %v6934_v30  ;;  %v1878_v30 = vld [vmem:[%s11607_s12 + $0x660] sm:$0xff] }
 0x293   : > { %6937 = vmatprep.subr.bf16.mxu0 %v6936_v40  ;;  %v1881_v40 = vld [vmem:[%s11607_s12 + $0x678] sm:$0xff] }
 0x2c0   : > { %v9422_v6 = vpop.permute.xlu1 %7557 }
 0x2c1   : > { %v7560_v39 = vunpack.i.h.bf16 %v9422_v6  ;;  %v7559_v62 = vunpack.i.l.bf16 %v9422_v6 }
 0x2c3   : > { %v1641_v4 = vsel %vm633_vm0, %v7559_v62, %v7560_v39 }
 0x2c4   : > { %v7563_v29 = vpop.permute.xlu1 %7562  ;;  %v1668_v1 = vmax.f32 %v9053_v5, %v1641_v4  ;;  %v6946_v4 = vpack.c.bf16 %v1881_v40, %v1878_v30  ;;  %v1904_v40 = vld [vmem:[%s11607_s12 + $0x730] sm:$0xff] }
 0x2c5   : > { %v7565_v44 = vunpack.i.h.bf16 %v7563_v29  ;;  %v7564_v43 = vunpack.i.l.bf16 %v7563_v29  ;;  %v6948_v29 = vpack.c.bf16 %v1888_v57, %v1885_v41  ;;  %v1907_v41 = vld [vmem:[%s11607_s12 + $0x748] sm:$0xff]  ;;  %v1961_v57 = vld [vmem:[%s11607_s12 + $0x8f8] sm:$0xff] }
 0x2c6   : > { %2067 = vmatprep.mubr.f32.mxu0 %v1668_v1  ;;  %2374 = vmatprep.mubr.f32.mxu1 %v1668_v1  ;;  %v1884_v1 = vld [vmem:[%s11607_s12 + $0x690] sm:$0xff] }
 0x2c7   : > { %v1561_v24 = vsel %vm843_vm2, %v7544_v22, %v7564_v43  ;;  %v1562_v38 = vsel %vm843_vm2, %v7564_v43, %v7565_v44  ;;  %v1891_v43 = vld [vmem:[%s11607_s12 + $0x6c8] sm:$0xff] }
 0x2c8   : > { %v9436_v32 = vmax.f32 %v1506_v28, %v1561_v24  ;;  %v9440_v27 = vmax.f32 %v1507_v15, %v1562_v38  ;;  %v1537_v10 = vpop.permute.xlu1 %1536  ;;  %v7088_v24 = vpack.c.bf16 %v1883_v25, %v1880_v21  ;;  %v1894_v38 = vld [vmem:[%s11607_s12 + $0x6e0] sm:$0xff]  ;;  %v1908_v25 = vld [vmem:[%s11607_s12 + $0x750] sm:$0xff] }
 0x2c9   : > { %v1557_v5 = vsel %vm843_vm2, %v7555_v26, %v1537_v10  ;;  %v9457_v15 = vmax.f32 %v1502_v23, %v1537_v10  ;;  %v1869_v26 = vld [vmem:[%s11607_s12 + $0x618] sm:$0xff] }
 0x2ca   : > { %v9447_v8 = vmax.f32 %v1501_v34, %v1557_v5  ;;  %v7571_v58 = vpack.i.bf16 %v9440_v27, %v9436_v32  ;;  %v6938_v2 = vpack.c.bf16 %v1869_v26, %v1866_v17  ;;  %v1886_v5 = vld [vmem:[%s11607_s12 + $0x6a0] sm:$0xff]  ;;  %v1893_v17 = vld [vmem:[%s11607_s12 + $0x6d8] sm:$0xff] }
 0x2cb   : > { %v7568_v22 = vpop.permute.xlu0 %7567  ;;  %v1897_v26 = vld [vmem:[%s11607_s12 + $0x6f8] sm:$0xff] }
 0x2cc   : > { %v7570_v37 = vunpack.i.h.bf16 %v7568_v22  ;;  %v7569_v28 = vunpack.i.l.bf16 %v7568_v22  ;;  %1616 = vrot.lane.b32.xlu0 %v9447_v8, %s11701_s27  ;;  %7572 = vrot.lane.b32.xlu1 %v7571_v58, %s11701_s27  ;;  %v1889_v22 = vld [vmem:[%s11607_s12 + $0x6b8] sm:$0xff]  ;;  %v1940_v58 = vld [vmem:[%s11607_s12 + $0x850] sm:$0xff] }
 0x2ce   : > { %v1640_v46 = vsel %vm633_vm0, %v7569_v28, %v7559_v62  ;;  %v1636_v51 = vsel %vm633_vm0, %v7550_v11, %v7570_v37  ;;  %v1922_v11 = vld [vmem:[%s11607_s12 + $0x7c0] sm:$0xff]  ;;  %v1937_v62 = vld [vmem:[%s11607_s12 + $0x838] sm:$0xff] }
 0x2cf   : > { %v9459_v0 = vpop.permute.xlu0 %1614  ;;  %v1667_v34 = vmax.f32 %v9137_v47, %v1640_v46  ;;  %v1876_v47 = vld [vmem:[%s11607_s12 + $0x650] sm:$0xff]  ;;  %v1662_v9 = vmax.f32 %v8930_v36, %v1636_v51  ;;  %v1882_v36 = vld [vmem:[%s11607_s12 + $0x680] sm:$0xff]  ;;  %v7082_v20 = vpack.c.bf16 %v1925_v42, %v1922_v11  ;;  %v7090_v10 = vpack.c.bf16 %v1937_v62, %v1934_v55  ;;  %v1911_v55 = vld [vmem:[%s11607_s12 + $0x768] sm:$0xff] }
 0x2d0   : > { %v1637_v23 = vsel %vm633_vm0, %v7570_v37, %v9459_v0  ;;  %1618 = vrot.lane.b32.xlu1 %v9457_v15, %s11701_s27  ;;  %v6940_v16 = vpack.c.bf16 %v1876_v47, %v1873_v13  ;;  %v6944_v33 = vpack.c.bf16 %v1882_v36, %v1879_v18  ;;  %v1943_v37 = vld [vmem:[%s11607_s12 + $0x868] sm:$0xff]  ;;  %v6952_v46 = vpack.c.bf16 %v1894_v38, %v1891_v43  ;;  %v1900_v51 = vld [vmem:[%s11607_s12 + $0x710] sm:$0xff]  ;;  %v1901_v36 = vld [vmem:[%s11607_s12 + $0x718] sm:$0xff] }
 0x2d1   : > { %2068 = vmatmul.mubr.f32.gmra.mrb[2].mxu0 %v1667_v34  ;;  %v1663_v54 = vmax.f32 %v9141_v63, %v1637_v23  ;;  %2375 = vmatmul.mubr.f32.gmra.mrb[2].mxu1 %v1667_v34  ;;  %v1875_v63 = vld [vmem:[%s11607_s12 + $0x648] sm:$0xff]  ;;  %v1890_v34 = vld [vmem:[%s11607_s12 + $0x6c0] sm:$0xff]  ;;  %v7092_v13 = vpack.c.bf16 %v1889_v22, %v1886_v5  ;;  %v7094_v23 = vpack.c.bf16 %v1943_v37, %v1940_v58  ;;  %v1892_v47 = vld [vmem:[%s11607_s12 + $0x6d0] sm:$0xff] }
 0x2d2   : > { %v6942_v3 = vpack.c.bf16 %v1875_v63, %v1872_v56  ;;  %v6954_v11 = vpack.c.bf16 %v1893_v17, %v1890_v34  ;;  %v6956_v42 = vpack.c.bf16 %v1900_v51, %v1897_v26  ;;  %v7096_v56 = vpack.c.bf16 %v1895_v19, %v1892_v47  ;;  %v1906_v63 = vld [vmem:[%s11607_s12 + $0x740] sm:$0xff]  ;;  %v1915_v62 = vld [vmem:[%s11607_s12 + $0x788] sm:$0xff]  ;;  %v1913_v43 = vld [vmem:[%s11607_s12 + $0x778] sm:$0xff] }
 0x2d3   : > { %2138 = vmatprep.mubr.f32.mxu0 %v1663_v54  ;;  %2444 = vmatprep.mubr.f32.mxu1 %v1663_v54  ;;  %v1949_v54 = vld [vmem:[%s11607_s12 + $0x898] sm:$0xff]  ;;  %v1924_v37 = vld [vmem:[%s11607_s12 + $0x7d0] sm:$0xff]  ;;  %v1923_v17 = vld [vmem:[%s11607_s12 + $0x7c8] sm:$0xff] }
 0x2d4   : > { %v1551_v35 = vpop.permute.xlu0 %1550  ;;  %v7098_v18 = vpack.c.bf16 %v1949_v54, %v1946_v61  ;;  %v1917_v5 = vld [vmem:[%s11607_s12 + $0x798] sm:$0xff]  ;;  %v1920_v34 = vld [vmem:[%s11607_s12 + $0x7b0] sm:$0xff]  ;;  %v1927_v26 = vld [vmem:[%s11607_s12 + $0x7e8] sm:$0xff] }
 0x2d5   : > { %2139 = vmatmul.mubr.f32.vlgmr.msra.gmra.mrb[0].mxu0 %v1662_v9  ;;  %v1563_v45 = vsel %vm843_vm2, %v7565_v44, %v1551_v35  ;;  %v9522_v52 = vmax.f32 %v1509_v48, %v1551_v35  ;;  %2445 = vmatmul.mubr.f32.vlgmr.msra.gmra.mrb[4].mxu1 %v1662_v9  ;;  %v7084_v48 = vpack.c.bf16 %v1877_v60, %v1874_v59  ;;  %v1887_v44 = vld [vmem:[%s11607_s12 + $0x6a8] sm:$0xff]  ;;  %v1921_v58 = vld [vmem:[%s11607_s12 + $0x7b8] sm:$0xff]  ;;  %v1926_v47 = vld [vmem:[%s11607_s12 + $0x7e0] sm:$0xff]  ;;  %vm2738_vm2 = vcmask 777216  }
 0x2d6   : > { %6939 = vmatpush1.bf16.msra.mxu0 %v6938_v2  ;;  %v9526_v49 = vmax.f32 %v1508_v14, %v1563_v45  ;;  %7081 = vmatpush3.bf16.msra.mxu1 %v7080_v12  ;;  %v7086_v14 = vpack.c.bf16 %v1931_v53, %v1928_v7  ;;  %v6950_v28 = vpack.c.bf16 %v1887_v44, %v1884_v1  ;;  %v1896_v2 = vld [vmem:[%s11607_s12 + $0x6f0] sm:$0xff]  ;;  %v1899_v9 = vld [vmem:[%s11607_s12 + $0x708] sm:$0xff]  ;;  %v1898_v12 = vld [vmem:[%s11607_s12 + $0x700] sm:$0xff] }
 0x2d7   : > { %6941 = vmatprep.subr.bf16.mxu0 %v6940_v16  ;;  %1632 = vrot.lane.b32.xlu1 %v9522_v52, %s11701_s27  ;;  %v1903_v16 = vld [vmem:[%s11607_s12 + $0x728] sm:$0xff]  ;;  %v6958_v60 = vpack.c.bf16 %v1899_v9, %v1896_v2  ;;  %v1902_v7 = vld [vmem:[%s11607_s12 + $0x720] sm:$0xff]  ;;  %v1905_v53 = vld [vmem:[%s11607_s12 + $0x738] sm:$0xff]  ;;  %v6974_v51 = vpack.c.bf16 %v1923_v17, %v1920_v34 }
 0x2d8   : > { %7083 = vmatprep.subr.bf16.mxu1 %v7082_v20  ;;  %1630 = vrot.lane.b32.xlu0 %v9526_v49, %s11701_s27  ;;  %v1952_v20 = vld [vmem:[%s11607_s12 + $0x8b0] sm:$0xff]  ;;  %v1955_v59 = vld [vmem:[%s11607_s12 + $0x8c8] sm:$0xff]  ;;  %v6960_v35 = vpack.c.bf16 %v1906_v63, %v1903_v16  ;;  %v1909_v45 = vld [vmem:[%s11607_s12 + $0x758] sm:$0xff] }
 0x2d9   : > { %v7102_v30 = vpack.c.bf16 %v1955_v59, %v1952_v20  ;;  %v1910_v44 = vld [vmem:[%s11607_s12 + $0x760] sm:$0xff]  ;;  %v1929_v19 = vld [vmem:[%s11607_s12 + $0x7f8] sm:$0xff]  ;;  %v1936_v54 = vld [vmem:[%s11607_s12 + $0x830] sm:$0xff] }
 0x2da   : > { %6943 = vmatpush1.bf16.msra.mxu0 %v6942_v3  ;;  %7085 = vmatpush3.bf16.msra.mxu1 %v7084_v48  ;;  %v7100_v3 = vpack.c.bf16 %v1901_v36, %v1898_v12  ;;  %v1958_v48 = vld [vmem:[%s11607_s12 + $0x8e0] sm:$0xff]  ;;  %v7108_v22 = vpack.c.bf16 %v1913_v43, %v1910_v44  ;;  %v1933_v61 = vld [vmem:[%s11607_s12 + $0x818] sm:$0xff]  ;;  %v1932_v2 = vld [vmem:[%s11607_s12 + $0x810] sm:$0xff] }
 0x2db   : > { %6945 = vmatprep.subr.bf16.mxu0 %v6944_v33  ;;  %7087 = vmatprep.subr.bf16.mxu1 %v7086_v14  ;;  %v1912_v33 = vld [vmem:[%s11607_s12 + $0x770] sm:$0xff]  ;;  %v6962_v14 = vpack.c.bf16 %v1905_v53, %v1902_v7  ;;  %v7106_v1 = vpack.c.bf16 %v1961_v57, %v1958_v48  ;;  %v1935_v9 = vld [vmem:[%s11607_s12 + $0x828] sm:$0xff]  ;;  %v1938_v12 = vld [vmem:[%s11607_s12 + $0x840] sm:$0xff] }
 0x2dc   : > { %v6964_v21 = vpack.c.bf16 %v1912_v33, %v1909_v45  ;;  %v1939_v16 = vld [vmem:[%s11607_s12 + $0x848] sm:$0xff]  ;;  %v6982_v63 = vpack.c.bf16 %v1935_v9, %v1932_v2  ;;  %v1941_v36 = vld [vmem:[%s11607_s12 + $0x858] sm:$0xff]  ;;  %v1948_v59 = vld [vmem:[%s11607_s12 + $0x890] sm:$0xff] }
 0x2dd   : > { %v1945_v20 = vld [vmem:[%s11607_s12 + $0x878] sm:$0xff]  ;;  %v1944_v7 = vld [vmem:[%s11607_s12 + $0x870] sm:$0xff]  ;;  %v1947_v53 = vld [vmem:[%s11607_s12 + $0x888] sm:$0xff] }
 0x2de   : > { %6947 = vmatpush1.bf16.msra.mxu0 %v6946_v4  ;;  %7089 = vmatpush3.bf16.msra.mxu1 %v7088_v24  ;;  %v7104_v4 = vpack.c.bf16 %v1907_v41, %v1904_v40  ;;  %v6966_v24 = vpack.c.bf16 %v1911_v55, %v1908_v25  ;;  %v1951_v45 = vld [vmem:[%s11607_s12 + $0x8a8] sm:$0xff]  ;;  %v6990_v33 = vpack.c.bf16 %v1947_v53, %v1944_v7  ;;  %v1950_v40 = vld [vmem:[%s11607_s12 + $0x8a0] sm:$0xff]  ;;  %v1953_v41 = vld [vmem:[%s11607_s12 + $0x8b8] sm:$0xff] }
 0x2df   : > { %6949 = vmatprep.subr.bf16.mxu0 %v6948_v29  ;;  %7091 = vmatprep.subr.bf16.mxu1 %v7090_v10  ;;  %v1918_v29 = vld [vmem:[%s11607_s12 + $0x7a0] sm:$0xff]  ;;  %v1957_v48 = vld [vmem:[%s11607_s12 + $0x8d8] sm:$0xff]  ;;  %v1960_v57 = vld [vmem:[%s11607_s12 + $0x8f0] sm:$0xff] }
 0x2e0   : > { %v6968_v38 = vpack.c.bf16 %v1918_v29, %v1915_v62  ;;  %v1914_v10 = vld [vmem:[%s11607_s12 + $0x780] sm:$0xff]  ;;  %v1956_v25 = vld [vmem:[%s11607_s12 + $0x8d0] sm:$0xff]  ;;  %v1959_v55 = vld [vmem:[%s11607_s12 + $0x8e8] sm:$0xff] }
 0x2e1   : > { %v1963_v62 = vld [vmem:[%s11607_s12 + $0x908] sm:$0xff]  ;;  %v6998_v29 = vpack.c.bf16 %v1959_v55, %v1956_v25  ;;  %v1974_v9 = vld [vmem:[%s11607_s12 + $0x960] sm:$0xff] }
 0x2e2   : > { %6951 = vmatpush1.bf16.msra.mxu0 %v6950_v28  ;;  %7093 = vmatpush3.bf16.msra.mxu1 %v7092_v13  ;;  %v6970_v28 = vpack.c.bf16 %v1917_v5, %v1914_v10  ;;  %v1930_v13 = vld [vmem:[%s11607_s12 + $0x800] sm:$0xff] }
 0x2e3   : > { %6953 = vmatprep.subr.bf16.mxu0 %v6952_v46  ;;  %7095 = vmatprep.subr.bf16.mxu1 %v7094_v23  ;;  %v6972_v46 = vpack.c.bf16 %v1924_v37, %v1921_v58  ;;  %v6976_v23 = vpack.c.bf16 %v1930_v13, %v1927_v26  ;;  %v1962_v26 = vld [vmem:[%s11607_s12 + $0x900] sm:$0xff]  ;;  %v1965_v13 = vld [vmem:[%s11607_s12 + $0x918] sm:$0xff] }
 0x2e6   : > { %6955 = vmatpush1.bf16.msra.mxu0 %v6954_v11  ;;  %7097 = vmatpush3.bf16.msra.mxu1 %v7096_v56  ;;  %v6978_v11 = vpack.c.bf16 %v1929_v19, %v1926_v47  ;;  %v1942_v56 = vld [vmem:[%s11607_s12 + $0x860] sm:$0xff]  ;;  %v1971_v47 = vld [vmem:[%s11607_s12 + $0x948] sm:$0xff] }
 0x2e7   : > { %6957 = vmatprep.subr.bf16.mxu0 %v6956_v42  ;;  %7099 = vmatprep.subr.bf16.mxu1 %v7098_v18  ;;  %v6980_v42 = vpack.c.bf16 %v1936_v54, %v1933_v61  ;;  %v6984_v18 = vpack.c.bf16 %v1942_v56, %v1939_v16  ;;  %v1975_v61 = vld [vmem:[%s11607_s12 + $0x968] sm:$0xff]  ;;  %v1977_v16 = vld [vmem:[%s11607_s12 + $0x978] sm:$0x1] }
 0x2ea   : > { %6959 = vmatpush1.bf16.msra.mxu0 %v6958_v60  ;;  %7101 = vmatpush3.bf16.msra.mxu1 %v7100_v3  ;;  %v6986_v60 = vpack.c.bf16 %v1941_v36, %v1938_v12  ;;  %v1954_v3 = vld [vmem:[%s11607_s12 + $0x8c0] sm:$0xff]  ;;  %v1964_v12 = vld [vmem:[%s11607_s12 + $0x910] sm:$0xff]  ;;  %v1967_v36 = vld [vmem:[%s11607_s12 + $0x928] sm:$0xff] }
 0x2eb   : > { %6961 = vmatprep.subr.bf16.mxu0 %v6960_v35  ;;  %7103 = vmatprep.subr.bf16.mxu1 %v7102_v30  ;;  %v6988_v35 = vpack.c.bf16 %v1948_v59, %v1945_v20  ;;  %v6992_v30 = vpack.c.bf16 %v1954_v3, %v1951_v45  ;;  %v1970_v59 = vld [vmem:[%s11607_s12 + $0x940] sm:$0xff]  ;;  %v1976_v45 = vld [vmem:[%s11607_s12 + $0x970] sm:$0xff]  ;;  %v1979_v3 = vld [vmem:[%s11607_s12 + $0x988] sm:$0x1] }
 0x2ee   : > { %6963 = vmatpush1.bf16.msra.mxu0 %v6962_v14  ;;  %7105 = vmatpush3.bf16.msra.mxu1 %v7104_v4  ;;  %v6994_v14 = vpack.c.bf16 %v1953_v41, %v1950_v40  ;;  %v1966_v4 = vld [vmem:[%s11607_s12 + $0x920] sm:$0xff] }
 0x2ef   : > { %6965 = vmatprep.subr.bf16.mxu0 %v6964_v21  ;;  %7107 = vmatprep.subr.bf16.mxu1 %v7106_v1  ;;  %v6996_v21 = vpack.c.bf16 %v1960_v57, %v1957_v48  ;;  %v7000_v1 = vpack.c.bf16 %v1966_v4, %v1963_v62 }
 0x2f2   : > { %6967 = vmatpush1.bf16.msra.mxu0 %v6966_v24  ;;  %7109 = vmatpush3.bf16.msra.mxu1 %v7108_v22 }
 0x2f3   : > { %6969 = vmatprep.subr.bf16.mxu0 %v6968_v38 }
 0x2f6   : > { %6971 = vmatpush1.bf16.msra.mxu0 %v6970_v28 }
 0x2f7   : > { %6973 = vmatprep.subr.bf16.mxu0 %v6972_v46 }
 0x2fa   : > { %6975 = vmatpush1.bf16.msra.mxu0 %v6974_v51  ;;  %v7002_v51 = vpack.c.bf16 %v1965_v13, %v1962_v26 }
 0x2fb   : > { %6977 = vmatprep.subr.bf16.mxu0 %v6976_v23 }
 0x2fe   : > { %6979 = vmatpush1.bf16.msra.mxu0 %v6978_v11 }
 0x2ff   : > { %6981 = vmatprep.subr.bf16.mxu0 %v6980_v42 }
 0x302   : > { %6983 = vmatpush1.bf16.msra.mxu0 %v6982_v63 }
 0x303   : > { %6985 = vmatprep.subr.bf16.mxu0 %v6984_v18 }
 0x306   : > { %6987 = vmatpush1.bf16.msra.mxu0 %v6986_v60  ;;  %v1973_v60 = vld [vmem:[%s11607_s12 + $0x958] sm:$0xff] }
 0x307   : > { %6989 = vmatprep.subr.bf16.mxu0 %v6988_v35  ;;  %v7602_v35 = vmov 0.0   ;;  %v7114_v53 = vpack.c.bf16 %v1973_v60, %v1970_v59 }
 0x30a   : > { %6991 = vmatpush1.bf16.msra.mxu0 %v6990_v33 }
 0x30b   : > { %6993 = vmatprep.subr.bf16.mxu0 %v6992_v30  ;;  %v7118_v30 = vpack.c.bf16 %v1979_v3, %v1976_v45 }
 0x30e   : > { %6995 = vmatpush1.bf16.msra.mxu0 %v6994_v14 }
 0x30f   : > { %6997 = vmatprep.subr.bf16.mxu0 %v6996_v21 }
 0x312   : > { %6999 = vmatpush1.bf16.msra.mxu0 %v6998_v29 }
 0x313   : > { %7001 = vmatprep.subr.bf16.mxu0 %v7000_v1 }
 0x328   : > { %v6213_v44 = vpop.f32.mrb[0].mxu1 }
 0x329   : > { %v6214_v43 = vpop.f32.mrb[1].mxu1 }
 0x32a   : > { %v9766_v24 = vadd.f32 %v6214_v43, %v6213_v44 }
 0x33e   : > { %v7573_v38 = vpop.permute.xlu1 %7572  ;;  %v1617_v22 = vpop.permute.xlu0 %1616 }
 0x33f   : > { %v7575_v10 = vunpack.i.h.bf16 %v7573_v38  ;;  %v7574_v5 = vunpack.i.l.bf16 %v7573_v38  ;;  %v1638_v6 = vsel %vm633_vm0, %v9459_v0, %v1617_v22 }
 0x340   : > { %v1664_v23 = vmax.f32 %v9194_v31, %v1638_v6  ;;  %v1978_v31 = vld [vmem:[%s11607_s12 + $0x980] sm:$0x1] }
 0x341   : > { %v1643_v58 = vsel %vm633_vm0, %v7574_v5, %v7575_v10  ;;  %v1642_v37 = vsel %vm633_vm0, %v7560_v39, %v7574_v5  ;;  %v7008_v18 = vpack.c.bf16 %v1978_v31, %v1975_v61  ;;  %v3033_v61 = vld [vmem:[%s11603_s8 + $0x18] sm:$0xff]  ;;  %v2970_v31 = vld [vmem:[%s11602_s7 + $0x20] sm:$0xff] }
 0x342   : > { %v1619_v28 = vpop.permute.xlu1 %1618  ;;  %v1670_v46 = vmax.f32 %v9436_v32, %v1643_v58  ;;  %v1669_v34 = vmax.f32 %v9057_v50, %v1642_v37  ;;  %v1969_v50 = vld [vmem:[%s11607_s12 + $0x938] sm:$0xff]  ;;  %v1972_v32 = vld [vmem:[%s11607_s12 + $0x950] sm:$0xff] }
 0x343   : > { %v1639_v17 = vsel %vm633_vm0, %v1617_v22, %v1619_v28  ;;  %v7004_v0 = vpack.c.bf16 %v1972_v32, %v1969_v50  ;;  %v1666_v7 = vmax.f32 %v9457_v15, %v1619_v28  ;;  %v2777_v50 = vld [vmem:[%s11597_s2 + $0x8] sm:$0xff]  ;;  %v2966_v32 = vld [vmem:[%s11602_s7] sm:$0xff] }
 0x344   : > { %2144 = vmatprep.mubr.f32.mxu0 %v1670_v46  ;;  %2449 = vmatprep.mubr.f32.mxu1 %v1670_v46  ;;  %v1665_v39 = vmax.f32 %v9447_v8, %v1639_v17  ;;  %v1968_v8 = vld [vmem:[%s11607_s12 + $0x930] sm:$0xff] }
 0x345   : > { %2145 = vmatmul.mubr.f32.gmra.mrb[2].mxu0 %v1669_v34  ;;  %2450 = vmatmul.mubr.f32.gmra.mrb[6].mxu1 %v1669_v34  ;;  %v7006_v11 = vpack.c.bf16 %v1971_v47, %v1968_v8  ;;  %v2968_v8 = vld [vmem:[%s11602_s7 + $0x10] sm:$0xff] }
 0x346   : > { %2215 = vmatprep.mubr.f32.mxu0 %v1665_v39  ;;  %2519 = vmatprep.mubr.f32.mxu1 %v1665_v39  ;;  %v3032_v47 = vld [vmem:[%s11603_s8 + $0x10] sm:$0xff] }
 0x349   : > { %v1633_v19 = vpop.permute.xlu1 %1632  ;;  %2216 = vmatmul.mubr.f32.vlgmr.msra.gmra.mrb[0].mxu0 %v1664_v23  ;;  %2520 = vmatmul.mubr.f32.vlgmr.msra.gmra.mrb[8].mxu1 %v1664_v23  ;;  %v2967_v23 = vld [vmem:[%s11602_s7 + $0x8] sm:$0xff] }
 0x34a   : > { %7003 = vmatpush1.bf16.msra.mxu0 %v7002_v51  ;;  %v1631_v54 = vpop.permute.xlu0 %1630  ;;  %v1673_v33 = vmax.f32 %v9522_v52, %v1633_v19  ;;  %v3030_v51 = vld [vmem:[%s11603_s8] sm:$0xff] }
 0x34b   : > { %v1644_v42 = vsel %vm633_vm0, %v7575_v10, %v1631_v54  ;;  %v1645_v2 = vsel %vm633_vm0, %v1631_v54, %v1633_v19  ;;  %7005 = vmatprep.subr.bf16.mxu0 %v7004_v0  ;;  %v3031_v0 = vld [vmem:[%s11603_s8 + $0x8] sm:$0xff]  ;;  %v2969_v19 = vld [vmem:[%s11602_s7 + $0x18] sm:$0xff]  ;;  %v3034_v54 = vld [vmem:[%s11603_s8 + $0x20] sm:$0xff] }
 0x34c   : > { %v1672_v56 = vmax.f32 %v9526_v49, %v1645_v2  ;;  %v1671_v63 = vmax.f32 %v9440_v27, %v1644_v42  ;;  %v7011_v49 = vpack.c.bf16 %v1977_v16, %v1974_v9  ;;  %v7110_v27 = vpack.c.bf16 %v1967_v36, %v1964_v12  ;;  %v3035_v42 = vld [vmem:[%s11603_s8 + $0x28] sm:$0xff]  ;;  %v2972_v2 = vld [vmem:[%s11602_s7 + $0x30] sm:$0xff]  ;;  %v2973_v16 = vld [vmem:[%s11602_s7 + $0x38] sm:$0xff] }
 0x34d   : > { %v3036_v9 = vld [vmem:[%s11603_s8 + $0x30] sm:$0xff] }
 0x34e   : > { %7007 = vmatpush1.bf16.msra.mxu0 %v7006_v11  ;;  %2221 = vmatprep.mubr.f32.mxu0 %v1672_v56  ;;  %v2971_v11 = vld [vmem:[%s11602_s7 + $0x28] sm:$0xff] }
 0x34f   : > { %2524 = vmatprep.mubr.f32.mxu1 %v1672_v56  ;;  %2222 = vmatmul.mubr.f32.gmra.mrb[2].mxu0 %v1671_v63  ;;  %v3037_v56 = vld [vmem:[%s11603_s8 + $0x38] sm:$0xff] }
 0x350   : > { %2525 = vmatmul.mubr.f32.gmra.mrb[10].mxu1 %v1671_v63  ;;  %7010 = vmatprep.subr.msk.bf16.mxu0 %vm9820_vm10, %v7008_v18 }
 0x351   : > { %2292 = vmatprep.mubr.f32.mxu0 %v7602_v35  ;;  %6128 = vmatprep.mubr.msk.f32.mxu1 %vm2828_vm12, %v2777_v50 }
 0x352   : > { %7013 = vmatpush1.bf16.msk.msra.mxu0 %vm9820_vm10, %v7011_v49 }
 0x353   : > { %7111 = vmatprep.subr.bf16.mxu0 %v7110_v27 }
 0x355   : > { %6123 = vmatmul.mubr.msk.f32.vlgmr.msra.gmra.mrb[0].mxu0 %vm1980_vm11, %v1666_v7 }
 0x356   : > { %7113 = vmatpush3.bf16.msra.mxu0 %v7110_v27  ;;  %2298 = vmatprep.mubr.f32.mxu0 %v7602_v35 }
 0x357   : > { %7115 = vmatprep.subr.bf16.mxu0 %v7114_v53 }
 0x359   : > { %6124 = vmatmul.mubr.msk.f32.gmra.mrb[2].mxu0 %vm1980_vm11, %v1673_v33 }
 0x35a   : > { %7117 = vmatpush3.bf16.msra.mxu0 %v7114_v53  ;;  %6692 = vmatprep.mubr.msk.f32.mxu0 %vm1980_vm11, %v1666_v7 }
 0x35b   : > { %7120 = vmatprep.subr.msk.bf16.mxu0 %vm9820_vm10, %v7118_v30 }
 0x35e   : > { %7123 = vmatpush3.bf16.msk.msra.mxu0 %vm9820_vm10, %v7118_v30  ;;  %vm6056_vm10 = vcmask 1024  }
 0x361   : > { %6693 = vmatmul.mubr.msk.f32.vlgmr.msra.gmra.mrb[4].mxu0 %vm1980_vm11, %v1673_v33  ;;  %vm6054_vm11 = vcmask 7168  }
 0x3a4   : > { %v6216_v15 = vpop.f32.mrb[2].mxu1 }
 0x3a5   : > { %v6217_v40 = vpop.f32.mrb[3].mxu1 }
 0x3a6   : > { %v6218_v41 = vadd.f32 %v6217_v40, %v6216_v15 }
 0x3a8   : > { %v6251_v48 = vpop.f32.mrb[4].mxu1 }
 0x3a9   : > { %v6252_v52 = vpop.f32.mrb[5].mxu1 }
 0x3aa   : > { %v6253_v57 = vadd.f32 %v6252_v52, %v6251_v48 }
 0x3ac   : > { %v2447_v14 = vadd.f32 %v6253_v57, %v9766_v24 }
 0x418   : > { %v6254_v21 = vpop.f32.mrb[6].mxu1 }
 0x419   : > { %v6255_v25 = vpop.f32.mrb[7].mxu1 }
 0x41a   : > { %v6256_v55 = vadd.f32 %v6255_v25, %v6254_v21 }
 0x41c   : > { %v2452_v62 = vadd.f32 %v6256_v55, %v6218_v41  ;;  %v6289_v4 = vpop.f32.mrb[8].mxu1 }
 0x41d   : > { %v6290_v29 = vpop.f32.mrb[9].mxu1 }
 0x41e   : > { %v6291_v1 = vadd.f32 %v6290_v29, %v6289_v4 }
 0x420   : > { %v2522_v44 = vadd.f32 %v6291_v1, %v2447_v14 }
 0x423   : > { %v6292_v43 = vpop.f32.mrb[10].mxu1 }
 0x424   : > { %v6293_v38 = vpop.f32.mrb[11].mxu1 }
 0x425   : > { %v6294_v10 = vadd.f32 %v6293_v38, %v6292_v43 }
 0x427   : > { %v2527_v5 = vadd.f32 %v6294_v10, %v2452_v62 }
 0x428   : > { %v2294_v22 = vpop.f32.mrb[0].mxu0 }
 0x429   : > { %2613 = vrot.lane.b32.xlu0 %v2294_v22, %s11701_s27  ;;  %v2296_v58 = vpop.f32.mrb[1].mxu0 }
 0x42a   : > { %2606 = vst.msk [vmem:[#allocation2 + $0x8] sm:$0xff] %vm1053_vm4, %v2296_v58  ;;  %2615 = vrot.lane.b32.xlu1 %v2296_v58, %s11701_s27 }
 0x42c   : > { %v2300_v24 = vpop.f32.mrb[2].mxu0 }
 0x42d   : > { %2631 = vrot.lane.b32.xlu0 %v2294_v22, %s11715_s17  ;;  %v2302_v37 = vpop.f32.mrb[3].mxu0  ;;  %v7126_v28 = vpack.c.bf16 %v2300_v24, %v2294_v22 }
 0x42e   : > { %2608 = vst.msk [vmem:[#allocation2 + $0x18] sm:$0xff] %vm1053_vm4, %v2302_v37  ;;  %2633 = vrot.lane.b32.xlu1 %v2296_v58, %s11715_s17 }
 0x431   : > { %2649 = vrot.lane.b32.xlu0 %v2294_v22, %s7603_s25  ;;  %v2793_v26 = vld [vmem:[#allocation2 + $0x8] sm:$0xff] }
 0x432   : > { %2651 = vrot.lane.b32.xlu1 %v2296_v58, %s7603_s25 }
 0x434   : > { %v6694_v46 = vpop.f32.mrb[4].mxu0 }
 0x435   : > { %v2602_v34 = vadd.f32 %v6694_v46, %v2527_v5  ;;  %2668 = vrot.lane.b32.xlu0 %v2294_v22, %s7604_s24  ;;  %v2596_v17 = vpop.f32.mrb[5].mxu0  ;;  %v2795_v13 = vld [vmem:[#allocation2 + $0x18] sm:$0xff] }
 0x436   : > { %v2597_v6 = vadd.f32 %v2596_v17, %v2522_v44  ;;  %2670 = vrot.lane.b32.xlu1 %v2296_v58, %s7604_s24  ;;  %v7124_v39 = vpack.c.bf16 %v2795_v13, %v2793_v26 }
 0x438   : > { %7125 = vmatprep.subr.bf16.mxu1 %v7124_v39 }
 0x439   : > { %2687 = vrot.lane.b32.xlu0 %v2294_v22, %s11653_s28  ;;  %7127 = vmatpush1.bf16.msra.mxu1 %v7126_v28 }
 0x43a   : > { %2689 = vrot.lane.b32.xlu1 %v2296_v58, %s11653_s28 }
 0x43d   : > { %2706 = vrot.lane.b32.xlu0 %v2294_v22, %s11716_s29 }
 0x43e   : > { %2708 = vrot.lane.b32.xlu1 %v2296_v58, %s11716_s29 }
 0x441   : > { %2726 = vrot.lane.b32.xlu0 %v2294_v22, %s7606_s30 }
 0x442   : > { %2732 = vrot.lane.b32.xlu1 %v2300_v24, %s7606_s30 }
 0x445   : > { %2728 = vrot.lane.b32.xlu0 %v2296_v58, %s7606_s30 }
 0x446   : > { %2619 = vrot.lane.b32.xlu1 %v2302_v37, %s11701_s27 }
 0x449   : > { %2753 = vrot.lane.b32.xlu0 %v2296_v58, %s7607_s20 }
 0x44a   : > { %2637 = vrot.lane.b32.xlu1 %v2302_v37, %s11715_s17 }
 0x44d   : > { %2617 = vrot.lane.b32.xlu0 %v2300_v24, %s11701_s27 }
 0x44e   : > { %2655 = vrot.lane.b32.xlu1 %v2302_v37, %s7603_s25 }
 0x451   : > { %2635 = vrot.lane.b32.xlu0 %v2300_v24, %s11715_s17 }
 0x452   : > { %2674 = vrot.lane.b32.xlu1 %v2302_v37, %s7604_s24 }
 0x455   : > { %2653 = vrot.lane.b32.xlu0 %v2300_v24, %s7603_s25 }
 0x456   : > { %2693 = vrot.lane.b32.xlu1 %v2302_v37, %s11653_s28 }
 0x459   : > { %2672 = vrot.lane.b32.xlu0 %v2300_v24, %s7604_s24  ;;  %s7610_s24 = smov 118  }
 0x45a   : > { %2712 = vrot.lane.b32.xlu1 %v2302_v37, %s11716_s29 }
 0x45d   : > { %2691 = vrot.lane.b32.xlu0 %v2300_v24, %s11653_s28  ;;  %s7619_s28 = smov 120  }
 0x45e   : > { %2736 = vrot.lane.b32.xlu1 %v2602_v34, %s7606_s30 }
 0x461   : > { %2710 = vrot.lane.b32.xlu0 %v2300_v24, %s11716_s29  ;;  %s7612_s29 = smov 117  }
 0x462   : > { %2761 = vrot.lane.b32.xlu1 %v2602_v34, %s7607_s20 }
 0x465   : > { %2734 = vrot.lane.b32.xlu0 %v2302_v37, %s7606_s30 }
 0x466   : > { %2730 = vrot.lane.b32.xlu1 %v2597_v6, %s7606_s30  ;;  %s7616_s30 = smov 124  }
 0x469   : > { %2759 = vrot.lane.b32.xlu0 %v2302_v37, %s7607_s20 }
 0x46a   : > { %2755 = vrot.lane.b32.xlu1 %v2597_v6, %s7607_s20 }
 0x46d   : > { %2751 = vrot.lane.b32.xlu0 %v2294_v22, %s7607_s20 }
 0x46e   : > { %2757 = vrot.lane.b32.xlu1 %v2300_v24, %s7607_s20  ;;  %s7613_s20 = smov 108  }
 0x471   : > { %2976 = vperm.xlu0 %7521, %v2966_v32  }
 0x472   : > { %3040 = vperm.xlu1 %7525, %v3030_v51  }
 0x475   : > { %2981 = vperm.xlu0 %7521, %v2967_v23  }
 0x476   : > { %3045 = vperm.xlu1 %7525, %v3031_v0  }
 0x479   : > { %2986 = vperm.xlu0 %7521, %v2968_v8  }
 0x47a   : > { %3050 = vperm.xlu1 %7525, %v3032_v47  }
 0x47d   : > { %2991 = vperm.xlu0 %7521, %v2969_v19  }
 0x47e   : > { %3055 = vperm.xlu1 %7525, %v3033_v61  }
 0x481   : > { %2996 = vperm.xlu0 %7521, %v2970_v31  }
 0x482   : > { %3060 = vperm.xlu1 %7525, %v3034_v54  }
 0x485   : > { %3001 = vperm.xlu0 %7521, %v2971_v11  }
 0x486   : > { %3065 = vperm.xlu1 %7525, %v3035_v42  }
 0x489   : > { %3006 = vperm.xlu0 %7521, %v2972_v2  }
 0x48a   : > { %3070 = vperm.xlu1 %7525, %v3036_v9  }
 0x48d   : > { %3011 = vperm.xlu0 %7521, %v2973_v16  }
 0x48e   : > { %3075 = vperm.xlu1 %7525, %v3037_v56  }
 0x49b   : > { %v2614_v63 = vpop.permute.xlu0 %2613 }
 0x49c   : > { %v2616_v18 = vpop.permute.xlu1 %2615 }
 0x49d   : > { %v2621_v12 = vsel %vm633_vm0, %v2614_v63, %v2616_v18  ;;  %2628 = vst.msk [vmem:[#allocation2 + $0x28] sm:$0xff] %vm1053_vm4, %v2616_v18 }
 0x49f   : > { %v2632_v36 = vpop.permute.xlu0 %2631 }
 0x4a0   : > { %v2634_v20 = vpop.permute.xlu1 %2633 }
 0x4a1   : > { %v2639_v49 = vsel %vm738_vm1, %v2632_v36, %v2634_v20  ;;  %2646 = vst.msk [vmem:[#allocation2 + $0x48] sm:$0xff] %vm1053_vm4, %v2634_v20 }
 0x4a3   : > { %v2650_v27 = vpop.permute.xlu0 %2649 }
 0x4a4   : > { %v2652_v59 = vpop.permute.xlu1 %2651  ;;  %v2797_v29 = vld [vmem:[#allocation2 + $0x28] sm:$0xff] }
 0x4a5   : > { %v2658_v60 = vsel %vm2657_vm13, %v2650_v27, %v2652_v59  ;;  %2665 = vst.msk [vmem:[#allocation2 + $0x68] sm:$0xff] %vm1053_vm4, %v2652_v59 }
 0x4a7   : > { %v2669_v35 = vpop.permute.xlu0 %2668 }
 0x4a8   : > { %v2671_v7 = vpop.permute.xlu1 %2670  ;;  %v2801_v22 = vld [vmem:[#allocation2 + $0x48] sm:$0xff] }
 0x4a9   : > { %v9932_v53 = vsel %vm2676_vm14, %v2669_v35, %v2671_v7  ;;  %2684 = vst.msk [vmem:[#allocation2 + $0x88] sm:$0xff] %vm1053_vm4, %v2671_v7 }
 0x4ab   : > { %v2688_v45 = vpop.permute.xlu0 %2687 }
 0x4ac   : > { %v2690_v3 = vpop.permute.xlu1 %2689  ;;  %v2805_v17 = vld [vmem:[#allocation2 + $0x68] sm:$0xff] }
 0x4ad   : > { %v9936_v33 = vsel %vm2695_vm15, %v2688_v45, %v2690_v3  ;;  %2703 = vst.msk [vmem:[#allocation2 + $0xa8] sm:$0xff] %vm1053_vm4, %v2690_v3 }
 0x4af   : > { %v2707_v30 = vpop.permute.xlu0 %2706 }
 0x4b0   : > { %v2709_v15 = vpop.permute.xlu1 %2708  ;;  %v2809_v51 = vld [vmem:[#allocation2 + $0x88] sm:$0xff] }
 0x4b1   : > { %v9940_v40 = vsel %vm1053_vm4, %v2707_v30, %v2709_v15  ;;  %2721 = vst.msk [vmem:[#allocation2 + $0xc8] sm:$0xff] %vm1053_vm4, %v2709_v15 }
 0x4b3   : > { %v2727_v41 = vpop.permute.xlu0 %2726 }
 0x4b4   : > { %v9943_v48 = vpop.permute.xlu1 %2732  ;;  %v2813_v31 = vld [vmem:[#allocation2 + $0xa8] sm:$0xff] }
 0x4b7   : > { %v9945_v52 = vpop.permute.xlu0 %2728 }
 0x4b8   : > { %v9949_v57 = vsel %vm2738_vm2, %v2727_v41, %v9945_v52  ;;  %v2620_v14 = vpop.permute.xlu1 %2619  ;;  %v2817_v56 = vld [vmem:[#allocation2 + $0xc8] sm:$0xff] }
 0x4b9   : > { %2630 = vst.msk [vmem:[#allocation2 + $0x38] sm:$0xff] %vm1053_vm4, %v2620_v14 }
 0x4bb   : > { %v9952_v21 = vpop.permute.xlu0 %2753 }
 0x4bc   : > { %v2638_v25 = vpop.permute.xlu1 %2637 }
 0x4bd   : > { %2648 = vst.msk [vmem:[#allocation2 + $0x58] sm:$0xff] %vm1053_vm4, %v2638_v25 }
 0x4bf   : > { %v2618_v55 = vpop.permute.xlu0 %2617 }
 0x4c0   : > { %v2622_v62 = vsel %vm633_vm0, %v2618_v55, %v2620_v14  ;;  %v2656_v4 = vpop.permute.xlu1 %2655  ;;  %v2799_v1 = vld [vmem:[#allocation2 + $0x38] sm:$0xff] }
 0x4c1   : > { %2667 = vst.msk [vmem:[#allocation2 + $0x78] sm:$0xff] %vm1053_vm4, %v2656_v4  ;;  %v7128_v44 = vpack.c.bf16 %v2799_v1, %v2797_v29  ;;  %v7130_v43 = vpack.c.bf16 %v2622_v62, %v2621_v12  ;;  %v2776_v62 = vld [vmem:[%s11597_s2] sm:$0xff]  ;;  %v2783_v1 = vld [vmem:[%s11597_s2 + $0x38] sm:$0xff] }
 0x4c2   : > { %v2780_v29 = vld [vmem:[%s11597_s2 + $0x20] sm:$0xff] }
 0x4c3   : > { %v2636_v38 = vpop.permute.xlu0 %2635  ;;  %7129 = vmatprep.subr.bf16.mxu1 %v7128_v44  ;;  %v2782_v44 = vld [vmem:[%s11597_s2 + $0x30] sm:$0xff] }
 0x4c4   : > { %v2640_v10 = vsel %vm738_vm1, %v2636_v38, %v2638_v25  ;;  %v2675_v5 = vpop.permute.xlu1 %2674  ;;  %7131 = vmatpush1.bf16.msra.mxu1 %v7130_v43  ;;  %v2803_v58 = vld [vmem:[#allocation2 + $0x58] sm:$0xff]  ;;  %vm2763_vm1 = vcmask 769024   ;;  %v2785_v43 = vld [vmem:[%s11597_s2 + $0x48] sm:$0xff]  ;;  %v2784_v38 = vld [vmem:[%s11597_s2 + $0x40] sm:$0xff] }
 0x4c5   : > { %2686 = vst.msk [vmem:[#allocation2 + $0x98] sm:$0xff] %vm1053_vm4, %v2675_v5  ;;  %v7132_v24 = vpack.c.bf16 %v2803_v58, %v2801_v22  ;;  %v7134_v37 = vpack.c.bf16 %v2640_v10, %v2639_v49  ;;  %v2787_v10 = vld [vmem:[%s11597_s2 + $0x58] sm:$0xff]  ;;  %v2789_v22 = vld [vmem:[%s11597_s2 + $0x68] sm:$0xff]  ;;  %v2788_v58 = vld [vmem:[%s11597_s2 + $0x60] sm:$0xff] }
 0x4c7   : > { %v2654_v28 = vpop.permute.xlu0 %2653  ;;  %7133 = vmatprep.subr.bf16.mxu1 %v7132_v24  ;;  %v2791_v24 = vld [vmem:[%s11597_s2 + $0x78] sm:$0xff] }
 0x4c8   : > { %v2659_v46 = vsel %vm2657_vm13, %v2654_v28, %v2656_v4  ;;  %v2694_v34 = vpop.permute.xlu1 %2693  ;;  %7135 = vmatpush1.bf16.msra.mxu1 %v7134_v37  ;;  %v2807_v26 = vld [vmem:[#allocation2 + $0x78] sm:$0xff]  ;;  %v2781_v4 = vld [vmem:[%s11597_s2 + $0x28] sm:$0xff]  ;;  %v2790_v37 = vld [vmem:[%s11597_s2 + $0x70] sm:$0xff] }
 0x4c9   : > { %2705 = vst.msk [vmem:[#allocation2 + $0xb8] sm:$0xff] %vm1053_vm4, %v2694_v34  ;;  %v7136_v13 = vpack.c.bf16 %v2807_v26, %v2805_v17  ;;  %v7138_v6 = vpack.c.bf16 %v2659_v46, %v2658_v60 }
 0x4cb   : > { %v2673_v39 = vpop.permute.xlu0 %2672  ;;  %7137 = vmatprep.subr.bf16.mxu1 %v7136_v13 }
 0x4cc   : > { %v2678_v50 = vsel %vm2676_vm14, %v2673_v39, %v2675_v5  ;;  %v2713_v32 = vpop.permute.xlu1 %2712  ;;  %7139 = vmatpush1.bf16.msra.mxu1 %v7138_v6  ;;  %v2811_v23 = vld [vmem:[#allocation2 + $0x98] sm:$0xff]  ;;  %v2786_v5 = vld [vmem:[%s11597_s2 + $0x50] sm:$0xff] }
 0x4cd   : > { %2723 = vst.msk [vmem:[#allocation2 + $0xd8] sm:$0xff] %vm1053_vm4, %v2713_v32  ;;  %v7140_v0 = vpack.c.bf16 %v2811_v23, %v2809_v51  ;;  %v7142_v8 = vpack.c.bf16 %v2678_v50, %v9932_v53 }
 0x4cf   : > { %v2692_v47 = vpop.permute.xlu0 %2691  ;;  %7141 = vmatprep.subr.bf16.mxu1 %v7140_v0 }
 0x4d0   : > { %v2697_v19 = vsel %vm2695_vm15, %v2692_v47, %v2694_v34  ;;  %v2737_v61 = vpop.permute.xlu1 %2736  ;;  %7143 = vmatpush1.bf16.msra.mxu1 %v7142_v8  ;;  %v2815_v54 = vld [vmem:[#allocation2 + $0xb8] sm:$0xff] }
 0x4d1   : > { %v7144_v11 = vpack.c.bf16 %v2815_v54, %v2813_v31  ;;  %v7146_v42 = vpack.c.bf16 %v2697_v19, %v9936_v33 }
 0x4d3   : > { %v2711_v2 = vpop.permute.xlu0 %2710  ;;  %7145 = vmatprep.subr.bf16.mxu1 %v7144_v11 }
 0x4d4   : > { %v2715_v9 = vsel %vm1053_vm4, %v2711_v2, %v2713_v32  ;;  %v2762_v16 = vpop.permute.xlu1 %2761  ;;  %7147 = vmatpush1.bf16.msra.mxu1 %v7146_v42  ;;  %v2819_v63 = vld [vmem:[#allocation2 + $0xd8] sm:$0xff] }
 0x4d5   : > { %v7148_v18 = vpack.c.bf16 %v2819_v63, %v2817_v56  ;;  %v7150_v12 = vpack.c.bf16 %v2715_v9, %v9940_v40 }
 0x4d7   : > { %v2735_v36 = vpop.permute.xlu0 %2734  ;;  %7149 = vmatprep.subr.bf16.mxu1 %v7148_v18 }
 0x4d8   : > { %v2741_v20 = vsel %vm2738_vm2, %v9943_v48, %v2735_v36  ;;  %v2742_v49 = vsel %vm2738_vm2, %v2735_v36, %v2737_v61  ;;  %v2731_v27 = vpop.permute.xlu1 %2730  ;;  %7151 = vmatpush1.bf16.msra.mxu1 %v7150_v12 }
 0x4d9   : > { %2750 = vst.msk [vmem:[#allocation2 + $0xf8] sm:$0xff] %vm1053_vm4, %v2742_v49  ;;  %v2740_v59 = vsel %vm2738_vm2, %v9945_v52, %v2731_v27  ;;  %v7154_v48 = vpack.c.bf16 %v2741_v20, %v9949_v57  ;;  %v2778_v57 = vld [vmem:[%s11597_s2 + $0x10] sm:$0xff] }
 0x4da   : > { %2748 = vst.msk [vmem:[#allocation2 + $0xe8] sm:$0xff] %vm1053_vm4, %v2740_v59 }
 0x4db   : > { %v2760_v60 = vpop.permute.xlu0 %2759 }
 0x4dc   : > { %v2767_v35 = vsel %vm2763_vm1, %v2760_v60, %v2762_v16  ;;  %v2756_v7 = vpop.permute.xlu1 %2755 }
 0x4dd   : > { %2775 = vst.msk [vmem:[#allocation2 + $0x118] sm:$0xff] %vm1053_vm4, %v2767_v35  ;;  %v2765_v53 = vsel %vm2763_vm1, %v9952_v21, %v2756_v7 }
 0x4de   : > { %2773 = vst.msk [vmem:[#allocation2 + $0x108] sm:$0xff] %vm1053_vm4, %v2765_v53  ;;  %vm7198_vm4 = vmpackc.low %vm3337_vm3, %vm7601_vm9  ;;  %vm4960_vm9 = vcmask 23552  }
 0x4df   : > { %v2752_v45 = vpop.permute.xlu0 %2751 }
 0x4e0   : > { %v2764_v3 = vsel %vm2763_vm1, %v2752_v45, %v9952_v21  ;;  %v2758_v33 = vpop.permute.xlu1 %2757  ;;  %v2823_v30 = vld [vmem:[#allocation2 + $0xf8] sm:$0xff] }
 0x4e1   : > { %v2766_v15 = vsel %vm2763_vm1, %v2758_v33, %v2760_v60  ;;  %v2821_v40 = vld [vmem:[#allocation2 + $0xe8] sm:$0xff]  ;;  %v2779_v21 = vld [vmem:[%s11597_s2 + $0x18] sm:$0xff] }
 0x4e2   : > { %v7152_v41 = vpack.c.bf16 %v2823_v30, %v2821_v40  ;;  %v7158_v55 = vpack.c.bf16 %v2766_v15, %v2764_v3 }
 0x4e4   : > { %7153 = vmatprep.subr.bf16.mxu1 %v7152_v41  ;;  %v2827_v52 = vld [vmem:[#allocation2 + $0x118] sm:$0xff] }
 0x4e5   : > { %7155 = vmatpush1.bf16.msra.mxu1 %v7154_v48  ;;  %v2825_v14 = vld [vmem:[#allocation2 + $0x108] sm:$0xff] }
 0x4e6   : > { %v7156_v25 = vpack.c.bf16 %v2827_v52, %v2825_v14 }
 0x4e8   : > { %7157 = vmatprep.subr.bf16.mxu1 %v7156_v25 }
 0x4e9   : > { %7159 = vmatpush1.bf16.msra.mxu1 %v7158_v55 }
 0x4ec   : > { %2918 = vmatmul.mubr.f32.vlgmr.msra.gmra.mrb[12].mxu1 %v2776_v62 }
 0x4ed   : > { %6129 = vmatprep.mubr.msk.f32.mxu1 %vm2828_vm12, %v2779_v21 }
 0x4f0   : > { %2924 = vmatmul.mubr.f32.gmra.mrb[14].mxu1 %v2778_v57  ;;  %v2977_v28 = vpop.permute.xlu0 %2976 }
 0x4f1   : > { %6130 = vmatprep.mubr.msk.f32.mxu1 %vm2828_vm12, %v2781_v4  ;;  %v3041_v46 = vpop.permute.xlu1 %3040 }
 0x4f4   : > { %2930 = vmatmul.mubr.f32.gmra.mrb[16].mxu1 %v2780_v29  ;;  %v2982_v34 = vpop.permute.xlu0 %2981 }
 0x4f5   : > { %6131 = vmatprep.mubr.msk.f32.mxu1 %vm2828_vm12, %v2783_v1  ;;  %v3046_v17 = vpop.permute.xlu1 %3045 }
 0x4f8   : > { %2936 = vmatmul.mubr.f32.gmra.mrb[18].mxu1 %v2782_v44  ;;  %v2987_v26 = vpop.permute.xlu0 %2986 }
 0x4f9   : > { %6132 = vmatprep.mubr.msk.f32.mxu1 %vm2828_vm12, %v2785_v43  ;;  %v3051_v13 = vpop.permute.xlu1 %3050 }
 0x4fc   : > { %2942 = vmatmul.mubr.f32.gmra.mrb[20].mxu1 %v2784_v38  ;;  %v2992_v23 = vpop.permute.xlu0 %2991 }
 0x4fd   : > { %6133 = vmatprep.mubr.msk.f32.mxu1 %vm2828_vm12, %v2787_v10  ;;  %v3056_v31 = vpop.permute.xlu1 %3055 }
 0x500   : > { %2948 = vmatmul.mubr.f32.gmra.mrb[22].mxu1 %v2786_v5  ;;  %v2997_v18 = vpop.permute.xlu0 %2996 }
 0x501   : > { %6134 = vmatprep.mubr.msk.f32.mxu1 %vm2828_vm12, %v2789_v22  ;;  %v3061_v49 = vpop.permute.xlu1 %3060 }
 0x504   : > { %2954 = vmatmul.mubr.f32.gmra.mrb[24].mxu1 %v2788_v58  ;;  %v3002_v33 = vpop.permute.xlu0 %3001 }
 0x505   : > { %6135 = vmatprep.mubr.msk.f32.mxu1 %vm2828_vm12, %v2791_v24  ;;  %v3066_v52 = vpop.permute.xlu1 %3065 }
 0x508   : > { %2960 = vmatmul.mubr.f32.gmra.mrb[26].mxu1 %v2790_v37  ;;  %v3007_v1 = vpop.permute.xlu0 %3006 }
 0x509   : > { %v3071_v10 = vpop.permute.xlu1 %3070 }
 0x5bf   : > { %v2919_v6 = vpop.f32.mrb[12].mxu1 }
 0x5c0   : > { %v3014_v39 = vmul.f32 %v2977_v28, %v2919_v6  ;;  %v2921_v50 = vpop.f32.mrb[13].mxu1  ;;  %v7608_v6 = vmov 0.0|0.0  }
 0x5c1   : > { %v3015_v32 = vmul.f32 %v2977_v28, %v2921_v50  ;;  %7160 = vmatprep.subr.bf16.mxu1 %v7608_v6  ;;  %v3289_v50 = vld [vmem:[%s11608_s13 + $0x18] sm:$0xff] }
 0x5c2   : > { %v10032_v51 = vadd.f32 %v3041_v46, %v3014_v39 }
 0x5c3   : > { %v10034_v0 = vadd.f32 %v3041_v46, %v3015_v32  ;;  %v2925_v8 = vpop.f32.mrb[14].mxu1  ;;  %v3012_v32 = vpop.permute.xlu0 %3011 }
 0x5c4   : > { %v3094_v47 = vmax.f32 %v10032_v51, 0.0  ;;  %v3016_v19 = vmul.f32 %v2982_v34, %v2925_v8  ;;  %v2927_v61 = vpop.f32.mrb[15].mxu1 }
 0x5c5   : > { %v3095_v54 = vmax.f32 %v10034_v0, 0.0  ;;  %v3017_v11 = vmul.f32 %v2982_v34, %v2927_v61  ;;  %v3286_v34 = vld [vmem:[%s11608_s13] sm:$0xff] }
 0x5c6   : > { %v10038_v42 = vadd.f32 %v3046_v17, %v3016_v19  ;;  %3126 = vrot.lane.b32.xlu0 %v3094_v47, %s7603_s25 }
 0x5c7   : > { %v10043_v2 = vadd.f32 %v3046_v17, %v3017_v11  ;;  %v2931_v9 = vpop.f32.mrb[16].mxu1  ;;  %3128 = vrot.lane.b32.xlu1 %v3095_v54, %s7603_s25  ;;  %v3287_v17 = vld [vmem:[%s11608_s13 + $0x8] sm:$0xff] }
 0x5c8   : > { %v3096_v16 = vmax.f32 %v10038_v42, 0.0  ;;  %v3018_v56 = vmul.f32 %v2987_v26, %v2931_v9  ;;  %v2933_v63 = vpop.f32.mrb[17].mxu1  ;;  %v7161_v39 = vpack.c.bf16 %v3287_v17, %v3286_v34  ;;  %v3076_v9 = vpop.permute.xlu1 %3075  ;;  %v3303_v34 = vld [vmem:[%s11608_s13 + $0x88] sm:$0xff] }
 0x5c9   : > { %v3097_v12 = vmax.f32 %v10043_v2, 0.0  ;;  %v3019_v36 = vmul.f32 %v2987_v26, %v2933_v63  ;;  %v3288_v26 = vld [vmem:[%s11608_s13 + $0x10] sm:$0xff] }
 0x5ca   : > { %v10050_v20 = vadd.f32 %v3051_v13, %v3018_v56  ;;  %3130 = vrot.lane.b32.xlu0 %v3096_v16, %s7603_s25  ;;  %7162 = vmatpush1.bf16.msra.mxu1 %v7161_v39  ;;  %v7164_v11 = vpack.c.bf16 %v3289_v50, %v3288_v26  ;;  %v3304_v26 = vld [vmem:[%s11608_s13 + $0x90] sm:$0xff]  ;;  %v3305_v39 = vld [vmem:[%s11608_s13 + $0x98] sm:$0xff] }
 0x5cb   : > { %v10055_v27 = vadd.f32 %v3051_v13, %v3019_v36  ;;  %v2937_v59 = vpop.f32.mrb[18].mxu1  ;;  %3132 = vrot.lane.b32.xlu1 %v3097_v12, %s7603_s25  ;;  %7163 = vmatprep.subr.bf16.mxu1 %v7608_v6  ;;  %v3291_v36 = vld [vmem:[%s11608_s13 + $0x28] sm:$0xff]  ;;  %v7188_v50 = vpack.c.bf16 %v3305_v39, %v3304_v26 }
 0x5cc   : > { %v3098_v60 = vmax.f32 %v10050_v20, 0.0  ;;  %v3020_v35 = vmul.f32 %v2992_v23, %v2937_v59  ;;  %v2939_v7 = vpop.f32.mrb[19].mxu1 }
 0x5cd   : > { %v3099_v53 = vmax.f32 %v10055_v27, 0.0  ;;  %v3021_v45 = vmul.f32 %v2992_v23, %v2939_v7 }
 0x5ce   : > { %v10062_v3 = vadd.f32 %v3056_v31, %v3020_v35  ;;  %3134 = vrot.lane.b32.xlu0 %v3098_v60, %s7603_s25  ;;  %7165 = vmatpush1.bf16.msra.mxu1 %v7164_v11  ;;  %v3309_v11 = vld [vmem:[%s11608_s13 + $0xb8] sm:$0xff] }
 0x5cf   : > { %v10067_v30 = vadd.f32 %v3056_v31, %v3021_v45  ;;  %v2943_v15 = vpop.f32.mrb[20].mxu1  ;;  %3136 = vrot.lane.b32.xlu1 %v3099_v53, %s7603_s25  ;;  %7166 = vmatprep.subr.bf16.mxu1 %v7608_v6 }
 0x5d0   : > { %v3100_v40 = vmax.f32 %v10062_v3, 0.0  ;;  %v3022_v41 = vmul.f32 %v2997_v18, %v2943_v15  ;;  %v2945_v48 = vpop.f32.mrb[21].mxu1  ;;  %v3293_v15 = vld [vmem:[%s11608_s13 + $0x38] sm:$0xff] }
 0x5d1   : > { %v3101_v14 = vmax.f32 %v10067_v30, 0.0  ;;  %v3023_v25 = vmul.f32 %v2997_v18, %v2945_v48  ;;  %v3290_v18 = vld [vmem:[%s11608_s13 + $0x20] sm:$0xff] }
 0x5d2   : > { %v10074_v55 = vadd.f32 %v3061_v49, %v3022_v41  ;;  %3138 = vrot.lane.b32.xlu0 %v3100_v40, %s7603_s25  ;;  %v7167_v7 = vpack.c.bf16 %v3291_v36, %v3290_v18  ;;  %v3294_v48 = vld [vmem:[%s11608_s13 + $0x40] sm:$0xff]  ;;  %v3311_v18 = vld [vmem:[%s11608_s13 + $0xc8] sm:$0x7f] }
 0x5d3   : > { %v10079_v62 = vadd.f32 %v3061_v49, %v3023_v25  ;;  %v2949_v21 = vpop.f32.mrb[22].mxu1  ;;  %3140 = vrot.lane.b32.xlu1 %v3101_v14, %s7603_s25 }
 0x5d4   : > { %v3102_v57 = vmax.f32 %v10074_v55, 0.0  ;;  %v3024_v4 = vmul.f32 %v3002_v33, %v2949_v21  ;;  %v2951_v29 = vpop.f32.mrb[23].mxu1  ;;  %7168 = vmatpush1.bf16.msra.mxu1 %v7167_v7  ;;  %v3296_v21 = vld [vmem:[%s11608_s13 + $0x50] sm:$0xff] }
 0x5d5   : > { %v3103_v44 = vmax.f32 %v10079_v62, 0.0  ;;  %v3025_v43 = vmul.f32 %v3002_v33, %v2951_v29  ;;  %v3292_v33 = vld [vmem:[%s11608_s13 + $0x30] sm:$0xff]  ;;  %7169 = vmatprep.subr.bf16.mxu1 %v7608_v6 }
 0x5d6   : > { %v10086_v38 = vadd.f32 %v3066_v52, %v3024_v4  ;;  %3142 = vrot.lane.b32.xlu0 %v3102_v57, %s7603_s25  ;;  %v7170_v41 = vpack.c.bf16 %v3293_v15, %v3292_v33  ;;  %v3297_v4 = vld [vmem:[%s11608_s13 + $0x58] sm:$0xff] }
 0x5d7   : > { %v10091_v5 = vadd.f32 %v3066_v52, %v3025_v43  ;;  %v2955_v22 = vpop.f32.mrb[24].mxu1  ;;  %3144 = vrot.lane.b32.xlu1 %v3103_v44, %s7603_s25  ;;  %v3295_v52 = vld [vmem:[%s11608_s13 + $0x48] sm:$0xff]  ;;  %v7176_v29 = vpack.c.bf16 %v3297_v4, %v3296_v21 }
 0x5d8   : > { %v3104_v58 = vmax.f32 %v10086_v38, 0.0  ;;  %v3026_v24 = vmul.f32 %v3007_v1, %v2955_v22  ;;  %v2957_v37 = vpop.f32.mrb[25].mxu1  ;;  %7171 = vmatpush1.bf16.msra.mxu1 %v7170_v41  ;;  %v7173_v25 = vpack.c.bf16 %v3295_v52, %v3294_v48  ;;  %v3299_v43 = vld [vmem:[%s11608_s13 + $0x68] sm:$0xff]  ;;  %v3300_v22 = vld [vmem:[%s11608_s13 + $0x70] sm:$0xff] }
 0x5d9   : > { %v3105_v28 = vmax.f32 %v10091_v5, 0.0  ;;  %v3027_v46 = vmul.f32 %v3007_v1, %v2957_v37  ;;  %7172 = vmatprep.subr.bf16.mxu1 %v7608_v6  ;;  %v3298_v1 = vld [vmem:[%s11608_s13 + $0x60] sm:$0xff] }
 0x5da   : > { %v10107_v13 = vadd.f32 %v3071_v10, %v3026_v24  ;;  %3146 = vrot.lane.b32.xlu0 %v3104_v58, %s7603_s25  ;;  %v3301_v24 = vld [vmem:[%s11608_s13 + $0x78] sm:$0xff] }
 0x5db   : > { %v10116_v23 = vadd.f32 %v3071_v10, %v3027_v46  ;;  %v2961_v8 = vpop.f32.mrb[26].mxu1  ;;  %3148 = vrot.lane.b32.xlu1 %v3105_v28, %s7603_s25  ;;  %v7179_v10 = vpack.c.bf16 %v3299_v43, %v3298_v1  ;;  %v7182_v37 = vpack.c.bf16 %v3301_v24, %v3300_v22  ;;  %v3302_v46 = vld [vmem:[%s11608_s13 + $0x80] sm:$0xff] }
 0x5dc   : > { %v3106_v19 = vmax.f32 %v10107_v13, 0.0  ;;  %v3028_v61 = vmul.f32 %v3012_v32, %v2961_v8  ;;  %v2963_v31 = vpop.f32.mrb[27].mxu1  ;;  %7174 = vmatpush1.bf16.msra.mxu1 %v7173_v25  ;;  %v7185_v17 = vpack.c.bf16 %v3303_v34, %v3302_v46  ;;  %v3307_v8 = vld [vmem:[%s11608_s13 + $0xa8] sm:$0xff] }
 0x5dd   : > { %v3107_v56 = vmax.f32 %v10116_v23, 0.0  ;;  %v3029_v63 = vmul.f32 %v3012_v32, %v2963_v31  ;;  %7175 = vmatprep.subr.bf16.mxu1 %v7608_v6  ;;  %v3306_v32 = vld [vmem:[%s11608_s13 + $0xa0] sm:$0xff]  ;;  %v3308_v31 = vld [vmem:[%s11608_s13 + $0xb0] sm:$0xff] }
 0x5de   : > { %v10130_v49 = vadd.f32 %v3076_v9, %v3028_v61  ;;  %3150 = vrot.lane.b32.xlu0 %v3106_v19, %s7603_s25  ;;  %v7191_v61 = vpack.c.bf16 %v3307_v8, %v3306_v32 }
 0x5df   : > { %v10135_v59 = vadd.f32 %v3076_v9, %v3029_v63  ;;  %3152 = vrot.lane.b32.xlu1 %v3107_v56, %s7603_s25  ;;  %v7194_v9 = vpack.c.bf16 %v3309_v11, %v3308_v31  ;;  %v3310_v63 = vld [vmem:[%s11608_s13 + $0xc0] sm:$0xff] }
 0x5e0   : > { %v3108_v35 = vmax.f32 %v10130_v49, 0.0  ;;  %7177 = vmatpush1.bf16.msra.mxu1 %v7176_v29  ;;  %v7197_v36 = vpack.c.bf16 %v3311_v18, %v3310_v63 }
 0x5e1   : > { %v3109_v45 = vmax.f32 %v10135_v59, 0.0  ;;  %7178 = vmatprep.subr.bf16.mxu1 %v7608_v6 }
 0x5e2   : > { %3154 = vrot.lane.b32.xlu0 %v3108_v35, %s7603_s25 }
 0x5e3   : > { %3156 = vrot.lane.b32.xlu1 %v3109_v45, %s7603_s25  ;;  %s7611_s25 = smov 109  }
 0x5e4   : > { %7180 = vmatpush1.bf16.msra.mxu1 %v7179_v10 }
 0x5e5   : > { %7181 = vmatprep.subr.bf16.mxu1 %v7608_v6 }
 0x5e8   : > { %7183 = vmatpush1.bf16.msra.mxu1 %v7182_v37 }
 0x5e9   : > { %7184 = vmatprep.subr.bf16.mxu1 %v7608_v6 }
 0x5ec   : > { %7186 = vmatpush1.bf16.msra.mxu1 %v7185_v17 }
 0x5ed   : > { %7187 = vmatprep.subr.bf16.mxu1 %v7608_v6 }
 0x5f0   : > { %7189 = vmatpush1.bf16.msra.mxu1 %v7188_v50 }
 0x5f1   : > { %7190 = vmatprep.subr.bf16.mxu1 %v7608_v6 }
 0x5f4   : > { %7192 = vmatpush1.bf16.msra.mxu1 %v7191_v61 }
 0x5f5   : > { %7193 = vmatprep.subr.bf16.mxu1 %v7608_v6 }
 0x5f8   : > { %7195 = vmatpush1.bf16.msra.mxu1 %v7194_v9 }
 0x5f9   : > { %7196 = vmatprep.subr.bf16.mxu1 %v7608_v6 }
 0x5fc   : > { %7199 = vmatpush1.bf16.msk.msra.mxu1 %vm7198_vm4, %v7197_v36 }
 0x638   : > { %v3127_v7 = vpop.permute.xlu0 %3126 }
 0x639   : > { %v3129_v33 = vpop.permute.xlu1 %3128 }
 0x63a   : > { %v3158_v15 = vsel %vm2657_vm13, %v3127_v7, %v3129_v33  ;;  %v3183_v6 = vmax.f32 %v3095_v54, %v3129_v33 }
 0x63b   : > { %v3182_v41 = vmax.f32 %v3094_v47, %v3158_v15 }
 0x63c   : > { %v3131_v48 = vpop.permute.xlu0 %3130  ;;  %3216 = vrot.lane.b32.xlu1 %v3183_v6, %s11701_s27 }
 0x63d   : > { %3214 = vrot.lane.b32.xlu0 %v3182_v41, %s11701_s27  ;;  %v3133_v52 = vpop.permute.xlu1 %3132 }
 0x63e   : > { %v3159_v25 = vsel %vm2657_vm13, %v3131_v48, %v3133_v52  ;;  %v3185_v21 = vmax.f32 %v3097_v12, %v3133_v52 }
 0x63f   : > { %v3184_v4 = vmax.f32 %v3096_v16, %v3159_v25 }
 0x640   : > { %v3135_v29 = vpop.permute.xlu0 %3134  ;;  %3220 = vrot.lane.b32.xlu1 %v3185_v21, %s11701_s27 }
 0x641   : > { %3218 = vrot.lane.b32.xlu0 %v3184_v4, %s11701_s27  ;;  %v3137_v51 = vpop.permute.xlu1 %3136 }
 0x642   : > { %v3160_v0 = vsel %vm2657_vm13, %v3135_v29, %v3137_v51  ;;  %v3187_v47 = vmax.f32 %v3099_v53, %v3137_v51 }
 0x643   : > { %v3186_v54 = vmax.f32 %v3098_v60, %v3160_v0 }
 0x644   : > { %v3139_v1 = vpop.permute.xlu0 %3138  ;;  %3224 = vrot.lane.b32.xlu1 %v3187_v47, %s11701_s27 }
 0x645   : > { %3222 = vrot.lane.b32.xlu0 %v3186_v54, %s11701_s27  ;;  %v3141_v42 = vpop.permute.xlu1 %3140 }
 0x646   : > { %v3161_v2 = vsel %vm2657_vm13, %v3139_v1, %v3141_v42  ;;  %v3189_v16 = vmax.f32 %v3101_v14, %v3141_v42 }
 0x647   : > { %v3188_v12 = vmax.f32 %v3100_v40, %v3161_v2 }
 0x648   : > { %v3143_v43 = vpop.permute.xlu0 %3142  ;;  %3228 = vrot.lane.b32.xlu1 %v3189_v16, %s11701_s27 }
 0x649   : > { %3226 = vrot.lane.b32.xlu0 %v3188_v12, %s11701_s27  ;;  %v3145_v20 = vpop.permute.xlu1 %3144 }
 0x64a   : > { %v3162_v27 = vsel %vm2657_vm13, %v3143_v43, %v3145_v20  ;;  %v3191_v60 = vmax.f32 %v3103_v44, %v3145_v20 }
 0x64b   : > { %v3190_v53 = vmax.f32 %v3102_v57, %v3162_v27 }
 0x64c   : > { %v3147_v10 = vpop.permute.xlu0 %3146  ;;  %3232 = vrot.lane.b32.xlu1 %v3191_v60, %s11701_s27 }
 0x64d   : > { %3230 = vrot.lane.b32.xlu0 %v3190_v53, %s11701_s27  ;;  %v3149_v3 = vpop.permute.xlu1 %3148 }
 0x64e   : > { %v3163_v30 = vsel %vm2657_vm13, %v3147_v10, %v3149_v3  ;;  %v3193_v40 = vmax.f32 %v3105_v28, %v3149_v3 }
 0x64f   : > { %v3192_v14 = vmax.f32 %v3104_v58, %v3163_v30 }
 0x650   : > { %v3151_v22 = vpop.permute.xlu0 %3150  ;;  %3236 = vrot.lane.b32.xlu1 %v3193_v40, %s11701_s27 }
 0x651   : > { %3234 = vrot.lane.b32.xlu0 %v3192_v14, %s11701_s27  ;;  %v3153_v55 = vpop.permute.xlu1 %3152 }
 0x652   : > { %v3164_v62 = vsel %vm2657_vm13, %v3151_v22, %v3153_v55  ;;  %v3195_v57 = vmax.f32 %v3107_v56, %v3153_v55 }
 0x653   : > { %v3194_v44 = vmax.f32 %v3106_v19, %v3164_v62  ;;  %v3720_v62 = vld [vmem:[%s11598_s3 + $0x8] sm:$0xff] }
 0x654   : > { %v3155_v24 = vpop.permute.xlu0 %3154  ;;  %3240 = vrot.lane.b32.xlu1 %v3195_v57, %s11701_s27 }
 0x655   : > { %3238 = vrot.lane.b32.xlu0 %v3194_v44, %s11701_s27  ;;  %v3157_v38 = vpop.permute.xlu1 %3156 }
 0x656   : > { %v3165_v5 = vsel %vm2657_vm13, %v3155_v24, %v3157_v38  ;;  %v3197_v58 = vmax.f32 %v3109_v45, %v3157_v38 }
 0x657   : > { %v3196_v28 = vmax.f32 %v3108_v35, %v3165_v5 }
 0x658   : > { %3244 = vrot.lane.b32.xlu1 %v3197_v58, %s11701_s27 }
 0x659   : > { %3242 = vrot.lane.b32.xlu0 %v3196_v28, %s11701_s27 }
 0x6ae   : > { %v3217_v13 = vpop.permute.xlu1 %3216 }
 0x6af   : > { %v3271_v23 = vmax.f32 %v3183_v6, %v3217_v13  ;;  %v3215_v19 = vpop.permute.xlu0 %3214 }
 0x6b0   : > { %v3246_v56 = vsel %vm633_vm0, %v3215_v19, %v3217_v13 }
 0x6b1   : > { %v3270_v37 = vmax.f32 %v3182_v41, %v3246_v56  ;;  %6137 = vmatprep.mubr.msk.f32.mxu1 %vm3312_vm5, %v3271_v23 }
 0x6b2   : > { %v3221_v46 = vpop.permute.xlu1 %3220 }
 0x6b3   : > { %v3273_v34 = vmax.f32 %v3185_v21, %v3221_v46  ;;  %v3219_v59 = vpop.permute.xlu0 %3218  ;;  %3406 = vmatmul.mubr.f32.vlgmr.msra.gmra.mrb[28].mxu1 %v3270_v37 }
 0x6b4   : > { %v3247_v49 = vsel %vm633_vm0, %v3219_v59, %v3221_v46 }
 0x6b5   : > { %v3272_v35 = vmax.f32 %v3184_v4, %v3247_v49  ;;  %6138 = vmatprep.mubr.msk.f32.mxu1 %vm3312_vm5, %v3273_v34  ;;  %v4467_v49 = vld [vmem:[%s11605_s10] sm:$0xff] }
 0x6b6   : > { %v3225_v45 = vpop.permute.xlu1 %3224 }
 0x6b7   : > { %v3275_v17 = vmax.f32 %v3187_v47, %v3225_v45  ;;  %v3223_v26 = vpop.permute.xlu0 %3222  ;;  %3411 = vmatmul.mubr.f32.gmra.mrb[30].mxu1 %v3272_v35  ;;  %v4356_v35 = vld [vmem:[%s11604_s9 + $0x8] sm:$0xff] }
 0x6b8   : > { %v3248_v39 = vsel %vm633_vm0, %v3223_v26, %v3225_v45  ;;  %v4357_v26 = vld [vmem:[%s11604_s9 + $0x10] sm:$0xff] }
 0x6b9   : > { %v3274_v50 = vmax.f32 %v3186_v54, %v3248_v39  ;;  %6139 = vmatprep.mubr.msk.f32.mxu1 %vm3312_vm5, %v3275_v17  ;;  %v4468_v39 = vld [vmem:[%s11605_s10 + $0x8] sm:$0xff] }
 0x6ba   : > { %v3229_v32 = vpop.permute.xlu1 %3228 }
 0x6bb   : > { %v3277_v8 = vmax.f32 %v3189_v16, %v3229_v32  ;;  %v3227_v61 = vpop.permute.xlu0 %3226  ;;  %3416 = vmatmul.mubr.f32.gmra.mrb[32].mxu1 %v3274_v50 }
 0x6bc   : > { %v3249_v31 = vsel %vm633_vm0, %v3227_v61, %v3229_v32  ;;  %v4358_v61 = vld [vmem:[%s11604_s9 + $0x18] sm:$0xff] }
 0x6bd   : > { %v3276_v11 = vmax.f32 %v3188_v12, %v3249_v31  ;;  %6140 = vmatprep.mubr.msk.f32.mxu1 %vm3312_vm5, %v3277_v8  ;;  %v4469_v8 = vld [vmem:[%s11605_s10 + $0x10] sm:$0xff] }
 0x6be   : > { %v3233_v9 = vpop.permute.xlu1 %3232 }
 0x6bf   : > { %v3279_v63 = vmax.f32 %v3191_v60, %v3233_v9  ;;  %v3231_v18 = vpop.permute.xlu0 %3230  ;;  %3421 = vmatmul.mubr.f32.gmra.mrb[34].mxu1 %v3276_v11 }
 0x6c0   : > { %v3250_v36 = vsel %vm633_vm0, %v3231_v18, %v3233_v9 }
 0x6c1   : > { %v3278_v7 = vmax.f32 %v3190_v53, %v3250_v36  ;;  %6141 = vmatprep.mubr.msk.f32.mxu1 %vm3312_vm5, %v3279_v63  ;;  %v4359_v36 = vld [vmem:[%s11604_s9 + $0x20] sm:$0xff] }
 0x6c2   : > { %v3237_v33 = vpop.permute.xlu1 %3236 }
 0x6c3   : > { %v3281_v15 = vmax.f32 %v3193_v40, %v3237_v33  ;;  %v3235_v6 = vpop.permute.xlu0 %3234  ;;  %3426 = vmatmul.mubr.f32.gmra.mrb[36].mxu1 %v3278_v7  ;;  %v4470_v7 = vld [vmem:[%s11605_s10 + $0x18] sm:$0xff] }
 0x6c4   : > { %v3251_v41 = vsel %vm633_vm0, %v3235_v6, %v3237_v33 }
 0x6c5   : > { %v3280_v48 = vmax.f32 %v3192_v14, %v3251_v41  ;;  %6142 = vmatprep.mubr.msk.f32.mxu1 %vm3312_vm5, %v3281_v15 }
 0x6c6   : > { %v3241_v52 = vpop.permute.xlu1 %3240 }
 0x6c7   : > { %v3283_v25 = vmax.f32 %v3195_v57, %v3241_v52  ;;  %v3239_v21 = vpop.permute.xlu0 %3238  ;;  %3431 = vmatmul.mubr.f32.gmra.mrb[38].mxu1 %v3280_v48  ;;  %v3722_v57 = vld [vmem:[%s11598_s3 + $0x18] sm:$0xff] }
 0x6c8   : > { %v3252_v4 = vsel %vm633_vm0, %v3239_v21, %v3241_v52  ;;  %4129 = vmatprep.mubr.f32.mxu0 %v3722_v57  ;;  %v4471_v52 = vld [vmem:[%s11605_s10 + $0x20] sm:$0xff] }
 0x6c9   : > { %v3282_v29 = vmax.f32 %v3194_v44, %v3252_v4  ;;  %6143 = vmatprep.mubr.msk.f32.mxu1 %vm3312_vm5, %v3283_v25  ;;  %v4360_v25 = vld [vmem:[%s11604_s9 + $0x28] sm:$0xff] }
 0x6ca   : > { %v3245_v51 = vpop.permute.xlu1 %3244 }
 0x6cb   : > { %v3285_v0 = vmax.f32 %v3197_v58, %v3245_v51  ;;  %v3243_v47 = vpop.permute.xlu0 %3242  ;;  %3436 = vmatmul.mubr.f32.gmra.mrb[40].mxu1 %v3282_v29 }
 0x6cc   : > { %v3253_v54 = vsel %vm633_vm0, %v3243_v47, %v3245_v51  ;;  %vm3871_vm0 = vcmask 523264  }
 0x6cd   : > { %v3284_v1 = vmax.f32 %v3196_v28, %v3253_v54  ;;  %6144 = vmatprep.mubr.msk.f32.mxu1 %vm3312_vm5, %v3285_v0  ;;  %v4355_v28 = vld [vmem:[%s11604_s9] sm:$0xff] }
 0x6cf   : > { %3441 = vmatmul.mubr.f32.gmra.mrb[42].mxu1 %v3284_v1 }
 0x6d0   : > { %3984 = vmatprep.mubr.f32.mxu1 %v3720_v62  ;;  %v4364_v62 = vld [vmem:[%s11604_s9 + $0x48] sm:$0xff] }
 0x786   : > { %v10292_v42 = vpop.f32.mrb[28].mxu1 }
 0x787   : > { %3447 = vst.msk [vmem:[#allocation3] sm:$0xff] %vm3446_vm6, %v10292_v42  ;;  %3495 = vrot.lane.b32.xlu0 %v10292_v42, %s11715_s17  ;;  %v3409_v2 = vpop.f32.mrb[29].mxu1 }
 0x788   : > { %v4472_v2 = vld [vmem:[%s11605_s10 + $0x28] sm:$0xff] }
 0x78a   : > { %v10298_v16 = vpop.f32.mrb[30].mxu1 }
 0x78b   : > { %3448 = vst.msk [vmem:[#allocation3 + $0x8] sm:$0xff] %vm3446_vm6, %v10298_v16  ;;  %3527 = vrot.lane.b32.xlu0 %v10292_v42, %s7609_s26  ;;  %3497 = vrot.lane.b32.xlu1 %v10298_v16, %s11715_s17  ;;  %v3414_v12 = vpop.f32.mrb[31].mxu1 }
 0x78e   : > { %v10306_v43 = vpop.f32.mrb[32].mxu1  ;;  %v3799_v34 = vld [vmem:[#allocation3] sm:$0xff] }
 0x78f   : > { %3449 = vst.msk [vmem:[#allocation3 + $0x10] sm:$0xff] %vm3446_vm6, %v10306_v43  ;;  %3463 = vrot.lane.b32.xlu0 %v10292_v42, %s11701_s27  ;;  %3529 = vrot.lane.b32.xlu1 %v10298_v16, %s7609_s26  ;;  %v3419_v20 = vpop.f32.mrb[33].mxu1 }
 0x790   : > { %v4362_v20 = vld [vmem:[%s11604_s9 + $0x38] sm:$0xff] }
 0x792   : > { %v10314_v27 = vpop.f32.mrb[34].mxu1  ;;  %v3800_v13 = vld [vmem:[#allocation3 + $0x8] sm:$0xff] }
 0x793   : > { %3450 = vst.msk [vmem:[#allocation3 + $0x18] sm:$0xff] %vm3446_vm6, %v10314_v27  ;;  %3623 = vrot.lane.b32.xlu0 %v10292_v42, %s11717_s21  ;;  %3465 = vrot.lane.b32.xlu1 %v10298_v16, %s11701_s27  ;;  %v3424_v60 = vpop.f32.mrb[35].mxu1  ;;  %v7202_v59 = vpack.c.bf16 %v3800_v13, %v3799_v34 }
 0x796   : > { %v10322_v53 = vpop.f32.mrb[36].mxu1  ;;  %v3801_v54 = vld [vmem:[#allocation3 + $0x10] sm:$0xff] }
 0x797   : > { %3451 = vst.msk [vmem:[#allocation3 + $0x20] sm:$0xff] %vm3446_vm6, %v10322_v53  ;;  %3559 = vrot.lane.b32.xlu0 %v10292_v42, %s7610_s24  ;;  %3625 = vrot.lane.b32.xlu1 %v10298_v16, %s11717_s21  ;;  %v3429_v10 = vpop.f32.mrb[37].mxu1 }
 0x798   : > { %v4474_v10 = vld [vmem:[%s11605_s10 + $0x38] sm:$0xff] }
 0x79a   : > { %v10330_v3 = vpop.f32.mrb[38].mxu1  ;;  %v3802_v21 = vld [vmem:[#allocation3 + $0x18] sm:$0xff] }
 0x79b   : > { %3452 = vst.msk [vmem:[#allocation3 + $0x28] sm:$0xff] %vm3446_vm6, %v10330_v3  ;;  %3561 = vrot.lane.b32.xlu1 %v10298_v16, %s7610_s24  ;;  %3499 = vrot.lane.b32.xlu0 %v10306_v43, %s11715_s17  ;;  %v3434_v30 = vpop.f32.mrb[39].mxu1  ;;  %v7206_v1 = vpack.c.bf16 %v3802_v21, %v3801_v54 }
 0x79e   : > { %v10338_v40 = vpop.f32.mrb[40].mxu1  ;;  %v3803_v34 = vld [vmem:[#allocation3 + $0x20] sm:$0xff] }
 0x79f   : > { %3453 = vst.msk [vmem:[#allocation3 + $0x30] sm:$0xff] %vm3446_vm6, %v10338_v40  ;;  %3531 = vrot.lane.b32.xlu0 %v10306_v43, %s7609_s26  ;;  %3501 = vrot.lane.b32.xlu1 %v10314_v27, %s11715_s17  ;;  %v3439_v14 = vpop.f32.mrb[41].mxu1 }
 0x7a2   : > { %v10346_v22 = vpop.f32.mrb[42].mxu1  ;;  %v3804_v13 = vld [vmem:[#allocation3 + $0x28] sm:$0xff] }
 0x7a3   : > { %3454 = vst.msk [vmem:[#allocation3 + $0x38] sm:$0xff] %vm3446_vm6, %v10346_v22  ;;  %3467 = vrot.lane.b32.xlu0 %v10306_v43, %s11701_s27  ;;  %3533 = vrot.lane.b32.xlu1 %v10314_v27, %s7609_s26  ;;  %v3444_v55 = vpop.f32.mrb[43].mxu1 }
 0x7a4   : > { %v4475_v55 = vld [vmem:[%s11605_s10 + $0x40] sm:$0xff] }
 0x7a7   : > { %3627 = vrot.lane.b32.xlu0 %v10306_v43, %s11717_s21  ;;  %3469 = vrot.lane.b32.xlu1 %v10314_v27, %s11701_s27 }
 0x7aa   : > { %v3806_v21 = vld [vmem:[#allocation3 + $0x38] sm:$0xff] }
 0x7ab   : > { %3563 = vrot.lane.b32.xlu0 %v10306_v43, %s7610_s24  ;;  %3629 = vrot.lane.b32.xlu1 %v10314_v27, %s11717_s21 }
 0x7af   : > { %3565 = vrot.lane.b32.xlu1 %v10314_v27, %s7610_s24  ;;  %3503 = vrot.lane.b32.xlu0 %v10322_v53, %s11715_s17 }
 0x7b3   : > { %3535 = vrot.lane.b32.xlu0 %v10322_v53, %s7609_s26  ;;  %3505 = vrot.lane.b32.xlu1 %v10330_v3, %s11715_s17 }
 0x7b7   : > { %3471 = vrot.lane.b32.xlu0 %v10322_v53, %s11701_s27  ;;  %3537 = vrot.lane.b32.xlu1 %v10330_v3, %s7609_s26 }
 0x7bb   : > { %3631 = vrot.lane.b32.xlu0 %v10322_v53, %s11717_s21  ;;  %3473 = vrot.lane.b32.xlu1 %v10330_v3, %s11701_s27 }
 0x7bf   : > { %3567 = vrot.lane.b32.xlu0 %v10322_v53, %s7610_s24  ;;  %3633 = vrot.lane.b32.xlu1 %v10330_v3, %s11717_s21 }
 0x7c3   : > { %3569 = vrot.lane.b32.xlu1 %v10330_v3, %s7610_s24  ;;  %3507 = vrot.lane.b32.xlu0 %v10338_v40, %s11715_s17 }
 0x7c7   : > { %3655 = vrot.lane.b32.xlu0 %v10292_v42, %s7611_s25  ;;  %3509 = vrot.lane.b32.xlu1 %v10346_v22, %s11715_s17 }
 0x7cb   : > { %3539 = vrot.lane.b32.xlu0 %v10338_v40, %s7609_s26  ;;  %3657 = vrot.lane.b32.xlu1 %v10298_v16, %s7611_s25 }
 0x7cf   : > { %3475 = vrot.lane.b32.xlu0 %v10338_v40, %s11701_s27  ;;  %3593 = vrot.lane.b32.xlu1 %v10298_v16, %s7612_s29 }
 0x7d3   : > { %3635 = vrot.lane.b32.xlu0 %v10338_v40, %s11717_s21  ;;  %3541 = vrot.lane.b32.xlu1 %v10346_v22, %s7609_s26 }
 0x7d7   : > { %3571 = vrot.lane.b32.xlu0 %v10338_v40, %s7610_s24  ;;  %3477 = vrot.lane.b32.xlu1 %v10346_v22, %s11701_s27 }
 0x7db   : > { %3591 = vrot.lane.b32.xlu0 %v10292_v42, %s7612_s29  ;;  %3661 = vrot.lane.b32.xlu1 %v10314_v27, %s7611_s25 }
 0x7df   : > { %3659 = vrot.lane.b32.xlu0 %v10306_v43, %s7611_s25  ;;  %3597 = vrot.lane.b32.xlu1 %v10314_v27, %s7612_s29 }
 0x7e3   : > { %3595 = vrot.lane.b32.xlu0 %v10306_v43, %s7612_s29  ;;  %3637 = vrot.lane.b32.xlu1 %v10346_v22, %s11717_s21 }
 0x7e7   : > { %3663 = vrot.lane.b32.xlu0 %v10322_v53, %s7611_s25  ;;  %3573 = vrot.lane.b32.xlu1 %v10346_v22, %s7610_s24 }
 0x7eb   : > { %3599 = vrot.lane.b32.xlu0 %v10322_v53, %s7612_s29  ;;  %3665 = vrot.lane.b32.xlu1 %v10330_v3, %s7611_s25 }
 0x7ef   : > { %3667 = vrot.lane.b32.xlu0 %v10338_v40, %s7611_s25  ;;  %3601 = vrot.lane.b32.xlu1 %v10330_v3, %s7612_s29 }
 0x7f3   : > { %3603 = vrot.lane.b32.xlu0 %v10338_v40, %s7612_s29  ;;  %3669 = vrot.lane.b32.xlu1 %v10346_v22, %s7611_s25 }
 0x7f7   : > { %3687 = vrot.lane.b32.xlu0 %v10292_v42, %s7613_s20  ;;  %3605 = vrot.lane.b32.xlu1 %v10346_v22, %s7612_s29  ;;  %v4361_v42 = vld [vmem:[%s11604_s9 + $0x30] sm:$0xff]  ;;  %s7615_s29 = smov 123  }
 0x7f9   : > { %v3496_v44 = vpop.permute.xlu0 %3495 }
 0x7fa   : > { %3519 = vst.msk [vmem:[#allocation3 + $0x80] sm:$0xff] %vm3446_vm6, %v3496_v44 }
 0x7fb   : > { %3691 = vrot.lane.b32.xlu0 %v10306_v43, %s7613_s20  ;;  %3689 = vrot.lane.b32.xlu1 %v10298_v16, %s7613_s20  ;;  %v4473_v43 = vld [vmem:[%s11605_s10 + $0x30] sm:$0xff] }
 0x7fd   : > { %v3528_v24 = vpop.permute.xlu0 %3527  ;;  %v3498_v38 = vpop.permute.xlu1 %3497 }
 0x7fe   : > { %3551 = vst.msk [vmem:[#allocation3 + $0xc0] sm:$0xff] %vm3446_vm6, %v3528_v24  ;;  %3520 = vst.msk [vmem:[#allocation3 + $0x88] sm:$0xff] %vm3446_vm6, %v3498_v38 }
 0x7ff   : > { %3695 = vrot.lane.b32.xlu0 %v10322_v53, %s7613_s20  ;;  %3693 = vrot.lane.b32.xlu1 %v10314_v27, %s7613_s20  ;;  %v4363_v53 = vld [vmem:[%s11604_s9 + $0x40] sm:$0xff] }
 0x801   : > { %v3464_v5 = vpop.permute.xlu0 %3463  ;;  %v3530_v58 = vpop.permute.xlu1 %3529  ;;  %v3815_v56 = vld [vmem:[#allocation3 + $0x80] sm:$0xff] }
 0x802   : > { %3487 = vst.msk [vmem:[#allocation3 + $0x40] sm:$0xff] %vm3446_vm6, %v3464_v5  ;;  %3552 = vst.msk [vmem:[#allocation3 + $0xc8] sm:$0xff] %vm3446_vm6, %v3530_v58  ;;  %v4365_v58 = vld [vmem:[%s11604_s9 + $0x50] sm:$0xff] }
 0x803   : > { %3699 = vrot.lane.b32.xlu0 %v10338_v40, %s7613_s20  ;;  %3697 = vrot.lane.b32.xlu1 %v10330_v3, %s7613_s20 }
 0x805   : > { %v3624_v23 = vpop.permute.xlu0 %3623  ;;  %v3466_v19 = vpop.permute.xlu1 %3465  ;;  %v3816_v37 = vld [vmem:[#allocation3 + $0x88] sm:$0xff] }
 0x806   : > { %3647 = vst.msk [vmem:[#allocation3 + $0x180] sm:$0xff] %vm3446_vm6, %v3624_v23  ;;  %3488 = vst.msk [vmem:[#allocation3 + $0x48] sm:$0xff] %vm3446_vm6, %v3466_v19  ;;  %v7200_v46 = vpack.c.bf16 %v3816_v37, %v3815_v56 }
 0x807   : > { %4373 = vperm.xlu0 %7521, %v4355_v28   ;;  %3701 = vrot.lane.b32.xlu1 %v10346_v22, %s7613_s20  ;;  %v4476_v28 = vld [vmem:[%s11605_s10 + $0x48] sm:$0xff] }
 0x808   : > { %7201 = vmatprep.subr.bf16.mxu1 %v7200_v46 }
 0x809   : > { %v3560_v45 = vpop.permute.xlu0 %3559  ;;  %7203 = vmatpush3.bf16.msra.mxu1 %v7202_v59  ;;  %v3626_v17 = vpop.permute.xlu1 %3625  ;;  %v7210_v59 = vpack.c.bf16 %v3804_v13, %v3803_v34 }
 0x80a   : > { %3583 = vst.msk [vmem:[#allocation3 + $0x100] sm:$0xff] %vm3446_vm6, %v3560_v45  ;;  %3648 = vst.msk [vmem:[#allocation3 + $0x188] sm:$0xff] %vm3446_vm6, %v3626_v17 }
 0x80b   : > { %4485 = vperm.xlu0 %7521, %v4467_v49   ;;  %4378 = vperm.xlu1 %7525, %v4356_v35   ;;  %v4477_v49 = vld [vmem:[%s11605_s10 + $0x50] sm:$0xff]  ;;  %v4366_v35 = vld [vmem:[%s11604_s9 + $0x58] sm:$0xff] }
 0x80d   : > { %v3500_v50 = vpop.permute.xlu0 %3499  ;;  %v3562_v32 = vpop.permute.xlu1 %3561  ;;  %v3847_v9 = vld [vmem:[#allocation3 + $0x180] sm:$0xff] }
 0x80e   : > { %3521 = vst.msk [vmem:[#allocation3 + $0x90] sm:$0xff] %vm3446_vm6, %v3500_v50  ;;  %3584 = vst.msk [vmem:[#allocation3 + $0x108] sm:$0xff] %vm3446_vm6, %v3562_v32 }
 0x80f   : > { %4383 = vperm.xlu0 %7521, %v4357_v26   ;;  %4490 = vperm.xlu1 %7525, %v4468_v39   ;;  %v4367_v26 = vld [vmem:[%s11604_s9 + $0x60] sm:$0xff]  ;;  %v4478_v39 = vld [vmem:[%s11605_s10 + $0x58] sm:$0xff] }
 0x811   : > { %v3532_v31 = vpop.permute.xlu0 %3531  ;;  %v3502_v11 = vpop.permute.xlu1 %3501  ;;  %v3848_v63 = vld [vmem:[#allocation3 + $0x188] sm:$0xff]  ;;  %v3831_v6 = vld [vmem:[#allocation3 + $0x100] sm:$0xff] }
 0x812   : > { %3553 = vst.msk [vmem:[#allocation3 + $0xd0] sm:$0xff] %vm3446_vm6, %v3532_v31  ;;  %3522 = vst.msk [vmem:[#allocation3 + $0x98] sm:$0xff] %vm3446_vm6, %v3502_v11  ;;  %v7232_v18 = vpack.c.bf16 %v3848_v63, %v3847_v9 }
 0x813   : > { %4495 = vperm.xlu0 %7521, %v4469_v8   ;;  %4388 = vperm.xlu1 %7525, %v4358_v61   ;;  %v4479_v8 = vld [vmem:[%s11605_s10 + $0x60] sm:$0xff]  ;;  %v4368_v61 = vld [vmem:[%s11604_s9 + $0x68] sm:$0xff] }
 0x814   : > { %7233 = vmatprep.subr.bf16.mxu0 %v7232_v18 }
 0x815   : > { %v3468_v33 = vpop.permute.xlu0 %3467  ;;  %v3534_v15 = vpop.permute.xlu1 %3533  ;;  %v3832_v41 = vld [vmem:[#allocation3 + $0x108] sm:$0xff]  ;;  %v3817_v51 = vld [vmem:[#allocation3 + $0x90] sm:$0xff] }
 0x816   : > { %3489 = vst.msk [vmem:[#allocation3 + $0x50] sm:$0xff] %vm3446_vm6, %v3468_v33  ;;  %3554 = vst.msk [vmem:[#allocation3 + $0xd8] sm:$0xff] %vm3446_vm6, %v3534_v15  ;;  %v7234_v48 = vpack.c.bf16 %v3832_v41, %v3831_v6 }
 0x817   : > { %4393 = vperm.xlu0 %7521, %v4359_v36   ;;  %4500 = vperm.xlu1 %7525, %v4470_v7   ;;  %v4369_v36 = vld [vmem:[%s11604_s9 + $0x70] sm:$0xff]  ;;  %v4480_v7 = vld [vmem:[%s11605_s10 + $0x68] sm:$0xff] }
 0x818   : > { %7235 = vmatpush3.bf16.msra.mxu0 %v7234_v48 }
 0x819   : > { %v3628_v4 = vpop.permute.xlu0 %3627  ;;  %v3470_v29 = vpop.permute.xlu1 %3469  ;;  %v3818_v0 = vld [vmem:[#allocation3 + $0x98] sm:$0xff] }
 0x81a   : > { %3649 = vst.msk [vmem:[#allocation3 + $0x190] sm:$0xff] %vm3446_vm6, %v3628_v4  ;;  %3490 = vst.msk [vmem:[#allocation3 + $0x58] sm:$0xff] %vm3446_vm6, %v3470_v29  ;;  %v7204_v47 = vpack.c.bf16 %v3818_v0, %v3817_v51 }
 0x81b   : > { %4505 = vperm.xlu0 %7521, %v4471_v52   ;;  %4398 = vperm.xlu1 %7525, %v4360_v25   ;;  %v4481_v52 = vld [vmem:[%s11605_s10 + $0x70] sm:$0xff]  ;;  %v4370_v25 = vld [vmem:[%s11604_s9 + $0x78] sm:$0xff] }
 0x81c   : > { %7205 = vmatprep.subr.bf16.mxu1 %v7204_v47  ;;  %v3824_v47 = vld [vmem:[#allocation3 + $0xc8] sm:$0xff] }
 0x81d   : > { %v3564_v16 = vpop.permute.xlu0 %3563  ;;  %7207 = vmatpush3.bf16.msra.mxu1 %v7206_v1  ;;  %v3630_v12 = vpop.permute.xlu1 %3629  ;;  %v3805_v1 = vld [vmem:[#allocation3 + $0x30] sm:$0xff] }
 0x81e   : > { %3585 = vst.msk [vmem:[#allocation3 + $0x110] sm:$0xff] %vm3446_vm6, %v3564_v16  ;;  %3650 = vst.msk [vmem:[#allocation3 + $0x198] sm:$0xff] %vm3446_vm6, %v3630_v12  ;;  %v4482_v12 = vld [vmem:[%s11605_s10 + $0x78] sm:$0xff] }
 0x81f   : > { %4403 = vperm.xlu0 %7521, %v4361_v42   ;;  %4510 = vperm.xlu1 %7525, %v4472_v2   ;;  %v7214_v42 = vpack.c.bf16 %v3806_v21, %v3805_v1  ;;  %v3823_v2 = vld [vmem:[#allocation3 + $0xc0] sm:$0xff]  ;;  %v3740_v21 = vld [vmem:[%s11598_s3 + $0xa8] sm:$0xff] }
 0x820   : > { %v7216_v16 = vpack.c.bf16 %v3824_v47, %v3823_v2 }
 0x821   : > { %v3504_v27 = vpop.permute.xlu0 %3503  ;;  %v3566_v60 = vpop.permute.xlu1 %3565  ;;  %v3849_v40 = vld [vmem:[#allocation3 + $0x190] sm:$0xff] }
 0x822   : > { %3523 = vst.msk [vmem:[#allocation3 + $0xa0] sm:$0xff] %vm3446_vm6, %v3504_v27  ;;  %3586 = vst.msk [vmem:[#allocation3 + $0x118] sm:$0xff] %vm3446_vm6, %v3566_v60  ;;  %v3826_v60 = vld [vmem:[#allocation3 + $0xd8] sm:$0xff] }
 0x823   : > { %4515 = vperm.xlu0 %7521, %v4473_v43   ;;  %4408 = vperm.xlu1 %7525, %v4362_v20   ;;  %v3808_v43 = vld [vmem:[#allocation3 + $0x48] sm:$0xff] }
 0x825   : > { %v3536_v3 = vpop.permute.xlu0 %3535  ;;  %v3506_v30 = vpop.permute.xlu1 %3505  ;;  %v3850_v14 = vld [vmem:[#allocation3 + $0x198] sm:$0xff]  ;;  %v3833_v24 = vld [vmem:[#allocation3 + $0x110] sm:$0xff] }
 0x826   : > { %3555 = vst.msk [vmem:[#allocation3 + $0xe0] sm:$0xff] %vm3446_vm6, %v3536_v3  ;;  %3524 = vst.msk [vmem:[#allocation3 + $0xa8] sm:$0xff] %vm3446_vm6, %v3506_v30  ;;  %v7236_v22 = vpack.c.bf16 %v3850_v14, %v3849_v40  ;;  %v3825_v3 = vld [vmem:[#allocation3 + $0xd0] sm:$0xff]  ;;  %v3810_v40 = vld [vmem:[#allocation3 + $0x58] sm:$0xff] }
 0x827   : > { %4413 = vperm.xlu0 %7521, %v4363_v53   ;;  %4520 = vperm.xlu1 %7525, %v4474_v10   ;;  %v3807_v53 = vld [vmem:[#allocation3 + $0x40] sm:$0xff]  ;;  %v7220_v30 = vpack.c.bf16 %v3826_v60, %v3825_v3 }
 0x828   : > { %7237 = vmatprep.subr.bf16.mxu0 %v7236_v22  ;;  %v7218_v10 = vpack.c.bf16 %v3808_v43, %v3807_v53  ;;  %v3744_v53 = vld [vmem:[%s11598_s3 + $0xc8] sm:$0xff] }
 0x829   : > { %v3472_v57 = vpop.permute.xlu0 %3471  ;;  %v3538_v44 = vpop.permute.xlu1 %3537  ;;  %v3834_v38 = vld [vmem:[#allocation3 + $0x118] sm:$0xff]  ;;  %v3819_v56 = vld [vmem:[#allocation3 + $0xa0] sm:$0xff] }
 0x82a   : > { %3491 = vst.msk [vmem:[#allocation3 + $0x60] sm:$0xff] %vm3446_vm6, %v3472_v57  ;;  %3556 = vst.msk [vmem:[#allocation3 + $0xe8] sm:$0xff] %vm3446_vm6, %v3538_v44  ;;  %v7238_v5 = vpack.c.bf16 %v3834_v38, %v3833_v24 }
 0x82b   : > { %4525 = vperm.xlu0 %7521, %v4475_v55   ;;  %4418 = vperm.xlu1 %7525, %v4364_v62   ;;  %v3809_v62 = vld [vmem:[#allocation3 + $0x50] sm:$0xff] }
 0x82c   : > { %7239 = vmatpush3.bf16.msra.mxu0 %v7238_v5  ;;  %v7222_v57 = vpack.c.bf16 %v3810_v40, %v3809_v62  ;;  %v3750_v40 = vld [vmem:[%s11598_s3 + $0xf8] sm:$0xff] }
 0x82d   : > { %v3632_v23 = vpop.permute.xlu0 %3631  ;;  %v3474_v19 = vpop.permute.xlu1 %3473  ;;  %v3820_v37 = vld [vmem:[#allocation3 + $0xa8] sm:$0xff]  ;;  %v3827_v44 = vld [vmem:[#allocation3 + $0xe0] sm:$0xff] }
 0x82e   : > { %3651 = vst.msk [vmem:[#allocation3 + $0x1a0] sm:$0xff] %vm3446_vm6, %v3632_v23  ;;  %3492 = vst.msk [vmem:[#allocation3 + $0x68] sm:$0xff] %vm3446_vm6, %v3474_v19  ;;  %v7208_v46 = vpack.c.bf16 %v3820_v37, %v3819_v56 }
 0x82f   : > { %4423 = vperm.xlu0 %7521, %v4365_v58   ;;  %4530 = vperm.xlu1 %7525, %v4476_v28  }
 0x830   : > { %7209 = vmatprep.subr.bf16.mxu1 %v7208_v46 }
 0x831   : > { %v3568_v45 = vpop.permute.xlu0 %3567  ;;  %7211 = vmatpush3.bf16.msra.mxu1 %v7210_v59  ;;  %v3634_v17 = vpop.permute.xlu1 %3633  ;;  %v3828_v55 = vld [vmem:[#allocation3 + $0xe8] sm:$0xff]  ;;  %v3811_v13 = vld [vmem:[#allocation3 + $0x60] sm:$0xff] }
 0x832   : > { %3587 = vst.msk [vmem:[#allocation3 + $0x120] sm:$0xff] %vm3446_vm6, %v3568_v45  ;;  %3652 = vst.msk [vmem:[#allocation3 + $0x1a8] sm:$0xff] %vm3446_vm6, %v3634_v17  ;;  %v7224_v24 = vpack.c.bf16 %v3828_v55, %v3827_v44  ;;  %v3719_v17 = vld [vmem:[%s11598_s3] sm:$0xff]  ;;  %v3749_v55 = vld [vmem:[%s11598_s3 + $0xf0] sm:$0xff] }
 0x833   : > { %4535 = vperm.xlu0 %7521, %v4477_v49   ;;  %4428 = vperm.xlu1 %7525, %v4366_v35  }
 0x835   : > { %v3508_v50 = vpop.permute.xlu0 %3507  ;;  %v3570_v32 = vpop.permute.xlu1 %3569  ;;  %v3851_v9 = vld [vmem:[#allocation3 + $0x1a0] sm:$0xff]  ;;  %v3812_v38 = vld [vmem:[#allocation3 + $0x68] sm:$0xff] }
 0x836   : > { %3525 = vst.msk [vmem:[#allocation3 + $0xb0] sm:$0xff] %vm3446_vm6, %v3508_v50  ;;  %3588 = vst.msk [vmem:[#allocation3 + $0x128] sm:$0xff] %vm3446_vm6, %v3570_v32  ;;  %v7226_v23 = vpack.c.bf16 %v3812_v38, %v3811_v13  ;;  %v3724_v32 = vld [vmem:[%s11598_s3 + $0x28] sm:$0xff] }
 0x837   : > { %4433 = vperm.xlu0 %7521, %v4367_v26   ;;  %4540 = vperm.xlu1 %7525, %v4478_v39   ;;  %v3725_v26 = vld [vmem:[%s11598_s3 + $0x30] sm:$0xff] }
 0x839   : > { %v3656_v31 = vpop.permute.xlu0 %3655  ;;  %v3510_v11 = vpop.permute.xlu1 %3509  ;;  %v3852_v63 = vld [vmem:[#allocation3 + $0x1a8] sm:$0xff]  ;;  %v3835_v6 = vld [vmem:[#allocation3 + $0x120] sm:$0xff] }
 0x83a   : > { %3679 = vst.msk [vmem:[#allocation3 + $0x1c0] sm:$0xff] %vm3446_vm6, %v3656_v31  ;;  %3526 = vst.msk [vmem:[#allocation3 + $0xb8] sm:$0xff] %vm3446_vm6, %v3510_v11  ;;  %v7240_v18 = vpack.c.bf16 %v3852_v63, %v3851_v9  ;;  %v3729_v11 = vld [vmem:[%s11598_s3 + $0x50] sm:$0xff] }
 0x83b   : > { %4545 = vperm.xlu0 %7521, %v4479_v8   ;;  %4438 = vperm.xlu1 %7525, %v4368_v61   ;;  %v3730_v8 = vld [vmem:[%s11598_s3 + $0x58] sm:$0xff] }
 0x83c   : > { %7241 = vmatprep.subr.bf16.mxu0 %v7240_v18 }
 0x83d   : > { %v3540_v33 = vpop.permute.xlu0 %3539  ;;  %v3658_v15 = vpop.permute.xlu1 %3657  ;;  %v3836_v41 = vld [vmem:[#allocation3 + $0x128] sm:$0xff]  ;;  %v3821_v51 = vld [vmem:[#allocation3 + $0xb0] sm:$0xff] }
 0x83e   : > { %3557 = vst.msk [vmem:[#allocation3 + $0xf0] sm:$0xff] %vm3446_vm6, %v3540_v33  ;;  %3680 = vst.msk [vmem:[#allocation3 + $0x1c8] sm:$0xff] %vm3446_vm6, %v3658_v15  ;;  %v7242_v48 = vpack.c.bf16 %v3836_v41, %v3835_v6  ;;  %v3734_v6 = vld [vmem:[%s11598_s3 + $0x78] sm:$0xff] }
 0x83f   : > { %4443 = vperm.xlu0 %7521, %v4369_v36   ;;  %4550 = vperm.xlu1 %7525, %v4480_v7   ;;  %v3735_v36 = vld [vmem:[%s11598_s3 + $0x80] sm:$0xff] }
 0x840   : > { %7243 = vmatpush3.bf16.msra.mxu0 %v7242_v48 }
 0x841   : > { %v3476_v4 = vpop.permute.xlu0 %3475  ;;  %v3594_v29 = vpop.permute.xlu1 %3593  ;;  %v3822_v0 = vld [vmem:[#allocation3 + $0xb8] sm:$0xff] }
 0x842   : > { %3493 = vst.msk [vmem:[#allocation3 + $0x70] sm:$0xff] %vm3446_vm6, %v3476_v4  ;;  %3616 = vst.msk [vmem:[#allocation3 + $0x148] sm:$0xff] %vm3446_vm6, %v3594_v29  ;;  %v7212_v54 = vpack.c.bf16 %v3822_v0, %v3821_v51 }
 0x843   : > { %4555 = vperm.xlu0 %7521, %v4481_v52   ;;  %4448 = vperm.xlu1 %7525, %v4370_v25   ;;  %v3855_v25 = vld [vmem:[#allocation3 + $0x1c0] sm:$0xff] }
 0x844   : > { %7213 = vmatprep.subr.bf16.mxu1 %v7212_v54  ;;  %v3739_v54 = vld [vmem:[%s11598_s3 + $0xa0] sm:$0xff] }
 0x845   : > { %v3636_v20 = vpop.permute.xlu0 %3635  ;;  %7215 = vmatpush3.bf16.msra.mxu1 %v7214_v42  ;;  %v3542_v27 = vpop.permute.xlu1 %3541  ;;  %v3829_v19 = vld [vmem:[#allocation3 + $0xf0] sm:$0xff]  ;;  %v3856_v7 = vld [vmem:[#allocation3 + $0x1c8] sm:$0xff] }
 0x846   : > { %3653 = vst.msk [vmem:[#allocation3 + $0x1b0] sm:$0xff] %vm3446_vm6, %v3636_v20  ;;  %3558 = vst.msk [vmem:[#allocation3 + $0xf8] sm:$0xff] %vm3446_vm6, %v3542_v27  ;;  %7217 = vmatprep.subr.bf16.mxu1 %v7216_v16  ;;  %v7248_v4 = vpack.c.bf16 %v3856_v7, %v3855_v25  ;;  %v3745_v16 = vld [vmem:[%s11598_s3 + $0xd0] sm:$0xff]  ;;  %v3731_v7 = vld [vmem:[%s11598_s3 + $0x60] sm:$0xff] }
 0x847   : > { %4560 = vperm.xlu1 %7525, %v4482_v12   ;;  %v3736_v25 = vld [vmem:[%s11598_s3 + $0x88] sm:$0xff] }
 0x849   : > { %v3572_v14 = vpop.permute.xlu0 %3571  ;;  %7219 = vmatpush3.bf16.msra.mxu1 %v7218_v10  ;;  %v3478_v22 = vpop.permute.xlu1 %3477  ;;  %v3813_v34 = vld [vmem:[#allocation3 + $0x70] sm:$0xff]  ;;  %v3840_v1 = vld [vmem:[#allocation3 + $0x148] sm:$0xff] }
 0x84a   : > { %3589 = vst.msk [vmem:[#allocation3 + $0x130] sm:$0xff] %vm3446_vm6, %v3572_v14  ;;  %3494 = vst.msk [vmem:[#allocation3 + $0x78] sm:$0xff] %vm3446_vm6, %v3478_v22  ;;  %7221 = vmatprep.subr.bf16.mxu1 %v7220_v30 }
 0x84d   : > { %v3592_v5 = vpop.permute.xlu0 %3591  ;;  %7223 = vmatpush3.bf16.msra.mxu1 %v7222_v57  ;;  %v3662_v58 = vpop.permute.xlu1 %3661  ;;  %v3830_v28 = vld [vmem:[#allocation3 + $0xf8] sm:$0xff]  ;;  %v3853_v9 = vld [vmem:[#allocation3 + $0x1b0] sm:$0xff] }
 0x84e   : > { %3615 = vst.msk [vmem:[#allocation3 + $0x140] sm:$0xff] %vm3446_vm6, %v3592_v5  ;;  %3682 = vst.msk [vmem:[#allocation3 + $0x1d8] sm:$0xff] %vm3446_vm6, %v3662_v58  ;;  %7225 = vmatprep.subr.bf16.mxu1 %v7224_v24  ;;  %v7228_v56 = vpack.c.bf16 %v3830_v28, %v3829_v19  ;;  %v3755_v28 = vld [vmem:[%s11598_s3 + $0x120] sm:$0xff]  ;;  %v3754_v19 = vld [vmem:[%s11598_s3 + $0x118] sm:$0xff] }
 0x851   : > { %v3660_v37 = vpop.permute.xlu0 %3659  ;;  %7227 = vmatpush3.bf16.msra.mxu1 %v7226_v23  ;;  %v3598_v46 = vpop.permute.xlu1 %3597  ;;  %v3814_v59 = vld [vmem:[#allocation3 + $0x78] sm:$0xff]  ;;  %v3837_v41 = vld [vmem:[#allocation3 + $0x130] sm:$0xff] }
 0x852   : > { %3681 = vst.msk [vmem:[#allocation3 + $0x1d0] sm:$0xff] %vm3446_vm6, %v3660_v37  ;;  %3618 = vst.msk [vmem:[#allocation3 + $0x158] sm:$0xff] %vm3446_vm6, %v3598_v46  ;;  %7229 = vmatprep.subr.bf16.mxu1 %v7228_v56  ;;  %v7230_v49 = vpack.c.bf16 %v3814_v59, %v3813_v34  ;;  %v3760_v34 = vld [vmem:[%s11598_s3 + $0x148] sm:$0xff]  ;;  %v3721_v59 = vld [vmem:[%s11598_s3 + $0x10] sm:$0xff] }
 0x855   : > { %v3596_v35 = vpop.permute.xlu0 %3595  ;;  %7231 = vmatpush3.bf16.msra.mxu1 %v7230_v49  ;;  %v3638_v45 = vpop.permute.xlu1 %3637  ;;  %v3839_v29 = vld [vmem:[#allocation3 + $0x140] sm:$0xff]  ;;  %v3858_v2 = vld [vmem:[#allocation3 + $0x1d8] sm:$0xff] }
 0x856   : > { %3617 = vst.msk [vmem:[#allocation3 + $0x150] sm:$0xff] %vm3446_vm6, %v3596_v35  ;;  %3654 = vst.msk [vmem:[#allocation3 + $0x1b8] sm:$0xff] %vm3446_vm6, %v3638_v45  ;;  %v7250_v42 = vpack.c.bf16 %v3840_v1, %v3839_v29  ;;  %v3759_v45 = vld [vmem:[%s11598_s3 + $0x140] sm:$0xff] }
 0x857   : > { %v3779_v1 = vld [vmem:[%s11598_s3 + $0x1e0] sm:$0xff] }
 0x858   : > { %3985 = vmatmul.mubr.f32.vlgmr.msra.gmra.mrb[44].mxu1 %v3719_v17 }
 0x859   : > { %v3664_v39 = vpop.permute.xlu0 %3663  ;;  %v3574_v50 = vpop.permute.xlu1 %3573  ;;  %3989 = vmatprep.mubr.f32.mxu1 %v3725_v26  ;;  %v3857_v51 = vld [vmem:[#allocation3 + $0x1d0] sm:$0xff]  ;;  %v3842_v10 = vld [vmem:[#allocation3 + $0x158] sm:$0xff] }
 0x85a   : > { %3683 = vst.msk [vmem:[#allocation3 + $0x1e0] sm:$0xff] %vm3446_vm6, %v3664_v39  ;;  %3590 = vst.msk [vmem:[#allocation3 + $0x138] sm:$0xff] %vm3446_vm6, %v3574_v50  ;;  %v7252_v12 = vpack.c.bf16 %v3858_v2, %v3857_v51  ;;  %v3727_v50 = vld [vmem:[%s11598_s3 + $0x40] sm:$0xff]  ;;  %v3785_v2 = vld [vmem:[%s11598_s3 + $0x210] sm:$0xff] }
 0x85c   : > { %3990 = vmatmul.mubr.f32.gmra.mrb[46].mxu1 %v3724_v32  ;;  %v3765_v32 = vld [vmem:[%s11598_s3 + $0x170] sm:$0xff] }
 0x85d   : > { %v3600_v61 = vpop.permute.xlu0 %3599  ;;  %v3666_v31 = vpop.permute.xlu1 %3665  ;;  %3994 = vmatprep.mubr.f32.mxu1 %v3730_v8  ;;  %v3854_v63 = vld [vmem:[#allocation3 + $0x1b8] sm:$0xff]  ;;  %v3841_v43 = vld [vmem:[#allocation3 + $0x150] sm:$0xff] }
 0x85e   : > { %3619 = vst.msk [vmem:[#allocation3 + $0x160] sm:$0xff] %vm3446_vm6, %v3600_v61  ;;  %3684 = vst.msk [vmem:[#allocation3 + $0x1e8] sm:$0xff] %vm3446_vm6, %v3666_v31  ;;  %v7244_v18 = vpack.c.bf16 %v3854_v63, %v3853_v9  ;;  %v7254_v3 = vpack.c.bf16 %v3842_v10, %v3841_v43  ;;  %v3726_v8 = vld [vmem:[%s11598_s3 + $0x38] sm:$0xff]  ;;  %v3764_v31 = vld [vmem:[%s11598_s3 + $0x168] sm:$0xff] }
 0x85f   : > { %v3752_v43 = vld [vmem:[%s11598_s3 + $0x108] sm:$0xff]  ;;  %v3795_v10 = vld [vmem:[%s11598_s3 + $0x260] sm:$0xff] }
 0x860   : > { %3995 = vmatmul.mubr.f32.gmra.mrb[48].mxu1 %v3729_v11  ;;  %7245 = vmatprep.subr.bf16.mxu0 %v7244_v18  ;;  %v3732_v18 = vld [vmem:[%s11598_s3 + $0x68] sm:$0xff] }
 0x861   : > { %v3668_v33 = vpop.permute.xlu0 %3667  ;;  %v3602_v15 = vpop.permute.xlu1 %3601  ;;  %3999 = vmatprep.mubr.f32.mxu1 %v3735_v36  ;;  %v3838_v48 = vld [vmem:[#allocation3 + $0x138] sm:$0xff]  ;;  %v3859_v30 = vld [vmem:[#allocation3 + $0x1e0] sm:$0xff] }
 0x862   : > { %3685 = vst.msk [vmem:[#allocation3 + $0x1f0] sm:$0xff] %vm3446_vm6, %v3668_v33  ;;  %3620 = vst.msk [vmem:[#allocation3 + $0x168] sm:$0xff] %vm3446_vm6, %v3602_v15  ;;  %v7246_v52 = vpack.c.bf16 %v3838_v48, %v3837_v41  ;;  %v3770_v36 = vld [vmem:[%s11598_s3 + $0x198] sm:$0xff]  ;;  %v3769_v33 = vld [vmem:[%s11598_s3 + $0x190] sm:$0xff] }
 0x863   : > { %v3737_v48 = vld [vmem:[%s11598_s3 + $0x90] sm:$0xff] }
 0x864   : > { %4000 = vmatmul.mubr.f32.gmra.mrb[50].mxu1 %v3734_v6  ;;  %7247 = vmatpush3.bf16.msra.mxu0 %v7246_v52  ;;  %v3775_v52 = vld [vmem:[%s11598_s3 + $0x1c0] sm:$0xff] }
 0x865   : > { %v3604_v0 = vpop.permute.xlu0 %3603  ;;  %7249 = vmatprep.subr.bf16.mxu0 %v7248_v4  ;;  %v3670_v47 = vpop.permute.xlu1 %3669  ;;  %4004 = vmatprep.mubr.f32.mxu1 %v3740_v21  ;;  %v3860_v20 = vld [vmem:[#allocation3 + $0x1e8] sm:$0xff]  ;;  %v3843_v44 = vld [vmem:[#allocation3 + $0x160] sm:$0xff]  ;;  %v3774_v21 = vld [vmem:[%s11598_s3 + $0x1b8] sm:$0xff] }
 0x866   : > { %3621 = vst.msk [vmem:[#allocation3 + $0x170] sm:$0xff] %vm3446_vm6, %v3604_v0  ;;  %3686 = vst.msk [vmem:[#allocation3 + $0x1f8] sm:$0xff] %vm3446_vm6, %v3670_v47  ;;  %v7256_v14 = vpack.c.bf16 %v3860_v20, %v3859_v30  ;;  %v3742_v0 = vld [vmem:[%s11598_s3 + $0xb8] sm:$0xff]  ;;  %v3780_v47 = vld [vmem:[%s11598_s3 + $0x1e8] sm:$0xff] }
 0x867   : > { %v3790_v20 = vld [vmem:[%s11598_s3 + $0x238] sm:$0xff] }
 0x868   : > { %4005 = vmatmul.mubr.f32.gmra.mrb[52].mxu1 %v3739_v54  ;;  %7251 = vmatpush3.bf16.msra.mxu0 %v7250_v42  ;;  %v3741_v54 = vld [vmem:[%s11598_s3 + $0xb0] sm:$0xff]  ;;  %v3747_v42 = vld [vmem:[%s11598_s3 + $0xe0] sm:$0xff]  ;;  %v3794_v30 = vld [vmem:[%s11598_s3 + $0x258] sm:$0xff] }
 0x869   : > { %v3688_v27 = vpop.permute.xlu0 %3687  ;;  %7253 = vmatprep.subr.bf16.mxu0 %v7252_v12  ;;  %v3606_v60 = vpop.permute.xlu1 %3605  ;;  %4009 = vmatprep.mubr.f32.mxu1 %v3745_v16  ;;  %v3844_v22 = vld [vmem:[#allocation3 + $0x168] sm:$0xff]  ;;  %v3861_v24 = vld [vmem:[#allocation3 + $0x1f0] sm:$0xff]  ;;  %v3746_v16 = vld [vmem:[%s11598_s3 + $0xd8] sm:$0xff] }
 0x86a   : > { %3711 = vst.msk [vmem:[#allocation3 + $0x200] sm:$0xff] %vm3446_vm6, %v3688_v27  ;;  %3622 = vst.msk [vmem:[#allocation3 + $0x178] sm:$0xff] %vm3446_vm6, %v3606_v60  ;;  %v7258_v5 = vpack.c.bf16 %v3844_v22, %v3843_v44  ;;  %v3784_v12 = vld [vmem:[%s11598_s3 + $0x208] sm:$0xff]  ;;  %v3751_v27 = vld [vmem:[%s11598_s3 + $0x100] sm:$0xff] }
 0x86b   : > { %v3789_v60 = vld [vmem:[%s11598_s3 + $0x230] sm:$0xff]  ;;  %v3766_v44 = vld [vmem:[%s11598_s3 + $0x178] sm:$0xff] }
 0x86c   : > { %4010 = vmatmul.mubr.f32.gmra.mrb[54].mxu1 %v3744_v53  ;;  %7255 = vmatpush3.bf16.msra.mxu0 %v7254_v3  ;;  %v3757_v53 = vld [vmem:[%s11598_s3 + $0x130] sm:$0xff]  ;;  %v3756_v3 = vld [vmem:[%s11598_s3 + $0x128] sm:$0xff] }
 0x86d   : > { %v3692_v62 = vpop.permute.xlu0 %3691  ;;  %7257 = vmatprep.subr.bf16.mxu0 %v7256_v14  ;;  %v3690_v57 = vpop.permute.xlu1 %3689  ;;  %4014 = vmatprep.mubr.f32.mxu1 %v3750_v40  ;;  %v3862_v38 = vld [vmem:[#allocation3 + $0x1f8] sm:$0xff]  ;;  %v3845_v56 = vld [vmem:[#allocation3 + $0x170] sm:$0xff]  ;;  %v3723_v14 = vld [vmem:[%s11598_s3 + $0x20] sm:$0xff] }
 0x86e   : > { %3713 = vst.msk [vmem:[#allocation3 + $0x210] sm:$0xff] %vm3446_vm6, %v3692_v62  ;;  %3712 = vst.msk [vmem:[#allocation3 + $0x208] sm:$0xff] %vm3446_vm6, %v3690_v57  ;;  %v7260_v58 = vpack.c.bf16 %v3862_v38, %v3861_v24  ;;  %v3762_v40 = vld [vmem:[%s11598_s3 + $0x158] sm:$0xff]  ;;  %v3761_v22 = vld [vmem:[%s11598_s3 + $0x150] sm:$0xff] }
 0x86f   : > { %v3767_v62 = vld [vmem:[%s11598_s3 + $0x180] sm:$0xff]  ;;  %v3733_v57 = vld [vmem:[%s11598_s3 + $0x70] sm:$0xff]  ;;  %v3738_v24 = vld [vmem:[%s11598_s3 + $0x98] sm:$0xff] }
 0x870   : > { %4015 = vmatmul.mubr.f32.gmra.mrb[56].mxu1 %v3749_v55  ;;  %7259 = vmatpush3.bf16.msra.mxu0 %v7258_v5  ;;  %v3728_v55 = vld [vmem:[%s11598_s3 + $0x48] sm:$0xff]  ;;  %v3743_v5 = vld [vmem:[%s11598_s3 + $0xc0] sm:$0xff] }
 0x871   : > { %v3696_v13 = vpop.permute.xlu0 %3695  ;;  %7261 = vmatprep.subr.bf16.mxu0 %v7260_v58  ;;  %v3694_v23 = vpop.permute.xlu1 %3693  ;;  %4019 = vmatprep.mubr.f32.mxu1 %v3755_v28  ;;  %v3846_v37 = vld [vmem:[#allocation3 + $0x178] sm:$0xff]  ;;  %v3863_v17 = vld [vmem:[#allocation3 + $0x200] sm:$0xff]  ;;  %v3772_v38 = vld [vmem:[%s11598_s3 + $0x1a8] sm:$0xff] }
 0x872   : > { %3715 = vst.msk [vmem:[#allocation3 + $0x220] sm:$0xff] %vm3446_vm6, %v3696_v13  ;;  %3714 = vst.msk [vmem:[#allocation3 + $0x218] sm:$0xff] %vm3446_vm6, %v3694_v23  ;;  %v7262_v46 = vpack.c.bf16 %v3846_v37, %v3845_v56  ;;  %v3771_v58 = vld [vmem:[%s11598_s3 + $0x1a0] sm:$0xff]  ;;  %v3748_v28 = vld [vmem:[%s11598_s3 + $0xe8] sm:$0xff] }
 0x873   : > { %v3777_v13 = vld [vmem:[%s11598_s3 + $0x1d0] sm:$0xff]  ;;  %v3758_v56 = vld [vmem:[%s11598_s3 + $0x138] sm:$0xff] }
 0x874   : > { %4020 = vmatmul.mubr.f32.gmra.mrb[58].mxu1 %v3754_v19  ;;  %7263 = vmatpush3.bf16.msra.mxu0 %v7262_v46  ;;  %v3753_v23 = vld [vmem:[%s11598_s3 + $0x110] sm:$0xff]  ;;  %v3776_v19 = vld [vmem:[%s11598_s3 + $0x1c8] sm:$0xff]  ;;  %v3782_v37 = vld [vmem:[%s11598_s3 + $0x1f8] sm:$0xff] }
 0x875   : > { %v3700_v49 = vpop.permute.xlu0 %3699  ;;  %v3698_v35 = vpop.permute.xlu1 %3697  ;;  %4024 = vmatprep.mubr.f32.mxu1 %v3760_v34  ;;  %v3864_v26 = vld [vmem:[#allocation3 + $0x208] sm:$0xff]  ;;  %v3865_v11 = vld [vmem:[#allocation3 + $0x210] sm:$0xff]  ;;  %v3763_v46 = vld [vmem:[%s11598_s3 + $0x160] sm:$0xff] }
 0x876   : > { %3717 = vst.msk [vmem:[#allocation3 + $0x230] sm:$0xff] %vm3446_vm6, %v3700_v49  ;;  %3716 = vst.msk [vmem:[#allocation3 + $0x228] sm:$0xff] %vm3446_vm6, %v3698_v35  ;;  %v7264_v39 = vpack.c.bf16 %v3864_v26, %v3863_v17  ;;  %v3781_v34 = vld [vmem:[%s11598_s3 + $0x1f0] sm:$0xff]  ;;  %v3787_v49 = vld [vmem:[%s11598_s3 + $0x220] sm:$0xff] }
 0x877   : > { %4130 = vmatmul.mubr.f32.vlgmr.msra.gmra.mrb[6].mxu0 %v3721_v59  ;;  %v3768_v59 = vld [vmem:[%s11598_s3 + $0x188] sm:$0xff]  ;;  %v3773_v35 = vld [vmem:[%s11598_s3 + $0x1b0] sm:$0xff]  ;;  %v3778_v17 = vld [vmem:[%s11598_s3 + $0x1d8] sm:$0xff] }
 0x878   : > { %4025 = vmatmul.mubr.f32.gmra.mrb[60].mxu1 %v3759_v45  ;;  %7265 = vmatprep.subr.bf16.mxu1 %v7264_v39  ;;  %v3786_v45 = vld [vmem:[%s11598_s3 + $0x218] sm:$0xff]  ;;  %v3792_v26 = vld [vmem:[%s11598_s3 + $0x248] sm:$0xff] }
 0x879   : > { %7267 = vmatpush3.bf16.msra.mxu1 %v7264_v39  ;;  %v3702_v61 = vpop.permute.xlu1 %3701  ;;  %4134 = vmatprep.mubr.f32.mxu0 %v3727_v50  ;;  %v3866_v9 = vld [vmem:[#allocation3 + $0x218] sm:$0xff]  ;;  %v3867_v15 = vld [vmem:[#allocation3 + $0x220] sm:$0xff] }
 0x87a   : > { %3718 = vst.msk [vmem:[#allocation3 + $0x238] sm:$0xff] %vm3446_vm6, %v3702_v61  ;;  %4029 = vmatprep.mubr.f32.mxu1 %v3765_v32  ;;  %v7268_v63 = vpack.c.bf16 %v3866_v9, %v3865_v11  ;;  %v3783_v39 = vld [vmem:[%s11598_s3 + $0x200] sm:$0xff]  ;;  %v3788_v32 = vld [vmem:[%s11598_s3 + $0x228] sm:$0xff]  ;;  %v3793_v61 = vld [vmem:[%s11598_s3 + $0x250] sm:$0xff] }
 0x87b   : > { %4135 = vmatmul.mubr.f32.gmra.mrb[8].mxu0 %v3726_v8  ;;  %v3791_v50 = vld [vmem:[%s11598_s3 + $0x240] sm:$0xff]  ;;  %v3797_v8 = vld [vmem:[%s11598_s3 + $0x270] sm:$0xff]  ;;  %v3798_v11 = vld [vmem:[%s11598_s3 + $0x278] sm:$0xff] }
 0x87c   : > { %4030 = vmatmul.mubr.f32.gmra.mrb[62].mxu1 %v3764_v31  ;;  %7269 = vmatprep.subr.bf16.mxu1 %v7268_v63  ;;  %v3796_v31 = vld [vmem:[%s11598_s3 + $0x268] sm:$0xff] }
 0x87d   : > { %7271 = vmatpush3.bf16.msra.mxu1 %v7268_v63  ;;  %4139 = vmatprep.mubr.f32.mxu0 %v3732_v18  ;;  %v3868_v6 = vld [vmem:[#allocation3 + $0x228] sm:$0xff]  ;;  %v3869_v4 = vld [vmem:[#allocation3 + $0x230] sm:$0xff] }
 0x87e   : > { %4034 = vmatprep.mubr.f32.mxu1 %v3770_v36  ;;  %v7272_v41 = vpack.c.bf16 %v3868_v6, %v3867_v15 }
 0x87f   : > { %4140 = vmatmul.mubr.f32.gmra.mrb[10].mxu0 %v3731_v7 }
 0x880   : > { %4035 = vmatmul.mubr.f32.gmra.mrb[64].mxu1 %v3769_v33  ;;  %7273 = vmatprep.subr.bf16.mxu1 %v7272_v41 }
 0x881   : > { %7275 = vmatpush3.bf16.msra.mxu1 %v7272_v41  ;;  %4144 = vmatprep.mubr.f32.mxu0 %v3737_v48  ;;  %v3870_v29 = vld [vmem:[#allocation3 + $0x238] sm:$0xff] }
 0x882   : > { %4039 = vmatprep.mubr.f32.mxu1 %v3775_v52  ;;  %v7276_v51 = vpack.c.bf16 %v3870_v29, %v3869_v4 }
 0x883   : > { %4145 = vmatmul.mubr.f32.gmra.mrb[12].mxu0 %v3736_v25 }
 0x884   : > { %4040 = vmatmul.mubr.f32.gmra.mrb[66].mxu1 %v3774_v21  ;;  %7277 = vmatprep.subr.bf16.mxu1 %v7276_v51 }
 0x885   : > { %7279 = vmatpush3.bf16.msra.mxu1 %v7276_v51  ;;  %4149 = vmatprep.mubr.f32.mxu0 %v3742_v0 }
 0x886   : > { %4044 = vmatprep.mubr.f32.mxu1 %v3780_v47  ;;  %v10852_v15 = vpop.permute.xlu0 %4373 }
 0x887   : > { %4150 = vmatmul.mubr.f32.gmra.mrb[14].mxu0 %v3741_v54 }
 0x888   : > { %4045 = vmatmul.mubr.f32.gmra.mrb[68].mxu1 %v3779_v1  ;;  %4154 = vmatprep.mubr.f32.mxu0 %v3747_v42 }
 0x889   : > { %4049 = vmatprep.mubr.f32.mxu1 %v3785_v2 }
 0x88a   : > { %v10854_v41 = vpop.permute.xlu1 %4378  ;;  %v10856_v21 = vpop.permute.xlu0 %4485 }
 0x88b   : > { %4155 = vmatmul.mubr.f32.gmra.mrb[16].mxu0 %v3746_v16 }
 0x88c   : > { %4050 = vmatmul.mubr.f32.gmra.mrb[70].mxu1 %v3784_v12  ;;  %4159 = vmatprep.mubr.f32.mxu0 %v3752_v43 }
 0x88d   : > { %4054 = vmatprep.mubr.f32.mxu1 %v3790_v20 }
 0x88e   : > { %v10858_v51 = vpop.permute.xlu1 %4490  ;;  %v10860_v1 = vpop.permute.xlu0 %4383 }
 0x88f   : > { %4160 = vmatmul.mubr.f32.gmra.mrb[18].mxu0 %v3751_v27 }
 0x890   : > { %4055 = vmatmul.mubr.f32.gmra.mrb[72].mxu1 %v3789_v60  ;;  %4164 = vmatprep.mubr.f32.mxu0 %v3757_v53 }
 0x891   : > { %4059 = vmatprep.mubr.f32.mxu1 %v3795_v10 }
 0x892   : > { %v10862_v2 = vpop.permute.xlu1 %4388  ;;  %v10864_v20 = vpop.permute.xlu0 %4495 }
 0x893   : > { %4165 = vmatmul.mubr.f32.gmra.mrb[20].mxu0 %v3756_v3 }
 0x894   : > { %4060 = vmatmul.mubr.f32.gmra.mrb[74].mxu1 %v3794_v30  ;;  %4169 = vmatprep.mubr.f32.mxu0 %v3762_v40 }
 0x895   : > { %6711 = vmatprep.mubr.msk.f32.mxu1 %vm3871_vm0, %v3723_v14 }
 0x896   : > { %v10868_v53 = vpop.permute.xlu1 %4500  ;;  %v10872_v40 = vpop.permute.xlu0 %4393 }
 0x897   : > { %4170 = vmatmul.mubr.f32.gmra.mrb[22].mxu0 %v3761_v22 }
 0x898   : > { %6712 = vmatmul.mubr.msk.f32.vlgmr.msra.gmra.mrb[76].mxu1 %vm3871_vm0, %v3728_v55  ;;  %4174 = vmatprep.mubr.f32.mxu0 %v3767_v62 }
 0x899   : > { %6714 = vmatprep.mubr.msk.f32.mxu1 %vm3871_vm0, %v3733_v57 }
 0x89a   : > { %v10874_v62 = vpop.permute.xlu1 %4398 }
 0x89b   : > { %4175 = vmatmul.mubr.f32.gmra.mrb[24].mxu0 %v3766_v44 }
 0x89c   : > { %6715 = vmatmul.mubr.msk.f32.gmra.mrb[78].mxu1 %vm3871_vm0, %v3738_v24  ;;  %4179 = vmatprep.mubr.f32.mxu0 %v3772_v38 }
 0x89d   : > { %6717 = vmatprep.mubr.msk.f32.mxu1 %vm3871_vm0, %v3743_v5 }
 0x89f   : > { %4180 = vmatmul.mubr.f32.gmra.mrb[26].mxu0 %v3771_v58 }
 0x8a0   : > { %6718 = vmatmul.mubr.msk.f32.gmra.mrb[80].mxu1 %vm3871_vm0, %v3748_v28  ;;  %4184 = vmatprep.mubr.f32.mxu0 %v3777_v13  ;;  %v10880_v13 = vpop.permute.xlu0 %4505 }
 0x8a1   : > { %6720 = vmatprep.mubr.msk.f32.mxu1 %vm3871_vm0, %v3753_v23 }
 0x8a3   : > { %4185 = vmatmul.mubr.f32.gmra.mrb[28].mxu0 %v3776_v19 }
 0x8a4   : > { %6721 = vmatmul.mubr.msk.f32.gmra.mrb[82].mxu1 %vm3871_vm0, %v3758_v56  ;;  %4189 = vmatprep.mubr.f32.mxu0 %v3782_v37  ;;  %v10884_v37 = vpop.permute.xlu1 %4510 }
 0x8a5   : > { %6723 = vmatprep.mubr.msk.f32.mxu1 %vm3871_vm0, %v3763_v46 }
 0x8a7   : > { %4190 = vmatmul.mubr.f32.gmra.mrb[30].mxu0 %v3781_v34 }
 0x8a8   : > { %6724 = vmatmul.mubr.msk.f32.gmra.mrb[84].mxu1 %vm3871_vm0, %v3768_v59  ;;  %4194 = vmatprep.mubr.f32.mxu0 %v3787_v49 }
 0x8a9   : > { %6726 = vmatprep.mubr.msk.f32.mxu1 %vm3871_vm0, %v3773_v35 }
 0x8ab   : > { %4195 = vmatmul.mubr.f32.gmra.mrb[32].mxu0 %v3786_v45 }
 0x8ac   : > { %6727 = vmatmul.mubr.msk.f32.gmra.mrb[86].mxu1 %vm3871_vm0, %v3778_v17  ;;  %4199 = vmatprep.mubr.f32.mxu0 %v3792_v26  ;;  %v10888_v26 = vpop.permute.xlu0 %4403 }
 0x8ad   : > { %6729 = vmatprep.mubr.msk.f32.mxu1 %vm3871_vm0, %v3783_v39 }
 0x8af   : > { %4200 = vmatmul.mubr.f32.gmra.mrb[34].mxu0 %v3791_v50 }
 0x8b0   : > { %6730 = vmatmul.mubr.msk.f32.gmra.mrb[88].mxu1 %vm3871_vm0, %v3788_v32  ;;  %4204 = vmatprep.mubr.f32.mxu0 %v3797_v8 }
 0x8b1   : > { %6732 = vmatprep.mubr.msk.f32.mxu1 %vm3871_vm0, %v3793_v61  ;;  %v10890_v61 = vpop.permute.xlu1 %4408 }
 0x8b3   : > { %4205 = vmatmul.mubr.f32.gmra.mrb[36].mxu0 %v3796_v31 }
 0x8b4   : > { %6733 = vmatmul.mubr.msk.f32.gmra.mrb[90].mxu1 %vm3871_vm0, %v3798_v11 }
 0x92b   : > { %v6335_v9 = vpop.f32.mrb[44].mxu1 }
 0x92c   : > { %v6336_v63 = vpop.f32.mrb[45].mxu1 }
 0x92d   : > { %v6337_v18 = vadd.f32 %v6336_v63, %v6335_v9 }
 0x92f   : > { %v6338_v36 = vpop.f32.mrb[46].mxu1 }
 0x930   : > { %v6339_v7 = vpop.f32.mrb[47].mxu1 }
 0x931   : > { %v6340_v33 = vadd.f32 %v6339_v7, %v6338_v36 }
 0x933   : > { %v6341_v6 = vpop.f32.mrb[48].mxu1 }
 0x934   : > { %v6342_v48 = vpop.f32.mrb[49].mxu1 }
 0x935   : > { %v6343_v52 = vadd.f32 %v6342_v48, %v6341_v6 }
 0x937   : > { %v6344_v25 = vpop.f32.mrb[50].mxu1 }
 0x938   : > { %v6345_v4 = vpop.f32.mrb[51].mxu1 }
 0x939   : > { %v6346_v29 = vadd.f32 %v6345_v4, %v6344_v25  ;;  %v10898_v4 = vpop.permute.xlu1 %4520 }
 0x93b   : > { %v6347_v0 = vpop.f32.mrb[52].mxu1 }
 0x93c   : > { %v6348_v47 = vpop.f32.mrb[53].mxu1 }
 0x93d   : > { %v6349_v54 = vadd.f32 %v6348_v47, %v6347_v0 }
 0x93f   : > { %v6350_v42 = vpop.f32.mrb[54].mxu1 }
 0x940   : > { %v6351_v16 = vpop.f32.mrb[55].mxu1 }
 0x941   : > { %v6352_v12 = vadd.f32 %v6351_v16, %v6350_v42 }
 0x943   : > { %v6353_v43 = vpop.f32.mrb[56].mxu1 }
 0x944   : > { %v6354_v27 = vpop.f32.mrb[57].mxu1 }
 0x945   : > { %v10866_v60 = vadd.f32 %v6354_v27, %v6353_v43 }
 0x947   : > { %v6356_v10 = vpop.f32.mrb[58].mxu1 }
 0x948   : > { %v6357_v3 = vpop.f32.mrb[59].mxu1 }
 0x949   : > { %v10870_v30 = vadd.f32 %v6357_v3, %v6356_v10 }
 0x94a   : > { %v6415_v14 = vpop.f32.mrb[6].mxu0 }
 0x94b   : > { %v6416_v22 = vpop.f32.mrb[7].mxu0  ;;  %v6359_v55 = vpop.f32.mrb[60].mxu1 }
 0x94c   : > { %v6417_v57 = vadd.f32 %v6416_v22, %v6415_v14  ;;  %v6360_v44 = vpop.f32.mrb[61].mxu1 }
 0x94d   : > { %v10876_v24 = vadd.f32 %v6360_v44, %v6359_v55  ;;  %v10904_v55 = vpop.permute.xlu1 %4418 }
 0x94e   : > { %v6418_v38 = vpop.f32.mrb[8].mxu0  ;;  %v10878_v5 = vadd.f32 %v6417_v57, %v6337_v18 }
 0x94f   : > { %v6419_v58 = vpop.f32.mrb[9].mxu0  ;;  %v6362_v28 = vpop.f32.mrb[62].mxu1 }
 0x950   : > { %v6420_v23 = vadd.f32 %v6419_v58, %v6418_v38  ;;  %v6363_v19 = vpop.f32.mrb[63].mxu1 }
 0x951   : > { %v10882_v56 = vadd.f32 %v6363_v19, %v6362_v28 }
 0x952   : > { %v6421_v46 = vpop.f32.mrb[10].mxu0  ;;  %v4137_v34 = vadd.f32 %v6420_v23, %v6340_v33  ;;  %v10894_v33 = vpop.permute.xlu0 %4515 }
 0x953   : > { %v6422_v59 = vpop.f32.mrb[11].mxu0  ;;  %v6365_v49 = vpop.f32.mrb[64].mxu1 }
 0x954   : > { %v6423_v35 = vadd.f32 %v6422_v59, %v6421_v46  ;;  %v6366_v45 = vpop.f32.mrb[65].mxu1 }
 0x955   : > { %v10886_v17 = vadd.f32 %v6366_v45, %v6365_v49 }
 0x956   : > { %v6424_v39 = vpop.f32.mrb[12].mxu0  ;;  %v4142_v50 = vadd.f32 %v6423_v35, %v6343_v52  ;;  %v10902_v10 = vpop.permute.xlu0 %4413 }
 0x957   : > { %v6425_v32 = vpop.f32.mrb[13].mxu0  ;;  %v6368_v8 = vpop.f32.mrb[66].mxu1 }
 0x958   : > { %v6426_v31 = vadd.f32 %v6425_v32, %v6424_v39  ;;  %v6369_v11 = vpop.f32.mrb[67].mxu1 }
 0x959   : > { %v10892_v9 = vadd.f32 %v6369_v11, %v6368_v8 }
 0x95a   : > { %v6427_v63 = vpop.f32.mrb[14].mxu0  ;;  %v4147_v18 = vadd.f32 %v6426_v31, %v6346_v29  ;;  %v10909_v19 = vpop.permute.xlu0 %4525 }
 0x95b   : > { %v6428_v36 = vpop.f32.mrb[15].mxu0  ;;  %v6371_v7 = vpop.f32.mrb[68].mxu1 }
 0x95c   : > { %v6429_v6 = vadd.f32 %v6428_v36, %v6427_v63  ;;  %v6372_v48 = vpop.f32.mrb[69].mxu1 }
 0x95d   : > { %v10896_v25 = vadd.f32 %v6372_v48, %v6371_v7 }
 0x95e   : > { %v6430_v52 = vpop.f32.mrb[16].mxu0  ;;  %v4152_v0 = vadd.f32 %v6429_v6, %v6349_v54  ;;  %v10917_v63 = vpop.permute.xlu0 %4423 }
 0x95f   : > { %v6431_v47 = vpop.f32.mrb[17].mxu0  ;;  %v6374_v42 = vpop.f32.mrb[70].mxu1 }
 0x960   : > { %v6432_v16 = vadd.f32 %v6431_v47, %v6430_v52  ;;  %v6375_v43 = vpop.f32.mrb[71].mxu1 }
 0x961   : > { %v10900_v27 = vadd.f32 %v6375_v43, %v6374_v42 }
 0x962   : > { %v6433_v29 = vpop.f32.mrb[18].mxu0  ;;  %v4157_v3 = vadd.f32 %v6432_v16, %v6352_v12  ;;  %v10913_v12 = vpop.permute.xlu1 %4530 }
 0x963   : > { %v6434_v14 = vpop.f32.mrb[19].mxu0  ;;  %v6377_v22 = vpop.f32.mrb[72].mxu1 }
 0x964   : > { %v6435_v57 = vadd.f32 %v6434_v14, %v6433_v29  ;;  %v6378_v44 = vpop.f32.mrb[73].mxu1 }
 0x965   : > { %v10906_v38 = vadd.f32 %v6378_v44, %v6377_v22 }
 0x966   : > { %v6436_v58 = vpop.f32.mrb[20].mxu0  ;;  %v4162_v54 = vadd.f32 %v6435_v57, %v10866_v60  ;;  %v10922_v42 = vpop.permute.xlu1 %4428 }
 0x967   : > { %v6437_v28 = vpop.f32.mrb[21].mxu0  ;;  %v6380_v23 = vpop.f32.mrb[74].mxu1 }
 0x968   : > { %v6438_v46 = vadd.f32 %v6437_v28, %v6436_v58  ;;  %v6381_v59 = vpop.f32.mrb[75].mxu1 }
 0x969   : > { %v10911_v49 = vadd.f32 %v6381_v59, %v6380_v23 }
 0x96a   : > { %v6439_v35 = vpop.f32.mrb[22].mxu0  ;;  %v4167_v45 = vadd.f32 %v6438_v46, %v10870_v30 }
 0x96b   : > { %v6713_v39 = vpop.f32.mrb[76].mxu1  ;;  %v6440_v32 = vpop.f32.mrb[23].mxu0 }
 0x96c   : > { %v4282_v8 = vadd.f32 %v6713_v39, %v4137_v34  ;;  %v6441_v31 = vadd.f32 %v6440_v32, %v6439_v35  ;;  %v4276_v11 = vpop.f32.mrb[77].mxu1 }
 0x96d   : > { %v4277_v60 = vadd.f32 %v4276_v11, %v10878_v5 }
 0x96e   : > { %v4452_v36 = vmul.f32 %v10854_v41, %v4282_v8  ;;  %v6442_v7 = vpop.f32.mrb[24].mxu0  ;;  %v4172_v6 = vadd.f32 %v6441_v31, %v10876_v24 }
 0x96f   : > { %v4451_v48 = vmul.f32 %v10852_v15, %v4277_v60  ;;  %v6716_v52 = vpop.f32.mrb[78].mxu1  ;;  %v6443_v47 = vpop.f32.mrb[25].mxu0 }
 0x970   : > { %v10925_v30 = vadd.f32 %v10858_v51, %v4452_v36  ;;  %v4292_v34 = vadd.f32 %v6716_v52, %v4147_v18  ;;  %v6444_v16 = vadd.f32 %v6443_v47, %v6442_v7  ;;  %v4286_v43 = vpop.f32.mrb[79].mxu1  ;;  %v10935_v18 = vpop.permute.xlu0 %4535 }
 0x971   : > { %v10928_v5 = vadd.f32 %v10856_v21, %v4451_v48  ;;  %v4287_v29 = vadd.f32 %v4286_v43, %v4142_v50 }
 0x972   : > { %v4580_v41 = vmax.f32 %v10925_v30, 0.0  ;;  %v4454_v24 = vmul.f32 %v10862_v2, %v4292_v34  ;;  %v6445_v14 = vpop.f32.mrb[26].mxu0  ;;  %v4177_v15 = vadd.f32 %v6444_v16, %v10882_v56 }
 0x973   : > { %v4579_v22 = vmax.f32 %v10928_v5, 0.0  ;;  %v4453_v57 = vmul.f32 %v10860_v1, %v4287_v29  ;;  %v6719_v51 = vpop.f32.mrb[80].mxu1  ;;  %v6446_v44 = vpop.f32.mrb[27].mxu0 }
 0x974   : > { %v10938_v58 = vadd.f32 %v10868_v53, %v4454_v24  ;;  %v4302_v21 = vadd.f32 %v6719_v51, %v4157_v3  ;;  %v6447_v50 = vadd.f32 %v6446_v44, %v6445_v14  ;;  %v4296_v28 = vpop.f32.mrb[81].mxu1  ;;  %4613 = vrot.lane.b32.xlu1 %v4580_v41, %s7609_s26  ;;  %v4541_v1 = vpop.permute.xlu1 %4540 }
 0x975   : > { %v10944_v2 = vadd.f32 %v10864_v20, %v4453_v57  ;;  %v4297_v56 = vadd.f32 %v4296_v28, %v4152_v0  ;;  %4611 = vrot.lane.b32.xlu0 %v4579_v22, %s7609_s26 }
 0x976   : > { %v4582_v23 = vmax.f32 %v10938_v58, 0.0  ;;  %v4456_v53 = vmul.f32 %v10874_v62, %v4302_v21  ;;  %v6448_v3 = vpop.f32.mrb[28].mxu0  ;;  %v4182_v46 = vadd.f32 %v6447_v50, %v10886_v17 }
 0x977   : > { %v4581_v59 = vmax.f32 %v10944_v2, 0.0  ;;  %v4455_v35 = vmul.f32 %v10872_v40, %v4297_v56  ;;  %v6722_v39 = vpop.f32.mrb[82].mxu1  ;;  %v6449_v20 = vpop.f32.mrb[29].mxu0 }
 0x978   : > { %v10955_v0 = vadd.f32 %v10884_v37, %v4456_v53  ;;  %v4312_v32 = vadd.f32 %v6722_v39, %v4167_v45  ;;  %v6450_v8 = vadd.f32 %v6449_v20, %v6448_v3  ;;  %v4306_v31 = vpop.f32.mrb[83].mxu1  ;;  %4617 = vrot.lane.b32.xlu1 %v4582_v23, %s7609_s26  ;;  %v4434_v40 = vpop.permute.xlu0 %4433 }
 0x979   : > { %v10961_v62 = vadd.f32 %v10880_v13, %v4455_v35  ;;  %v4307_v17 = vadd.f32 %v4306_v31, %v4162_v54  ;;  %4615 = vrot.lane.b32.xlu0 %v4581_v59, %s7609_s26  ;;  %v4439_v52 = vpop.permute.xlu1 %4438 }
 0x97a   : > { %v4584_v11 = vmax.f32 %v10955_v0, 0.0  ;;  %v4458_v37 = vmul.f32 %v10890_v61, %v4312_v32  ;;  %v6451_v45 = vpop.f32.mrb[30].mxu0  ;;  %v4187_v60 = vadd.f32 %v6450_v8, %v10892_v9 }
 0x97b   : > { %v4583_v36 = vmax.f32 %v10961_v62, 0.0  ;;  %v4457_v7 = vmul.f32 %v10888_v26, %v4307_v17  ;;  %v6725_v48 = vpop.f32.mrb[84].mxu1  ;;  %v6452_v13 = vpop.f32.mrb[31].mxu0 }
 0x97c   : > { %v10972_v54 = vadd.f32 %v10898_v4, %v4458_v37  ;;  %v4322_v47 = vadd.f32 %v6725_v48, %v4177_v15  ;;  %v6453_v34 = vadd.f32 %v6452_v13, %v6451_v45  ;;  %v4316_v16 = vpop.f32.mrb[85].mxu1  ;;  %4621 = vrot.lane.b32.xlu1 %v4584_v11, %s7609_s26 }
 0x97d   : > { %v10978_v61 = vadd.f32 %v10894_v33, %v4457_v7  ;;  %v4317_v9 = vadd.f32 %v4316_v16, %v4172_v6  ;;  %4619 = vrot.lane.b32.xlu0 %v4583_v36, %s7609_s26  ;;  %v4546_v33 = vpop.permute.xlu0 %4545  ;;  %v4757_v16 = vld [vmem:[%s11609_s14 + $0x10] sm:$0xff] }
 0x97e   : > { %v4586_v26 = vmax.f32 %v10972_v54, 0.0  ;;  %v4460_v4 = vmul.f32 %v10904_v55, %v4322_v47  ;;  %v6454_v43 = vpop.f32.mrb[32].mxu0  ;;  %v4192_v29 = vadd.f32 %v6453_v34, %v10896_v25 }
 0x97f   : > { %v4585_v24 = vmax.f32 %v10978_v61, 0.0  ;;  %v4459_v14 = vmul.f32 %v10902_v10, %v4317_v9  ;;  %v6455_v15 = vpop.f32.mrb[33].mxu0  ;;  %v6728_v57 = vpop.f32.mrb[86].mxu1 }
 0x980   : > { %v10989_v6 = vadd.f32 %v10913_v12, %v4460_v4  ;;  %v6456_v51 = vadd.f32 %v6455_v15, %v6454_v43  ;;  %v4332_v44 = vadd.f32 %v6728_v57, %v4187_v60  ;;  %v4326_v21 = vpop.f32.mrb[87].mxu1  ;;  %4625 = vrot.lane.b32.xlu1 %v4586_v26, %s7609_s26  ;;  %v4551_v10 = vpop.permute.xlu1 %4550 }
 0x981   : > { %v10995_v55 = vadd.f32 %v10909_v19, %v4459_v14  ;;  %v4327_v25 = vadd.f32 %v4326_v21, %v4182_v46  ;;  %4623 = vrot.lane.b32.xlu0 %v4585_v24, %s7609_s26 }
 0x982   : > { %v4588_v50 = vmax.f32 %v10989_v6, 0.0  ;;  %v4462_v12 = vmul.f32 %v10922_v42, %v4332_v44  ;;  %v6457_v28 = vpop.f32.mrb[34].mxu0  ;;  %v4197_v56 = vadd.f32 %v6456_v51, %v10900_v27  ;;  %v4444_v27 = vpop.permute.xlu0 %4443  ;;  %v4760_v51 = vld [vmem:[%s11609_s14 + $0x28] sm:$0xff] }
 0x983   : > { %v4587_v53 = vmax.f32 %v10995_v55, 0.0  ;;  %v4461_v3 = vmul.f32 %v10917_v63, %v4327_v25  ;;  %v6731_v35 = vpop.f32.mrb[88].mxu1  ;;  %v6458_v19 = vpop.f32.mrb[35].mxu0 }
 0x984   : > { %v11005_v39 = vadd.f32 %v4541_v1, %v4462_v12  ;;  %v4342_v46 = vadd.f32 %v6731_v35, %v4197_v56  ;;  %v6459_v20 = vadd.f32 %v6458_v19, %v6457_v28  ;;  %v4336_v32 = vpop.f32.mrb[89].mxu1  ;;  %4629 = vrot.lane.b32.xlu1 %v4588_v50, %s7609_s26  ;;  %v4449_v47 = vpop.permute.xlu1 %4448  ;;  %v4761_v35 = vld [vmem:[%s11609_s14 + $0x30] sm:$0x1f] }
 0x985   : > { %v11011_v42 = vadd.f32 %v10935_v18, %v4461_v3  ;;  %v4337_v8 = vadd.f32 %v4336_v32, %v4192_v29  ;;  %4627 = vrot.lane.b32.xlu0 %v4587_v53, %s7609_s26  ;;  %v4758_v29 = vld [vmem:[%s11609_s14 + $0x18] sm:$0xff] }
 0x986   : > { %v4590_v63 = vmax.f32 %v11005_v39, 0.0  ;;  %v4464_v1 = vmul.f32 %v4439_v52, %v4342_v46  ;;  %v6460_v31 = vpop.f32.mrb[36].mxu0  ;;  %v4202_v17 = vadd.f32 %v6459_v20, %v10906_v38  ;;  %v4755_v38 = vld [vmem:[%s11609_s14] sm:$0xff]  ;;  %v7284_v57 = vpack.c.bf16 %v4758_v29, %v4757_v16  ;;  %v4556_v44 = vpop.permute.xlu0 %4555 }
 0x987   : > { %v4589_v37 = vmax.f32 %v11011_v42, 0.0  ;;  %v4463_v45 = vmul.f32 %v4434_v40, %v4337_v8  ;;  %v6461_v60 = vpop.f32.mrb[37].mxu0  ;;  %v6734_v7 = vpop.f32.mrb[90].mxu1  ;;  %v4756_v40 = vld [vmem:[%s11609_s14 + $0x8] sm:$0xff] }
 0x988   : > { %v11019_v48 = vadd.f32 %v4551_v10, %v4464_v1  ;;  %v6462_v18 = vadd.f32 %v6461_v60, %v6460_v31  ;;  %v4346_v13 = vpop.f32.mrb[91].mxu1  ;;  %4633 = vrot.lane.b32.xlu1 %v4590_v63, %s7609_s26  ;;  %v7280_v43 = vpack.c.bf16 %v4756_v40, %v4755_v38  ;;  %v4561_v12 = vpop.permute.xlu1 %4560 }
 0x989   : > { %v11024_v34 = vadd.f32 %v4546_v33, %v4463_v45  ;;  %v4347_v52 = vadd.f32 %v4346_v13, %v4202_v17  ;;  %4631 = vrot.lane.b32.xlu0 %v4589_v37, %s7609_s26  ;;  %v4759_v33 = vld [vmem:[%s11609_s14 + $0x20] sm:$0xff] }
 0x98a   : > { %v4592_v9 = vmax.f32 %v11019_v48, 0.0  ;;  %v4207_v4 = vadd.f32 %v6462_v18, %v10911_v49  ;;  %7281 = vmatprep.subr.bf16.mxu0 %v7280_v43  ;;  %v7288_v10 = vpack.c.bf16 %v4760_v51, %v4759_v33 }
 0x98b   : > { %v4591_v14 = vmax.f32 %v11024_v34, 0.0  ;;  %v4465_v15 = vmul.f32 %v4444_v27, %v4347_v52  ;;  %7283 = vmatpush3.bf16.msra.mxu0 %v7280_v43 }
 0x98c   : > { %v4352_v21 = vadd.f32 %v6734_v7, %v4207_v4  ;;  %4637 = vrot.lane.b32.xlu1 %v4592_v9, %s7609_s26  ;;  %7285 = vmatprep.subr.bf16.mxu0 %v7284_v57 }
 0x98d   : > { %v11053_v49 = vadd.f32 %v4556_v44, %v4465_v15  ;;  %4635 = vrot.lane.b32.xlu0 %v4591_v14, %s7609_s26 }
 0x98e   : > { %v4466_v25 = vmul.f32 %v4449_v47, %v4352_v21 }
 0x98f   : > { %v4593_v28 = vmax.f32 %v11053_v49, 0.0  ;;  %7287 = vmatpush3.bf16.msra.mxu0 %v7284_v57 }
 0x990   : > { %v4578_v56 = vadd.f32 %v4561_v12, %v4466_v25  ;;  %7289 = vmatprep.subr.bf16.mxu0 %v7288_v10 }
 0x991   : > { %4639 = vrot.lane.b32.xlu0 %v4593_v28, %s7609_s26 }
 0x992   : > { %v4594_v3 = vmax.f32 %v4578_v56, 0.0 }
 0x993   : > { %7291 = vmatpush3.bf16.msra.mxu0 %v7288_v10 }
 0x994   : > { %4641 = vrot.lane.b32.xlu1 %v4594_v3, %s7609_s26  ;;  %6747 = vmatprep.subr.msk.mxu0 %vm4811_vm7, %v4761_v35  ;;  %s7614_s26 = smov 125  }
 0x997   : > { %6748 = vmatpush3.msk.msra.mxu0 %vm4811_vm7, %v4761_v35 }
 0x9e6   : > { %v4614_v19 = vpop.permute.xlu1 %4613 }
 0x9e7   : > { %v4660_v46 = vmax.f32 %v4580_v41, %v4614_v19  ;;  %v4612_v20 = vpop.permute.xlu0 %4611 }
 0x9e8   : > { %v4659_v32 = vmax.f32 %v4579_v22, %v4612_v20 }
 0x9e9   : > { %4693 = vrot.lane.b32.xlu1 %v4660_v46, %s11701_s27 }
 0x9ea   : > { %4691 = vrot.lane.b32.xlu0 %v4659_v32, %s11701_s27  ;;  %v4618_v8 = vpop.permute.xlu1 %4617 }
 0x9eb   : > { %v4662_v27 = vmax.f32 %v4582_v23, %v4618_v8  ;;  %v4616_v1 = vpop.permute.xlu0 %4615 }
 0x9ec   : > { %v4661_v31 = vmax.f32 %v4581_v59, %v4616_v1 }
 0x9ed   : > { %4697 = vrot.lane.b32.xlu1 %v4662_v27, %s11701_s27 }
 0x9ee   : > { %4695 = vrot.lane.b32.xlu0 %v4661_v31, %s11701_s27  ;;  %v4622_v30 = vpop.permute.xlu1 %4621 }
 0x9ef   : > { %v4664_v5 = vmax.f32 %v4584_v11, %v4622_v30  ;;  %v4620_v41 = vpop.permute.xlu0 %4619 }
 0x9f0   : > { %v4663_v22 = vmax.f32 %v4583_v36, %v4620_v41 }
 0x9f1   : > { %4701 = vrot.lane.b32.xlu1 %v4664_v5, %s11701_s27 }
 0x9f2   : > { %4699 = vrot.lane.b32.xlu0 %v4663_v22, %s11701_s27  ;;  %v4626_v58 = vpop.permute.xlu1 %4625 }
 0x9f3   : > { %v4666_v2 = vmax.f32 %v4586_v26, %v4626_v58  ;;  %v4624_v23 = vpop.permute.xlu0 %4623 }
 0x9f4   : > { %v4665_v59 = vmax.f32 %v4585_v24, %v4624_v23 }
 0x9f5   : > { %4705 = vrot.lane.b32.xlu1 %v4666_v2, %s11701_s27 }
 0x9f6   : > { %4703 = vrot.lane.b32.xlu0 %v4665_v59, %s11701_s27  ;;  %v4630_v0 = vpop.permute.xlu1 %4629 }
 0x9f7   : > { %v4668_v62 = vmax.f32 %v4588_v50, %v4630_v0  ;;  %v4628_v11 = vpop.permute.xlu0 %4627 }
 0x9f8   : > { %v4667_v36 = vmax.f32 %v4587_v53, %v4628_v11 }
 0x9f9   : > { %4709 = vrot.lane.b32.xlu1 %v4668_v62, %s11701_s27 }
 0x9fa   : > { %4707 = vrot.lane.b32.xlu0 %v4667_v36, %s11701_s27  ;;  %v4634_v54 = vpop.permute.xlu1 %4633 }
 0x9fb   : > { %v4670_v61 = vmax.f32 %v4590_v63, %v4634_v54  ;;  %v4632_v26 = vpop.permute.xlu0 %4631 }
 0x9fc   : > { %v4669_v24 = vmax.f32 %v4589_v37, %v4632_v26 }
 0x9fd   : > { %4713 = vrot.lane.b32.xlu1 %v4670_v61, %s11701_s27 }
 0x9fe   : > { %4711 = vrot.lane.b32.xlu0 %v4669_v24, %s11701_s27  ;;  %v4638_v6 = vpop.permute.xlu1 %4637 }
 0x9ff   : > { %v4672_v55 = vmax.f32 %v4592_v9, %v4638_v6  ;;  %v4636_v50 = vpop.permute.xlu0 %4635 }
 0xa00   : > { %v4671_v53 = vmax.f32 %v4591_v14, %v4636_v50 }
 0xa01   : > { %4717 = vrot.lane.b32.xlu1 %v4672_v55, %s11701_s27 }
 0xa02   : > { %4715 = vrot.lane.b32.xlu0 %v4671_v53, %s11701_s27 }
 0xa03   : > { %v4640_v39 = vpop.permute.xlu0 %4639 }
 0xa04   : > { %v4673_v63 = vmax.f32 %v4593_v28, %v4640_v39 }
 0xa06   : > { %4719 = vrot.lane.b32.xlu0 %v4673_v63, %s11701_s27  ;;  %v4642_v42 = vpop.permute.xlu1 %4641 }
 0xa07   : > { %v4674_v17 = vmax.f32 %v4594_v3, %v4642_v42 }
 0xa09   : > { %4721 = vrot.lane.b32.xlu1 %v4674_v17, %s11701_s27 }
 0xa5b   : > { %v4694_v37 = vpop.permute.xlu1 %4693 }
 0xa5c   : > { %v4692_v45 = vpop.permute.xlu0 %4691  ;;  %v4740_v7 = vmax.f32 %v4660_v46, %v4694_v37 }
 0xa5d   : > { %v4739_v60 = vmax.f32 %v4659_v32, %v4692_v45 }
 0xa5f   : > { %6749 = vmatprep.mubr.msk.f32.mxu0 %vm4762_vm8, %v4739_v60  ;;  %v4698_v48 = vpop.permute.xlu1 %4697 }
 0xa60   : > { %v4696_v18 = vpop.permute.xlu0 %4695  ;;  %6750 = vmatmul.mubr.msk.f32.vlgmr.msra.gmra.mrb[38].mxu0 %vm4762_vm8, %v4740_v7  ;;  %v4742_v47 = vmax.f32 %v4662_v27, %v4698_v48 }
 0xa61   : > { %v4741_v13 = vmax.f32 %v4661_v31, %v4696_v18 }
 0xa63   : > { %6752 = vmatprep.mubr.msk.f32.mxu0 %vm4762_vm8, %v4741_v13  ;;  %v4702_v34 = vpop.permute.xlu1 %4701 }
 0xa64   : > { %v4700_v52 = vpop.permute.xlu0 %4699  ;;  %6753 = vmatmul.mubr.msk.f32.gmra.mrb[40].mxu0 %vm4762_vm8, %v4742_v47  ;;  %v4744_v40 = vmax.f32 %v4664_v5, %v4702_v34 }
 0xa65   : > { %v4743_v38 = vmax.f32 %v4663_v22, %v4700_v52 }
 0xa67   : > { %6755 = vmatprep.mubr.msk.f32.mxu0 %vm4762_vm8, %v4743_v38  ;;  %v4706_v16 = vpop.permute.xlu1 %4705 }
 0xa68   : > { %v4704_v9 = vpop.permute.xlu0 %4703  ;;  %6756 = vmatmul.mubr.msk.f32.gmra.mrb[42].mxu0 %vm4762_vm8, %v4744_v40  ;;  %v4746_v43 = vmax.f32 %v4666_v2, %v4706_v16 }
 0xa69   : > { %v4745_v4 = vmax.f32 %v4665_v59, %v4704_v9 }
 0xa6b   : > { %6758 = vmatprep.mubr.msk.f32.mxu0 %vm4762_vm8, %v4745_v4  ;;  %v4710_v29 = vpop.permute.xlu1 %4709 }
 0xa6c   : > { %v4708_v14 = vpop.permute.xlu0 %4707  ;;  %6759 = vmatmul.mubr.msk.f32.gmra.mrb[44].mxu0 %vm4762_vm8, %v4746_v43  ;;  %v4748_v57 = vmax.f32 %v4668_v62, %v4710_v29 }
 0xa6d   : > { %v4747_v15 = vmax.f32 %v4667_v36, %v4708_v14 }
 0xa6f   : > { %6761 = vmatprep.mubr.msk.f32.mxu0 %vm4762_vm8, %v4747_v15  ;;  %v4714_v33 = vpop.permute.xlu1 %4713 }
 0xa70   : > { %v4712_v51 = vpop.permute.xlu0 %4711  ;;  %6762 = vmatmul.mubr.msk.f32.gmra.mrb[46].mxu0 %vm4762_vm8, %v4748_v57  ;;  %v4750_v21 = vmax.f32 %v4670_v61, %v4714_v33 }
 0xa71   : > { %v4749_v44 = vmax.f32 %v4669_v24, %v4712_v51 }
 0xa73   : > { %6764 = vmatprep.mubr.msk.f32.mxu0 %vm4762_vm8, %v4749_v44  ;;  %v4718_v49 = vpop.permute.xlu1 %4717 }
 0xa74   : > { %v4716_v25 = vpop.permute.xlu0 %4715  ;;  %6765 = vmatmul.mubr.msk.f32.gmra.mrb[48].mxu0 %vm4762_vm8, %v4750_v21  ;;  %v4752_v12 = vmax.f32 %v4672_v55, %v4718_v49 }
 0xa75   : > { %v4751_v10 = vmax.f32 %v4671_v53, %v4716_v25 }
 0xa77   : > { %6767 = vmatprep.mubr.msk.f32.mxu0 %vm4762_vm8, %v4751_v10 }
 0xa78   : > { %v4720_v28 = vpop.permute.xlu0 %4719  ;;  %6768 = vmatmul.mubr.msk.f32.gmra.mrb[50].mxu0 %vm4762_vm8, %v4752_v12 }
 0xa79   : > { %v4753_v56 = vmax.f32 %v4673_v63, %v4720_v28 }
 0xa7b   : > { %6770 = vmatprep.mubr.msk.f32.mxu0 %vm4762_vm8, %v4753_v56  ;;  %v4722_v3 = vpop.permute.xlu1 %4721 }
 0xa7c   : > { %v4754_v35 = vmax.f32 %v4674_v17, %v4722_v3 }
 0xa7e   : > { %6771 = vmatmul.mubr.msk.f32.gmra.mrb[52].mxu0 %vm4762_vm8, %v4754_v35 }
 0xb33   : > { %v6751_v19 = vpop.f32.mrb[38].mxu0 }
 0xb34   : > { %4962 = vst.msk [vmem:[#allocation4 + $0x8] sm:$0xff] %vm4960_vm9, %v6751_v19  ;;  %4995 = vrot.lane.b32.xlu1 %v6751_v19, %s11701_s27  ;;  %v4881_v46 = vpop.f32.mrb[39].mxu0 }
 0xb35   : > { %4961 = vst.msk [vmem:[#allocation4] sm:$0xff] %vm4960_vm9, %v4881_v46  ;;  %4993 = vrot.lane.b32.xlu0 %v4881_v46, %s11701_s27 }
 0xb37   : > { %v6754_v20 = vpop.f32.mrb[40].mxu0 }
 0xb38   : > { %4964 = vst.msk [vmem:[#allocation4 + $0x18] sm:$0xff] %vm4960_vm9, %v6754_v20  ;;  %5123 = vrot.lane.b32.xlu1 %v6751_v19, %s7614_s26  ;;  %v4891_v32 = vpop.f32.mrb[41].mxu0 }
 0xb39   : > { %4963 = vst.msk [vmem:[#allocation4 + $0x10] sm:$0xff] %vm4960_vm9, %v4891_v32  ;;  %5121 = vrot.lane.b32.xlu0 %v4881_v46, %s7614_s26 }
 0xb3b   : > { %v11132_v8 = vpop.f32.mrb[42].mxu0  ;;  %v5524_v24 = vld [vmem:[#allocation4 + $0x8] sm:$0xff] }
 0xb3c   : > { %4966 = vst.msk [vmem:[#allocation4 + $0x28] sm:$0xff] %vm4960_vm9, %v11132_v8  ;;  %5059 = vrot.lane.b32.xlu1 %v6751_v19, %s11715_s17  ;;  %v11137_v27 = vpop.f32.mrb[43].mxu0  ;;  %v5523_v26 = vld [vmem:[#allocation4] sm:$0xff] }
 0xb3d   : > { %4965 = vst.msk [vmem:[#allocation4 + $0x20] sm:$0xff] %vm4960_vm9, %v11137_v27  ;;  %5057 = vrot.lane.b32.xlu0 %v4881_v46, %s11715_s17  ;;  %v7294_v53 = vpack.c.bf16 %v5524_v24, %v5523_v26 }
 0xb3f   : > { %v11142_v1 = vpop.f32.mrb[44].mxu0  ;;  %v5526_v57 = vld [vmem:[#allocation4 + $0x18] sm:$0xff] }
 0xb40   : > { %4968 = vst.msk [vmem:[#allocation4 + $0x38] sm:$0xff] %vm4960_vm9, %v11142_v1  ;;  %5251 = vrot.lane.b32.xlu1 %v6751_v19, %s7615_s29  ;;  %v11147_v31 = vpop.f32.mrb[45].mxu0  ;;  %v5525_v15 = vld [vmem:[#allocation4 + $0x10] sm:$0xff] }
 0xb41   : > { %4967 = vst.msk [vmem:[#allocation4 + $0x30] sm:$0xff] %vm4960_vm9, %v11147_v31  ;;  %5249 = vrot.lane.b32.xlu0 %v4881_v46, %s7615_s29  ;;  %v7298_v21 = vpack.c.bf16 %v5526_v57, %v5525_v15 }
 0xb43   : > { %v11152_v30 = vpop.f32.mrb[46].mxu0 }
 0xb44   : > { %4970 = vst.msk [vmem:[#allocation4 + $0x48] sm:$0xff] %vm4960_vm9, %v11152_v30  ;;  %5187 = vrot.lane.b32.xlu1 %v6751_v19, %s7616_s30  ;;  %v11157_v5 = vpop.f32.mrb[47].mxu0 }
 0xb45   : > { %4969 = vst.msk [vmem:[#allocation4 + $0x40] sm:$0xff] %vm4960_vm9, %v11157_v5  ;;  %5185 = vrot.lane.b32.xlu0 %v4881_v46, %s7616_s30 }
 0xb47   : > { %v11162_v41 = vpop.f32.mrb[48].mxu0 }
 0xb48   : > { %4972 = vst.msk [vmem:[#allocation4 + $0x58] sm:$0xff] %vm4960_vm9, %v11162_v41  ;;  %5379 = vrot.lane.b32.xlu1 %v6751_v19, %s7617_s23  ;;  %v11167_v22 = vpop.f32.mrb[49].mxu0 }
 0xb49   : > { %4971 = vst.msk [vmem:[#allocation4 + $0x50] sm:$0xff] %vm4960_vm9, %v11167_v22  ;;  %5377 = vrot.lane.b32.xlu0 %v4881_v46, %s7617_s23 }
 0xb4b   : > { %v11172_v58 = vpop.f32.mrb[50].mxu0 }
 0xb4c   : > { %4974 = vst.msk [vmem:[#allocation4 + $0x68] sm:$0xff] %vm4960_vm9, %v11172_v58  ;;  %5315 = vrot.lane.b32.xlu1 %v6751_v19, %s7618_s16  ;;  %v11177_v2 = vpop.f32.mrb[51].mxu0 }
 0xb4d   : > { %4973 = vst.msk [vmem:[#allocation4 + $0x60] sm:$0xff] %vm4960_vm9, %v11177_v2  ;;  %5313 = vrot.lane.b32.xlu0 %v4881_v46, %s7618_s16 }
 0xb50   : > { %5443 = vrot.lane.b32.xlu1 %v6751_v19, %s7619_s28 }
 0xb51   : > { %5441 = vrot.lane.b32.xlu0 %v4881_v46, %s7619_s28  ;;  %v11184_v23 = vpop.f32.mrb[52].mxu0 }
 0xb52   : > { %4976 = vst.msk [vmem:[#allocation4 + $0x78] sm:$0xff] %vm4960_vm9, %v11184_v23  ;;  %v11188_v59 = vpop.f32.mrb[53].mxu0 }
 0xb53   : > { %4975 = vst.msk [vmem:[#allocation4 + $0x70] sm:$0xff] %vm4960_vm9, %v11188_v59 }
 0xb54   : > { %4999 = vrot.lane.b32.xlu1 %v6754_v20, %s11701_s27 }
 0xb55   : > { %4997 = vrot.lane.b32.xlu0 %v4891_v32, %s11701_s27 }
 0xb58   : > { %5127 = vrot.lane.b32.xlu1 %v6754_v20, %s7614_s26 }
 0xb59   : > { %5125 = vrot.lane.b32.xlu0 %v4891_v32, %s7614_s26 }
 0xb5c   : > { %5063 = vrot.lane.b32.xlu1 %v6754_v20, %s11715_s17 }
 0xb5d   : > { %5061 = vrot.lane.b32.xlu0 %v4891_v32, %s11715_s17 }
 0xb60   : > { %5255 = vrot.lane.b32.xlu1 %v6754_v20, %s7615_s29 }
 0xb61   : > { %5253 = vrot.lane.b32.xlu0 %v4891_v32, %s7615_s29 }
 0xb64   : > { %5191 = vrot.lane.b32.xlu1 %v6754_v20, %s7616_s30 }
 0xb65   : > { %5189 = vrot.lane.b32.xlu0 %v4891_v32, %s7616_s30 }
 0xb68   : > { %5383 = vrot.lane.b32.xlu1 %v6754_v20, %s7617_s23 }
 0xb69   : > { %5381 = vrot.lane.b32.xlu0 %v4891_v32, %s7617_s23 }
 0xb6c   : > { %5319 = vrot.lane.b32.xlu1 %v6754_v20, %s7618_s16 }
 0xb6d   : > { %5317 = vrot.lane.b32.xlu0 %v4891_v32, %s7618_s16 }
 0xb70   : > { %5447 = vrot.lane.b32.xlu1 %v6754_v20, %s7619_s28 }
 0xb71   : > { %5445 = vrot.lane.b32.xlu0 %v4891_v32, %s7619_s28 }
 0xb74   : > { %5003 = vrot.lane.b32.xlu1 %v11132_v8, %s11701_s27 }
 0xb75   : > { %5001 = vrot.lane.b32.xlu0 %v11137_v27, %s11701_s27 }
 0xb78   : > { %5131 = vrot.lane.b32.xlu1 %v11132_v8, %s7614_s26 }
 0xb79   : > { %5129 = vrot.lane.b32.xlu0 %v11137_v27, %s7614_s26 }
 0xb7c   : > { %5067 = vrot.lane.b32.xlu1 %v11132_v8, %s11715_s17 }
 0xb7d   : > { %5065 = vrot.lane.b32.xlu0 %v11137_v27, %s11715_s17 }
 0xb80   : > { %5259 = vrot.lane.b32.xlu1 %v11132_v8, %s7615_s29 }
 0xb81   : > { %5257 = vrot.lane.b32.xlu0 %v11137_v27, %s7615_s29 }
 0xb84   : > { %5195 = vrot.lane.b32.xlu1 %v11132_v8, %s7616_s30 }
 0xb85   : > { %5193 = vrot.lane.b32.xlu0 %v11137_v27, %s7616_s30 }
 0xb88   : > { %5387 = vrot.lane.b32.xlu1 %v11132_v8, %s7617_s23 }
 0xb89   : > { %5385 = vrot.lane.b32.xlu0 %v11137_v27, %s7617_s23 }
 0xb8c   : > { %5323 = vrot.lane.b32.xlu1 %v11132_v8, %s7618_s16 }
 0xb8d   : > { %5321 = vrot.lane.b32.xlu0 %v11137_v27, %s7618_s16 }
 0xb90   : > { %5451 = vrot.lane.b32.xlu1 %v11132_v8, %s7619_s28 }
 0xb91   : > { %5449 = vrot.lane.b32.xlu0 %v11137_v27, %s7619_s28 }
 0xb94   : > { %5007 = vrot.lane.b32.xlu1 %v11142_v1, %s11701_s27 }
 0xb95   : > { %5005 = vrot.lane.b32.xlu0 %v11147_v31, %s11701_s27 }
 0xb98   : > { %5135 = vrot.lane.b32.xlu1 %v11142_v1, %s7614_s26 }
 0xb99   : > { %5133 = vrot.lane.b32.xlu0 %v11147_v31, %s7614_s26 }
 0xb9c   : > { %5071 = vrot.lane.b32.xlu1 %v11142_v1, %s11715_s17 }
 0xb9d   : > { %5069 = vrot.lane.b32.xlu0 %v11147_v31, %s11715_s17 }
 0xba0   : > { %5263 = vrot.lane.b32.xlu1 %v11142_v1, %s7615_s29 }
 0xba1   : > { %5261 = vrot.lane.b32.xlu0 %v11147_v31, %s7615_s29 }
 0xba4   : > { %5199 = vrot.lane.b32.xlu1 %v11142_v1, %s7616_s30 }
 0xba5   : > { %5197 = vrot.lane.b32.xlu0 %v11147_v31, %s7616_s30 }
 0xba6   : > { %v4996_v0 = vpop.permute.xlu1 %4995 }
 0xba7   : > { %5042 = vst.msk [vmem:[#allocation4 + $0x88] sm:$0xff] %vm4960_vm9, %v4996_v0  ;;  %v4994_v62 = vpop.permute.xlu0 %4993 }
 0xba8   : > { %5041 = vst.msk [vmem:[#allocation4 + $0x80] sm:$0xff] %vm4960_vm9, %v4994_v62  ;;  %5391 = vrot.lane.b32.xlu1 %v11142_v1, %s7617_s23 }
 0xba9   : > { %5389 = vrot.lane.b32.xlu0 %v11147_v31, %s7617_s23 }
 0xbaa   : > { %v5124_v11 = vpop.permute.xlu1 %5123 }
 0xbab   : > { %5170 = vst.msk [vmem:[#allocation4 + $0x188] sm:$0xff] %vm4960_vm9, %v5124_v11  ;;  %v5122_v36 = vpop.permute.xlu0 %5121 }
 0xbac   : > { %5169 = vst.msk [vmem:[#allocation4 + $0x180] sm:$0xff] %vm4960_vm9, %v5122_v36  ;;  %5327 = vrot.lane.b32.xlu1 %v11142_v1, %s7618_s16 }
 0xbad   : > { %5325 = vrot.lane.b32.xlu0 %v11147_v31, %s7618_s16 }
 0xbae   : > { %v5060_v54 = vpop.permute.xlu1 %5059  ;;  %v5540_v61 = vld [vmem:[#allocation4 + $0x88] sm:$0xff] }
 0xbaf   : > { %5106 = vst.msk [vmem:[#allocation4 + $0x108] sm:$0xff] %vm4960_vm9, %v5060_v54  ;;  %v5058_v6 = vpop.permute.xlu0 %5057  ;;  %v5539_v55 = vld [vmem:[#allocation4 + $0x80] sm:$0xff] }
 0xbb0   : > { %5105 = vst.msk [vmem:[#allocation4 + $0x100] sm:$0xff] %vm4960_vm9, %v5058_v6  ;;  %5011 = vrot.lane.b32.xlu1 %v11152_v30, %s11701_s27  ;;  %v7292_v50 = vpack.c.bf16 %v5540_v61, %v5539_v55  ;;  %v5527_v6 = vld [vmem:[#allocation4 + $0x20] sm:$0xff]  ;;  %v5528_v55 = vld [vmem:[#allocation4 + $0x28] sm:$0xff] }
 0xbb1   : > { %5009 = vrot.lane.b32.xlu0 %v11157_v5, %s11701_s27 }
 0xbb2   : > { %7293 = vmatprep.subr.bf16.mxu1 %v7292_v50  ;;  %v5252_v39 = vpop.permute.xlu1 %5251  ;;  %v5572_v63 = vld [vmem:[#allocation4 + $0x188] sm:$0xff] }
 0xbb3   : > { %5298 = vst.msk [vmem:[#allocation4 + $0x288] sm:$0xff] %vm4960_vm9, %v5252_v39  ;;  %v5250_v42 = vpop.permute.xlu0 %5249  ;;  %7295 = vmatpush3.bf16.msra.mxu1 %v7294_v53  ;;  %v5571_v17 = vld [vmem:[#allocation4 + $0x180] sm:$0xff] }
 0xbb4   : > { %5297 = vst.msk [vmem:[#allocation4 + $0x280] sm:$0xff] %vm4960_vm9, %v5250_v42  ;;  %5139 = vrot.lane.b32.xlu1 %v11152_v30, %s7614_s26  ;;  %v7324_v37 = vpack.c.bf16 %v5572_v63, %v5571_v17  ;;  %v5506_v63 = vld [vmem:[%s11599_s4 + $0x8] sm:$0xff]  ;;  %v7302_v42 = vpack.c.bf16 %v5528_v55, %v5527_v6 }
 0xbb5   : > { %5137 = vrot.lane.b32.xlu0 %v11157_v5, %s7614_s26  ;;  %5743 = vmatprep.mubr.f32.mxu1 %v5506_v63 }
 0xbb6   : > { %7325 = vmatprep.subr.bf16.mxu0 %v7324_v37  ;;  %v5188_v45 = vpop.permute.xlu1 %5187  ;;  %v5556_v60 = vld [vmem:[#allocation4 + $0x108] sm:$0xff] }
 0xbb7   : > { %5234 = vst.msk [vmem:[#allocation4 + $0x208] sm:$0xff] %vm4960_vm9, %v5188_v45  ;;  %v5186_v7 = vpop.permute.xlu0 %5185  ;;  %v5555_v48 = vld [vmem:[#allocation4 + $0x100] sm:$0xff] }
 0xbb8   : > { %5233 = vst.msk [vmem:[#allocation4 + $0x200] sm:$0xff] %vm4960_vm9, %v5186_v7  ;;  %5075 = vrot.lane.b32.xlu1 %v11152_v30, %s11715_s17  ;;  %v7326_v18 = vpack.c.bf16 %v5556_v60, %v5555_v48 }
 0xbb9   : > { %5073 = vrot.lane.b32.xlu0 %v11157_v5, %s11715_s17 }
 0xbba   : > { %7327 = vmatpush3.bf16.msra.mxu0 %v7326_v18  ;;  %v5380_v13 = vpop.permute.xlu1 %5379 }
 0xbbb   : > { %5426 = vst.msk [vmem:[#allocation4 + $0x388] sm:$0xff] %vm4960_vm9, %v5380_v13  ;;  %v5378_v47 = vpop.permute.xlu0 %5377 }
 0xbbc   : > { %5425 = vst.msk [vmem:[#allocation4 + $0x380] sm:$0xff] %vm4960_vm9, %v5378_v47  ;;  %5267 = vrot.lane.b32.xlu1 %v11152_v30, %s7615_s29 }
 0xbbd   : > { %5265 = vrot.lane.b32.xlu0 %v11157_v5, %s7615_s29 }
 0xbbe   : > { %v5316_v34 = vpop.permute.xlu1 %5315 }
 0xbbf   : > { %5362 = vst.msk [vmem:[#allocation4 + $0x308] sm:$0xff] %vm4960_vm9, %v5316_v34  ;;  %v5314_v52 = vpop.permute.xlu0 %5313 }
 0xbc0   : > { %5361 = vst.msk [vmem:[#allocation4 + $0x300] sm:$0xff] %vm4960_vm9, %v5314_v52  ;;  %5203 = vrot.lane.b32.xlu1 %v11152_v30, %s7616_s30 }
 0xbc1   : > { %5201 = vrot.lane.b32.xlu0 %v11157_v5, %s7616_s30 }
 0xbc2   : > { %v5444_v38 = vpop.permute.xlu1 %5443 }
 0xbc3   : > { %5490 = vst.msk [vmem:[#allocation4 + $0x408] sm:$0xff] %vm4960_vm9, %v5444_v38  ;;  %v5442_v40 = vpop.permute.xlu0 %5441 }
 0xbc4   : > { %5489 = vst.msk [vmem:[#allocation4 + $0x400] sm:$0xff] %vm4960_vm9, %v5442_v40  ;;  %5395 = vrot.lane.b32.xlu1 %v11152_v30, %s7617_s23 }
 0xbc5   : > { %5393 = vrot.lane.b32.xlu0 %v11157_v5, %s7617_s23 }
 0xbc6   : > { %v5000_v16 = vpop.permute.xlu1 %4999 }
 0xbc7   : > { %5044 = vst.msk [vmem:[#allocation4 + $0x98] sm:$0xff] %vm4960_vm9, %v5000_v16  ;;  %v4998_v9 = vpop.permute.xlu0 %4997 }
 0xbc8   : > { %5043 = vst.msk [vmem:[#allocation4 + $0x90] sm:$0xff] %vm4960_vm9, %v4998_v9  ;;  %5015 = vrot.lane.b32.xlu1 %v11162_v41, %s11701_s27 }
 0xbc9   : > { %5013 = vrot.lane.b32.xlu0 %v11167_v22, %s11701_s27 }
 0xbca   : > { %v5128_v4 = vpop.permute.xlu1 %5127 }
 0xbcb   : > { %5172 = vst.msk [vmem:[#allocation4 + $0x198] sm:$0xff] %vm4960_vm9, %v5128_v4  ;;  %v5126_v43 = vpop.permute.xlu0 %5125 }
 0xbcc   : > { %5171 = vst.msk [vmem:[#allocation4 + $0x190] sm:$0xff] %vm4960_vm9, %v5126_v43  ;;  %5143 = vrot.lane.b32.xlu1 %v11162_v41, %s7614_s26 }
 0xbcd   : > { %5141 = vrot.lane.b32.xlu0 %v11167_v22, %s7614_s26 }
 0xbce   : > { %v5064_v29 = vpop.permute.xlu1 %5063  ;;  %v5542_v14 = vld [vmem:[#allocation4 + $0x98] sm:$0xff] }
 0xbcf   : > { %5108 = vst.msk [vmem:[#allocation4 + $0x118] sm:$0xff] %vm4960_vm9, %v5064_v29  ;;  %v5062_v33 = vpop.permute.xlu0 %5061  ;;  %v5541_v51 = vld [vmem:[#allocation4 + $0x90] sm:$0xff]  ;;  %v5508_v29 = vld [vmem:[%s11599_s4 + $0x18] sm:$0xff] }
 0xbd0   : > { %5107 = vst.msk [vmem:[#allocation4 + $0x110] sm:$0xff] %vm4960_vm9, %v5062_v33  ;;  %5079 = vrot.lane.b32.xlu1 %v11162_v41, %s11715_s17  ;;  %v7296_v44 = vpack.c.bf16 %v5542_v14, %v5541_v51  ;;  %5818 = vmatprep.mubr.f32.mxu0 %v5508_v29  ;;  %v5529_v51 = vld [vmem:[#allocation4 + $0x30] sm:$0xff] }
 0xbd1   : > { %5077 = vrot.lane.b32.xlu0 %v11167_v22, %s11715_s17 }
 0xbd2   : > { %7297 = vmatprep.subr.bf16.mxu1 %v7296_v44  ;;  %v5256_v49 = vpop.permute.xlu1 %5255  ;;  %v5574_v25 = vld [vmem:[#allocation4 + $0x198] sm:$0xff] }
 0xbd3   : > { %5300 = vst.msk [vmem:[#allocation4 + $0x298] sm:$0xff] %vm4960_vm9, %v5256_v49  ;;  %v5254_v10 = vpop.permute.xlu0 %5253  ;;  %7299 = vmatpush3.bf16.msra.mxu1 %v7298_v21  ;;  %v5573_v12 = vld [vmem:[#allocation4 + $0x190] sm:$0xff]  ;;  %v5530_v44 = vld [vmem:[#allocation4 + $0x38] sm:$0xff] }
 0xbd4   : > { %5299 = vst.msk [vmem:[#allocation4 + $0x290] sm:$0xff] %vm4960_vm9, %v5254_v10  ;;  %5271 = vrot.lane.b32.xlu1 %v11162_v41, %s7615_s29  ;;  %v7328_v28 = vpack.c.bf16 %v5574_v25, %v5573_v12 }
 0xbd5   : > { %5269 = vrot.lane.b32.xlu0 %v11167_v22, %s7615_s29 }
 0xbd6   : > { %7329 = vmatprep.subr.bf16.mxu0 %v7328_v28  ;;  %v5192_v56 = vpop.permute.xlu1 %5191  ;;  %v5558_v3 = vld [vmem:[#allocation4 + $0x118] sm:$0xff] }
 0xbd7   : > { %5236 = vst.msk [vmem:[#allocation4 + $0x218] sm:$0xff] %vm4960_vm9, %v5192_v56  ;;  %v5190_v35 = vpop.permute.xlu0 %5189  ;;  %v5557_v19 = vld [vmem:[#allocation4 + $0x110] sm:$0xff] }
 0xbd8   : > { %5235 = vst.msk [vmem:[#allocation4 + $0x210] sm:$0xff] %vm4960_vm9, %v5190_v35  ;;  %5207 = vrot.lane.b32.xlu1 %v11162_v41, %s7616_s30  ;;  %v7330_v46 = vpack.c.bf16 %v5558_v3, %v5557_v19 }
 0xbd9   : > { %5205 = vrot.lane.b32.xlu0 %v11167_v22, %s7616_s30 }
 0xbda   : > { %7331 = vmatpush3.bf16.msra.mxu0 %v7330_v46  ;;  %v5384_v20 = vpop.permute.xlu1 %5383 }
 0xbdb   : > { %5428 = vst.msk [vmem:[#allocation4 + $0x398] sm:$0xff] %vm4960_vm9, %v5384_v20  ;;  %v5382_v32 = vpop.permute.xlu0 %5381 }
 0xbdc   : > { %5427 = vst.msk [vmem:[#allocation4 + $0x390] sm:$0xff] %vm4960_vm9, %v5382_v32  ;;  %5019 = vrot.lane.b32.xlu1 %v11172_v58, %s11701_s27 }
 0xbdd   : > { %5017 = vrot.lane.b32.xlu0 %v11177_v2, %s11701_s27 }
 0xbde   : > { %v5320_v8 = vpop.permute.xlu1 %5319 }
 0xbdf   : > { %5364 = vst.msk [vmem:[#allocation4 + $0x318] sm:$0xff] %vm4960_vm9, %v5320_v8  ;;  %v5318_v27 = vpop.permute.xlu0 %5317 }
 0xbe0   : > { %5363 = vst.msk [vmem:[#allocation4 + $0x310] sm:$0xff] %vm4960_vm9, %v5318_v27  ;;  %5147 = vrot.lane.b32.xlu1 %v11172_v58, %s7614_s26 }
 0xbe1   : > { %5145 = vrot.lane.b32.xlu0 %v11177_v2, %s7614_s26 }
 0xbe2   : > { %v5448_v0 = vpop.permute.xlu1 %5447 }
 0xbe3   : > { %5492 = vst.msk [vmem:[#allocation4 + $0x418] sm:$0xff] %vm4960_vm9, %v5448_v0  ;;  %v5446_v62 = vpop.permute.xlu0 %5445 }
 0xbe4   : > { %5491 = vst.msk [vmem:[#allocation4 + $0x410] sm:$0xff] %vm4960_vm9, %v5446_v62  ;;  %5083 = vrot.lane.b32.xlu1 %v11172_v58, %s11715_s17 }
 0xbe5   : > { %5081 = vrot.lane.b32.xlu0 %v11177_v2, %s11715_s17 }
 0xbe6   : > { %v5004_v11 = vpop.permute.xlu1 %5003 }
 0xbe7   : > { %5046 = vst.msk [vmem:[#allocation4 + $0xa8] sm:$0xff] %vm4960_vm9, %v5004_v11  ;;  %v5002_v36 = vpop.permute.xlu0 %5001 }
 0xbe8   : > { %5045 = vst.msk [vmem:[#allocation4 + $0xa0] sm:$0xff] %vm4960_vm9, %v5002_v36  ;;  %5275 = vrot.lane.b32.xlu1 %v11172_v58, %s7615_s29 }
 0xbe9   : > { %5273 = vrot.lane.b32.xlu0 %v11177_v2, %s7615_s29 }
 0xbea   : > { %v5132_v54 = vpop.permute.xlu1 %5131 }
 0xbeb   : > { %5174 = vst.msk [vmem:[#allocation4 + $0x1a8] sm:$0xff] %vm4960_vm9, %v5132_v54  ;;  %v5130_v61 = vpop.permute.xlu0 %5129 }
 0xbec   : > { %5173 = vst.msk [vmem:[#allocation4 + $0x1a0] sm:$0xff] %vm4960_vm9, %v5130_v61  ;;  %5211 = vrot.lane.b32.xlu1 %v11172_v58, %s7616_s30  ;;  %v5531_v61 = vld [vmem:[#allocation4 + $0x40] sm:$0xff] }
 0xbed   : > { %5209 = vrot.lane.b32.xlu0 %v11177_v2, %s7616_s30 }
 0xbee   : > { %v5068_v26 = vpop.permute.xlu1 %5067  ;;  %v5544_v24 = vld [vmem:[#allocation4 + $0xa8] sm:$0xff] }
 0xbef   : > { %5110 = vst.msk [vmem:[#allocation4 + $0x128] sm:$0xff] %vm4960_vm9, %v5068_v26  ;;  %v5066_v50 = vpop.permute.xlu0 %5065  ;;  %v5543_v53 = vld [vmem:[#allocation4 + $0xa0] sm:$0xff]  ;;  %v5532_v26 = vld [vmem:[#allocation4 + $0x48] sm:$0xff] }
 0xbf0   : > { %5109 = vst.msk [vmem:[#allocation4 + $0x120] sm:$0xff] %vm4960_vm9, %v5066_v50  ;;  %5023 = vrot.lane.b32.xlu1 %v11184_v23, %s11701_s27  ;;  %v7300_v39 = vpack.c.bf16 %v5544_v24, %v5543_v53  ;;  %v7310_v55 = vpack.c.bf16 %v5532_v26, %v5531_v61 }
 0xbf1   : > { %5021 = vrot.lane.b32.xlu0 %v11188_v59, %s11701_s27 }
 0xbf2   : > { %7301 = vmatprep.subr.bf16.mxu1 %v7300_v39  ;;  %v5260_v17 = vpop.permute.xlu1 %5259  ;;  %v5576_v37 = vld [vmem:[#allocation4 + $0x1a8] sm:$0xff] }
 0xbf3   : > { %5302 = vst.msk [vmem:[#allocation4 + $0x2a8] sm:$0xff] %vm4960_vm9, %v5260_v17  ;;  %v5258_v45 = vpop.permute.xlu0 %5257  ;;  %7303 = vmatpush3.bf16.msra.mxu1 %v7302_v42  ;;  %v5575_v60 = vld [vmem:[#allocation4 + $0x1a0] sm:$0xff] }
 0xbf4   : > { %5301 = vst.msk [vmem:[#allocation4 + $0x2a0] sm:$0xff] %vm4960_vm9, %v5258_v45  ;;  %5151 = vrot.lane.b32.xlu1 %v11184_v23, %s7614_s26  ;;  %v7332_v7 = vpack.c.bf16 %v5576_v37, %v5575_v60  ;;  %v5667_v17 = vld [vmem:[%s11606_s11] sm:$0xff] }
 0xbf5   : > { %5329 = vrot.lane.b32.xlu0 %v11157_v5, %s7618_s16 }
 0xbf6   : > { %7333 = vmatprep.subr.bf16.mxu0 %v7332_v7  ;;  %v5196_v48 = vpop.permute.xlu1 %5195  ;;  %v5560_v18 = vld [vmem:[#allocation4 + $0x128] sm:$0xff] }
 0xbf7   : > { %5238 = vst.msk [vmem:[#allocation4 + $0x228] sm:$0xff] %vm4960_vm9, %v5196_v48  ;;  %v5194_v13 = vpop.permute.xlu0 %5193  ;;  %v5559_v47 = vld [vmem:[#allocation4 + $0x120] sm:$0xff] }
 0xbf8   : > { %5237 = vst.msk [vmem:[#allocation4 + $0x220] sm:$0xff] %vm4960_vm9, %v5194_v13  ;;  %5087 = vrot.lane.b32.xlu1 %v11184_v23, %s11715_s17  ;;  %v7334_v34 = vpack.c.bf16 %v5560_v18, %v5559_v47 }
 0xbf9   : > { %5397 = vrot.lane.b32.xlu0 %v11167_v22, %s7617_s23 }
 0xbfa   : > { %7335 = vmatpush3.bf16.msra.mxu0 %v7334_v34  ;;  %v5388_v52 = vpop.permute.xlu1 %5387 }
 0xbfb   : > { %5430 = vst.msk [vmem:[#allocation4 + $0x3a8] sm:$0xff] %vm4960_vm9, %v5388_v52  ;;  %v5386_v38 = vpop.permute.xlu0 %5385 }
 0xbfc   : > { %5429 = vst.msk [vmem:[#allocation4 + $0x3a0] sm:$0xff] %vm4960_vm9, %v5386_v38  ;;  %5279 = vrot.lane.b32.xlu1 %v11184_v23, %s7615_s29  ;;  %v5533_v38 = vld [vmem:[#allocation4 + $0x50] sm:$0xff] }
 0xbfd   : > { %5453 = vrot.lane.b32.xlu0 %v11147_v31, %s7619_s28 }
 0xbfe   : > { %v5324_v40 = vpop.permute.xlu1 %5323 }
 0xbff   : > { %5366 = vst.msk [vmem:[#allocation4 + $0x328] sm:$0xff] %vm4960_vm9, %v5324_v40  ;;  %v5322_v16 = vpop.permute.xlu0 %5321  ;;  %v5534_v40 = vld [vmem:[#allocation4 + $0x58] sm:$0xff] }
 0xc00   : > { %5365 = vst.msk [vmem:[#allocation4 + $0x320] sm:$0xff] %vm4960_vm9, %v5322_v16  ;;  %5215 = vrot.lane.b32.xlu1 %v11184_v23, %s7616_s30 }
 0xc01   : > { %5333 = vrot.lane.b32.xlu0 %v11167_v22, %s7618_s16 }
 0xc02   : > { %v5452_v9 = vpop.permute.xlu1 %5451 }
 0xc03   : > { %5494 = vst.msk [vmem:[#allocation4 + $0x428] sm:$0xff] %vm4960_vm9, %v5452_v9  ;;  %v5450_v4 = vpop.permute.xlu0 %5449 }
 0xc04   : > { %5493 = vst.msk [vmem:[#allocation4 + $0x420] sm:$0xff] %vm4960_vm9, %v5450_v4  ;;  %5331 = vrot.lane.b32.xlu1 %v11152_v30, %s7618_s16 }
 0xc05   : > { %5149 = vrot.lane.b32.xlu0 %v11188_v59, %s7614_s26 }
 0xc06   : > { %v5008_v31 = vpop.permute.xlu1 %5007 }
 0xc07   : > { %5048 = vst.msk [vmem:[#allocation4 + $0xb8] sm:$0xff] %vm4960_vm9, %v5008_v31  ;;  %v5006_v43 = vpop.permute.xlu0 %5005  ;;  %v7314_v31 = vpack.c.bf16 %v5534_v40, %v5533_v38  ;;  %v5589_v38 = vld [vmem:[#allocation4 + $0x210] sm:$0xff]  ;;  %v5590_v40 = vld [vmem:[#allocation4 + $0x218] sm:$0xff] }
 0xc08   : > { %5047 = vst.msk [vmem:[#allocation4 + $0xb0] sm:$0xff] %vm4960_vm9, %v5006_v43  ;;  %5399 = vrot.lane.b32.xlu1 %v11162_v41, %s7617_s23 }
 0xc09   : > { %5085 = vrot.lane.b32.xlu0 %v11188_v59, %s11715_s17  ;;  %s491_s17 = scalar_lea.vmem %s11610_s15, %s6180_s22 }
 0xc0a   : > { %v5136_v14 = vpop.permute.xlu1 %5135 }
 0xc0b   : > { %5176 = vst.msk [vmem:[#allocation4 + $0x1b8] sm:$0xff] %vm4960_vm9, %v5136_v14  ;;  %v5134_v15 = vpop.permute.xlu0 %5133 }
 0xc0c   : > { %5175 = vst.msk [vmem:[#allocation4 + $0x1b0] sm:$0xff] %vm4960_vm9, %v5134_v15  ;;  %5455 = vrot.lane.b32.xlu1 %v11142_v1, %s7619_s28  ;;  %v7306_v1 = vpack.c.bf16 %v5530_v44, %v5529_v51 }
 0xc0d   : > { %5277 = vrot.lane.b32.xlu0 %v11188_v59, %s7615_s29 }
 0xc0e   : > { %v5072_v57 = vpop.permute.xlu1 %5071  ;;  %v5546_v33 = vld [vmem:[#allocation4 + $0xb8] sm:$0xff] }
 0xc0f   : > { %5112 = vst.msk [vmem:[#allocation4 + $0x138] sm:$0xff] %vm4960_vm9, %v5072_v57  ;;  %v5070_v21 = vpop.permute.xlu0 %5069  ;;  %v5545_v49 = vld [vmem:[#allocation4 + $0xb0] sm:$0xff] }
 0xc10   : > { %5111 = vst.msk [vmem:[#allocation4 + $0x130] sm:$0xff] %vm4960_vm9, %v5070_v21  ;;  %5335 = vrot.lane.b32.xlu1 %v11162_v41, %s7618_s16  ;;  %v7304_v25 = vpack.c.bf16 %v5546_v33, %v5545_v49 }
 0xc11   : > { %5213 = vrot.lane.b32.xlu0 %v11188_v59, %s7616_s30 }
 0xc12   : > { %7305 = vmatprep.subr.bf16.mxu1 %v7304_v25  ;;  %v5264_v10 = vpop.permute.xlu1 %5263  ;;  %v5578_v12 = vld [vmem:[#allocation4 + $0x1b8] sm:$0xff] }
 0xc13   : > { %5304 = vst.msk [vmem:[#allocation4 + $0x2b8] sm:$0xff] %vm4960_vm9, %v5264_v10  ;;  %v5262_v28 = vpop.permute.xlu0 %5261  ;;  %7307 = vmatpush3.bf16.msra.mxu1 %v7306_v1  ;;  %v5577_v56 = vld [vmem:[#allocation4 + $0x1b0] sm:$0xff] }
 0xc14   : > { %5303 = vst.msk [vmem:[#allocation4 + $0x2b0] sm:$0xff] %vm4960_vm9, %v5262_v28  ;;  %5403 = vrot.lane.b32.xlu1 %v11172_v58, %s7617_s23  ;;  %v7336_v3 = vpack.c.bf16 %v5578_v12, %v5577_v56 }
 0xc15   : > { %5401 = vrot.lane.b32.xlu0 %v11177_v2, %s7617_s23 }
 0xc16   : > { %7337 = vmatprep.subr.bf16.mxu0 %v7336_v3  ;;  %v5200_v35 = vpop.permute.xlu1 %5199  ;;  %v5562_v19 = vld [vmem:[#allocation4 + $0x138] sm:$0xff]  ;;  %v5535_v3 = vld [vmem:[#allocation4 + $0x60] sm:$0xff] }
 0xc17   : > { %5240 = vst.msk [vmem:[#allocation4 + $0x238] sm:$0xff] %vm4960_vm9, %v5200_v35  ;;  %v5198_v46 = vpop.permute.xlu0 %5197  ;;  %v5561_v20 = vld [vmem:[#allocation4 + $0x130] sm:$0xff]  ;;  %v5536_v35 = vld [vmem:[#allocation4 + $0x68] sm:$0xff] }
 0xc18   : > { %5239 = vst.msk [vmem:[#allocation4 + $0x230] sm:$0xff] %vm4960_vm9, %v5198_v46  ;;  %5459 = vrot.lane.b32.xlu1 %v11152_v30, %s7619_s28  ;;  %v7338_v32 = vpack.c.bf16 %v5562_v19, %v5561_v20 }
 0xc19   : > { %5457 = vrot.lane.b32.xlu0 %v11157_v5, %s7619_s28 }
 0xc1a   : > { %7339 = vmatpush3.bf16.msra.mxu0 %v7338_v32  ;;  %v5392_v8 = vpop.permute.xlu1 %5391  ;;  %v7318_v32 = vpack.c.bf16 %v5536_v35, %v5535_v3 }
 0xc1b   : > { %5432 = vst.msk [vmem:[#allocation4 + $0x3b8] sm:$0xff] %vm4960_vm9, %v5392_v8  ;;  %v5390_v27 = vpop.permute.xlu0 %5389 }
 0xc1c   : > { %5431 = vst.msk [vmem:[#allocation4 + $0x3b0] sm:$0xff] %vm4960_vm9, %v5390_v27  ;;  %5339 = vrot.lane.b32.xlu1 %v11172_v58, %s7618_s16 }
 0xc1d   : > { %5337 = vrot.lane.b32.xlu0 %v11177_v2, %s7618_s16 }
 0xc1e   : > { %v5328_v0 = vpop.permute.xlu1 %5327 }
 0xc1f   : > { %5368 = vst.msk [vmem:[#allocation4 + $0x338] sm:$0xff] %vm4960_vm9, %v5328_v0  ;;  %v5326_v30 = vpop.permute.xlu0 %5325 }
 0xc20   : > { %5367 = vst.msk [vmem:[#allocation4 + $0x330] sm:$0xff] %vm4960_vm9, %v5326_v30  ;;  %5407 = vrot.lane.b32.xlu1 %v11184_v23, %s7617_s23 }
 0xc21   : > { %5461 = vrot.lane.b32.xlu0 %v11167_v22, %s7619_s28 }
 0xc22   : > { %v5012_v5 = vpop.permute.xlu1 %5011 }
 0xc23   : > { %5050 = vst.msk [vmem:[#allocation4 + $0xc8] sm:$0xff] %vm4960_vm9, %v5012_v5  ;;  %v5010_v62 = vpop.permute.xlu0 %5009 }
 0xc24   : > { %5049 = vst.msk [vmem:[#allocation4 + $0xc0] sm:$0xff] %vm4960_vm9, %v5010_v62  ;;  %5463 = vrot.lane.b32.xlu1 %v11162_v41, %s7619_s28 }
 0xc25   : > { %5405 = vrot.lane.b32.xlu0 %v11188_v59, %s7617_s23 }
 0xc26   : > { %v5140_v11 = vpop.permute.xlu1 %5139 }
 0xc27   : > { %5178 = vst.msk [vmem:[#allocation4 + $0x1c8] sm:$0xff] %vm4960_vm9, %v5140_v11  ;;  %v5138_v36 = vpop.permute.xlu0 %5137 }
 0xc28   : > { %5177 = vst.msk [vmem:[#allocation4 + $0x1c0] sm:$0xff] %vm4960_vm9, %v5138_v36  ;;  %5343 = vrot.lane.b32.xlu1 %v11184_v23, %s7618_s16 }
 0xc29   : > { %5341 = vrot.lane.b32.xlu0 %v11188_v59, %s7618_s16 }
 0xc2a   : > { %v5076_v22 = vpop.permute.xlu1 %5075  ;;  %v5548_v54 = vld [vmem:[#allocation4 + $0xc8] sm:$0xff] }
 0xc2b   : > { %5114 = vst.msk [vmem:[#allocation4 + $0x148] sm:$0xff] %vm4960_vm9, %v5076_v22  ;;  %v5074_v41 = vpop.permute.xlu0 %5073  ;;  %v5547_v24 = vld [vmem:[#allocation4 + $0xc0] sm:$0xff] }
 0xc2c   : > { %5113 = vst.msk [vmem:[#allocation4 + $0x140] sm:$0xff] %vm4960_vm9, %v5074_v41  ;;  %5467 = vrot.lane.b32.xlu1 %v11172_v58, %s7619_s28  ;;  %v7308_v6 = vpack.c.bf16 %v5548_v54, %v5547_v24  ;;  %v5668_v58 = vld [vmem:[%s11606_s11 + $0x8] sm:$0x3] }
 0xc2d   : > { %5465 = vrot.lane.b32.xlu0 %v11177_v2, %s7619_s28 }
 0xc2e   : > { %7309 = vmatprep.subr.bf16.mxu1 %v7308_v6  ;;  %v5268_v50 = vpop.permute.xlu1 %5267  ;;  %v5580_v53 = vld [vmem:[#allocation4 + $0x1c8] sm:$0xff] }
 0xc2f   : > { %5306 = vst.msk [vmem:[#allocation4 + $0x2c8] sm:$0xff] %vm4960_vm9, %v5268_v50  ;;  %v5266_v39 = vpop.permute.xlu0 %5265  ;;  %7311 = vmatpush3.bf16.msra.mxu1 %v7310_v55  ;;  %v5579_v63 = vld [vmem:[#allocation4 + $0x1c0] sm:$0xff]  ;;  %v5537_v50 = vld [vmem:[#allocation4 + $0x70] sm:$0xff] }
 0xc30   : > { %5305 = vst.msk [vmem:[#allocation4 + $0x2c0] sm:$0xff] %vm4960_vm9, %v5266_v39  ;;  %5471 = vrot.lane.b32.xlu1 %v11184_v23, %s7619_s28  ;;  %v7340_v42 = vpack.c.bf16 %v5580_v53, %v5579_v63  ;;  %v5538_v53 = vld [vmem:[#allocation4 + $0x78] sm:$0xff] }
 0xc31   : > { %5469 = vrot.lane.b32.xlu0 %v11188_v59, %s7619_s28 }
 0xc32   : > { %7341 = vmatprep.subr.bf16.mxu0 %v7340_v42  ;;  %v5204_v2 = vpop.permute.xlu1 %5203  ;;  %v5564_v37 = vld [vmem:[#allocation4 + $0x148] sm:$0xff]  ;;  %v5603_v42 = vld [vmem:[#allocation4 + $0x280] sm:$0xff] }
 0xc33   : > { %5242 = vst.msk [vmem:[#allocation4 + $0x248] sm:$0xff] %vm4960_vm9, %v5204_v2  ;;  %v5202_v45 = vpop.permute.xlu0 %5201  ;;  %v5563_v60 = vld [vmem:[#allocation4 + $0x140] sm:$0xff] }
 0xc34   : > { %5241 = vst.msk [vmem:[#allocation4 + $0x240] sm:$0xff] %vm4960_vm9, %v5202_v45  ;;  %5676 = vperm.xlu1 %7525, %v5668_v58   ;;  %v7342_v23 = vpack.c.bf16 %v5564_v37, %v5563_v60  ;;  %v5604_v58 = vld [vmem:[#allocation4 + $0x288] sm:$0xff]  ;;  %v5587_v60 = vld [vmem:[#allocation4 + $0x200] sm:$0xff] }
 0xc35   : > { %5671 = vperm.xlu0 %7521, %v5667_v17   ;;  %v7322_v17 = vpack.c.bf16 %v5538_v53, %v5537_v50  ;;  %v7356_v45 = vpack.c.bf16 %v5604_v58, %v5603_v42 }
 0xc36   : > { %7343 = vmatpush3.bf16.msra.mxu0 %v7342_v23  ;;  %v5396_v59 = vpop.permute.xlu1 %5395  ;;  %v5588_v23 = vld [vmem:[#allocation4 + $0x208] sm:$0xff] }
 0xc37   : > { %5434 = vst.msk [vmem:[#allocation4 + $0x3c8] sm:$0xff] %vm4960_vm9, %v5396_v59  ;;  %v5394_v7 = vpop.permute.xlu0 %5393  ;;  %v5612_v3 = vld [vmem:[#allocation4 + $0x2c8] sm:$0xff] }
 0xc38   : > { %5433 = vst.msk [vmem:[#allocation4 + $0x3c0] sm:$0xff] %vm4960_vm9, %v5394_v7  ;;  %v5505_v7 = vld [vmem:[%s11599_s4] sm:$0xff] }
 0xc3a   : > { %v5016_v48 = vpop.permute.xlu1 %5015 }
 0xc3b   : > { %5052 = vst.msk [vmem:[#allocation4 + $0xd8] sm:$0xff] %vm4960_vm9, %v5016_v48  ;;  %v5014_v18 = vpop.permute.xlu0 %5013  ;;  %v5605_v48 = vld [vmem:[#allocation4 + $0x290] sm:$0xff] }
 0xc3c   : > { %5051 = vst.msk [vmem:[#allocation4 + $0xd0] sm:$0xff] %vm4960_vm9, %v5014_v18  ;;  %v5606_v18 = vld [vmem:[#allocation4 + $0x298] sm:$0xff] }
 0xc3e   : > { %v5144_v13 = vpop.permute.xlu1 %5143 }
 0xc3f   : > { %5180 = vst.msk [vmem:[#allocation4 + $0x1d8] sm:$0xff] %vm4960_vm9, %v5144_v13  ;;  %v5142_v47 = vpop.permute.xlu0 %5141  ;;  %v5515_v13 = vld [vmem:[%s11599_s4 + $0x50] sm:$0x3] }
 0xc40   : > { %5179 = vst.msk [vmem:[#allocation4 + $0x1d0] sm:$0xff] %vm4960_vm9, %v5142_v47  ;;  %v7358_v47 = vpack.c.bf16 %v5588_v23, %v5587_v60  ;;  %v5507_v23 = vld [vmem:[%s11599_s4 + $0x10] sm:$0xff] }
 0xc42   : > { %v5080_v34 = vpop.permute.xlu1 %5079  ;;  %v5550_v52 = vld [vmem:[#allocation4 + $0xd8] sm:$0xff] }
 0xc43   : > { %5116 = vst.msk [vmem:[#allocation4 + $0x158] sm:$0xff] %vm4960_vm9, %v5080_v34  ;;  %v5078_v16 = vpop.permute.xlu0 %5077  ;;  %v5549_v9 = vld [vmem:[#allocation4 + $0xd0] sm:$0xff] }
 0xc44   : > { %5115 = vst.msk [vmem:[#allocation4 + $0x150] sm:$0xff] %vm4960_vm9, %v5078_v16  ;;  %v7312_v4 = vpack.c.bf16 %v5550_v52, %v5549_v9  ;;  %v7360_v52 = vpack.c.bf16 %v5606_v18, %v5605_v48  ;;  %v5514_v9 = vld [vmem:[%s11599_s4 + $0x48] sm:$0x3]  ;;  %v5517_v18 = vld [vmem:[%s11599_s4 + $0x60] sm:$0x3] }
 0xc46   : > { %7313 = vmatprep.subr.bf16.mxu1 %v7312_v4  ;;  %v5272_v43 = vpop.permute.xlu1 %5271  ;;  %v5582_v29 = vld [vmem:[#allocation4 + $0x1d8] sm:$0xff]  ;;  %v5607_v4 = vld [vmem:[#allocation4 + $0x2a0] sm:$0xff] }
 0xc47   : > { %5308 = vst.msk [vmem:[#allocation4 + $0x2d8] sm:$0xff] %vm4960_vm9, %v5272_v43  ;;  %v5270_v14 = vpop.permute.xlu0 %5269  ;;  %7315 = vmatpush3.bf16.msra.mxu1 %v7314_v31  ;;  %v5581_v15 = vld [vmem:[#allocation4 + $0x1d0] sm:$0xff]  ;;  %v5608_v31 = vld [vmem:[#allocation4 + $0x2a8] sm:$0xff] }
 0xc48   : > { %5307 = vst.msk [vmem:[#allocation4 + $0x2d0] sm:$0xff] %vm4960_vm9, %v5270_v14  ;;  %v7344_v57 = vpack.c.bf16 %v5582_v29, %v5581_v15  ;;  %v5510_v43 = vld [vmem:[%s11599_s4 + $0x28] sm:$0xff]  ;;  %v7362_v29 = vpack.c.bf16 %v5590_v40, %v5589_v38  ;;  %v7364_v15 = vpack.c.bf16 %v5608_v31, %v5607_v4  ;;  %v5621_v40 = vld [vmem:[#allocation4 + $0x310] sm:$0xff] }
 0xc49   : > { %v5652_v4 = vld [vmem:[#allocation4 + $0x408] sm:$0xff] }
 0xc4a   : > { %7345 = vmatprep.subr.bf16.mxu0 %v7344_v57  ;;  %v5208_v33 = vpop.permute.xlu1 %5207  ;;  %v5566_v51 = vld [vmem:[#allocation4 + $0x158] sm:$0xff]  ;;  %v5591_v57 = vld [vmem:[#allocation4 + $0x220] sm:$0xff] }
 0xc4b   : > { %5244 = vst.msk [vmem:[#allocation4 + $0x258] sm:$0xff] %vm4960_vm9, %v5208_v33  ;;  %v5206_v44 = vpop.permute.xlu0 %5205  ;;  %v5565_v21 = vld [vmem:[#allocation4 + $0x150] sm:$0xff]  ;;  %v5592_v33 = vld [vmem:[#allocation4 + $0x228] sm:$0xff] }
 0xc4c   : > { %5243 = vst.msk [vmem:[#allocation4 + $0x250] sm:$0xff] %vm4960_vm9, %v5206_v44  ;;  %v7346_v49 = vpack.c.bf16 %v5566_v51, %v5565_v21  ;;  %v5609_v44 = vld [vmem:[#allocation4 + $0x2b0] sm:$0xff]  ;;  %v5610_v21 = vld [vmem:[#allocation4 + $0x2b8] sm:$0xff] }
 0xc4e   : > { %7347 = vmatpush3.bf16.msra.mxu0 %v7346_v49  ;;  %v5020_v25 = vpop.permute.xlu1 %5019  ;;  %v7366_v49 = vpack.c.bf16 %v5592_v33, %v5591_v57 }
 0xc4f   : > { %5054 = vst.msk [vmem:[#allocation4 + $0xe8] sm:$0xff] %vm4960_vm9, %v5020_v25  ;;  %v5018_v1 = vpop.permute.xlu0 %5017 }
 0xc50   : > { %5053 = vst.msk [vmem:[#allocation4 + $0xe0] sm:$0xff] %vm4960_vm9, %v5018_v1  ;;  %v7368_v1 = vpack.c.bf16 %v5610_v21, %v5609_v44  ;;  %v5512_v44 = vld [vmem:[%s11599_s4 + $0x38] sm:$0xff] }
 0xc52   : > { %v5148_v10 = vpop.permute.xlu1 %5147 }
 0xc53   : > { %5182 = vst.msk [vmem:[#allocation4 + $0x1e8] sm:$0xff] %vm4960_vm9, %v5148_v10  ;;  %v5146_v12 = vpop.permute.xlu0 %5145  ;;  %v5593_v10 = vld [vmem:[#allocation4 + $0x230] sm:$0xff] }
 0xc54   : > { %5181 = vst.msk [vmem:[#allocation4 + $0x1e0] sm:$0xff] %vm4960_vm9, %v5146_v12  ;;  %v5594_v12 = vld [vmem:[#allocation4 + $0x238] sm:$0xff] }
 0xc55   : > { %v7370_v35 = vpack.c.bf16 %v5594_v12, %v5593_v10  ;;  %v5624_v10 = vld [vmem:[#allocation4 + $0x328] sm:$0xff] }
 0xc56   : > { %v5084_v28 = vpop.permute.xlu1 %5083  ;;  %v5552_v56 = vld [vmem:[#allocation4 + $0xe8] sm:$0xff] }
 0xc57   : > { %5118 = vst.msk [vmem:[#allocation4 + $0x168] sm:$0xff] %vm4960_vm9, %v5084_v28  ;;  %v5082_v19 = vpop.permute.xlu0 %5081  ;;  %v5551_v46 = vld [vmem:[#allocation4 + $0xe0] sm:$0xff] }
 0xc58   : > { %5117 = vst.msk [vmem:[#allocation4 + $0x160] sm:$0xff] %vm4960_vm9, %v5082_v19  ;;  %v7316_v20 = vpack.c.bf16 %v5552_v56, %v5551_v46  ;;  %v5611_v56 = vld [vmem:[#allocation4 + $0x2c0] sm:$0xff] }
 0xc59   : > { %v7372_v46 = vpack.c.bf16 %v5612_v3, %v5611_v56  ;;  %v5641_v56 = vld [vmem:[#allocation4 + $0x3b0] sm:$0xff]  ;;  %v5642_v3 = vld [vmem:[#allocation4 + $0x3b8] sm:$0xff] }
 0xc5a   : > { %7317 = vmatprep.subr.bf16.mxu1 %v7316_v20  ;;  %v5276_v8 = vpop.permute.xlu1 %5275  ;;  %v5584_v27 = vld [vmem:[#allocation4 + $0x1e8] sm:$0xff]  ;;  %v5595_v20 = vld [vmem:[#allocation4 + $0x240] sm:$0xff] }
 0xc5b   : > { %5310 = vst.msk [vmem:[#allocation4 + $0x2e8] sm:$0xff] %vm4960_vm9, %v5276_v8  ;;  %v5274_v0 = vpop.permute.xlu0 %5273  ;;  %7319 = vmatpush3.bf16.msra.mxu1 %v7318_v32  ;;  %v5583_v30 = vld [vmem:[#allocation4 + $0x1e0] sm:$0xff]  ;;  %v5596_v32 = vld [vmem:[#allocation4 + $0x248] sm:$0xff]  ;;  %v5614_v8 = vld [vmem:[#allocation4 + $0x2d8] sm:$0xff] }
 0xc5c   : > { %5309 = vst.msk [vmem:[#allocation4 + $0x2e0] sm:$0xff] %vm4960_vm9, %v5274_v0  ;;  %v7348_v5 = vpack.c.bf16 %v5584_v27, %v5583_v30 }
 0xc5e   : > { %7349 = vmatprep.subr.bf16.mxu0 %v7348_v5  ;;  %v5212_v62 = vpop.permute.xlu1 %5211  ;;  %v5568_v11 = vld [vmem:[#allocation4 + $0x168] sm:$0xff]  ;;  %v5613_v5 = vld [vmem:[#allocation4 + $0x2d0] sm:$0xff] }
 0xc5f   : > { %5246 = vst.msk [vmem:[#allocation4 + $0x268] sm:$0xff] %vm4960_vm9, %v5212_v62  ;;  %v5210_v36 = vpop.permute.xlu0 %5209  ;;  %v5567_v22 = vld [vmem:[#allocation4 + $0x160] sm:$0xff] }
 0xc60   : > { %5245 = vst.msk [vmem:[#allocation4 + $0x260] sm:$0xff] %vm4960_vm9, %v5210_v36  ;;  %v7350_v54 = vpack.c.bf16 %v5568_v11, %v5567_v22  ;;  %v7374_v11 = vpack.c.bf16 %v5596_v32, %v5595_v20  ;;  %v5635_v36 = vld [vmem:[#allocation4 + $0x380] sm:$0xff]  ;;  %v5636_v22 = vld [vmem:[#allocation4 + $0x388] sm:$0xff]  ;;  %v5654_v20 = vld [vmem:[#allocation4 + $0x418] sm:$0xff] }
 0xc61   : > { %v7388_v58 = vpack.c.bf16 %v5636_v22, %v5635_v36  ;;  %v5644_v36 = vld [vmem:[#allocation4 + $0x3c8] sm:$0xff] }
 0xc62   : > { %7351 = vmatpush3.bf16.msra.mxu0 %v7350_v54  ;;  %v5024_v61 = vpop.permute.xlu1 %5023 }
 0xc63   : > { %5056 = vst.msk [vmem:[#allocation4 + $0xf8] sm:$0xff] %vm4960_vm9, %v5024_v61  ;;  %v5022_v26 = vpop.permute.xlu0 %5021  ;;  %v7376_v61 = vpack.c.bf16 %v5614_v8, %v5613_v5  ;;  %v5615_v53 = vld [vmem:[#allocation4 + $0x2e0] sm:$0xff]  ;;  %v7400_v8 = vpack.c.bf16 %v5642_v3, %v5641_v56 }
 0xc64   : > { %5055 = vst.msk [vmem:[#allocation4 + $0xf0] sm:$0xff] %vm4960_vm9, %v5022_v26  ;;  %v5597_v26 = vld [vmem:[#allocation4 + $0x250] sm:$0xff]  ;;  %v5521_v56 = vld [vmem:[%s11599_s4 + $0x80] sm:$0x3] }
 0xc66   : > { %v5152_v41 = vpop.permute.xlu1 %5151 }
 0xc67   : > { %5184 = vst.msk [vmem:[#allocation4 + $0x1f8] sm:$0xff] %vm4960_vm9, %v5152_v41  ;;  %v5330_v24 = vpop.permute.xlu0 %5329  ;;  %v5598_v41 = vld [vmem:[#allocation4 + $0x258] sm:$0xff] }
 0xc68   : > { %5369 = vst.msk [vmem:[#allocation4 + $0x340] sm:$0xff] %vm4960_vm9, %v5330_v24  ;;  %v5616_v24 = vld [vmem:[#allocation4 + $0x2e8] sm:$0xff]  ;;  %v7378_v42 = vpack.c.bf16 %v5598_v41, %v5597_v26 }
 0xc69   : > { %v7380_v60 = vpack.c.bf16 %v5616_v24, %v5615_v53  ;;  %v5656_v26 = vld [vmem:[#allocation4 + $0x428] sm:$0xff] }
 0xc6a   : > { %v5088_v6 = vpop.permute.xlu1 %5087  ;;  %v5554_v55 = vld [vmem:[#allocation4 + $0xf8] sm:$0xff] }
 0xc6b   : > { %5120 = vst.msk [vmem:[#allocation4 + $0x178] sm:$0xff] %vm4960_vm9, %v5088_v6  ;;  %v5398_v39 = vpop.permute.xlu0 %5397  ;;  %v5553_v63 = vld [vmem:[#allocation4 + $0xf0] sm:$0xff] }
 0xc6c   : > { %5435 = vst.msk [vmem:[#allocation4 + $0x3d0] sm:$0xff] %vm4960_vm9, %v5398_v39  ;;  %v7320_v2 = vpack.c.bf16 %v5554_v55, %v5553_v63  ;;  %v5620_v63 = vld [vmem:[#allocation4 + $0x308] sm:$0xff] }
 0xc6e   : > { %7321 = vmatprep.subr.bf16.mxu1 %v7320_v2  ;;  %v5280_v37 = vpop.permute.xlu1 %5279  ;;  %v5586_v30 = vld [vmem:[#allocation4 + $0x1f8] sm:$0xff]  ;;  %v5619_v2 = vld [vmem:[#allocation4 + $0x300] sm:$0xff] }
 0xc6f   : > { %5312 = vst.msk [vmem:[#allocation4 + $0x2f8] sm:$0xff] %vm4960_vm9, %v5280_v37  ;;  %v5454_v59 = vpop.permute.xlu0 %5453  ;;  %7323 = vmatpush3.bf16.msra.mxu1 %v7322_v17  ;;  %v5637_v17 = vld [vmem:[#allocation4 + $0x390] sm:$0xff]  ;;  %v5638_v37 = vld [vmem:[#allocation4 + $0x398] sm:$0xff] }
 0xc70   : > { %5495 = vst.msk [vmem:[#allocation4 + $0x430] sm:$0xff] %vm4960_vm9, %v5454_v59  ;;  %7357 = vmatprep.subr.bf16.mxu1 %v7356_v45  ;;  %v5599_v59 = vld [vmem:[#allocation4 + $0x260] sm:$0xff] }
 0xc72   : > { %5744 = vmatmul.mubr.f32.vlgmr.msra.gmra.mrb[92].mxu1 %v5505_v7  ;;  %v5216_v34 = vpop.permute.xlu1 %5215  ;;  %v5570_v50 = vld [vmem:[#allocation4 + $0x178] sm:$0xff]  ;;  %v5600_v7 = vld [vmem:[#allocation4 + $0x268] sm:$0xff] }
 0xc73   : > { %5248 = vst.msk [vmem:[#allocation4 + $0x278] sm:$0xff] %vm4960_vm9, %v5216_v34  ;;  %v5334_v16 = vpop.permute.xlu0 %5333  ;;  %7359 = vmatpush3.bf16.msra.mxu1 %v7358_v47  ;;  %5748 = vmatprep.mubr.f32.mxu1 %v5515_v13  ;;  %v7390_v47 = vpack.c.bf16 %v5620_v63, %v5619_v2  ;;  %v7382_v34 = vpack.c.bf16 %v5600_v7, %v5599_v59 }
 0xc74   : > { %5371 = vst.msk [vmem:[#allocation4 + $0x350] sm:$0xff] %vm4960_vm9, %v5334_v16  ;;  %7361 = vmatprep.subr.bf16.mxu1 %v7360_v52  ;;  %v7392_v52 = vpack.c.bf16 %v5638_v37, %v5637_v17  ;;  %v5622_v16 = vld [vmem:[#allocation4 + $0x318] sm:$0xff]  ;;  %v5645_v17 = vld [vmem:[#allocation4 + $0x3d0] sm:$0xff] }
 0xc75   : > { %v7394_v21 = vpack.c.bf16 %v5622_v16, %v5621_v40 }
 0xc76   : > { %5749 = vmatmul.mubr.f32.gmra.mrb[94].mxu1 %v5514_v9  ;;  %v5332_v14 = vpop.permute.xlu1 %5331  ;;  %v5618_v38 = vld [vmem:[#allocation4 + $0x2f8] sm:$0xff]  ;;  %v5651_v9 = vld [vmem:[#allocation4 + $0x400] sm:$0xff] }
 0xc77   : > { %5370 = vst.msk [vmem:[#allocation4 + $0x348] sm:$0xff] %vm4960_vm9, %v5332_v14  ;;  %v5150_v51 = vpop.permute.xlu0 %5149  ;;  %7363 = vmatpush3.bf16.msra.mxu1 %v7362_v29  ;;  %5893 = vmatprep.mubr.f32.mxu1 %v5510_v43  ;;  %v5516_v29 = vld [vmem:[%s11599_s4 + $0x58] sm:$0x3]  ;;  %v5639_v14 = vld [vmem:[#allocation4 + $0x3a0] sm:$0xff] }
 0xc78   : > { %5183 = vst.msk [vmem:[#allocation4 + $0x1f0] sm:$0xff] %vm4960_vm9, %v5150_v51  ;;  %7365 = vmatprep.subr.bf16.mxu1 %v7364_v15  ;;  %v5640_v15 = vld [vmem:[#allocation4 + $0x3a8] sm:$0xff] }
 0xc7a   : > { %v5400_v25 = vpop.permute.xlu1 %5399  ;;  %v5602_v51 = vld [vmem:[#allocation4 + $0x278] sm:$0xff] }
 0xc7b   : > { %5436 = vst.msk [vmem:[#allocation4 + $0x3d8] sm:$0xff] %vm4960_vm9, %v5400_v25  ;;  %v5086_v28 = vpop.permute.xlu0 %5085  ;;  %7367 = vmatpush3.bf16.msra.mxu1 %v7366_v49  ;;  %v7396_v25 = vpack.c.bf16 %v5640_v15, %v5639_v14 }
 0xc7c   : > { %5119 = vst.msk [vmem:[#allocation4 + $0x170] sm:$0xff] %vm4960_vm9, %v5086_v28  ;;  %7369 = vmatprep.subr.bf16.mxu1 %v7368_v1  ;;  %v5623_v1 = vld [vmem:[#allocation4 + $0x320] sm:$0xff]  ;;  %v7420_v28 = vpack.c.bf16 %v5652_v4, %v5651_v9 }
 0xc7d   : > { %v7398_v32 = vpack.c.bf16 %v5624_v10, %v5623_v1  ;;  %v5511_v10 = vld [vmem:[%s11599_s4 + $0x30] sm:$0xff] }
 0xc7e   : > { %v5456_v19 = vpop.permute.xlu1 %5455 }
 0xc7f   : > { %5496 = vst.msk [vmem:[#allocation4 + $0x438] sm:$0xff] %vm4960_vm9, %v5456_v19  ;;  %v5278_v27 = vpop.permute.xlu0 %5277  ;;  %7371 = vmatpush3.bf16.msra.mxu1 %v7370_v35  ;;  %v5585_v0 = vld [vmem:[#allocation4 + $0x1f0] sm:$0xff]  ;;  %v5509_v19 = vld [vmem:[%s11599_s4 + $0x20] sm:$0xff] }
 0xc80   : > { %5311 = vst.msk [vmem:[#allocation4 + $0x2f0] sm:$0xff] %vm4960_vm9, %v5278_v27  ;;  %7373 = vmatprep.subr.bf16.mxu1 %v7372_v46  ;;  %v7352_v62 = vpack.c.bf16 %v5586_v30, %v5585_v0  ;;  %v5653_v46 = vld [vmem:[#allocation4 + $0x410] sm:$0xff]  ;;  %v5626_v30 = vld [vmem:[#allocation4 + $0x338] sm:$0xff] }
 0xc81   : > { %v5519_v27 = vld [vmem:[%s11599_s4 + $0x70] sm:$0x3] }
 0xc82   : > { %7353 = vmatprep.subr.bf16.mxu0 %v7352_v62  ;;  %v5336_v54 = vpop.permute.xlu1 %5335  ;;  %v5625_v0 = vld [vmem:[#allocation4 + $0x330] sm:$0xff]  ;;  %v7424_v62 = vpack.c.bf16 %v5654_v20, %v5653_v46 }
 0xc83   : > { %5372 = vst.msk [vmem:[#allocation4 + $0x358] sm:$0xff] %vm4960_vm9, %v5336_v54  ;;  %v5214_v6 = vpop.permute.xlu0 %5213  ;;  %7375 = vmatpush3.bf16.msra.mxu1 %v7374_v11  ;;  %v5569_v55 = vld [vmem:[#allocation4 + $0x170] sm:$0xff]  ;;  %v5643_v11 = vld [vmem:[#allocation4 + $0x3c0] sm:$0xff]  ;;  %v5518_v54 = vld [vmem:[%s11599_s4 + $0x68] sm:$0x3]  ;;  %v7402_v41 = vpack.c.bf16 %v5626_v30, %v5625_v0 }
 0xc84   : > { %5247 = vst.msk [vmem:[#allocation4 + $0x270] sm:$0xff] %vm4960_vm9, %v5214_v6  ;;  %7377 = vmatprep.subr.bf16.mxu1 %v7376_v61  ;;  %v7354_v39 = vpack.c.bf16 %v5570_v50, %v5569_v55  ;;  %v5655_v61 = vld [vmem:[#allocation4 + $0x420] sm:$0xff]  ;;  %v7404_v24 = vpack.c.bf16 %v5644_v36, %v5643_v11  ;;  %v5628_v6 = vld [vmem:[#allocation4 + $0x348] sm:$0xff] }
 0xc85   : > { %v5513_v55 = vld [vmem:[%s11599_s4 + $0x40] sm:$0xff]  ;;  %v7428_v53 = vpack.c.bf16 %v5656_v26, %v5655_v61 }
 0xc86   : > { %7355 = vmatpush3.bf16.msra.mxu0 %v7354_v39  ;;  %v5404_v45 = vpop.permute.xlu1 %5403  ;;  %v5646_v39 = vld [vmem:[#allocation4 + $0x3d8] sm:$0xff] }
 0xc87   : > { %5438 = vst.msk [vmem:[#allocation4 + $0x3e8] sm:$0xff] %vm4960_vm9, %v5404_v45  ;;  %v5402_v48 = vpop.permute.xlu0 %5401  ;;  %7379 = vmatpush3.bf16.msra.mxu1 %v7378_v42  ;;  %7389 = vmatprep.subr.bf16.mxu0 %v7388_v58  ;;  %v5617_v13 = vld [vmem:[#allocation4 + $0x2f0] sm:$0xff]  ;;  %v5627_v42 = vld [vmem:[#allocation4 + $0x340] sm:$0xff]  ;;  %v5658_v58 = vld [vmem:[#allocation4 + $0x438] sm:$0xff]  ;;  %v7408_v37 = vpack.c.bf16 %v5646_v39, %v5645_v17 }
 0xc88   : > { %5437 = vst.msk [vmem:[#allocation4 + $0x3e0] sm:$0xff] %vm4960_vm9, %v5402_v48  ;;  %7381 = vmatprep.subr.bf16.mxu1 %v7380_v60  ;;  %v7384_v43 = vpack.c.bf16 %v5618_v38, %v5617_v13  ;;  %v7406_v2 = vpack.c.bf16 %v5628_v6, %v5627_v42  ;;  %v5657_v45 = vld [vmem:[#allocation4 + $0x430] sm:$0xff] }
 0xc89   : > { %5819 = vmatmul.mubr.f32.vlgmr.msra.gmra.mrb[54].mxu0 %v5507_v23  ;;  %v7432_v59 = vpack.c.bf16 %v5658_v58, %v5657_v45  ;;  %v5629_v13 = vld [vmem:[#allocation4 + $0x350] sm:$0xff] }
 0xc8a   : > { %7391 = vmatpush3.bf16.msra.mxu0 %v7390_v47  ;;  %v5460_v31 = vpop.permute.xlu1 %5459  ;;  %5823 = vmatprep.mubr.f32.mxu0 %v5517_v18  ;;  %v5630_v60 = vld [vmem:[#allocation4 + $0x358] sm:$0xff] }
 0xc8b   : > { %5498 = vst.msk [vmem:[#allocation4 + $0x448] sm:$0xff] %vm4960_vm9, %v5460_v31  ;;  %v5458_v57 = vpop.permute.xlu0 %5457  ;;  %7383 = vmatpush3.bf16.msra.mxu1 %v7382_v34  ;;  %7393 = vmatprep.subr.bf16.mxu0 %v7392_v52  ;;  %v5601_v33 = vld [vmem:[#allocation4 + $0x270] sm:$0xff]  ;;  %v7410_v52 = vpack.c.bf16 %v5630_v60, %v5629_v13 }
 0xc8c   : > { %5497 = vst.msk [vmem:[#allocation4 + $0x440] sm:$0xff] %vm4960_vm9, %v5458_v57  ;;  %7385 = vmatprep.subr.bf16.mxu1 %v7384_v43  ;;  %v7386_v49 = vpack.c.bf16 %v5602_v51, %v5601_v33 }
 0xc8d   : > { %5824 = vmatmul.mubr.f32.gmra.mrb[56].mxu0 %v5516_v29 }
 0xc8e   : > { %7395 = vmatpush3.bf16.msra.mxu0 %v7394_v21  ;;  %v5340_v12 = vpop.permute.xlu1 %5339  ;;  %5968 = vmatprep.mubr.f32.mxu0 %v5512_v44  ;;  %v5648_v48 = vld [vmem:[#allocation4 + $0x3e8] sm:$0xff] }
 0xc8f   : > { %5374 = vst.msk [vmem:[#allocation4 + $0x368] sm:$0xff] %vm4960_vm9, %v5340_v12  ;;  %v5338_v35 = vpop.permute.xlu0 %5337  ;;  %7387 = vmatpush3.bf16.msra.mxu1 %v7386_v49  ;;  %7397 = vmatprep.subr.bf16.mxu0 %v7396_v25  ;;  %v5647_v7 = vld [vmem:[#allocation4 + $0x3e0] sm:$0xff] }
 0xc90   : > { %5373 = vst.msk [vmem:[#allocation4 + $0x360] sm:$0xff] %vm4960_vm9, %v5338_v35  ;;  %7421 = vmatprep.subr.bf16.mxu1 %v7420_v28  ;;  %v7412_v38 = vpack.c.bf16 %v5648_v48, %v5647_v7  ;;  %v5520_v35 = vld [vmem:[%s11599_s4 + $0x78] sm:$0x3] }
 0xc92   : > { %5894 = vmatmul.mubr.f32.vlgmr.msra.gmra.mrb[96].mxu1 %v5509_v19  ;;  %7399 = vmatpush3.bf16.msra.mxu0 %v7398_v32  ;;  %v5408_v5 = vpop.permute.xlu1 %5407  ;;  %v5660_v34 = vld [vmem:[#allocation4 + $0x448] sm:$0xff] }
 0xc93   : > { %5440 = vst.msk [vmem:[#allocation4 + $0x3f8] sm:$0xff] %vm4960_vm9, %v5408_v5  ;;  %v5462_v22 = vpop.permute.xlu0 %5461  ;;  %7401 = vmatprep.subr.bf16.mxu0 %v7400_v8  ;;  %7423 = vmatpush3.bf16.msra.mxu1 %v7420_v28  ;;  %v5659_v47 = vld [vmem:[#allocation4 + $0x440] sm:$0xff]  ;;  %v5522_v32 = vld [vmem:[%s11599_s4 + $0x88] sm:$0x3] }
 0xc94   : > { %5499 = vst.msk [vmem:[#allocation4 + $0x450] sm:$0xff] %vm4960_vm9, %v5462_v22  ;;  %7425 = vmatprep.subr.bf16.mxu1 %v7424_v62  ;;  %5898 = vmatprep.mubr.f32.mxu1 %v5519_v27  ;;  %v7436_v4 = vpack.c.bf16 %v5660_v34, %v5659_v47 }
 0xc96   : > { %5899 = vmatmul.mubr.f32.gmra.mrb[98].mxu1 %v5518_v54  ;;  %7403 = vmatpush3.bf16.msra.mxu0 %v7402_v41  ;;  %v5464_v50 = vpop.permute.xlu1 %5463  ;;  %v5632_v16 = vld [vmem:[#allocation4 + $0x368] sm:$0xff] }
 0xc97   : > { %5500 = vst.msk [vmem:[#allocation4 + $0x458] sm:$0xff] %vm4960_vm9, %v5464_v50  ;;  %v5406_v63 = vpop.permute.xlu0 %5405  ;;  %7405 = vmatprep.subr.bf16.mxu0 %v7404_v24  ;;  %7427 = vmatpush3.bf16.msra.mxu1 %v7424_v62  ;;  %v5631_v40 = vld [vmem:[#allocation4 + $0x360] sm:$0xff] }
 0xc98   : > { %5439 = vst.msk [vmem:[#allocation4 + $0x3f0] sm:$0xff] %vm4960_vm9, %v5406_v63  ;;  %7429 = vmatprep.subr.bf16.mxu1 %v7428_v53  ;;  %6805 = vmatprep.mubr.f32.mxu1 %v5513_v55  ;;  %v7414_v15 = vpack.c.bf16 %v5632_v16, %v5631_v40 }
 0xc9a   : > { %7407 = vmatpush3.bf16.msra.mxu0 %v7406_v2  ;;  %v5344_v23 = vpop.permute.xlu1 %5343  ;;  %v5650_v29 = vld [vmem:[#allocation4 + $0x3f8] sm:$0xff] }
 0xc9b   : > { %5376 = vst.msk [vmem:[#allocation4 + $0x378] sm:$0xff] %vm4960_vm9, %v5344_v23  ;;  %v5342_v18 = vpop.permute.xlu0 %5341  ;;  %7409 = vmatprep.subr.bf16.mxu0 %v7408_v37  ;;  %7431 = vmatpush3.bf16.msra.mxu1 %v7428_v53  ;;  %v5661_v33 = vld [vmem:[#allocation4 + $0x450] sm:$0xff] }
 0xc9c   : > { %5375 = vst.msk [vmem:[#allocation4 + $0x370] sm:$0xff] %vm4960_vm9, %v5342_v18  ;;  %7433 = vmatprep.subr.bf16.mxu1 %v7432_v59 }
 0xc9e   : > { %7411 = vmatpush3.bf16.msra.mxu0 %v7410_v52  ;;  %v5468_v9 = vpop.permute.xlu1 %5467  ;;  %v5662_v14 = vld [vmem:[#allocation4 + $0x458] sm:$0xff] }
 0xc9f   : > { %5502 = vst.msk [vmem:[#allocation4 + $0x468] sm:$0xff] %vm4960_vm9, %v5468_v9  ;;  %v5466_v31 = vpop.permute.xlu0 %5465  ;;  %7413 = vmatprep.subr.bf16.mxu0 %v7412_v38  ;;  %7435 = vmatpush3.bf16.msra.mxu1 %v7432_v59  ;;  %v5649_v43 = vld [vmem:[#allocation4 + $0x3f0] sm:$0xff]  ;;  %v7440_v44 = vpack.c.bf16 %v5662_v14, %v5661_v33 }
 0xca0   : > { %5501 = vst.msk [vmem:[#allocation4 + $0x460] sm:$0xff] %vm4960_vm9, %v5466_v31  ;;  %7437 = vmatprep.subr.bf16.mxu1 %v7436_v4  ;;  %v7416_v57 = vpack.c.bf16 %v5650_v29, %v5649_v43 }
 0xca2   : > { %7415 = vmatpush3.bf16.msra.mxu0 %v7414_v15  ;;  %v5472_v51 = vpop.permute.xlu1 %5471  ;;  %v5634_v21 = vld [vmem:[#allocation4 + $0x378] sm:$0xff] }
 0xca3   : > { %5504 = vst.msk [vmem:[#allocation4 + $0x478] sm:$0xff] %vm4960_vm9, %v5472_v51  ;;  %v5470_v49 = vpop.permute.xlu0 %5469  ;;  %7417 = vmatprep.subr.bf16.mxu0 %v7416_v57  ;;  %7439 = vmatpush3.bf16.msra.mxu1 %v7436_v4  ;;  %v5633_v25 = vld [vmem:[#allocation4 + $0x370] sm:$0xff] }
 0xca4   : > { %5503 = vst.msk [vmem:[#allocation4 + $0x470] sm:$0xff] %vm4960_vm9, %v5470_v49  ;;  %7441 = vmatprep.subr.bf16.mxu1 %v7440_v44  ;;  %v7418_v1 = vpack.c.bf16 %v5634_v21, %v5633_v25 }
 0xca6   : > { %7419 = vmatpush3.bf16.msra.mxu0 %v7418_v1  ;;  %v5664_v12 = vld [vmem:[#allocation4 + $0x468] sm:$0xff] }
 0xca7   : > { %7443 = vmatpush3.bf16.msra.mxu1 %v7440_v44  ;;  %v5663_v28 = vld [vmem:[#allocation4 + $0x460] sm:$0xff] }
 0xca8   : > { %v7444_v3 = vpack.c.bf16 %v5664_v12, %v5663_v28 }
 0xca9   : > { %5969 = vmatmul.mubr.f32.vlgmr.msra.gmra.mrb[58].mxu0 %v5511_v10 }
 0xcaa   : > { %7445 = vmatprep.subr.bf16.mxu1 %v7444_v3  ;;  %5973 = vmatprep.mubr.f32.mxu0 %v5521_v56  ;;  %v5666_v19 = vld [vmem:[#allocation4 + $0x478] sm:$0xff] }
 0xcab   : > { %7447 = vmatpush3.bf16.msra.mxu1 %v7444_v3  ;;  %v5665_v46 = vld [vmem:[#allocation4 + $0x470] sm:$0xff] }
 0xcac   : > { %v7448_v20 = vpack.c.bf16 %v5666_v19, %v5665_v46 }
 0xcad   : > { %5974 = vmatmul.mubr.f32.gmra.mrb[60].mxu0 %v5520_v35 }
 0xcae   : > { %7449 = vmatprep.subr.bf16.mxu1 %v7448_v20 }
 0xcaf   : > { %7451 = vmatpush3.bf16.msra.mxu1 %v7448_v20 }
 0xcb2   : > { %6806 = vmatmul.mubr.f32.vlgmr.msra.gmra.mrb[100].mxu1 %v5522_v32 }
 0xcb3   : > { %v5677_v24 = vpop.permute.xlu1 %5676 }
 0xcb4   : > { %v5672_v36 = vpop.permute.xlu0 %5671 }
 0xd45   : > { %v6542_v8 = vpop.f32.mrb[92].mxu1 }
 0xd46   : > { %v6543_v27 = vpop.f32.mrb[93].mxu1 }
 0xd47   : > { %v6544_v0 = vadd.f32 %v6543_v27, %v6542_v8 }
 0xd49   : > { %v6545_v30 = vpop.f32.mrb[94].mxu1  ;;  %v5746_v54 = vadd.f32 %v6544_v0, %v5672_v36 }
 0xd4a   : > { %v6546_v5 = vpop.f32.mrb[95].mxu1 }
 0xd4b   : > { %v6547_v62 = vadd.f32 %v6546_v5, %v6545_v30 }
 0xd4d   : > { %v5751_v55 = vadd.f32 %v6547_v62, %v5677_v24 }
 0xd5c   : > { %v6580_v11 = vpop.f32.mrb[54].mxu0 }
 0xd5d   : > { %v6581_v22 = vpop.f32.mrb[55].mxu0 }
 0xd5e   : > { %v6582_v61 = vadd.f32 %v6581_v22, %v6580_v11 }
 0xd60   : > { %v5821_v26 = vadd.f32 %v6582_v61, %v5746_v54  ;;  %v6583_v41 = vpop.f32.mrb[56].mxu0 }
 0xd61   : > { %v6584_v6 = vpop.f32.mrb[57].mxu0 }
 0xd62   : > { %v6585_v50 = vadd.f32 %v6584_v6, %v6583_v41 }
 0xd64   : > { %v5826_v53 = vadd.f32 %v6585_v50, %v5751_v55 }
 0xd65   : > { %v6618_v39 = vpop.f32.mrb[96].mxu1 }
 0xd66   : > { %v6619_v63 = vpop.f32.mrb[97].mxu1 }
 0xd67   : > { %v6620_v42 = vadd.f32 %v6619_v63, %v6618_v39 }
 0xd69   : > { %v5896_v58 = vadd.f32 %v6620_v42, %v5821_v26  ;;  %v6621_v2 = vpop.f32.mrb[98].mxu1 }
 0xd6a   : > { %v6622_v17 = vpop.f32.mrb[99].mxu1 }
 0xd6b   : > { %v6623_v37 = vadd.f32 %v6622_v17, %v6621_v2 }
 0xd6d   : > { %v5901_v45 = vadd.f32 %v6623_v37, %v5826_v53 }
 0xd7c   : > { %v6656_v60 = vpop.f32.mrb[58].mxu0 }
 0xd7d   : > { %v6657_v23 = vpop.f32.mrb[59].mxu0 }
 0xd7e   : > { %v6658_v59 = vadd.f32 %v6657_v23, %v6656_v60 }
 0xd80   : > { %v6659_v7 = vpop.f32.mrb[60].mxu0  ;;  %v5971_v48 = vadd.f32 %v6658_v59, %v5896_v58 }
 0xd81   : > { %v6660_v18 = vpop.f32.mrb[61].mxu0 }
 0xd82   : > { %v6661_v13 = vadd.f32 %v6660_v18, %v6659_v7 }
 0xd84   : > { %v5976_v47 = vadd.f32 %v6661_v13, %v5901_v45 }
 0xd85   : > { %v6807_v34 = vpop.f32.mrb[100].mxu1 }
 0xd86   : > { %v6051_v52 = vadd.f32 %v6807_v34, %v5976_v47  ;;  %v6045_v38 = vpop.f32.mrb[101].mxu1 }
 0xd87   : > { %v6046_v40 = vadd.f32 %v6045_v38, %v5971_v48 }
 0xd88   : > { %6057 = vst.msk [vmem:[%s491_s17 + $0x8] sm:$0x3] %vm6056_vm10, %v6051_v52 }
 0xd89   : > { %6055 = vst.msk [vmem:[%s491_s17] sm:$0xff] %vm6054_vm11, %v6046_v40 }
 0xd8a PF: > { %s25_s18 = sadd.s32 1, %s7582_s18  }
 0xd8b   : > { %p22_p4 = scmp.ge.s32.totalorder %s25_s18, 4  }
 0xd8d   :  { %24 = sbr.rel (!%p22_p4) target bundleno = 1 (0x1), region = 110 }

</bundles_post_ra>
